<compile_context>
chip_gen: v7x
topology: tpu7x:2x2x1
jax: 0.10.0
libtpu: 0.0.40
codegen_flags: <defaults>
</compile_context>

<pallas_src>
import functools

import jax
import jax.numpy as jnp
from jax.experimental import pallas as pl
from jax.experimental.pallas import tpu as pltpu

_VMEM = pl.BlockSpec(memory_space=pltpu.MemorySpace.VMEM)


def _round_up(n, m):
    return ((n + m - 1) // m) * m


# ------------------------------ fused kernel ------------------------------- #

def _net_kernel(pat_ref, se_ref, so_ref, w1_ref, b1_ref, w2_ref, b2_ref,
                f1w_ref, f1b_ref, f2w_ref, f2b_ref, f3w_ref, f3b_ref,
                out_ref, pool1_ref, *, batch):
    """Whole forward pass, one invocation (no grid).

    pat_ref : (4*B*14*24, 128) host-built conv1 im2col, rows = (quad, b, wp, hp)
              (hp padded 14->24 with zero rows, K padded 75->128).
    se/so   : (25*BP, B*80) 0/1 selectors: H-pool + (b,hq,wq)->row reorder.
    w2_ref  : (25, 128, 128) per-tap conv2 weights (ic, oc) padded.
    pool1_ref scratch: (B, 14, 24, 128) = pooled conv1 as (b, wp, hp, c).
    """
    B = batch
    BP = _round_up(B, 8)                       # batch rows padded to a vreg
    f32 = jnp.float32

    def mm(a, b):
        return jnp.dot(a, b, preferred_element_type=f32)

    # ---- stage 1: conv1 (5x5, 3->32p128) + ReLU + 2x2 pool ----------------
    # One big MXU matmul, then max over the 4 pool quadrants (leading slices).
    y = jnp.maximum(mm(pat_ref[...], w1_ref[...]) + b1_ref[...], 0.0)
    n = B * 14 * 24
    p1 = jnp.maximum(jnp.maximum(y[:n], y[n:2 * n]),
                     jnp.maximum(y[2 * n:3 * n], y[3 * n:]))
    pool1_ref[...] = p1.reshape(B, 14, 24, 128)    # (b, wp, hp_pad, c)
    # (hp rows 14..23 hold relu(bias) junk; conv2 only ever reads hp<=13.)

    # ---- stage 2: conv2 (5x5, 32p128->16p128) as 25-tap accumulation ------
    # acc rows = (b, ow, oh_pad16); per kh one shifted sublane-window load,
    # per kw a free leading-dim slice of that value.
    acc = jnp.zeros((B * 160, 128), f32)
    for kh in range(5):
        blk = pool1_ref[:, :, kh:kh + 16, :]              # (B, 14, 16, 128)
        for kw in range(5):
            slab = blk[:, kw:kw + 10].reshape(B * 160, 128)
            acc = acc + mm(slab, w2_ref[kh * 5 + kw])
    act2 = jnp.maximum(acc + b2_ref[...], 0.0)            # relu(conv2)

    # W-pool: max over adjacent ow (a leading dim after a tile-aligned split).
    v = act2.reshape(B, 5, 2, 16, 128)
    v = jnp.maximum(v[:, :, 0], v[:, :, 1]).reshape(B * 80, 128)

    # H-pool + reorder to rows (hq*5+wq)*BP + b via ONE selector matmul pair.
    pooled = jnp.maximum(mm(se_ref[...], v), mm(so_ref[...], v))   # (25*BP,128)

    # ---- stage 3: fc1 -> fc2 -> fc3 ----------------------------------------
    # Assemble a lane-dense (BP, 3200) input: 25 single-vreg, 128-aligned
    # blocks; torch's NCHW .view(-1,400) order is absorbed into f1w at init.
    fcin = jnp.concatenate(
        [pooled[j * BP:(j + 1) * BP, :] for j in range(25)], axis=1)
    h1 = jnp.maximum(mm(fcin, f1w_ref[...]) + f1b_ref[...], 0.0)
    h2 = jnp.maximum(mm(h1, f2w_ref[...]) + f2b_ref[...], 0.0)
    out_ref[...] = mm(h2, f3w_ref[...]) + f3b_ref[...]             # (BP, 128)


# --------------------------- host-side helpers ----------------------------- #

def _build_conv1_patches(x_nchw):
    """Lane-dense conv1 im2col, rows ordered (quadrant, b, wp, hp_pad24).

    patches[(q,b,wp,hp), (kh*5+kw)*3+ci] = x[b, ci, 2hp+dh+kh, 2wp+dw+kw]
    with q=(dh,dw) the 2x2 max-pool quadrant; hp rows 14..23 are zero.
    """
    B = x_nchw.shape[0]
    x = jnp.transpose(x_nchw, (0, 2, 3, 1))               # (B, 32, 32, 3)
    quads = []
    for dh in range(2):
        for dw in range(2):
            taps = []
            for kh in range(5):
                for kw in range(5):
                    taps.append(x[:, dh + kh:dh + kh + 27:2,
                                  dw + kw:dw + kw + 27:2, :])      # (B,14,14,3)
            quads.append(jnp.concatenate(taps, axis=-1))           # (B,14,14,75)
    p = jnp.stack(quads, axis=0)                                   # (4,B,hp,wp,75)
    p = jnp.transpose(p, (0, 1, 3, 2, 4))                          # (4,B,wp,hp,75)
    p = jnp.pad(p, ((0, 0), (0, 0), (0, 0), (0, 10), (0, 53)))     # hp->24, K->128
    return p.reshape(4 * B * 14 * 24, 128)


def _build_pool2_selectors(B):
    """0/1 matrices doing the conv2 H-pool and the batch->row reorder.

    s_e[(hq*5+wq)*BP + b, b*80 + wq*16 + 2*hq] = 1  (s_o: ...+ 2*hq + 1)
    so max(s_e @ v, s_o @ v) = maxpooled conv2, rows (hq,wq)-major, batch minor.
    """
    BP = _round_up(B, 8)
    Q = B * 80
    shape = (5, 5, BP, Q)
    hq = jax.lax.broadcasted_iota(jnp.int32, shape, 0)
    wq = jax.lax.broadcasted_iota(jnp.int32, shape, 1)
    bi = jax.lax.broadcasted_iota(jnp.int32, shape, 2)
    qi = jax.lax.broadcasted_iota(jnp.int32, shape, 3)
    tgt = bi * 80 + wq * 16 + 2 * hq
    valid = bi < B
    s_e = jnp.where((qi == tgt) & valid, 1.0, 0.0).astype(jnp.float32)
    s_o = jnp.where((qi == tgt + 1) & valid, 1.0, 0.0).astype(jnp.float32)
    return s_e.reshape(25 * BP, Q), s_o.reshape(25 * BP, Q)


@jax.jit
def net_forward(x_nchw, params):
    B = x_nchw.shape[0]
    assert x_nchw.shape[1:] == (3, 32, 32)
    BP = _round_up(B, 8)
    patches = _build_conv1_patches(x_nchw)
    s_e, s_o = _build_pool2_selectors(B)
    out = pl.pallas_call(
        functools.partial(_net_kernel, batch=B),
        out_shape=jax.ShapeDtypeStruct((BP, 128), jnp.float32),
        in_specs=[_VMEM] * 13,
        out_specs=_VMEM,
        scratch_shapes=[
            pltpu.VMEM((B, 14, 24, 128), jnp.float32),   # pooled conv1
        ],
        compiler_params=pltpu.CompilerParams(
            vmem_limit_bytes=32 * 1024 * 1024),
    )(patches, s_e, s_o,
      params["w1"], params["b1"], params["w2"], params["b2"],
      params["f1w"], params["f1b"], params["f2w"], params["f2b"],
      params["f3w"], params["f3b"])
    return out[:B, :10]                                   # drop row/lane padding


# --------------------------- params / weight prep -------------------------- #

def init_raw_params(key):
    """PyTorch-layout parameters, U(-1/sqrt(fan_in), 1/sqrt(fan_in)) init."""
    def u(k, shape, fan_in):
        bound = 1.0 / float(fan_in) ** 0.5
        return jax.random.uniform(k, shape, jnp.float32, -bound, bound)

    ks = jax.random.split(key, 10)
    return {
        "conv1_w": u(ks[0], (32, 3, 5, 5), 3 * 5 * 5),
        "conv1_b": u(ks[1], (32,), 3 * 5 * 5),
        "conv2_w": u(ks[2], (16, 32, 5, 5), 32 * 5 * 5),
        "conv2_b": u(ks[3], (16,), 32 * 5 * 5),
        "fc1_w": u(ks[4], (120, 400), 400),
        "fc1_b": u(ks[5], (120,), 400),
        "fc2_w": u(ks[6], (84, 120), 120),
        "fc2_b": u(ks[7], (84,), 120),
        "fc3_w": u(ks[8], (10, 84), 84),
        "fc3_b": u(ks[9], (10,), 84),
    }


def prepare_params(raw):
    """One-time layout work: transpose to matmul layout, zero-pad to 128 lanes."""
    # conv1: rows (kh*5+kw)*3 + ci (padded 75->128), cols oc padded 32->128.
    w1 = jnp.transpose(raw["conv1_w"], (2, 3, 1, 0)).reshape(75, 32)
    w1 = jnp.pad(w1, ((0, 53), (0, 96)))
    b1 = jnp.pad(raw["conv1_b"], (0, 96)).reshape(1, 128)
    # conv2: per-tap (ic padded 32->128, oc padded 16->128), tap = kh*5+kw.
    w2 = jnp.transpose(raw["conv2_w"], (2, 3, 1, 0))              # (5,5,32,16)
    w2 = jnp.pad(w2, ((0, 0), (0, 0), (0, 96), (0, 112))).reshape(25, 128, 128)
    b2 = jnp.pad(raw["conv2_b"], (0, 112)).reshape(1, 128)
    # fc1: torch column order is (c, h, w); permute rows to (h, w, c_pad128)
    # so the kernel's lane-dense (hq*5+wq)*128 + c assembly is a plain dot.
    f1 = raw["fc1_w"].reshape(120, 16, 5, 5)                      # (n, c, h, w)
    f1 = jnp.transpose(f1, (2, 3, 1, 0))                          # (h, w, c, n)
    f1 = jnp.pad(f1, ((0, 0), (0, 0), (0, 112), (0, 8))).reshape(3200, 128)
    f1b = jnp.pad(raw["fc1_b"], (0, 8)).reshape(1, 128)
    f2 = jnp.pad(raw["fc2_w"].T, ((0, 8), (0, 44)))               # (128, 128)
    f2b = jnp.pad(raw["fc2_b"], (0, 44)).reshape(1, 128)
    f3 = jnp.pad(raw["fc3_w"].T, ((0, 44), (0, 118)))             # (128, 128)
    f3b = jnp.pad(raw["fc3_b"], (0, 118)).reshape(1, 128)
    return dict(w1=w1, b1=b1, w2=w2, b2=b2, f1w=f1, f1b=f1b,
                f2w=f2, f2b=f2b, f3w=f3, f3b=f3b)


# ------------------------- plain-JAX reference (check) --------------------- #

def reference_forward(x_nchw, raw):
    hi = jax.lax.Precision.HIGHEST
    x = jnp.transpose(x_nchw, (0, 2, 3, 1))                       # NHWC

    def conv_relu(x, w, b):
        y = jax.lax.conv_general_dilated(
            x, jnp.transpose(w, (2, 3, 1, 0)), (1, 1), 'VALID',
            dimension_numbers=('NHWC', 'HWIO', 'NHWC'), precision=hi)
        return jnp.maximum(y + b, 0.0)

    def pool(x):
        return jax.lax.reduce_window(x, -jnp.inf, jax.lax.max,
                                     (1, 2, 2, 1), (1, 2, 2, 1), 'VALID')

    x = pool(conv_relu(x, raw["conv1_w"], raw["conv1_b"]))
    x = pool(conv_relu(x, raw["conv2_w"], raw["conv2_b"]))
    B = x.shape[0]
    x = jnp.transpose(x, (0, 3, 1, 2)).reshape(B, 400)            # torch .view order
    x = jnp.maximum(jnp.dot(x, raw["fc1_w"].T, precision=hi) + raw["fc1_b"], 0.0)
    x = jnp.maximum(jnp.dot(x, raw["fc2_w"].T, precision=hi) + raw["fc2_b"], 0.0)
    return jnp.dot(x, raw["fc3_w"].T, precision=hi) + raw["fc3_b"]

# TODO(synk): TrainingLoss (optimizer loop / CrossEntropyLoss) is training-time
# code, not part of the forward pass, and is intentionally not a kernel.


if __name__ == "__main__":
    key = jax.random.PRNGKey(0)
    k_x, k_p = jax.random.split(key)
    # 32x32 input so fc1 sees 16*5*5 features (CIFAR-style), batch = 2.
    x = jax.random.normal(k_x, (2, 3, 32, 32), jnp.float32)
    raw = init_raw_params(k_p)
    params = prepare_params(raw)

    out = jax.block_until_ready(net_forward(x, params))
    assert out.shape == (2, 10) and out.dtype == jnp.float32

    ref = reference_forward(x, raw)
    err = float(jnp.max(jnp.abs(out - ref)))
    # Tightened from 5e-2.  The floor is set by the MXU's default-precision
    # f32 (bf16-pass) matmuls, not by the layout: any indexing/permutation bug
    # would show up as O(0.1-1) discrepancies, far above this bound.
    assert err < 5e-3, err
    print("KERNEL_OK")
</pallas_src>

<mosaic_0001>
module attributes {stable_mosaic.version = 11 : i64} {
  func.func @_net_kernel(%arg0: memref<2688x128xf32, #tpu.memory_space<vmem>>, %arg1: memref<200x160xf32, #tpu.memory_space<vmem>>, %arg2: memref<200x160xf32, #tpu.memory_space<vmem>>, %arg3: memref<128x128xf32, #tpu.memory_space<vmem>>, %arg4: memref<1x128xf32, #tpu.memory_space<vmem>>, %arg5: memref<25x128x128xf32, #tpu.memory_space<vmem>>, %arg6: memref<1x128xf32, #tpu.memory_space<vmem>>, %arg7: memref<3200x128xf32, #tpu.memory_space<vmem>>, %arg8: memref<1x128xf32, #tpu.memory_space<vmem>>, %arg9: memref<128x128xf32, #tpu.memory_space<vmem>>, %arg10: memref<1x128xf32, #tpu.memory_space<vmem>>, %arg11: memref<128x128xf32, #tpu.memory_space<vmem>>, %arg12: memref<1x128xf32, #tpu.memory_space<vmem>>, %arg13: memref<8x128xf32, #tpu.memory_space<vmem>>, %arg14: memref<2x14x24x128xf32, #tpu.memory_space<vmem>>) attributes {dimension_semantics = [], scalar_prefetch = 0 : i64, scratch_operands = 1 : i64, tpu.core_type = #tpu.core_type<tc>} {
    %c0 = arith.constant 0 : index
    %c0_0 = arith.constant 0 : index
    %0 = vector.load %arg0[%c0, %c0_0] : memref<2688x128xf32, #tpu.memory_space<vmem>>, vector<2688x128xf32>
    %c0_1 = arith.constant 0 : index
    %c0_2 = arith.constant 0 : index
    %1 = vector.load %arg3[%c0_1, %c0_2] : memref<128x128xf32, #tpu.memory_space<vmem>>, vector<128x128xf32>
    %cst = arith.constant dense<0.000000e+00> : vector<2688x128xf32>
    %2 = tpu.matmul %0, %1, %cst {dimension_numbers = #tpu.dot_dimension_numbers<[1], [0], [0], [1], [0, 0, 1, 1], [], []>} : vector<2688x128xf32>, vector<128x128xf32>, vector<2688x128xf32> -> vector<2688x128xf32>
    %c0_3 = arith.constant 0 : index
    %c0_4 = arith.constant 0 : index
    %3 = vector.load %arg4[%c0_3, %c0_4] : memref<1x128xf32, #tpu.memory_space<vmem>>, vector<1x128xf32>
    %4 = vector.broadcast %3 : vector<1x128xf32> to vector<2688x128xf32>
    %5 = arith.addf %2, %4 : vector<2688x128xf32>
    %cst_5 = arith.constant 0.000000e+00 : f32
    %6 = vector.broadcast %cst_5 : f32 to vector<2688x128xf32>
    %7 = arith.maximumf %5, %6 : vector<2688x128xf32>
    %8 = vector.extract_strided_slice %7 {offsets = [0, 0], sizes = [672, 128], strides = [1, 1]} : vector<2688x128xf32> to vector<672x128xf32>
    %9 = vector.extract_strided_slice %7 {offsets = [672, 0], sizes = [672, 128], strides = [1, 1]} : vector<2688x128xf32> to vector<672x128xf32>
    %10 = arith.maximumf %8, %9 : vector<672x128xf32>
    %11 = vector.extract_strided_slice %7 {offsets = [1344, 0], sizes = [672, 128], strides = [1, 1]} : vector<2688x128xf32> to vector<672x128xf32>
    %12 = vector.extract_strided_slice %7 {offsets = [2016, 0], sizes = [672, 128], strides = [1, 1]} : vector<2688x128xf32> to vector<672x128xf32>
    %13 = arith.maximumf %11, %12 : vector<672x128xf32>
    %14 = arith.maximumf %10, %13 : vector<672x128xf32>
    %15 = vector.shape_cast %14 : vector<672x128xf32> to vector<2x14x24x128xf32>
    %c0_6 = arith.constant 0 : index
    %c0_7 = arith.constant 0 : index
    %c0_8 = arith.constant 0 : index
    %c0_9 = arith.constant 0 : index
    %16 = vector.load %arg14[%c0_6, %c0_7, %c0_8, %c0_9] : memref<2x14x24x128xf32, #tpu.memory_space<vmem>>, vector<2x14x24x128xf32>
    tpu.vector_store %arg14[%c0_6, %c0_7, %c0_8, %c0_9], %15 {strides = array<i32>} : memref<2x14x24x128xf32, #tpu.memory_space<vmem>>, vector<2x14x24x128xf32>,
    %cst_10 = arith.constant 0.000000e+00 : f32
    %17 = vector.broadcast %cst_10 : f32 to vector<320x128xf32>
    %c0_11 = arith.constant 0 : index
    %c0_12 = arith.constant 0 : index
    %c0_13 = arith.constant 0 : index
    %c0_14 = arith.constant 0 : index
    %18 = vector.load %arg14[%c0_11, %c0_12, %c0_13, %c0_14] : memref<2x14x24x128xf32, #tpu.memory_space<vmem>>, vector<2x14x16x128xf32>
    %19 = vector.extract_strided_slice %18 {offsets = [0, 0, 0, 0], sizes = [2, 10, 16, 128], strides = [1, 1, 1, 1]} : vector<2x14x16x128xf32> to vector<2x10x16x128xf32>
    %20 = vector.shape_cast %19 : vector<2x10x16x128xf32> to vector<320x128xf32>
    %c0_15 = arith.constant 0 : index
    %c0_16 = arith.constant 0 : index
    %c0_17 = arith.constant 0 : index
    %21 = vector.load %arg5[%c0_15, %c0_16, %c0_17] : memref<25x128x128xf32, #tpu.memory_space<vmem>>, vector<1x128x128xf32>
    %22 = vector.shape_cast %21 : vector<1x128x128xf32> to vector<128x128xf32>
    %cst_18 = arith.constant dense<0.000000e+00> : vector<320x128xf32>
    %23 = tpu.matmul %20, %22, %cst_18 {dimension_numbers = #tpu.dot_dimension_numbers<[1], [0], [0], [1], [0, 0, 1, 1], [], []>} : vector<320x128xf32>, vector<128x128xf32>, vector<320x128xf32> -> vector<320x128xf32>
    %24 = arith.addf %17, %23 : vector<320x128xf32>
    %25 = vector.extract_strided_slice %18 {offsets = [0, 1, 0, 0], sizes = [2, 10, 16, 128], strides = [1, 1, 1, 1]} : vector<2x14x16x128xf32> to vector<2x10x16x128xf32>
    %26 = vector.shape_cast %25 : vector<2x10x16x128xf32> to vector<320x128xf32>
    %c1 = arith.constant 1 : index
    %c0_19 = arith.constant 0 : index
    %c0_20 = arith.constant 0 : index
    %27 = vector.load %arg5[%c1, %c0_19, %c0_20] : memref<25x128x128xf32, #tpu.memory_space<vmem>>, vector<1x128x128xf32>
    %28 = vector.shape_cast %27 : vector<1x128x128xf32> to vector<128x128xf32>
    %cst_21 = arith.constant dense<0.000000e+00> : vector<320x128xf32>
    %29 = tpu.matmul %26, %28, %cst_21 {dimension_numbers = #tpu.dot_dimension_numbers<[1], [0], [0], [1], [0, 0, 1, 1], [], []>} : vector<320x128xf32>, vector<128x128xf32>, vector<320x128xf32> -> vector<320x128xf32>
    %30 = arith.addf %24, %29 : vector<320x128xf32>
    %31 = vector.extract_strided_slice %18 {offsets = [0, 2, 0, 0], sizes = [2, 10, 16, 128], strides = [1, 1, 1, 1]} : vector<2x14x16x128xf32> to vector<2x10x16x128xf32>
    %32 = vector.shape_cast %31 : vector<2x10x16x128xf32> to vector<320x128xf32>
    %c2 = arith.constant 2 : index
    %c0_22 = arith.constant 0 : index
    %c0_23 = arith.constant 0 : index
    %33 = vector.load %arg5[%c2, %c0_22, %c0_23] : memref<25x128x128xf32, #tpu.memory_space<vmem>>, vector<1x128x128xf32>
    %34 = vector.shape_cast %33 : vector<1x128x128xf32> to vector<128x128xf32>
    %cst_24 = arith.constant dense<0.000000e+00> : vector<320x128xf32>
    %35 = tpu.matmul %32, %34, %cst_24 {dimension_numbers = #tpu.dot_dimension_numbers<[1], [0], [0], [1], [0, 0, 1, 1], [], []>} : vector<320x128xf32>, vector<128x128xf32>, vector<320x128xf32> -> vector<320x128xf32>
    %36 = arith.addf %30, %35 : vector<320x128xf32>
    %37 = vector.extract_strided_slice %18 {offsets = [0, 3, 0, 0], sizes = [2, 10, 16, 128], strides = [1, 1, 1, 1]} : vector<2x14x16x128xf32> to vector<2x10x16x128xf32>
    %38 = vector.shape_cast %37 : vector<2x10x16x128xf32> to vector<320x128xf32>
    %c3 = arith.constant 3 : index
    %c0_25 = arith.constant 0 : index
    %c0_26 = arith.constant 0 : index
    %39 = vector.load %arg5[%c3, %c0_25, %c0_26] : memref<25x128x128xf32, #tpu.memory_space<vmem>>, vector<1x128x128xf32>
    %40 = vector.shape_cast %39 : vector<1x128x128xf32> to vector<128x128xf32>
    %cst_27 = arith.constant dense<0.000000e+00> : vector<320x128xf32>
    %41 = tpu.matmul %38, %40, %cst_27 {dimension_numbers = #tpu.dot_dimension_numbers<[1], [0], [0], [1], [0, 0, 1, 1], [], []>} : vector<320x128xf32>, vector<128x128xf32>, vector<320x128xf32> -> vector<320x128xf32>
    %42 = arith.addf %36, %41 : vector<320x128xf32>
    %43 = vector.extract_strided_slice %18 {offsets = [0, 4, 0, 0], sizes = [2, 10, 16, 128], strides = [1, 1, 1, 1]} : vector<2x14x16x128xf32> to vector<2x10x16x128xf32>
    %44 = vector.shape_cast %43 : vector<2x10x16x128xf32> to vector<320x128xf32>
    %c4 = arith.constant 4 : index
    %c0_28 = arith.constant 0 : index
    %c0_29 = arith.constant 0 : index
    %45 = vector.load %arg5[%c4, %c0_28, %c0_29] : memref<25x128x128xf32, #tpu.memory_space<vmem>>, vector<1x128x128xf32>
    %46 = vector.shape_cast %45 : vector<1x128x128xf32> to vector<128x128xf32>
    %cst_30 = arith.constant dense<0.000000e+00> : vector<320x128xf32>
    %47 = tpu.matmul %44, %46, %cst_30 {dimension_numbers = #tpu.dot_dimension_numbers<[1], [0], [0], [1], [0, 0, 1, 1], [], []>} : vector<320x128xf32>, vector<128x128xf32>, vector<320x128xf32> -> vector<320x128xf32>
    %48 = arith.addf %42, %47 : vector<320x128xf32>
    %c0_31 = arith.constant 0 : index
    %c0_32 = arith.constant 0 : index
    %c1_33 = arith.constant 1 : index
    %c0_34 = arith.constant 0 : index
    %49 = vector.load %arg14[%c0_31, %c0_32, %c1_33, %c0_34] : memref<2x14x24x128xf32, #tpu.memory_space<vmem>>, vector<2x14x16x128xf32>
    %50 = vector.extract_strided_slice %49 {offsets = [0, 0, 0, 0], sizes = [2, 10, 16, 128], strides = [1, 1, 1, 1]} : vector<2x14x16x128xf32> to vector<2x10x16x128xf32>
    %51 = vector.shape_cast %50 : vector<2x10x16x128xf32> to vector<320x128xf32>
    %c5 = arith.constant 5 : index
    %c0_35 = arith.constant 0 : index
    %c0_36 = arith.constant 0 : index
    %52 = vector.load %arg5[%c5, %c0_35, %c0_36] : memref<25x128x128xf32, #tpu.memory_space<vmem>>, vector<1x128x128xf32>
    %53 = vector.shape_cast %52 : vector<1x128x128xf32> to vector<128x128xf32>
    %cst_37 = arith.constant dense<0.000000e+00> : vector<320x128xf32>
    %54 = tpu.matmul %51, %53, %cst_37 {dimension_numbers = #tpu.dot_dimension_numbers<[1], [0], [0], [1], [0, 0, 1, 1], [], []>} : vector<320x128xf32>, vector<128x128xf32>, vector<320x128xf32> -> vector<320x128xf32>
    %55 = arith.addf %48, %54 : vector<320x128xf32>
    %56 = vector.extract_strided_slice %49 {offsets = [0, 1, 0, 0], sizes = [2, 10, 16, 128], strides = [1, 1, 1, 1]} : vector<2x14x16x128xf32> to vector<2x10x16x128xf32>
    %57 = vector.shape_cast %56 : vector<2x10x16x128xf32> to vector<320x128xf32>
    %c6 = arith.constant 6 : index
    %c0_38 = arith.constant 0 : index
    %c0_39 = arith.constant 0 : index
    %58 = vector.load %arg5[%c6, %c0_38, %c0_39] : memref<25x128x128xf32, #tpu.memory_space<vmem>>, vector<1x128x128xf32>
    %59 = vector.shape_cast %58 : vector<1x128x128xf32> to vector<128x128xf32>
    %cst_40 = arith.constant dense<0.000000e+00> : vector<320x128xf32>
    %60 = tpu.matmul %57, %59, %cst_40 {dimension_numbers = #tpu.dot_dimension_numbers<[1], [0], [0], [1], [0, 0, 1, 1], [], []>} : vector<320x128xf32>, vector<128x128xf32>, vector<320x128xf32> -> vector<320x128xf32>
    %61 = arith.addf %55, %60 : vector<320x128xf32>
    %62 = vector.extract_strided_slice %49 {offsets = [0, 2, 0, 0], sizes = [2, 10, 16, 128], strides = [1, 1, 1, 1]} : vector<2x14x16x128xf32> to vector<2x10x16x128xf32>
    %63 = vector.shape_cast %62 : vector<2x10x16x128xf32> to vector<320x128xf32>
    %c7 = arith.constant 7 : index
    %c0_41 = arith.constant 0 : index
    %c0_42 = arith.constant 0 : index
    %64 = vector.load %arg5[%c7, %c0_41, %c0_42] : memref<25x128x128xf32, #tpu.memory_space<vmem>>, vector<1x128x128xf32>
    %65 = vector.shape_cast %64 : vector<1x128x128xf32> to vector<128x128xf32>
    %cst_43 = arith.constant dense<0.000000e+00> : vector<320x128xf32>
    %66 = tpu.matmul %63, %65, %cst_43 {dimension_numbers = #tpu.dot_dimension_numbers<[1], [0], [0], [1], [0, 0, 1, 1], [], []>} : vector<320x128xf32>, vector<128x128xf32>, vector<320x128xf32> -> vector<320x128xf32>
    %67 = arith.addf %61, %66 : vector<320x128xf32>
    %68 = vector.extract_strided_slice %49 {offsets = [0, 3, 0, 0], sizes = [2, 10, 16, 128], strides = [1, 1, 1, 1]} : vector<2x14x16x128xf32> to vector<2x10x16x128xf32>
    %69 = vector.shape_cast %68 : vector<2x10x16x128xf32> to vector<320x128xf32>
    %c8 = arith.constant 8 : index
    %c0_44 = arith.constant 0 : index
    %c0_45 = arith.constant 0 : index
    %70 = vector.load %arg5[%c8, %c0_44, %c0_45] : memref<25x128x128xf32, #tpu.memory_space<vmem>>, vector<1x128x128xf32>
    %71 = vector.shape_cast %70 : vector<1x128x128xf32> to vector<128x128xf32>
    %cst_46 = arith.constant dense<0.000000e+00> : vector<320x128xf32>
    %72 = tpu.matmul %69, %71, %cst_46 {dimension_numbers = #tpu.dot_dimension_numbers<[1], [0], [0], [1], [0, 0, 1, 1], [], []>} : vector<320x128xf32>, vector<128x128xf32>, vector<320x128xf32> -> vector<320x128xf32>
    %73 = arith.addf %67, %72 : vector<320x128xf32>
    %74 = vector.extract_strided_slice %49 {offsets = [0, 4, 0, 0], sizes = [2, 10, 16, 128], strides = [1, 1, 1, 1]} : vector<2x14x16x128xf32> to vector<2x10x16x128xf32>
    %75 = vector.shape_cast %74 : vector<2x10x16x128xf32> to vector<320x128xf32>
    %c9 = arith.constant 9 : index
    %c0_47 = arith.constant 0 : index
    %c0_48 = arith.constant 0 : index
    %76 = vector.load %arg5[%c9, %c0_47, %c0_48] : memref<25x128x128xf32, #tpu.memory_space<vmem>>, vector<1x128x128xf32>
    %77 = vector.shape_cast %76 : vector<1x128x128xf32> to vector<128x128xf32>
    %cst_49 = arith.constant dense<0.000000e+00> : vector<320x128xf32>
    %78 = tpu.matmul %75, %77, %cst_49 {dimension_numbers = #tpu.dot_dimension_numbers<[1], [0], [0], [1], [0, 0, 1, 1], [], []>} : vector<320x128xf32>, vector<128x128xf32>, vector<320x128xf32> -> vector<320x128xf32>
    %79 = arith.addf %73, %78 : vector<320x128xf32>
    %c0_50 = arith.constant 0 : index
    %c0_51 = arith.constant 0 : index
    %c2_52 = arith.constant 2 : index
    %c0_53 = arith.constant 0 : index
    %80 = vector.load %arg14[%c0_50, %c0_51, %c2_52, %c0_53] : memref<2x14x24x128xf32, #tpu.memory_space<vmem>>, vector<2x14x16x128xf32>
    %81 = vector.extract_strided_slice %80 {offsets = [0, 0, 0, 0], sizes = [2, 10, 16, 128], strides = [1, 1, 1, 1]} : vector<2x14x16x128xf32> to vector<2x10x16x128xf32>
    %82 = vector.shape_cast %81 : vector<2x10x16x128xf32> to vector<320x128xf32>
    %c10 = arith.constant 10 : index
    %c0_54 = arith.constant 0 : index
    %c0_55 = arith.constant 0 : index
    %83 = vector.load %arg5[%c10, %c0_54, %c0_55] : memref<25x128x128xf32, #tpu.memory_space<vmem>>, vector<1x128x128xf32>
    %84 = vector.shape_cast %83 : vector<1x128x128xf32> to vector<128x128xf32>
    %cst_56 = arith.constant dense<0.000000e+00> : vector<320x128xf32>
    %85 = tpu.matmul %82, %84, %cst_56 {dimension_numbers = #tpu.dot_dimension_numbers<[1], [0], [0], [1], [0, 0, 1, 1], [], []>} : vector<320x128xf32>, vector<128x128xf32>, vector<320x128xf32> -> vector<320x128xf32>
    %86 = arith.addf %79, %85 : vector<320x128xf32>
    %87 = vector.extract_strided_slice %80 {offsets = [0, 1, 0, 0], sizes = [2, 10, 16, 128], strides = [1, 1, 1, 1]} : vector<2x14x16x128xf32> to vector<2x10x16x128xf32>
    %88 = vector.shape_cast %87 : vector<2x10x16x128xf32> to vector<320x128xf32>
    %c11 = arith.constant 11 : index
    %c0_57 = arith.constant 0 : index
    %c0_58 = arith.constant 0 : index
    %89 = vector.load %arg5[%c11, %c0_57, %c0_58] : memref<25x128x128xf32, #tpu.memory_space<vmem>>, vector<1x128x128xf32>
    %90 = vector.shape_cast %89 : vector<1x128x128xf32> to vector<128x128xf32>
    %cst_59 = arith.constant dense<0.000000e+00> : vector<320x128xf32>
    %91 = tpu.matmul %88, %90, %cst_59 {dimension_numbers = #tpu.dot_dimension_numbers<[1], [0], [0], [1], [0, 0, 1, 1], [], []>} : vector<320x128xf32>, vector<128x128xf32>, vector<320x128xf32> -> vector<320x128xf32>
    %92 = arith.addf %86, %91 : vector<320x128xf32>
    %93 = vector.extract_strided_slice %80 {offsets = [0, 2, 0, 0], sizes = [2, 10, 16, 128], strides = [1, 1, 1, 1]} : vector<2x14x16x128xf32> to vector<2x10x16x128xf32>
    %94 = vector.shape_cast %93 : vector<2x10x16x128xf32> to vector<320x128xf32>
    %c12 = arith.constant 12 : index
    %c0_60 = arith.constant 0 : index
    %c0_61 = arith.constant 0 : index
    %95 = vector.load %arg5[%c12, %c0_60, %c0_61] : memref<25x128x128xf32, #tpu.memory_space<vmem>>, vector<1x128x128xf32>
    %96 = vector.shape_cast %95 : vector<1x128x128xf32> to vector<128x128xf32>
    %cst_62 = arith.constant dense<0.000000e+00> : vector<320x128xf32>
    %97 = tpu.matmul %94, %96, %cst_62 {dimension_numbers = #tpu.dot_dimension_numbers<[1], [0], [0], [1], [0, 0, 1, 1], [], []>} : vector<320x128xf32>, vector<128x128xf32>, vector<320x128xf32> -> vector<320x128xf32>
    %98 = arith.addf %92, %97 : vector<320x128xf32>
    %99 = vector.extract_strided_slice %80 {offsets = [0, 3, 0, 0], sizes = [2, 10, 16, 128], strides = [1, 1, 1, 1]} : vector<2x14x16x128xf32> to vector<2x10x16x128xf32>
    %100 = vector.shape_cast %99 : vector<2x10x16x128xf32> to vector<320x128xf32>
    %c13 = arith.constant 13 : index
    %c0_63 = arith.constant 0 : index
    %c0_64 = arith.constant 0 : index
    %101 = vector.load %arg5[%c13, %c0_63, %c0_64] : memref<25x128x128xf32, #tpu.memory_space<vmem>>, vector<1x128x128xf32>
    %102 = vector.shape_cast %101 : vector<1x128x128xf32> to vector<128x128xf32>
    %cst_65 = arith.constant dense<0.000000e+00> : vector<320x128xf32>
    %103 = tpu.matmul %100, %102, %cst_65 {dimension_numbers = #tpu.dot_dimension_numbers<[1], [0], [0], [1], [0, 0, 1, 1], [], []>} : vector<320x128xf32>, vector<128x128xf32>, vector<320x128xf32> -> vector<320x128xf32>
    %104 = arith.addf %98, %103 : vector<320x128xf32>
    %105 = vector.extract_strided_slice %80 {offsets = [0, 4, 0, 0], sizes = [2, 10, 16, 128], strides = [1, 1, 1, 1]} : vector<2x14x16x128xf32> to vector<2x10x16x128xf32>
    %106 = vector.shape_cast %105 : vector<2x10x16x128xf32> to vector<320x128xf32>
    %c14 = arith.constant 14 : index
    %c0_66 = arith.constant 0 : index
    %c0_67 = arith.constant 0 : index
    %107 = vector.load %arg5[%c14, %c0_66, %c0_67] : memref<25x128x128xf32, #tpu.memory_space<vmem>>, vector<1x128x128xf32>
    %108 = vector.shape_cast %107 : vector<1x128x128xf32> to vector<128x128xf32>
    %cst_68 = arith.constant dense<0.000000e+00> : vector<320x128xf32>
    %109 = tpu.matmul %106, %108, %cst_68 {dimension_numbers = #tpu.dot_dimension_numbers<[1], [0], [0], [1], [0, 0, 1, 1], [], []>} : vector<320x128xf32>, vector<128x128xf32>, vector<320x128xf32> -> vector<320x128xf32>
    %110 = arith.addf %104, %109 : vector<320x128xf32>
    %c0_69 = arith.constant 0 : index
    %c0_70 = arith.constant 0 : index
    %c3_71 = arith.constant 3 : index
    %c0_72 = arith.constant 0 : index
    %111 = vector.load %arg14[%c0_69, %c0_70, %c3_71, %c0_72] : memref<2x14x24x128xf32, #tpu.memory_space<vmem>>, vector<2x14x16x128xf32>
    %112 = vector.extract_strided_slice %111 {offsets = [0, 0, 0, 0], sizes = [2, 10, 16, 128], strides = [1, 1, 1, 1]} : vector<2x14x16x128xf32> to vector<2x10x16x128xf32>
    %113 = vector.shape_cast %112 : vector<2x10x16x128xf32> to vector<320x128xf32>
    %c15 = arith.constant 15 : index
    %c0_73 = arith.constant 0 : index
    %c0_74 = arith.constant 0 : index
    %114 = vector.load %arg5[%c15, %c0_73, %c0_74] : memref<25x128x128xf32, #tpu.memory_space<vmem>>, vector<1x128x128xf32>
    %115 = vector.shape_cast %114 : vector<1x128x128xf32> to vector<128x128xf32>
    %cst_75 = arith.constant dense<0.000000e+00> : vector<320x128xf32>
    %116 = tpu.matmul %113, %115, %cst_75 {dimension_numbers = #tpu.dot_dimension_numbers<[1], [0], [0], [1], [0, 0, 1, 1], [], []>} : vector<320x128xf32>, vector<128x128xf32>, vector<320x128xf32> -> vector<320x128xf32>
    %117 = arith.addf %110, %116 : vector<320x128xf32>
    %118 = vector.extract_strided_slice %111 {offsets = [0, 1, 0, 0], sizes = [2, 10, 16, 128], strides = [1, 1, 1, 1]} : vector<2x14x16x128xf32> to vector<2x10x16x128xf32>
    %119 = vector.shape_cast %118 : vector<2x10x16x128xf32> to vector<320x128xf32>
    %c16 = arith.constant 16 : index
    %c0_76 = arith.constant 0 : index
    %c0_77 = arith.constant 0 : index
    %120 = vector.load %arg5[%c16, %c0_76, %c0_77] : memref<25x128x128xf32, #tpu.memory_space<vmem>>, vector<1x128x128xf32>
    %121 = vector.shape_cast %120 : vector<1x128x128xf32> to vector<128x128xf32>
    %cst_78 = arith.constant dense<0.000000e+00> : vector<320x128xf32>
    %122 = tpu.matmul %119, %121, %cst_78 {dimension_numbers = #tpu.dot_dimension_numbers<[1], [0], [0], [1], [0, 0, 1, 1], [], []>} : vector<320x128xf32>, vector<128x128xf32>, vector<320x128xf32> -> vector<320x128xf32>
    %123 = arith.addf %117, %122 : vector<320x128xf32>
    %124 = vector.extract_strided_slice %111 {offsets = [0, 2, 0, 0], sizes = [2, 10, 16, 128], strides = [1, 1, 1, 1]} : vector<2x14x16x128xf32> to vector<2x10x16x128xf32>
    %125 = vector.shape_cast %124 : vector<2x10x16x128xf32> to vector<320x128xf32>
    %c17 = arith.constant 17 : index
    %c0_79 = arith.constant 0 : index
    %c0_80 = arith.constant 0 : index
    %126 = vector.load %arg5[%c17, %c0_79, %c0_80] : memref<25x128x128xf32, #tpu.memory_space<vmem>>, vector<1x128x128xf32>
    %127 = vector.shape_cast %126 : vector<1x128x128xf32> to vector<128x128xf32>
    %cst_81 = arith.constant dense<0.000000e+00> : vector<320x128xf32>
    %128 = tpu.matmul %125, %127, %cst_81 {dimension_numbers = #tpu.dot_dimension_numbers<[1], [0], [0], [1], [0, 0, 1, 1], [], []>} : vector<320x128xf32>, vector<128x128xf32>, vector<320x128xf32> -> vector<320x128xf32>
    %129 = arith.addf %123, %128 : vector<320x128xf32>
    %130 = vector.extract_strided_slice %111 {offsets = [0, 3, 0, 0], sizes = [2, 10, 16, 128], strides = [1, 1, 1, 1]} : vector<2x14x16x128xf32> to vector<2x10x16x128xf32>
    %131 = vector.shape_cast %130 : vector<2x10x16x128xf32> to vector<320x128xf32>
    %c18 = arith.constant 18 : index
    %c0_82 = arith.constant 0 : index
    %c0_83 = arith.constant 0 : index
    %132 = vector.load %arg5[%c18, %c0_82, %c0_83] : memref<25x128x128xf32, #tpu.memory_space<vmem>>, vector<1x128x128xf32>
    %133 = vector.shape_cast %132 : vector<1x128x128xf32> to vector<128x128xf32>
    %cst_84 = arith.constant dense<0.000000e+00> : vector<320x128xf32>
    %134 = tpu.matmul %131, %133, %cst_84 {dimension_numbers = #tpu.dot_dimension_numbers<[1], [0], [0], [1], [0, 0, 1, 1], [], []>} : vector<320x128xf32>, vector<128x128xf32>, vector<320x128xf32> -> vector<320x128xf32>
    %135 = arith.addf %129, %134 : vector<320x128xf32>
    %136 = vector.extract_strided_slice %111 {offsets = [0, 4, 0, 0], sizes = [2, 10, 16, 128], strides = [1, 1, 1, 1]} : vector<2x14x16x128xf32> to vector<2x10x16x128xf32>
    %137 = vector.shape_cast %136 : vector<2x10x16x128xf32> to vector<320x128xf32>
    %c19 = arith.constant 19 : index
    %c0_85 = arith.constant 0 : index
    %c0_86 = arith.constant 0 : index
    %138 = vector.load %arg5[%c19, %c0_85, %c0_86] : memref<25x128x128xf32, #tpu.memory_space<vmem>>, vector<1x128x128xf32>
    %139 = vector.shape_cast %138 : vector<1x128x128xf32> to vector<128x128xf32>
    %cst_87 = arith.constant dense<0.000000e+00> : vector<320x128xf32>
    %140 = tpu.matmul %137, %139, %cst_87 {dimension_numbers = #tpu.dot_dimension_numbers<[1], [0], [0], [1], [0, 0, 1, 1], [], []>} : vector<320x128xf32>, vector<128x128xf32>, vector<320x128xf32> -> vector<320x128xf32>
    %141 = arith.addf %135, %140 : vector<320x128xf32>
    %c0_88 = arith.constant 0 : index
    %c0_89 = arith.constant 0 : index
    %c4_90 = arith.constant 4 : index
    %c0_91 = arith.constant 0 : index
    %142 = vector.load %arg14[%c0_88, %c0_89, %c4_90, %c0_91] : memref<2x14x24x128xf32, #tpu.memory_space<vmem>>, vector<2x14x16x128xf32>
    %143 = vector.extract_strided_slice %142 {offsets = [0, 0, 0, 0], sizes = [2, 10, 16, 128], strides = [1, 1, 1, 1]} : vector<2x14x16x128xf32> to vector<2x10x16x128xf32>
    %144 = vector.shape_cast %143 : vector<2x10x16x128xf32> to vector<320x128xf32>
    %c20 = arith.constant 20 : index
    %c0_92 = arith.constant 0 : index
    %c0_93 = arith.constant 0 : index
    %145 = vector.load %arg5[%c20, %c0_92, %c0_93] : memref<25x128x128xf32, #tpu.memory_space<vmem>>, vector<1x128x128xf32>
    %146 = vector.shape_cast %145 : vector<1x128x128xf32> to vector<128x128xf32>
    %cst_94 = arith.constant dense<0.000000e+00> : vector<320x128xf32>
    %147 = tpu.matmul %144, %146, %cst_94 {dimension_numbers = #tpu.dot_dimension_numbers<[1], [0], [0], [1], [0, 0, 1, 1], [], []>} : vector<320x128xf32>, vector<128x128xf32>, vector<320x128xf32> -> vector<320x128xf32>
    %148 = arith.addf %141, %147 : vector<320x128xf32>
    %149 = vector.extract_strided_slice %142 {offsets = [0, 1, 0, 0], sizes = [2, 10, 16, 128], strides = [1, 1, 1, 1]} : vector<2x14x16x128xf32> to vector<2x10x16x128xf32>
    %150 = vector.shape_cast %149 : vector<2x10x16x128xf32> to vector<320x128xf32>
    %c21 = arith.constant 21 : index
    %c0_95 = arith.constant 0 : index
    %c0_96 = arith.constant 0 : index
    %151 = vector.load %arg5[%c21, %c0_95, %c0_96] : memref<25x128x128xf32, #tpu.memory_space<vmem>>, vector<1x128x128xf32>
    %152 = vector.shape_cast %151 : vector<1x128x128xf32> to vector<128x128xf32>
    %cst_97 = arith.constant dense<0.000000e+00> : vector<320x128xf32>
    %153 = tpu.matmul %150, %152, %cst_97 {dimension_numbers = #tpu.dot_dimension_numbers<[1], [0], [0], [1], [0, 0, 1, 1], [], []>} : vector<320x128xf32>, vector<128x128xf32>, vector<320x128xf32> -> vector<320x128xf32>
    %154 = arith.addf %148, %153 : vector<320x128xf32>
    %155 = vector.extract_strided_slice %142 {offsets = [0, 2, 0, 0], sizes = [2, 10, 16, 128], strides = [1, 1, 1, 1]} : vector<2x14x16x128xf32> to vector<2x10x16x128xf32>
    %156 = vector.shape_cast %155 : vector<2x10x16x128xf32> to vector<320x128xf32>
    %c22 = arith.constant 22 : index
    %c0_98 = arith.constant 0 : index
    %c0_99 = arith.constant 0 : index
    %157 = vector.load %arg5[%c22, %c0_98, %c0_99] : memref<25x128x128xf32, #tpu.memory_space<vmem>>, vector<1x128x128xf32>
    %158 = vector.shape_cast %157 : vector<1x128x128xf32> to vector<128x128xf32>
    %cst_100 = arith.constant dense<0.000000e+00> : vector<320x128xf32>
    %159 = tpu.matmul %156, %158, %cst_100 {dimension_numbers = #tpu.dot_dimension_numbers<[1], [0], [0], [1], [0, 0, 1, 1], [], []>} : vector<320x128xf32>, vector<128x128xf32>, vector<320x128xf32> -> vector<320x128xf32>
    %160 = arith.addf %154, %159 : vector<320x128xf32>
    %161 = vector.extract_strided_slice %142 {offsets = [0, 3, 0, 0], sizes = [2, 10, 16, 128], strides = [1, 1, 1, 1]} : vector<2x14x16x128xf32> to vector<2x10x16x128xf32>
    %162 = vector.shape_cast %161 : vector<2x10x16x128xf32> to vector<320x128xf32>
    %c23 = arith.constant 23 : index
    %c0_101 = arith.constant 0 : index
    %c0_102 = arith.constant 0 : index
    %163 = vector.load %arg5[%c23, %c0_101, %c0_102] : memref<25x128x128xf32, #tpu.memory_space<vmem>>, vector<1x128x128xf32>
    %164 = vector.shape_cast %163 : vector<1x128x128xf32> to vector<128x128xf32>
    %cst_103 = arith.constant dense<0.000000e+00> : vector<320x128xf32>
    %165 = tpu.matmul %162, %164, %cst_103 {dimension_numbers = #tpu.dot_dimension_numbers<[1], [0], [0], [1], [0, 0, 1, 1], [], []>} : vector<320x128xf32>, vector<128x128xf32>, vector<320x128xf32> -> vector<320x128xf32>
    %166 = arith.addf %160, %165 : vector<320x128xf32>
    %167 = vector.extract_strided_slice %142 {offsets = [0, 4, 0, 0], sizes = [2, 10, 16, 128], strides = [1, 1, 1, 1]} : vector<2x14x16x128xf32> to vector<2x10x16x128xf32>
    %168 = vector.shape_cast %167 : vector<2x10x16x128xf32> to vector<320x128xf32>
    %c24 = arith.constant 24 : index
    %c0_104 = arith.constant 0 : index
    %c0_105 = arith.constant 0 : index
    %169 = vector.load %arg5[%c24, %c0_104, %c0_105] : memref<25x128x128xf32, #tpu.memory_space<vmem>>, vector<1x128x128xf32>
    %170 = vector.shape_cast %169 : vector<1x128x128xf32> to vector<128x128xf32>
    %cst_106 = arith.constant dense<0.000000e+00> : vector<320x128xf32>
    %171 = tpu.matmul %168, %170, %cst_106 {dimension_numbers = #tpu.dot_dimension_numbers<[1], [0], [0], [1], [0, 0, 1, 1], [], []>} : vector<320x128xf32>, vector<128x128xf32>, vector<320x128xf32> -> vector<320x128xf32>
    %172 = arith.addf %166, %171 : vector<320x128xf32>
    %c0_107 = arith.constant 0 : index
    %c0_108 = arith.constant 0 : index
    %173 = vector.load %arg6[%c0_107, %c0_108] : memref<1x128xf32, #tpu.memory_space<vmem>>, vector<1x128xf32>
    %174 = vector.broadcast %173 : vector<1x128xf32> to vector<320x128xf32>
    %175 = arith.addf %172, %174 : vector<320x128xf32>
    %cst_109 = arith.constant 0.000000e+00 : f32
    %176 = vector.broadcast %cst_109 : f32 to vector<320x128xf32>
    %177 = arith.maximumf %175, %176 : vector<320x128xf32>
    %178 = vector.shape_cast %177 : vector<320x128xf32> to vector<2x5x2x16x128xf32>
    %179 = vector.extract_strided_slice %178 {offsets = [0, 0, 0, 0, 0], sizes = [2, 5, 1, 16, 128], strides = [1, 1, 1, 1, 1]} : vector<2x5x2x16x128xf32> to vector<2x5x1x16x128xf32>
    %180 = vector.shape_cast %179 : vector<2x5x1x16x128xf32> to vector<2x5x16x128xf32>
    %181 = vector.extract_strided_slice %178 {offsets = [0, 0, 1, 0, 0], sizes = [2, 5, 1, 16, 128], strides = [1, 1, 1, 1, 1]} : vector<2x5x2x16x128xf32> to vector<2x5x1x16x128xf32>
    %182 = vector.shape_cast %181 : vector<2x5x1x16x128xf32> to vector<2x5x16x128xf32>
    %183 = arith.maximumf %180, %182 : vector<2x5x16x128xf32>
    %184 = vector.shape_cast %183 : vector<2x5x16x128xf32> to vector<160x128xf32>
    %c0_110 = arith.constant 0 : index
    %c0_111 = arith.constant 0 : index
    %185 = vector.load %arg1[%c0_110, %c0_111] : memref<200x160xf32, #tpu.memory_space<vmem>>, vector<200x160xf32>
    %cst_112 = arith.constant dense<0.000000e+00> : vector<200x128xf32>
    %186 = tpu.matmul %185, %184, %cst_112 {dimension_numbers = #tpu.dot_dimension_numbers<[1], [0], [0], [1], [0, 0, 1, 1], [], []>} : vector<200x160xf32>, vector<160x128xf32>, vector<200x128xf32> -> vector<200x128xf32>
    %c0_113 = arith.constant 0 : index
    %c0_114 = arith.constant 0 : index
    %187 = vector.load %arg2[%c0_113, %c0_114] : memref<200x160xf32, #tpu.memory_space<vmem>>, vector<200x160xf32>
    %cst_115 = arith.constant dense<0.000000e+00> : vector<200x128xf32>
    %188 = tpu.matmul %187, %184, %cst_115 {dimension_numbers = #tpu.dot_dimension_numbers<[1], [0], [0], [1], [0, 0, 1, 1], [], []>} : vector<200x160xf32>, vector<160x128xf32>, vector<200x128xf32> -> vector<200x128xf32>
    %189 = arith.maximumf %186, %188 : vector<200x128xf32>
    %190 = vector.extract_strided_slice %189 {offsets = [0, 0], sizes = [8, 128], strides = [1, 1]} : vector<200x128xf32> to vector<8x128xf32>
    %191 = vector.extract_strided_slice %189 {offsets = [8, 0], sizes = [8, 128], strides = [1, 1]} : vector<200x128xf32> to vector<8x128xf32>
    %192 = vector.extract_strided_slice %189 {offsets = [16, 0], sizes = [8, 128], strides = [1, 1]} : vector<200x128xf32> to vector<8x128xf32>
    %193 = vector.extract_strided_slice %189 {offsets = [24, 0], sizes = [8, 128], strides = [1, 1]} : vector<200x128xf32> to vector<8x128xf32>
    %194 = vector.extract_strided_slice %189 {offsets = [32, 0], sizes = [8, 128], strides = [1, 1]} : vector<200x128xf32> to vector<8x128xf32>
    %195 = vector.extract_strided_slice %189 {offsets = [40, 0], sizes = [8, 128], strides = [1, 1]} : vector<200x128xf32> to vector<8x128xf32>
    %196 = vector.extract_strided_slice %189 {offsets = [48, 0], sizes = [8, 128], strides = [1, 1]} : vector<200x128xf32> to vector<8x128xf32>
    %197 = vector.extract_strided_slice %189 {offsets = [56, 0], sizes = [8, 128], strides = [1, 1]} : vector<200x128xf32> to vector<8x128xf32>
    %198 = vector.extract_strided_slice %189 {offsets = [64, 0], sizes = [8, 128], strides = [1, 1]} : vector<200x128xf32> to vector<8x128xf32>
    %199 = vector.extract_strided_slice %189 {offsets = [72, 0], sizes = [8, 128], strides = [1, 1]} : vector<200x128xf32> to vector<8x128xf32>
    %200 = vector.extract_strided_slice %189 {offsets = [80, 0], sizes = [8, 128], strides = [1, 1]} : vector<200x128xf32> to vector<8x128xf32>
    %201 = vector.extract_strided_slice %189 {offsets = [88, 0], sizes = [8, 128], strides = [1, 1]} : vector<200x128xf32> to vector<8x128xf32>
    %202 = vector.extract_strided_slice %189 {offsets = [96, 0], sizes = [8, 128], strides = [1, 1]} : vector<200x128xf32> to vector<8x128xf32>
    %203 = vector.extract_strided_slice %189 {offsets = [104, 0], sizes = [8, 128], strides = [1, 1]} : vector<200x128xf32> to vector<8x128xf32>
    %204 = vector.extract_strided_slice %189 {offsets = [112, 0], sizes = [8, 128], strides = [1, 1]} : vector<200x128xf32> to vector<8x128xf32>
    %205 = vector.extract_strided_slice %189 {offsets = [120, 0], sizes = [8, 128], strides = [1, 1]} : vector<200x128xf32> to vector<8x128xf32>
    %206 = vector.extract_strided_slice %189 {offsets = [128, 0], sizes = [8, 128], strides = [1, 1]} : vector<200x128xf32> to vector<8x128xf32>
    %207 = vector.extract_strided_slice %189 {offsets = [136, 0], sizes = [8, 128], strides = [1, 1]} : vector<200x128xf32> to vector<8x128xf32>
    %208 = vector.extract_strided_slice %189 {offsets = [144, 0], sizes = [8, 128], strides = [1, 1]} : vector<200x128xf32> to vector<8x128xf32>
    %209 = vector.extract_strided_slice %189 {offsets = [152, 0], sizes = [8, 128], strides = [1, 1]} : vector<200x128xf32> to vector<8x128xf32>
    %210 = vector.extract_strided_slice %189 {offsets = [160, 0], sizes = [8, 128], strides = [1, 1]} : vector<200x128xf32> to vector<8x128xf32>
    %211 = vector.extract_strided_slice %189 {offsets = [168, 0], sizes = [8, 128], strides = [1, 1]} : vector<200x128xf32> to vector<8x128xf32>
    %212 = vector.extract_strided_slice %189 {offsets = [176, 0], sizes = [8, 128], strides = [1, 1]} : vector<200x128xf32> to vector<8x128xf32>
    %213 = vector.extract_strided_slice %189 {offsets = [184, 0], sizes = [8, 128], strides = [1, 1]} : vector<200x128xf32> to vector<8x128xf32>
    %214 = vector.extract_strided_slice %189 {offsets = [192, 0], sizes = [8, 128], strides = [1, 1]} : vector<200x128xf32> to vector<8x128xf32>
    %215 = tpu.concatenate %190, %191, %192, %193, %194, %195, %196, %197, %198, %199, %200, %201, %202, %203, %204, %205 in 1 : vector<8x128xf32>, vector<8x128xf32>, vector<8x128xf32>, vector<8x128xf32>, vector<8x128xf32>, vector<8x128xf32>, vector<8x128xf32>, vector<8x128xf32>, vector<8x128xf32>, vector<8x128xf32>, vector<8x128xf32>, vector<8x128xf32>, vector<8x128xf32>, vector<8x128xf32>, vector<8x128xf32>, vector<8x128xf32> -> vector<8x2048xf32>
    %216 = tpu.concatenate %206, %207, %208, %209, %210, %211, %212, %213, %214 in 1 : vector<8x128xf32>, vector<8x128xf32>, vector<8x128xf32>, vector<8x128xf32>, vector<8x128xf32>, vector<8x128xf32>, vector<8x128xf32>, vector<8x128xf32>, vector<8x128xf32> -> vector<8x1152xf32>
    %217 = tpu.concatenate %215, %216 in 1 : vector<8x2048xf32>, vector<8x1152xf32> -> vector<8x3200xf32>
    %c0_116 = arith.constant 0 : index
    %c0_117 = arith.constant 0 : index
    %218 = vector.load %arg7[%c0_116, %c0_117] : memref<3200x128xf32, #tpu.memory_space<vmem>>, vector<3200x128xf32>
    %cst_118 = arith.constant dense<0.000000e+00> : vector<8x128xf32>
    %219 = tpu.matmul %217, %218, %cst_118 {dimension_numbers = #tpu.dot_dimension_numbers<[1], [0], [0], [1], [0, 0, 1, 1], [], []>} : vector<8x3200xf32>, vector<3200x128xf32>, vector<8x128xf32> -> vector<8x128xf32>
    %c0_119 = arith.constant 0 : index
    %c0_120 = arith.constant 0 : index
    %220 = vector.load %arg8[%c0_119, %c0_120] : memref<1x128xf32, #tpu.memory_space<vmem>>, vector<1x128xf32>
    %221 = vector.broadcast %220 : vector<1x128xf32> to vector<8x128xf32>
    %222 = arith.addf %219, %221 : vector<8x128xf32>
    %cst_121 = arith.constant 0.000000e+00 : f32
    %223 = vector.broadcast %cst_121 : f32 to vector<8x128xf32>
    %224 = arith.maximumf %222, %223 : vector<8x128xf32>
    %c0_122 = arith.constant 0 : index
    %c0_123 = arith.constant 0 : index
    %225 = vector.load %arg9[%c0_122, %c0_123] : memref<128x128xf32, #tpu.memory_space<vmem>>, vector<128x128xf32>
    %cst_124 = arith.constant dense<0.000000e+00> : vector<8x128xf32>
    %226 = tpu.matmul %224, %225, %cst_124 {dimension_numbers = #tpu.dot_dimension_numbers<[1], [0], [0], [1], [0, 0, 1, 1], [], []>} : vector<8x128xf32>, vector<128x128xf32>, vector<8x128xf32> -> vector<8x128xf32>
    %c0_125 = arith.constant 0 : index
    %c0_126 = arith.constant 0 : index
    %227 = vector.load %arg10[%c0_125, %c0_126] : memref<1x128xf32, #tpu.memory_space<vmem>>, vector<1x128xf32>
    %228 = vector.broadcast %227 : vector<1x128xf32> to vector<8x128xf32>
    %229 = arith.addf %226, %228 : vector<8x128xf32>
    %cst_127 = arith.constant 0.000000e+00 : f32
    %230 = vector.broadcast %cst_127 : f32 to vector<8x128xf32>
    %231 = arith.maximumf %229, %230 : vector<8x128xf32>
    %c0_128 = arith.constant 0 : index
    %c0_129 = arith.constant 0 : index
    %232 = vector.load %arg11[%c0_128, %c0_129] : memref<128x128xf32, #tpu.memory_space<vmem>>, vector<128x128xf32>
    %cst_130 = arith.constant dense<0.000000e+00> : vector<8x128xf32>
    %233 = tpu.matmul %231, %232, %cst_130 {dimension_numbers = #tpu.dot_dimension_numbers<[1], [0], [0], [1], [0, 0, 1, 1], [], []>} : vector<8x128xf32>, vector<128x128xf32>, vector<8x128xf32> -> vector<8x128xf32>
    %c0_131 = arith.constant 0 : index
    %c0_132 = arith.constant 0 : index
    %234 = vector.load %arg12[%c0_131, %c0_132] : memref<1x128xf32, #tpu.memory_space<vmem>>, vector<1x128xf32>
    %235 = vector.broadcast %234 : vector<1x128xf32> to vector<8x128xf32>
    %236 = arith.addf %233, %235 : vector<8x128xf32>
    %c0_133 = arith.constant 0 : index
    %c0_134 = arith.constant 0 : index
    %237 = vector.load %arg13[%c0_133, %c0_134] : memref<8x128xf32, #tpu.memory_space<vmem>>, vector<8x128xf32>
    tpu.vector_store %arg13[%c0_133, %c0_134], %236 {strides = array<i32>} : memref<8x128xf32, #tpu.memory_space<vmem>>, vector<8x128xf32>,
    return
  }
}

</mosaic_0001>

<bundles_post_ra>
// kernel: net_forward.1
= control target key start
LH: loop header
LB: loop body
LE: loop exit
PB: predicated region body
PF: predicated region fallthrough
CT: control target
= control target key end

     0   :  { %vm11226_vm0 = vcmask 261120   ;;  %vm21303_vm1 = vmmov 0   ;;  %s28309_s3 = inlined_call_operand.vmem [shape: f32[128,128], index: 3, kind: input, shape index: {}]   ;;  %s28310_s0 = inlined_call_operand.vmem [shape: f32[2688,128], index: 0, kind: input, shape index: {}]   ;;  %s28311_s4 = inlined_call_operand.vmem [shape: f32[1,128], index: 4, kind: input, shape index: {}]   ;;  %s28312_s5 = inlined_call_operand.vmem [shape: f32[25,128,128], index: 5, kind: input, shape index: {}]   ;;  %s28313_s1 = inlined_call_operand.vmem [shape: f32[200,160], index: 1, kind: input, shape index: {}]   ;;  %s28314_s6 = inlined_call_operand.vmem [shape: f32[1,128], index: 6, kind: input, shape index: {}]   ;;  %s28315_s2 = inlined_call_operand.vmem [shape: f32[200,160], index: 2, kind: input, shape index: {}]   ;;  %s28316_s7 = inlined_call_operand.vmem [shape: f32[3200,128], index: 7, kind: input, shape index: {}]   ;;  %s28317_s8 = inlined_call_operand.vmem [shape: f32[1,128], index: 8, kind: input, shape index: {}]   ;;  %s28318_s9 = inlined_call_operand.vmem [shape: f32[128,128], index: 9, kind: input, shape index: {}]   ;;  %s28319_s11 = inlined_call_operand.vmem [shape: f32[128,128], index: 11, kind: input, shape index: {}]   ;;  %s28320_s10 = inlined_call_operand.vmem [shape: f32[1,128], index: 10, kind: input, shape index: {}]   ;;  %s28321_s12 = inlined_call_operand.vmem [shape: f32[1,128], index: 12, kind: input, shape index: {}]   ;;  %s28322_s13 = inlined_call_operand.vmem [shape: f32[8,128], index: 13, kind: output, shape index: {}]  }
   0x1   :  { %v380_v0 = vld [vmem:[%s28309_s3] sm:$0xff]  ;;  %v381_v1 = vld [vmem:[%s28309_s3 + $0x8] sm:$0xff]  ;;  %v382_v2 = vld [vmem:[%s28309_s3 + $0x10] sm:$0xff] }
   0x2   :  { %v18945_v3 = vpack.c.bf16 %v381_v1, %v380_v0  ;;  %v383_v4 = vld [vmem:[%s28309_s3 + $0x18] sm:$0xff]  ;;  %v384_v6 = vld [vmem:[%s28309_s3 + $0x20] sm:$0xff]  ;;  %v385_v7 = vld [vmem:[%s28309_s3 + $0x28] sm:$0xff] }
   0x3   :  { %v18949_v5 = vpack.c.bf16 %v383_v4, %v382_v2  ;;  %v18953_v8 = vpack.c.bf16 %v385_v7, %v384_v6  ;;  %v44_v9 = vld [vmem:[%s28310_s0] sm:$0xff]  ;;  %v386_v10 = vld [vmem:[%s28309_s3 + $0x30] sm:$0xff]  ;;  %v387_v11 = vld [vmem:[%s28309_s3 + $0x38] sm:$0xff] }
   0x4   :  { %18946 = vmatprep.subr.bf16.mxu0 %v18945_v3  ;;  %16036 = vmatprep.mubr.f32.mxu0 %v44_v9  ;;  %v18957_v12 = vpack.c.bf16 %v387_v11, %v386_v10  ;;  %v388_v13 = vld [vmem:[%s28309_s3 + $0x40] sm:$0xff]  ;;  %v389_v14 = vld [vmem:[%s28309_s3 + $0x48] sm:$0xff]  ;;  %v390_v16 = vld [vmem:[%s28309_s3 + $0x50] sm:$0xff] }
   0x5   :  { %18948 = vmatpush3.bf16.msra.mxu0 %v18945_v3  ;;  %v18961_v15 = vpack.c.bf16 %v389_v14, %v388_v13  ;;  %v391_v17 = vld [vmem:[%s28309_s3 + $0x58] sm:$0xff]  ;;  %v392_v19 = vld [vmem:[%s28309_s3 + $0x60] sm:$0xff]  ;;  %v393_v20 = vld [vmem:[%s28309_s3 + $0x68] sm:$0xff] }
   0x6   :  { %18950 = vmatprep.subr.bf16.mxu0 %v18949_v5  ;;  %v18965_v18 = vpack.c.bf16 %v391_v17, %v390_v16  ;;  %v18969_v21 = vpack.c.bf16 %v393_v20, %v392_v19  ;;  %v394_v22 = vld [vmem:[%s28309_s3 + $0x70] sm:$0xff]  ;;  %v395_v23 = vld [vmem:[%s28309_s3 + $0x78] sm:$0xff]  ;;  %v45_v25 = vld [vmem:[%s28310_s0 + $0x8] sm:$0xff] }
   0x7   :  { %v18973_v24 = vpack.c.bf16 %v395_v23, %v394_v22  ;;  %v46_v26 = vld [vmem:[%s28310_s0 + $0x10] sm:$0xff]  ;;  %v47_v27 = vld [vmem:[%s28310_s0 + $0x18] sm:$0xff]  ;;  %v48_v28 = vld [vmem:[%s28310_s0 + $0x20] sm:$0xff] }
   0x8   :  { %v49_v29 = vld [vmem:[%s28310_s0 + $0x28] sm:$0xff]  ;;  %v50_v30 = vld [vmem:[%s28310_s0 + $0x30] sm:$0xff]  ;;  %v51_v31 = vld [vmem:[%s28310_s0 + $0x38] sm:$0xff] }
   0x9   :  { %18952 = vmatpush3.bf16.msra.mxu0 %v18949_v5  ;;  %v52_v32 = vld [vmem:[%s28310_s0 + $0x40] sm:$0xff]  ;;  %v53_v33 = vld [vmem:[%s28310_s0 + $0x48] sm:$0xff]  ;;  %v54_v34 = vld [vmem:[%s28310_s0 + $0x50] sm:$0xff] }
   0xa   :  { %18954 = vmatprep.subr.bf16.mxu0 %v18953_v8  ;;  %v55_v35 = vld [vmem:[%s28310_s0 + $0x58] sm:$0xff]  ;;  %v56_v36 = vld [vmem:[%s28310_s0 + $0x60] sm:$0xff]  ;;  %v57_v37 = vld [vmem:[%s28310_s0 + $0x68] sm:$0xff] }
   0xb   :  { %v58_v38 = vld [vmem:[%s28310_s0 + $0x70] sm:$0xff]  ;;  %v59_v39 = vld [vmem:[%s28310_s0 + $0x78] sm:$0xff]  ;;  %v60_v40 = vld [vmem:[%s28310_s0 + $0x80] sm:$0xff] }
   0xc   :  { %v61_v41 = vld [vmem:[%s28310_s0 + $0x88] sm:$0xff]  ;;  %v62_v42 = vld [vmem:[%s28310_s0 + $0x90] sm:$0xff]  ;;  %v63_v43 = vld [vmem:[%s28310_s0 + $0x98] sm:$0xff] }
   0xd   :  { %18956 = vmatpush3.bf16.msra.mxu0 %v18953_v8  ;;  %v64_v44 = vld [vmem:[%s28310_s0 + $0xa0] sm:$0xff]  ;;  %v65_v45 = vld [vmem:[%s28310_s0 + $0xa8] sm:$0xff]  ;;  %v66_v46 = vld [vmem:[%s28310_s0 + $0xb0] sm:$0xff] }
   0xe   :  { %18958 = vmatprep.subr.bf16.mxu0 %v18957_v12  ;;  %v67_v47 = vld [vmem:[%s28310_s0 + $0xb8] sm:$0xff]  ;;  %v68_v48 = vld [vmem:[%s28310_s0 + $0xc0] sm:$0xff]  ;;  %v69_v49 = vld [vmem:[%s28310_s0 + $0xc8] sm:$0xff] }
   0xf   :  { %v70_v50 = vld [vmem:[%s28310_s0 + $0xd0] sm:$0xff]  ;;  %v71_v51 = vld [vmem:[%s28310_s0 + $0xd8] sm:$0xff]  ;;  %v72_v52 = vld [vmem:[%s28310_s0 + $0xe0] sm:$0xff] }
  0x10   :  { %v73_v53 = vld [vmem:[%s28310_s0 + $0xe8] sm:$0xff]  ;;  %v74_v54 = vld [vmem:[%s28310_s0 + $0xf0] sm:$0xff]  ;;  %v75_v55 = vld [vmem:[%s28310_s0 + $0xf8] sm:$0xff] }
  0x11   :  { %18960 = vmatpush3.bf16.msra.mxu0 %v18957_v12  ;;  %v76_v56 = vld [vmem:[%s28310_s0 + $0x100] sm:$0xff]  ;;  %v77_v57 = vld [vmem:[%s28310_s0 + $0x108] sm:$0xff]  ;;  %v78_v58 = vld [vmem:[%s28310_s0 + $0x110] sm:$0xff] }
  0x12   :  { %18962 = vmatprep.subr.bf16.mxu0 %v18961_v15  ;;  %v79_v59 = vld [vmem:[%s28310_s0 + $0x118] sm:$0xff]  ;;  %v80_v60 = vld [vmem:[%s28310_s0 + $0x120] sm:$0xff]  ;;  %v81_v61 = vld [vmem:[%s28310_s0 + $0x128] sm:$0xff] }
  0x13   :  { %v82_v62 = vld [vmem:[%s28310_s0 + $0x130] sm:$0xff]  ;;  %v83_v63 = vld [vmem:[%s28310_s0 + $0x138] sm:$0xff]  ;;  %v84_v0 = vld [vmem:[%s28310_s0 + $0x140] sm:$0xff] }
  0x14   :  { %v85_v1 = vld [vmem:[%s28310_s0 + $0x148] sm:$0xff]  ;;  %v86_v2 = vld [vmem:[%s28310_s0 + $0x150] sm:$0xff]  ;;  %v87_v3 = vld [vmem:[%s28310_s0 + $0x158] sm:$0xff] }
  0x15   :  { %18964 = vmatpush3.bf16.msra.mxu0 %v18961_v15  ;;  %v88_v4 = vld [vmem:[%s28310_s0 + $0x160] sm:$0xff]  ;;  %v89_v5 = vld [vmem:[%s28310_s0 + $0x168] sm:$0xff]  ;;  %v90_v6 = vld [vmem:[%s28310_s0 + $0x170] sm:$0xff] }
  0x16   :  { %18966 = vmatprep.subr.bf16.mxu0 %v18965_v18  ;;  %v91_v7 = vld [vmem:[%s28310_s0 + $0x178] sm:$0xff]  ;;  %v92_v8 = vld [vmem:[%s28310_s0 + $0x180] sm:$0xff]  ;;  %v93_v9 = vld [vmem:[%s28310_s0 + $0x188] sm:$0xff] }
  0x17   :  { %v94_v10 = vld [vmem:[%s28310_s0 + $0x190] sm:$0xff]  ;;  %v95_v11 = vld [vmem:[%s28310_s0 + $0x198] sm:$0xff]  ;;  %v96_v12 = vld [vmem:[%s28310_s0 + $0x1a0] sm:$0xff] }
  0x18   :  { %v97_v13 = vld [vmem:[%s28310_s0 + $0x1a8] sm:$0xff]  ;;  %v98_v14 = vld [vmem:[%s28310_s0 + $0x1b0] sm:$0xff]  ;;  %v99_v15 = vld [vmem:[%s28310_s0 + $0x1b8] sm:$0xff] }
  0x19   :  { %18968 = vmatpush3.bf16.msra.mxu0 %v18965_v18  ;;  %v100_v16 = vld [vmem:[%s28310_s0 + $0x1c0] sm:$0xff]  ;;  %v101_v17 = vld [vmem:[%s28310_s0 + $0x1c8] sm:$0xff]  ;;  %v102_v18 = vld [vmem:[%s28310_s0 + $0x1d0] sm:$0xff] }
  0x1a   :  { %18970 = vmatprep.subr.bf16.mxu0 %v18969_v21  ;;  %v103_v19 = vld [vmem:[%s28310_s0 + $0x1d8] sm:$0xff]  ;;  %v104_v20 = vld [vmem:[%s28310_s0 + $0x1e0] sm:$0xff]  ;;  %v106_v22 = vld [vmem:[%s28310_s0 + $0x1f0] sm:$0xff] }
  0x1b   :  { %v107_v23 = vld [vmem:[%s28310_s0 + $0x1f8] sm:$0xff] }
  0x1d   :  { %18972 = vmatpush3.bf16.msra.mxu0 %v18969_v21  ;;  %v105_v21 = vld [vmem:[%s28310_s0 + $0x1e8] sm:$0xff] }
  0x1e   :  { %18974 = vmatprep.subr.bf16.mxu0 %v18973_v24 }
  0x21   :  { %18976 = vmatpush3.bf16.msra.mxu0 %v18973_v24  ;;  %v108_v24 = vld [vmem:[%s28310_s0 + $0x200] sm:$0xff] }
  0x24   :  { %16037 = vmatmul.mubr.f32.vlgmr.msra.gmra.mrb[0].mxu0 %v45_v25  ;;  %v109_v25 = vld [vmem:[%s28310_s0 + $0x208] sm:$0xff] }
  0x25   :  { %16039 = vmatprep.mubr.f32.mxu0 %v46_v26  ;;  %v110_v26 = vld [vmem:[%s28310_s0 + $0x210] sm:$0xff] }
  0x28   :  { %16040 = vmatmul.mubr.f32.gmra.mrb[2].mxu0 %v47_v27  ;;  %v111_v27 = vld [vmem:[%s28310_s0 + $0x218] sm:$0xff] }
  0x29   :  { %16042 = vmatprep.mubr.f32.mxu0 %v48_v28  ;;  %v112_v28 = vld [vmem:[%s28310_s0 + $0x220] sm:$0xff] }
  0x2c   :  { %16043 = vmatmul.mubr.f32.gmra.mrb[4].mxu0 %v49_v29  ;;  %v113_v29 = vld [vmem:[%s28310_s0 + $0x228] sm:$0xff] }
  0x2d   :  { %16045 = vmatprep.mubr.f32.mxu0 %v50_v30  ;;  %v114_v30 = vld [vmem:[%s28310_s0 + $0x230] sm:$0xff] }
  0x30   :  { %16046 = vmatmul.mubr.f32.gmra.mrb[6].mxu0 %v51_v31  ;;  %v115_v31 = vld [vmem:[%s28310_s0 + $0x238] sm:$0xff] }
  0x31   :  { %16048 = vmatprep.mubr.f32.mxu0 %v52_v32  ;;  %v116_v32 = vld [vmem:[%s28310_s0 + $0x240] sm:$0xff] }
  0x34   :  { %16049 = vmatmul.mubr.f32.gmra.mrb[8].mxu0 %v53_v33  ;;  %v117_v33 = vld [vmem:[%s28310_s0 + $0x248] sm:$0xff] }
  0x35   :  { %16051 = vmatprep.mubr.f32.mxu0 %v54_v34  ;;  %v118_v34 = vld [vmem:[%s28310_s0 + $0x250] sm:$0xff] }
  0x38   :  { %16052 = vmatmul.mubr.f32.gmra.mrb[10].mxu0 %v55_v35  ;;  %v119_v35 = vld [vmem:[%s28310_s0 + $0x258] sm:$0xff] }
  0x39   :  { %16054 = vmatprep.mubr.f32.mxu0 %v56_v36  ;;  %v120_v36 = vld [vmem:[%s28310_s0 + $0x260] sm:$0xff] }
  0x3c   :  { %16055 = vmatmul.mubr.f32.gmra.mrb[12].mxu0 %v57_v37  ;;  %v121_v37 = vld [vmem:[%s28310_s0 + $0x268] sm:$0xff] }
  0x3d   :  { %16057 = vmatprep.mubr.f32.mxu0 %v58_v38  ;;  %v122_v38 = vld [vmem:[%s28310_s0 + $0x270] sm:$0xff] }
  0x40   :  { %16058 = vmatmul.mubr.f32.gmra.mrb[14].mxu0 %v59_v39  ;;  %v123_v39 = vld [vmem:[%s28310_s0 + $0x278] sm:$0xff] }
  0x41   :  { %16060 = vmatprep.mubr.f32.mxu0 %v60_v40  ;;  %v124_v40 = vld [vmem:[%s28310_s0 + $0x280] sm:$0xff] }
  0x44   :  { %16061 = vmatmul.mubr.f32.gmra.mrb[16].mxu0 %v61_v41  ;;  %v125_v41 = vld [vmem:[%s28310_s0 + $0x288] sm:$0xff] }
  0x45   :  { %16063 = vmatprep.mubr.f32.mxu0 %v62_v42  ;;  %v126_v42 = vld [vmem:[%s28310_s0 + $0x290] sm:$0xff] }
  0x48   :  { %16064 = vmatmul.mubr.f32.gmra.mrb[18].mxu0 %v63_v43  ;;  %v127_v43 = vld [vmem:[%s28310_s0 + $0x298] sm:$0xff] }
  0x49   :  { %16066 = vmatprep.mubr.f32.mxu0 %v64_v44  ;;  %v128_v44 = vld [vmem:[%s28310_s0 + $0x2a0] sm:$0xff] }
  0x4c   :  { %16067 = vmatmul.mubr.f32.gmra.mrb[20].mxu0 %v65_v45  ;;  %v129_v45 = vld [vmem:[%s28310_s0 + $0x2a8] sm:$0xff] }
  0x4d   :  { %16069 = vmatprep.mubr.f32.mxu0 %v66_v46  ;;  %v130_v46 = vld [vmem:[%s28310_s0 + $0x2b0] sm:$0xff] }
  0x50   :  { %16070 = vmatmul.mubr.f32.gmra.mrb[22].mxu0 %v67_v47  ;;  %v131_v47 = vld [vmem:[%s28310_s0 + $0x2b8] sm:$0xff] }
  0x51   :  { %16072 = vmatprep.mubr.f32.mxu0 %v68_v48  ;;  %v132_v48 = vld [vmem:[%s28310_s0 + $0x2c0] sm:$0xff] }
  0x54   :  { %16073 = vmatmul.mubr.f32.gmra.mrb[24].mxu0 %v69_v49  ;;  %v133_v49 = vld [vmem:[%s28310_s0 + $0x2c8] sm:$0xff] }
  0x55   :  { %16075 = vmatprep.mubr.f32.mxu0 %v70_v50  ;;  %v134_v50 = vld [vmem:[%s28310_s0 + $0x2d0] sm:$0xff] }
  0x58   :  { %16076 = vmatmul.mubr.f32.gmra.mrb[26].mxu0 %v71_v51  ;;  %v135_v51 = vld [vmem:[%s28310_s0 + $0x2d8] sm:$0xff] }
  0x59   :  { %16078 = vmatprep.mubr.f32.mxu0 %v72_v52  ;;  %v136_v52 = vld [vmem:[%s28310_s0 + $0x2e0] sm:$0xff] }
  0x5c   :  { %16079 = vmatmul.mubr.f32.gmra.mrb[28].mxu0 %v73_v53  ;;  %v137_v53 = vld [vmem:[%s28310_s0 + $0x2e8] sm:$0xff] }
  0x5d   :  { %16081 = vmatprep.mubr.f32.mxu0 %v74_v54  ;;  %v138_v54 = vld [vmem:[%s28310_s0 + $0x2f0] sm:$0xff] }
  0x60   :  { %16082 = vmatmul.mubr.f32.gmra.mrb[30].mxu0 %v75_v55  ;;  %v139_v55 = vld [vmem:[%s28310_s0 + $0x2f8] sm:$0xff] }
  0x61   :  { %16084 = vmatprep.mubr.f32.mxu0 %v76_v56  ;;  %v140_v56 = vld [vmem:[%s28310_s0 + $0x300] sm:$0xff] }
  0x64   :  { %16085 = vmatmul.mubr.f32.gmra.mrb[32].mxu0 %v77_v57  ;;  %v141_v57 = vld [vmem:[%s28310_s0 + $0x308] sm:$0xff] }
  0x65   :  { %16087 = vmatprep.mubr.f32.mxu0 %v78_v58  ;;  %v142_v58 = vld [vmem:[%s28310_s0 + $0x310] sm:$0xff] }
  0x68   :  { %16088 = vmatmul.mubr.f32.gmra.mrb[34].mxu0 %v79_v59  ;;  %v143_v59 = vld [vmem:[%s28310_s0 + $0x318] sm:$0xff] }
  0x69   :  { %16090 = vmatprep.mubr.f32.mxu0 %v80_v60  ;;  %v144_v60 = vld [vmem:[%s28310_s0 + $0x320] sm:$0xff] }
  0x6c   :  { %16091 = vmatmul.mubr.f32.gmra.mrb[36].mxu0 %v81_v61  ;;  %v145_v61 = vld [vmem:[%s28310_s0 + $0x328] sm:$0xff] }
  0x6d   :  { %16093 = vmatprep.mubr.f32.mxu0 %v82_v62  ;;  %v146_v62 = vld [vmem:[%s28310_s0 + $0x330] sm:$0xff] }
  0x70   :  { %16094 = vmatmul.mubr.f32.gmra.mrb[38].mxu0 %v83_v63  ;;  %v147_v63 = vld [vmem:[%s28310_s0 + $0x338] sm:$0xff] }
  0x71   :  { %16096 = vmatprep.mubr.f32.mxu0 %v84_v0  ;;  %v148_v0 = vld [vmem:[%s28310_s0 + $0x340] sm:$0xff] }
  0x74   :  { %16097 = vmatmul.mubr.f32.gmra.mrb[40].mxu0 %v85_v1  ;;  %v149_v1 = vld [vmem:[%s28310_s0 + $0x348] sm:$0xff] }
  0x75   :  { %16099 = vmatprep.mubr.f32.mxu0 %v86_v2  ;;  %v150_v2 = vld [vmem:[%s28310_s0 + $0x350] sm:$0xff] }
  0x78   :  { %16100 = vmatmul.mubr.f32.gmra.mrb[42].mxu0 %v87_v3  ;;  %v151_v3 = vld [vmem:[%s28310_s0 + $0x358] sm:$0xff] }
  0x79   :  { %16102 = vmatprep.mubr.f32.mxu0 %v88_v4  ;;  %v152_v4 = vld [vmem:[%s28310_s0 + $0x360] sm:$0xff] }
  0x7c   :  { %16103 = vmatmul.mubr.f32.gmra.mrb[44].mxu0 %v89_v5 }
  0x7d   :  { %16105 = vmatprep.mubr.f32.mxu0 %v90_v6 }
  0x80   :  { %16106 = vmatmul.mubr.f32.gmra.mrb[46].mxu0 %v91_v7  ;;  %v153_v7 = vld [vmem:[%s28310_s0 + $0x368] sm:$0xff] }
  0x81   :  { %16108 = vmatprep.mubr.f32.mxu0 %v92_v8  ;;  %v154_v8 = vld [vmem:[%s28310_s0 + $0x370] sm:$0xff] }
  0x84   :  { %16109 = vmatmul.mubr.f32.gmra.mrb[48].mxu0 %v93_v9 }
  0x85   :  { %16111 = vmatprep.mubr.f32.mxu0 %v94_v10 }
  0x88   :  { %16112 = vmatmul.mubr.f32.gmra.mrb[50].mxu0 %v95_v11  ;;  %v155_v11 = vld [vmem:[%s28310_s0 + $0x378] sm:$0xff] }
  0x89   :  { %16114 = vmatprep.mubr.f32.mxu0 %v96_v12  ;;  %v156_v12 = vld [vmem:[%s28310_s0 + $0x380] sm:$0xff] }
  0x8c   :  { %16115 = vmatmul.mubr.f32.gmra.mrb[52].mxu0 %v97_v13 }
  0x8d   :  { %16117 = vmatprep.mubr.f32.mxu0 %v98_v14 }
  0x90   :  { %16118 = vmatmul.mubr.f32.gmra.mrb[54].mxu0 %v99_v15  ;;  %v157_v15 = vld [vmem:[%s28310_s0 + $0x388] sm:$0xff] }
  0x91   :  { %16120 = vmatprep.mubr.f32.mxu0 %v100_v16  ;;  %v158_v16 = vld [vmem:[%s28310_s0 + $0x390] sm:$0xff] }
  0x94   :  { %16121 = vmatmul.mubr.f32.gmra.mrb[56].mxu0 %v101_v17 }
  0x95   :  { %16123 = vmatprep.mubr.f32.mxu0 %v102_v18 }
  0x98   :  { %16124 = vmatmul.mubr.f32.gmra.mrb[58].mxu0 %v103_v19  ;;  %v159_v19 = vld [vmem:[%s28310_s0 + $0x398] sm:$0xff] }
  0x99   :  { %16126 = vmatprep.mubr.f32.mxu0 %v104_v20  ;;  %v160_v20 = vld [vmem:[%s28310_s0 + $0x3a0] sm:$0xff] }
  0x9c   :  { %16127 = vmatmul.mubr.f32.gmra.mrb[60].mxu0 %v105_v21 }
  0x9d   :  { %16129 = vmatprep.mubr.f32.mxu0 %v106_v22 }
  0xa0   :  { %16130 = vmatmul.mubr.f32.gmra.mrb[62].mxu0 %v107_v23  ;;  %v161_v23 = vld [vmem:[%s28310_s0 + $0x3a8] sm:$0xff] }
  0xa1   :  { %16132 = vmatprep.mubr.f32.mxu0 %v108_v24  ;;  %v162_v24 = vld [vmem:[%s28310_s0 + $0x3b0] sm:$0xff] }
  0xa4   :  { %16133 = vmatmul.mubr.f32.gmra.mrb[64].mxu0 %v109_v25 }
  0xa5   :  { %16135 = vmatprep.mubr.f32.mxu0 %v110_v26 }
  0xa8   :  { %16136 = vmatmul.mubr.f32.gmra.mrb[66].mxu0 %v111_v27  ;;  %v163_v27 = vld [vmem:[%s28310_s0 + $0x3b8] sm:$0xff] }
  0xa9   :  { %16138 = vmatprep.mubr.f32.mxu0 %v112_v28  ;;  %v164_v28 = vld [vmem:[%s28310_s0 + $0x3c0] sm:$0xff] }
  0xac   :  { %16139 = vmatmul.mubr.f32.gmra.mrb[68].mxu0 %v113_v29 }
  0xad   :  { %16141 = vmatprep.mubr.f32.mxu0 %v114_v30 }
  0xb0   :  { %16142 = vmatmul.mubr.f32.gmra.mrb[70].mxu0 %v115_v31  ;;  %v165_v31 = vld [vmem:[%s28310_s0 + $0x3c8] sm:$0xff] }
  0xb1   :  { %16144 = vmatprep.mubr.f32.mxu0 %v116_v32  ;;  %v166_v32 = vld [vmem:[%s28310_s0 + $0x3d0] sm:$0xff] }
  0xb4   :  { %16145 = vmatmul.mubr.f32.gmra.mrb[72].mxu0 %v117_v33 }
  0xb5   :  { %16147 = vmatprep.mubr.f32.mxu0 %v118_v34 }
  0xb8   :  { %16148 = vmatmul.mubr.f32.gmra.mrb[74].mxu0 %v119_v35  ;;  %v167_v35 = vld [vmem:[%s28310_s0 + $0x3d8] sm:$0xff] }
  0xb9   :  { %16150 = vmatprep.mubr.f32.mxu0 %v120_v36  ;;  %v168_v36 = vld [vmem:[%s28310_s0 + $0x3e0] sm:$0xff] }
  0xbc   :  { %16151 = vmatmul.mubr.f32.gmra.mrb[76].mxu0 %v121_v37 }
  0xbd   :  { %16153 = vmatprep.mubr.f32.mxu0 %v122_v38 }
  0xc0   :  { %16154 = vmatmul.mubr.f32.gmra.mrb[78].mxu0 %v123_v39  ;;  %v169_v39 = vld [vmem:[%s28310_s0 + $0x3e8] sm:$0xff] }
  0xc1   :  { %16156 = vmatprep.mubr.f32.mxu0 %v124_v40  ;;  %v170_v40 = vld [vmem:[%s28310_s0 + $0x3f0] sm:$0xff] }
  0xc4   :  { %16157 = vmatmul.mubr.f32.gmra.mrb[80].mxu0 %v125_v41 }
  0xc5   :  { %16159 = vmatprep.mubr.f32.mxu0 %v126_v42 }
  0xc8   :  { %16160 = vmatmul.mubr.f32.gmra.mrb[82].mxu0 %v127_v43  ;;  %v171_v43 = vld [vmem:[%s28310_s0 + $0x3f8] sm:$0xff] }
  0xc9   :  { %16162 = vmatprep.mubr.f32.mxu0 %v128_v44  ;;  %v172_v44 = vld [vmem:[%s28310_s0 + $0x400] sm:$0xff] }
  0xcc   :  { %16163 = vmatmul.mubr.f32.gmra.mrb[84].mxu0 %v129_v45 }
  0xcd   :  { %16165 = vmatprep.mubr.f32.mxu0 %v130_v46 }
  0xd0   :  { %16166 = vmatmul.mubr.f32.gmra.mrb[86].mxu0 %v131_v47  ;;  %v173_v47 = vld [vmem:[%s28310_s0 + $0x408] sm:$0xff] }
  0xd1   :  { %16168 = vmatprep.mubr.f32.mxu0 %v132_v48  ;;  %v174_v48 = vld [vmem:[%s28310_s0 + $0x410] sm:$0xff] }
  0xd4   :  { %16169 = vmatmul.mubr.f32.gmra.mrb[88].mxu0 %v133_v49 }
  0xd5   :  { %16171 = vmatprep.mubr.f32.mxu0 %v134_v50 }
  0xd8   :  { %16172 = vmatmul.mubr.f32.gmra.mrb[90].mxu0 %v135_v51  ;;  %v175_v51 = vld [vmem:[%s28310_s0 + $0x418] sm:$0xff] }
  0xd9   :  { %16174 = vmatprep.mubr.f32.mxu0 %v136_v52  ;;  %v176_v52 = vld [vmem:[%s28310_s0 + $0x420] sm:$0xff] }
  0xdc   :  { %16175 = vmatmul.mubr.f32.gmra.mrb[92].mxu0 %v137_v53 }
  0xdd   :  { %16177 = vmatprep.mubr.f32.mxu0 %v138_v54 }
  0xe0   :  { %16178 = vmatmul.mubr.f32.gmra.mrb[94].mxu0 %v139_v55  ;;  %v177_v55 = vld [vmem:[%s28310_s0 + $0x428] sm:$0xff] }
  0xe1   :  { %16180 = vmatprep.mubr.f32.mxu0 %v140_v56  ;;  %v178_v56 = vld [vmem:[%s28310_s0 + $0x430] sm:$0xff] }
  0xe4   :  { %16181 = vmatmul.mubr.f32.gmra.mrb[96].mxu0 %v141_v57 }
  0xe5   :  { %16183 = vmatprep.mubr.f32.mxu0 %v142_v58 }
  0xe8   :  { %16184 = vmatmul.mubr.f32.gmra.mrb[98].mxu0 %v143_v59  ;;  %v179_v59 = vld [vmem:[%s28310_s0 + $0x438] sm:$0xff] }
  0xe9   :  { %16186 = vmatprep.mubr.f32.mxu0 %v144_v60  ;;  %v180_v60 = vld [vmem:[%s28310_s0 + $0x440] sm:$0xff] }
  0xec   :  { %16187 = vmatmul.mubr.f32.gmra.mrb[100].mxu0 %v145_v61 }
  0xed   :  { %16189 = vmatprep.mubr.f32.mxu0 %v146_v62 }
  0xf0   :  { %16190 = vmatmul.mubr.f32.gmra.mrb[102].mxu0 %v147_v63  ;;  %v181_v63 = vld [vmem:[%s28310_s0 + $0x448] sm:$0xff] }
  0xf1   :  { %16192 = vmatprep.mubr.f32.mxu0 %v148_v0  ;;  %v182_v0 = vld [vmem:[%s28310_s0 + $0x450] sm:$0xff] }
  0xf4   :  { %16193 = vmatmul.mubr.f32.gmra.mrb[104].mxu0 %v149_v1 }
  0xf5   :  { %16195 = vmatprep.mubr.f32.mxu0 %v150_v2 }
  0xf7   :  { %v21750_v5 = vpop.f32.mrb[0].mxu0 }
  0xf8   :  { %v21752_v6 = vpop.f32.mrb[1].mxu0  ;;  %16196 = vmatmul.mubr.f32.gmra.mrb[106].mxu0 %v151_v3  ;;  %v183_v3 = vld [vmem:[%s28310_s0 + $0x458] sm:$0xff] }
  0xf9   :  { %16198 = vmatprep.mubr.f32.mxu0 %v152_v4  ;;  %v184_v4 = vld [vmem:[%s28310_s0 + $0x460] sm:$0xff] }
  0xfb   :  { %v21760_v9 = vpop.f32.mrb[2].mxu0 }
  0xfc   :  { %v21762_v10 = vpop.f32.mrb[3].mxu0  ;;  %16199 = vmatmul.mubr.f32.gmra.mrb[108].mxu0 %v153_v7 }
  0xfd   :  { %16201 = vmatprep.mubr.f32.mxu0 %v154_v8 }
  0xff   :  { %v21770_v13 = vpop.f32.mrb[4].mxu0 }
 0x100   :  { %v21772_v14 = vpop.f32.mrb[5].mxu0  ;;  %16202 = vmatmul.mubr.f32.gmra.mrb[110].mxu0 %v155_v11  ;;  %v185_v11 = vld [vmem:[%s28310_s0 + $0x468] sm:$0xff] }
 0x101   :  { %16204 = vmatprep.mubr.f32.mxu0 %v156_v12  ;;  %v186_v12 = vld [vmem:[%s28310_s0 + $0x470] sm:$0xff] }
 0x103   :  { %v21780_v17 = vpop.f32.mrb[6].mxu0 }
 0x104   :  { %v21782_v18 = vpop.f32.mrb[7].mxu0  ;;  %16205 = vmatmul.mubr.f32.gmra.mrb[112].mxu0 %v157_v15 }
 0x105   :  { %16207 = vmatprep.mubr.f32.mxu0 %v158_v16 }
 0x107   :  { %v21790_v21 = vpop.f32.mrb[8].mxu0 }
 0x108   :  { %v21792_v22 = vpop.f32.mrb[9].mxu0  ;;  %16208 = vmatmul.mubr.f32.gmra.mrb[114].mxu0 %v159_v19  ;;  %v187_v19 = vld [vmem:[%s28310_s0 + $0x478] sm:$0xff] }
 0x109   :  { %16210 = vmatprep.mubr.f32.mxu0 %v160_v20  ;;  %v188_v20 = vld [vmem:[%s28310_s0 + $0x480] sm:$0xff] }
 0x10b   :  { %v21800_v25 = vpop.f32.mrb[10].mxu0 }
 0x10c   :  { %v21802_v26 = vpop.f32.mrb[11].mxu0  ;;  %16211 = vmatmul.mubr.f32.gmra.mrb[116].mxu0 %v161_v23 }
 0x10d   :  { %16213 = vmatprep.mubr.f32.mxu0 %v162_v24 }
 0x10f   :  { %v21810_v29 = vpop.f32.mrb[12].mxu0 }
 0x110   :  { %v21812_v30 = vpop.f32.mrb[13].mxu0  ;;  %16214 = vmatmul.mubr.f32.gmra.mrb[118].mxu0 %v163_v27  ;;  %v189_v27 = vld [vmem:[%s28310_s0 + $0x488] sm:$0xff] }
 0x111   :  { %16216 = vmatprep.mubr.f32.mxu0 %v164_v28  ;;  %v190_v28 = vld [vmem:[%s28310_s0 + $0x490] sm:$0xff] }
 0x113   :  { %v21820_v33 = vpop.f32.mrb[14].mxu0 }
 0x114   :  { %v21822_v34 = vpop.f32.mrb[15].mxu0  ;;  %16217 = vmatmul.mubr.f32.gmra.mrb[120].mxu0 %v165_v31 }
 0x115   :  { %16219 = vmatprep.mubr.f32.mxu0 %v166_v32 }
 0x117   :  { %v21830_v37 = vpop.f32.mrb[16].mxu0 }
 0x118   :  { %v21832_v38 = vpop.f32.mrb[17].mxu0  ;;  %16220 = vmatmul.mubr.f32.gmra.mrb[122].mxu0 %v167_v35  ;;  %v191_v35 = vld [vmem:[%s28310_s0 + $0x498] sm:$0xff] }
 0x119   :  { %16222 = vmatprep.mubr.f32.mxu0 %v168_v36  ;;  %v192_v36 = vld [vmem:[%s28310_s0 + $0x4a0] sm:$0xff] }
 0x11b   :  { %v21840_v41 = vpop.f32.mrb[18].mxu0 }
 0x11c   :  { %v21842_v42 = vpop.f32.mrb[19].mxu0  ;;  %16223 = vmatmul.mubr.f32.gmra.mrb[124].mxu0 %v169_v39 }
 0x11d   :  { %16225 = vmatprep.mubr.f32.mxu0 %v170_v40 }
 0x11f   :  { %v21850_v45 = vpop.f32.mrb[20].mxu0 }
 0x120   :  { %v21852_v46 = vpop.f32.mrb[21].mxu0  ;;  %16226 = vmatmul.mubr.f32.gmra.mrb[126].mxu0 %v171_v43  ;;  %v193_v43 = vld [vmem:[%s28310_s0 + $0x4a8] sm:$0xff] }
 0x121   :  { %16228 = vmatprep.mubr.f32.mxu0 %v172_v44  ;;  %v194_v44 = vld [vmem:[%s28310_s0 + $0x4b0] sm:$0xff] }
 0x123   :  { %v21860_v49 = vpop.f32.mrb[22].mxu0 }
 0x124   :  { %v21862_v50 = vpop.f32.mrb[23].mxu0  ;;  %16229 = vmatmul.mubr.f32.gmra.mrb[128].mxu0 %v173_v47 }
 0x125   :  { %16231 = vmatprep.mubr.f32.mxu0 %v174_v48 }
 0x127   :  { %v21870_v53 = vpop.f32.mrb[24].mxu0 }
 0x128   :  { %v21872_v54 = vpop.f32.mrb[25].mxu0  ;;  %16232 = vmatmul.mubr.f32.gmra.mrb[130].mxu0 %v175_v51  ;;  %v195_v51 = vld [vmem:[%s28310_s0 + $0x4b8] sm:$0xff] }
 0x129   :  { %16234 = vmatprep.mubr.f32.mxu0 %v176_v52  ;;  %v196_v52 = vld [vmem:[%s28310_s0 + $0x4c0] sm:$0xff] }
 0x12b   :  { %v21880_v57 = vpop.f32.mrb[26].mxu0 }
 0x12c   :  { %v21882_v58 = vpop.f32.mrb[27].mxu0  ;;  %16235 = vmatmul.mubr.f32.gmra.mrb[132].mxu0 %v177_v55 }
 0x12d   :  { %16237 = vmatprep.mubr.f32.mxu0 %v178_v56 }
 0x12f   :  { %v21890_v61 = vpop.f32.mrb[28].mxu0 }
 0x130   :  { %v21892_v62 = vpop.f32.mrb[29].mxu0  ;;  %16238 = vmatmul.mubr.f32.gmra.mrb[134].mxu0 %v179_v59  ;;  %v197_v59 = vld [vmem:[%s28310_s0 + $0x4c8] sm:$0xff] }
 0x131   :  { %16240 = vmatprep.mubr.f32.mxu0 %v180_v60  ;;  %v198_v60 = vld [vmem:[%s28310_s0 + $0x4d0] sm:$0xff] }
 0x133   :  { %v21900_v1 = vpop.f32.mrb[30].mxu0 }
 0x134   :  { %v21902_v2 = vpop.f32.mrb[31].mxu0  ;;  %16241 = vmatmul.mubr.f32.gmra.mrb[136].mxu0 %v181_v63 }
 0x135   :  { %16243 = vmatprep.mubr.f32.mxu0 %v182_v0 }
 0x137   :  { %v21910_v7 = vpop.f32.mrb[32].mxu0 }
 0x138   :  { %v21912_v8 = vpop.f32.mrb[33].mxu0  ;;  %16244 = vmatmul.mubr.f32.gmra.mrb[138].mxu0 %v183_v3  ;;  %v199_v3 = vld [vmem:[%s28310_s0 + $0x4d8] sm:$0xff] }
 0x139   :  { %16246 = vmatprep.mubr.f32.mxu0 %v184_v4  ;;  %v200_v4 = vld [vmem:[%s28310_s0 + $0x4e0] sm:$0xff] }
 0x13b   :  { %v21920_v15 = vpop.f32.mrb[34].mxu0 }
 0x13c   :  { %v21922_v16 = vpop.f32.mrb[35].mxu0  ;;  %16247 = vmatmul.mubr.f32.gmra.mrb[140].mxu0 %v185_v11 }
 0x13d   :  { %16249 = vmatprep.mubr.f32.mxu0 %v186_v12 }
 0x13f   :  { %v21930_v23 = vpop.f32.mrb[36].mxu0 }
 0x140   :  { %v21932_v24 = vpop.f32.mrb[37].mxu0  ;;  %16250 = vmatmul.mubr.f32.gmra.mrb[142].mxu0 %v187_v19  ;;  %v201_v19 = vld [vmem:[%s28310_s0 + $0x4e8] sm:$0xff] }
 0x141   :  { %16252 = vmatprep.mubr.f32.mxu0 %v188_v20  ;;  %v202_v20 = vld [vmem:[%s28310_s0 + $0x4f0] sm:$0xff] }
 0x143   :  { %v21940_v31 = vpop.f32.mrb[38].mxu0 }
 0x144   :  { %v21942_v32 = vpop.f32.mrb[39].mxu0  ;;  %16253 = vmatmul.mubr.f32.gmra.mrb[144].mxu0 %v189_v27 }
 0x145   :  { %16255 = vmatprep.mubr.f32.mxu0 %v190_v28 }
 0x147   :  { %v21950_v39 = vpop.f32.mrb[40].mxu0 }
 0x148   :  { %v21952_v40 = vpop.f32.mrb[41].mxu0  ;;  %16256 = vmatmul.mubr.f32.gmra.mrb[146].mxu0 %v191_v35  ;;  %v203_v35 = vld [vmem:[%s28310_s0 + $0x4f8] sm:$0xff] }
 0x149   :  { %16258 = vmatprep.mubr.f32.mxu0 %v192_v36  ;;  %v204_v36 = vld [vmem:[%s28310_s0 + $0x500] sm:$0xff] }
 0x14b   :  { %v21960_v47 = vpop.f32.mrb[42].mxu0 }
 0x14c   :  { %v21962_v48 = vpop.f32.mrb[43].mxu0  ;;  %16259 = vmatmul.mubr.f32.gmra.mrb[148].mxu0 %v193_v43 }
 0x14d   :  { %16261 = vmatprep.mubr.f32.mxu0 %v194_v44 }
 0x14f   :  { %v21970_v55 = vpop.f32.mrb[44].mxu0 }
 0x150   :  { %v21972_v56 = vpop.f32.mrb[45].mxu0  ;;  %16262 = vmatmul.mubr.f32.gmra.mrb[150].mxu0 %v195_v51  ;;  %v205_v51 = vld [vmem:[%s28310_s0 + $0x508] sm:$0xff] }
 0x151   :  { %16264 = vmatprep.mubr.f32.mxu0 %v196_v52  ;;  %v206_v52 = vld [vmem:[%s28310_s0 + $0x510] sm:$0xff] }
 0x153   :  { %v21980_v63 = vpop.f32.mrb[46].mxu0 }
 0x154   :  { %v21982_v0 = vpop.f32.mrb[47].mxu0  ;;  %16265 = vmatmul.mubr.f32.gmra.mrb[152].mxu0 %v197_v59 }
 0x155   :  { %16267 = vmatprep.mubr.f32.mxu0 %v198_v60 }
 0x157   :  { %v21990_v11 = vpop.f32.mrb[48].mxu0 }
 0x158   :  { %v21992_v12 = vpop.f32.mrb[49].mxu0  ;;  %16268 = vmatmul.mubr.f32.gmra.mrb[154].mxu0 %v199_v3  ;;  %v207_v3 = vld [vmem:[%s28310_s0 + $0x518] sm:$0xff] }
 0x159   :  { %28342 = vst [vmem:[#allocation3_spill] sm:$0xff] %v21992_v12  ;;  %16270 = vmatprep.mubr.f32.mxu0 %v200_v4  ;;  %v208_v4 = vld [vmem:[%s28310_s0 + $0x520] sm:$0xff] }
 0x15b   :  { %v22000_v27 = vpop.f32.mrb[50].mxu0 }
 0x15c   :  { %28343 = vst [vmem:[#allocation4_spill] sm:$0xff] %v22000_v27  ;;  %v22002_v28 = vpop.f32.mrb[51].mxu0  ;;  %16271 = vmatmul.mubr.f32.gmra.mrb[156].mxu0 %v201_v19 }
 0x15d   :  { %28344 = vst [vmem:[#allocation5_spill] sm:$0xff] %v22002_v28  ;;  %16273 = vmatprep.mubr.f32.mxu0 %v202_v20 }
 0x15f   :  { %v22010_v43 = vpop.f32.mrb[52].mxu0 }
 0x160   :  { %28345 = vst [vmem:[#allocation6_spill] sm:$0xff] %v22010_v43  ;;  %v22012_v44 = vpop.f32.mrb[53].mxu0  ;;  %16274 = vmatmul.mubr.f32.gmra.mrb[158].mxu0 %v203_v35  ;;  %v209_v35 = vld [vmem:[%s28310_s0 + $0x528] sm:$0xff] }
 0x161   :  { %28346 = vst [vmem:[#allocation7_spill] sm:$0xff] %v22012_v44  ;;  %16276 = vmatprep.mubr.f32.mxu0 %v204_v36  ;;  %v210_v36 = vld [vmem:[%s28310_s0 + $0x530] sm:$0xff] }
 0x163   :  { %v22020_v59 = vpop.f32.mrb[54].mxu0 }
 0x164   :  { %28347 = vst [vmem:[#allocation8_spill] sm:$0xff] %v22020_v59  ;;  %v22022_v60 = vpop.f32.mrb[55].mxu0  ;;  %16277 = vmatmul.mubr.f32.gmra.mrb[160].mxu0 %v205_v51 }
 0x165   :  { %28348 = vst [vmem:[#allocation9_spill] sm:$0xff] %v22022_v60  ;;  %16279 = vmatprep.mubr.f32.mxu0 %v206_v52 }
 0x167   :  { %v22030_v19 = vpop.f32.mrb[56].mxu0 }
 0x168   :  { %28349 = vst [vmem:[#allocation10_spill] sm:$0xff] %v22030_v19  ;;  %v22032_v20 = vpop.f32.mrb[57].mxu0  ;;  %16280 = vmatmul.mubr.f32.gmra.mrb[162].mxu0 %v207_v3  ;;  %v212_v3 = vld [vmem:[%s28310_s0 + $0x540] sm:$0xff] }
 0x169   :  { %28350 = vst [vmem:[#allocation11_spill] sm:$0xff] %v22032_v20  ;;  %16282 = vmatprep.mubr.f32.mxu0 %v208_v4  ;;  %v211_v20 = vld [vmem:[%s28310_s0 + $0x538] sm:$0xff] }
 0x16b   :  { %v22040_v51 = vpop.f32.mrb[58].mxu0 }
 0x16c   :  { %28351 = vst [vmem:[#allocation12_spill] sm:$0xff] %v22040_v51  ;;  %v22042_v52 = vpop.f32.mrb[59].mxu0  ;;  %16283 = vmatmul.mubr.f32.gmra.mrb[164].mxu0 %v209_v35  ;;  %v214_v35 = vld [vmem:[%s28310_s0 + $0x550] sm:$0xff] }
 0x16d   :  { %28352 = vst [vmem:[#allocation13_spill] sm:$0xff] %v22042_v52  ;;  %16285 = vmatprep.mubr.f32.mxu0 %v210_v36  ;;  %v213_v52 = vld [vmem:[%s28310_s0 + $0x548] sm:$0xff] }
 0x16f   :  { %v22050_v4 = vpop.f32.mrb[60].mxu0 }
 0x170   :  { %28353 = vst [vmem:[#allocation14_spill] sm:$0xff] %v22050_v4  ;;  %v22052_v19 = vpop.f32.mrb[61].mxu0  ;;  %16286 = vmatmul.mubr.f32.gmra.mrb[166].mxu0 %v211_v20  ;;  %v216_v20 = vld [vmem:[%s28310_s0 + $0x560] sm:$0xff] }
 0x171   :  { %28354 = vst [vmem:[#allocation15_spill] sm:$0xff] %v22052_v19  ;;  %16288 = vmatprep.mubr.f32.mxu0 %v212_v3  ;;  %v215_v19 = vld [vmem:[%s28310_s0 + $0x558] sm:$0xff] }
 0x173   :  { %v22060_v36 = vpop.f32.mrb[62].mxu0 }
 0x174   :  { %28355 = vst [vmem:[#allocation16_spill] sm:$0xff] %v22060_v36  ;;  %v22062_v51 = vpop.f32.mrb[63].mxu0  ;;  %16289 = vmatmul.mubr.f32.gmra.mrb[168].mxu0 %v213_v52  ;;  %v218_v52 = vld [vmem:[%s28310_s0 + $0x570] sm:$0xff] }
 0x175   :  { %28356 = vst [vmem:[#allocation17_spill] sm:$0xff] %v22062_v51  ;;  %16291 = vmatprep.mubr.f32.mxu0 %v214_v35  ;;  %v217_v51 = vld [vmem:[%s28310_s0 + $0x568] sm:$0xff] }
 0x177   :  { %v22070_v3 = vpop.f32.mrb[64].mxu0 }
 0x178   :  { %28357 = vst [vmem:[#allocation18_spill] sm:$0xff] %v22070_v3  ;;  %v22072_v4 = vpop.f32.mrb[65].mxu0  ;;  %16292 = vmatmul.mubr.f32.gmra.mrb[170].mxu0 %v215_v19  ;;  %v220_v19 = vld [vmem:[%s28310_s0 + $0x580] sm:$0xff] }
 0x179   :  { %28358 = vst [vmem:[#allocation19_spill] sm:$0xff] %v22072_v4  ;;  %16294 = vmatprep.mubr.f32.mxu0 %v216_v20  ;;  %v219_v4 = vld [vmem:[%s28310_s0 + $0x578] sm:$0xff] }
 0x17b   :  { %v22080_v35 = vpop.f32.mrb[66].mxu0 }
 0x17c   :  { %28359 = vst [vmem:[#allocation20_spill] sm:$0xff] %v22080_v35  ;;  %v22082_v36 = vpop.f32.mrb[67].mxu0  ;;  %16295 = vmatmul.mubr.f32.gmra.mrb[172].mxu0 %v217_v51  ;;  %v222_v51 = vld [vmem:[%s28310_s0 + $0x590] sm:$0xff] }
 0x17d   :  { %28360 = vst [vmem:[#allocation21_spill] sm:$0xff] %v22082_v36  ;;  %16297 = vmatprep.mubr.f32.mxu0 %v218_v52  ;;  %v221_v36 = vld [vmem:[%s28310_s0 + $0x588] sm:$0xff] }
 0x17f   :  { %v22090_v20 = vpop.f32.mrb[68].mxu0 }
 0x180   :  { %28361 = vst [vmem:[#allocation22_spill] sm:$0xff] %v22090_v20  ;;  %v22092_v3 = vpop.f32.mrb[69].mxu0  ;;  %16298 = vmatmul.mubr.f32.gmra.mrb[174].mxu0 %v219_v4  ;;  %v224_v4 = vld [vmem:[%s28310_s0 + $0x5a0] sm:$0xff] }
 0x181   :  { %28362 = vst [vmem:[#allocation23_spill] sm:$0xff] %v22092_v3  ;;  %16300 = vmatprep.mubr.f32.mxu0 %v220_v19  ;;  %v223_v3 = vld [vmem:[%s28310_s0 + $0x598] sm:$0xff] }
 0x183   :  { %v22100_v52 = vpop.f32.mrb[70].mxu0 }
 0x184   :  { %28363 = vst [vmem:[#allocation24_spill] sm:$0xff] %v22100_v52  ;;  %v22102_v35 = vpop.f32.mrb[71].mxu0  ;;  %16301 = vmatmul.mubr.f32.gmra.mrb[176].mxu0 %v221_v36  ;;  %v226_v36 = vld [vmem:[%s28310_s0 + $0x5b0] sm:$0xff] }
 0x185   :  { %28364 = vst [vmem:[#allocation25_spill] sm:$0xff] %v22102_v35  ;;  %16303 = vmatprep.mubr.f32.mxu0 %v222_v51  ;;  %v225_v35 = vld [vmem:[%s28310_s0 + $0x5a8] sm:$0xff] }
 0x187   :  { %v22110_v19 = vpop.f32.mrb[72].mxu0 }
 0x188   :  { %28365 = vst [vmem:[#allocation26_spill] sm:$0xff] %v22110_v19  ;;  %v22112_v20 = vpop.f32.mrb[73].mxu0  ;;  %16304 = vmatmul.mubr.f32.gmra.mrb[178].mxu0 %v223_v3  ;;  %v228_v3 = vld [vmem:[%s28310_s0 + $0x5c0] sm:$0xff] }
 0x189   :  { %28366 = vst [vmem:[#allocation27_spill] sm:$0xff] %v22112_v20  ;;  %16306 = vmatprep.mubr.f32.mxu0 %v224_v4  ;;  %v227_v20 = vld [vmem:[%s28310_s0 + $0x5b8] sm:$0xff] }
 0x18b   :  { %v22120_v51 = vpop.f32.mrb[74].mxu0 }
 0x18c   :  { %28367 = vst [vmem:[#allocation28_spill] sm:$0xff] %v22120_v51  ;;  %v22122_v52 = vpop.f32.mrb[75].mxu0  ;;  %16307 = vmatmul.mubr.f32.gmra.mrb[180].mxu0 %v225_v35  ;;  %v230_v35 = vld [vmem:[%s28310_s0 + $0x5d0] sm:$0xff] }
 0x18d   :  { %28368 = vst [vmem:[#allocation29_spill] sm:$0xff] %v22122_v52  ;;  %16309 = vmatprep.mubr.f32.mxu0 %v226_v36  ;;  %v229_v52 = vld [vmem:[%s28310_s0 + $0x5c8] sm:$0xff] }
 0x18f   :  { %v22130_v4 = vpop.f32.mrb[76].mxu0 }
 0x190   :  { %28369 = vst [vmem:[#allocation30_spill] sm:$0xff] %v22130_v4  ;;  %v22132_v19 = vpop.f32.mrb[77].mxu0  ;;  %16310 = vmatmul.mubr.f32.gmra.mrb[182].mxu0 %v227_v20  ;;  %v232_v20 = vld [vmem:[%s28310_s0 + $0x5e0] sm:$0xff] }
 0x191   :  { %28370 = vst [vmem:[#allocation31_spill] sm:$0xff] %v22132_v19  ;;  %16312 = vmatprep.mubr.f32.mxu0 %v228_v3  ;;  %v231_v19 = vld [vmem:[%s28310_s0 + $0x5d8] sm:$0xff] }
 0x193   :  { %v22140_v36 = vpop.f32.mrb[78].mxu0 }
 0x194   :  { %28371 = vst [vmem:[#allocation32_spill] sm:$0xff] %v22140_v36  ;;  %v22142_v51 = vpop.f32.mrb[79].mxu0  ;;  %16313 = vmatmul.mubr.f32.gmra.mrb[184].mxu0 %v229_v52  ;;  %v234_v52 = vld [vmem:[%s28310_s0 + $0x5f0] sm:$0xff] }
 0x195   :  { %28372 = vst [vmem:[#allocation33_spill] sm:$0xff] %v22142_v51  ;;  %16315 = vmatprep.mubr.f32.mxu0 %v230_v35  ;;  %v233_v51 = vld [vmem:[%s28310_s0 + $0x5e8] sm:$0xff]  ;;  %v22163_v35 = vld [vmem:[%s28311_s4] ss:$0 sm:$0xff] }
 0x196   :  { %v470_v60 = vadd.f32 %v22163_v35, %v21752_v6  ;;  %v485_v44 = vadd.f32 %v21760_v9, %v22163_v35  ;;  %v238_v6 = vld [vmem:[%s28310_s0 + $0x610] sm:$0xff]  ;;  %v239_v9 = vld [vmem:[%s28310_s0 + $0x618] sm:$0xff] }
 0x197   :  { %v22150_v3 = vpop.f32.mrb[80].mxu0 }
 0x198   :  { %28373 = vst [vmem:[#allocation34_spill] sm:$0xff] %v22150_v3  ;;  %v22152_v4 = vpop.f32.mrb[81].mxu0  ;;  %16316 = vmatmul.mubr.f32.gmra.mrb[186].mxu0 %v231_v19  ;;  %v235_v19 = vld [vmem:[%s28310_s0 + $0x5f8] sm:$0xff]  ;;  %v2148_v28 = vmax.f32 %v470_v60, 0.0 }
 0x199   :  { %28374 = vst [vmem:[#allocation35_spill] sm:$0xff] %v22152_v4  ;;  %16318 = vmatprep.mubr.f32.mxu0 %v232_v20  ;;  %v475_v20 = vadd.f32 %v21750_v5, %v22163_v35  ;;  %v236_v4 = vld [vmem:[%s28310_s0 + $0x600] sm:$0xff] }
 0x19b   :  { %v22165_v36 = vpop.f32.mrb[82].mxu0  ;;  %v2149_v5 = vmax.f32 %v475_v20, 0.0 }
 0x19c   :  { %28375 = vst [vmem:[#allocation36_spill] sm:$0xff] %v22165_v36  ;;  %v22167_v3 = vpop.f32.mrb[83].mxu0  ;;  %16319 = vmatmul.mubr.f32.gmra.mrb[188].mxu0 %v233_v51 }
 0x19d   :  { %28376 = vst [vmem:[#allocation37_spill] sm:$0xff] %v22167_v3  ;;  %16321 = vmatprep.mubr.f32.mxu0 %v234_v52  ;;  %v237_v52 = vld [vmem:[%s28310_s0 + $0x608] sm:$0xff] }
 0x19f   :  { %v16164_v59 = vpop.f32.mrb[84].mxu0 }
 0x1a0   :  { %v889_v36 = vpop.f32.mrb[85].mxu0  ;;  %16322 = vmatmul.mubr.f32.gmra.mrb[190].mxu0 %v235_v19  ;;  %v895_v51 = vadd.f32 %v16164_v59, %v22163_v35  ;;  %v480_v59 = vadd.f32 %v22163_v35, %v21762_v10  ;;  %v495_v10 = vadd.f32 %v21770_v13, %v22163_v35  ;;  %v241_v13 = vld [vmem:[%s28310_s0 + $0x628] sm:$0xff] }
 0x1a1   :  { %16324 = vmatprep.mubr.f32.mxu0 %v236_v4  ;;  %v890_v3 = vadd.f32 %v22163_v35, %v889_v36 }
 0x1a2   :  { %v2233_v43 = vmax.f32 %v895_v51, 0.0  ;;  %v2151_v51 = vmax.f32 %v485_v44, 0.0 }
 0x1a3   :  { %v16167_v4 = vpop.f32.mrb[86].mxu0  ;;  %v2232_v19 = vmax.f32 %v890_v3, 0.0 }
 0x1a4   :  { %v899_v27 = vpop.f32.mrb[87].mxu0  ;;  %16325 = vmatmul.mubr.f32.gmra.mrb[192].mxu0 %v237_v52  ;;  %v22191_v12 = vmax.f32 %v2149_v5, %v2233_v43  ;;  %v905_v36 = vadd.f32 %v16167_v4, %v22163_v35  ;;  %v240_v43 = vld [vmem:[%s28310_s0 + $0x620] sm:$0xff]  ;;  %v2150_v52 = vmax.f32 %v480_v59, 0.0  ;;  %v490_v5 = vadd.f32 %v22163_v35, %v21772_v14 }
 0x1a5   :  { %16327 = vmatprep.mubr.f32.mxu0 %v238_v6  ;;  %v22197_v20 = vmax.f32 %v2148_v28, %v2232_v19  ;;  %v900_v60 = vadd.f32 %v22163_v35, %v899_v27  ;;  %v2153_v19 = vmax.f32 %v495_v10, 0.0  ;;  %v505_v14 = vadd.f32 %v21780_v17, %v22163_v35  ;;  %v243_v17 = vld [vmem:[%s28310_s0 + $0x638] sm:$0xff] }
 0x1a6   :  { %28377 = vst [vmem:[#allocation38_spill] sm:$0xff] %v22191_v12  ;;  %v2235_v3 = vmax.f32 %v905_v36, 0.0  ;;  %v242_v36 = vld [vmem:[%s28310_s0 + $0x630] sm:$0xff] }
 0x1a7   :  { %v16170_v6 = vpop.f32.mrb[88].mxu0  ;;  %v2234_v4 = vmax.f32 %v900_v60, 0.0  ;;  %v2152_v60 = vmax.f32 %v490_v5, 0.0 }
 0x1a8   :  { %v909_v12 = vpop.f32.mrb[89].mxu0  ;;  %16328 = vmatmul.mubr.f32.gmra.mrb[194].mxu0 %v239_v9  ;;  %v22207_v28 = vmax.f32 %v2151_v51, %v2235_v3  ;;  %v915_v27 = vadd.f32 %v16170_v6, %v22163_v35  ;;  %v500_v51 = vadd.f32 %v22163_v35, %v21782_v18  ;;  %v515_v18 = vadd.f32 %v21790_v21, %v22163_v35  ;;  %v245_v21 = vld [vmem:[%s28310_s0 + $0x648] sm:$0xff] }
 0x1a9   :  { %16330 = vmatprep.mubr.f32.mxu0 %v240_v43  ;;  %v22213_v44 = vmax.f32 %v2150_v52, %v2234_v4  ;;  %v910_v59 = vadd.f32 %v22163_v35, %v909_v12  ;;  %v2155_v4 = vmax.f32 %v505_v14, 0.0 }
 0x1aa   :  { %v2237_v9 = vmax.f32 %v915_v27, 0.0  ;;  %v244_v27 = vld [vmem:[%s28310_s0 + $0x640] sm:$0xff] }
 0x1ab   :  { %v16173_v43 = vpop.f32.mrb[90].mxu0  ;;  %v2236_v3 = vmax.f32 %v910_v59, 0.0  ;;  %v2154_v59 = vmax.f32 %v500_v51, 0.0 }
 0x1ac   :  { %v919_v6 = vpop.f32.mrb[91].mxu0  ;;  %16331 = vmatmul.mubr.f32.gmra.mrb[196].mxu0 %v241_v13  ;;  %v22223_v52 = vmax.f32 %v2153_v19, %v2237_v9  ;;  %v925_v12 = vadd.f32 %v16173_v43, %v22163_v35  ;;  %v510_v19 = vadd.f32 %v22163_v35, %v21792_v22  ;;  %v525_v22 = vadd.f32 %v21800_v25, %v22163_v35  ;;  %v247_v25 = vld [vmem:[%s28310_s0 + $0x658] sm:$0xff] }
 0x1ad   :  { %16333 = vmatprep.mubr.f32.mxu0 %v242_v36  ;;  %v22229_v10 = vmax.f32 %v2152_v60, %v2236_v3  ;;  %v920_v5 = vadd.f32 %v22163_v35, %v919_v6  ;;  %v2157_v6 = vmax.f32 %v515_v18, 0.0 }
 0x1ae   :  { %v2239_v13 = vmax.f32 %v925_v12, 0.0  ;;  %v246_v12 = vld [vmem:[%s28310_s0 + $0x650] sm:$0xff] }
 0x1af   :  { %v16176_v36 = vpop.f32.mrb[92].mxu0  ;;  %v2238_v9 = vmax.f32 %v920_v5, 0.0  ;;  %v2156_v5 = vmax.f32 %v510_v19, 0.0 }
 0x1b0   :  { %v929_v43 = vpop.f32.mrb[93].mxu0  ;;  %16334 = vmatmul.mubr.f32.gmra.mrb[198].mxu0 %v243_v17  ;;  %v22239_v60 = vmax.f32 %v2155_v4, %v2239_v13  ;;  %v935_v14 = vadd.f32 %v16176_v36, %v22163_v35  ;;  %v520_v4 = vadd.f32 %v22163_v35, %v21802_v26  ;;  %v535_v26 = vadd.f32 %v21810_v29, %v22163_v35  ;;  %v249_v29 = vld [vmem:[%s28310_s0 + $0x668] sm:$0xff] }
 0x1b1   :  { %16336 = vmatprep.mubr.f32.mxu0 %v244_v27  ;;  %v22245_v3 = vmax.f32 %v2154_v59, %v2238_v9  ;;  %v930_v51 = vadd.f32 %v22163_v35, %v929_v43  ;;  %v2159_v43 = vmax.f32 %v525_v22, 0.0 }
 0x1b2   :  { %v2241_v17 = vmax.f32 %v935_v14, 0.0  ;;  %v248_v14 = vld [vmem:[%s28310_s0 + $0x660] sm:$0xff] }
 0x1b3   :  { %v16179_v27 = vpop.f32.mrb[94].mxu0  ;;  %v2240_v13 = vmax.f32 %v930_v51, 0.0  ;;  %v2158_v51 = vmax.f32 %v520_v4, 0.0 }
 0x1b4   :  { %v939_v36 = vpop.f32.mrb[95].mxu0  ;;  %16337 = vmatmul.mubr.f32.gmra.mrb[200].mxu0 %v245_v21  ;;  %v22255_v59 = vmax.f32 %v2157_v6, %v2241_v17  ;;  %v945_v18 = vadd.f32 %v16179_v27, %v22163_v35  ;;  %v530_v6 = vadd.f32 %v22163_v35, %v21812_v30  ;;  %v545_v30 = vadd.f32 %v21820_v33, %v22163_v35  ;;  %v251_v33 = vld [vmem:[%s28310_s0 + $0x678] sm:$0xff] }
 0x1b5   :  { %16339 = vmatprep.mubr.f32.mxu0 %v246_v12  ;;  %v22261_v9 = vmax.f32 %v2156_v5, %v2240_v13  ;;  %v940_v19 = vadd.f32 %v22163_v35, %v939_v36  ;;  %v2161_v36 = vmax.f32 %v535_v26, 0.0 }
 0x1b6   :  { %v2243_v21 = vmax.f32 %v945_v18, 0.0  ;;  %v250_v18 = vld [vmem:[%s28310_s0 + $0x670] sm:$0xff] }
 0x1b7   :  { %v16182_v12 = vpop.f32.mrb[96].mxu0  ;;  %v2242_v17 = vmax.f32 %v940_v19, 0.0  ;;  %v2160_v19 = vmax.f32 %v530_v6, 0.0 }
 0x1b8   :  { %v949_v27 = vpop.f32.mrb[97].mxu0  ;;  %16340 = vmatmul.mubr.f32.gmra.mrb[202].mxu0 %v247_v25  ;;  %v22271_v5 = vmax.f32 %v2159_v43, %v2243_v21  ;;  %v955_v22 = vadd.f32 %v16182_v12, %v22163_v35  ;;  %v540_v43 = vadd.f32 %v22163_v35, %v21822_v34  ;;  %v555_v34 = vadd.f32 %v21830_v37, %v22163_v35  ;;  %v253_v37 = vld [vmem:[%s28310_s0 + $0x688] sm:$0xff] }
 0x1b9   :  { %16342 = vmatprep.mubr.f32.mxu0 %v248_v14  ;;  %v22277_v13 = vmax.f32 %v2158_v51, %v2242_v17  ;;  %v950_v4 = vadd.f32 %v22163_v35, %v949_v27  ;;  %v2163_v27 = vmax.f32 %v545_v30, 0.0 }
 0x1ba   :  { %v2245_v25 = vmax.f32 %v955_v22, 0.0  ;;  %v252_v22 = vld [vmem:[%s28310_s0 + $0x680] sm:$0xff] }
 0x1bb   :  { %v16185_v14 = vpop.f32.mrb[98].mxu0  ;;  %v2244_v21 = vmax.f32 %v950_v4, 0.0  ;;  %v2162_v4 = vmax.f32 %v540_v43, 0.0 }
 0x1bc   :  { %v959_v12 = vpop.f32.mrb[99].mxu0  ;;  %16343 = vmatmul.mubr.f32.gmra.mrb[204].mxu0 %v249_v29  ;;  %v22287_v51 = vmax.f32 %v2161_v36, %v2245_v25  ;;  %v965_v26 = vadd.f32 %v16185_v14, %v22163_v35  ;;  %v550_v36 = vadd.f32 %v22163_v35, %v21832_v38  ;;  %v565_v38 = vadd.f32 %v21840_v41, %v22163_v35  ;;  %v255_v41 = vld [vmem:[%s28310_s0 + $0x698] sm:$0xff] }
 0x1bd   :  { %16345 = vmatprep.mubr.f32.mxu0 %v250_v18  ;;  %v22293_v17 = vmax.f32 %v2160_v19, %v2244_v21  ;;  %v960_v6 = vadd.f32 %v22163_v35, %v959_v12  ;;  %v2165_v12 = vmax.f32 %v555_v34, 0.0 }
 0x1be   :  { %v2247_v29 = vmax.f32 %v965_v26, 0.0  ;;  %v254_v26 = vld [vmem:[%s28310_s0 + $0x690] sm:$0xff] }
 0x1bf   :  { %v16188_v18 = vpop.f32.mrb[100].mxu0  ;;  %v2246_v25 = vmax.f32 %v960_v6, 0.0  ;;  %v2164_v6 = vmax.f32 %v550_v36, 0.0 }
 0x1c0   :  { %v969_v14 = vpop.f32.mrb[101].mxu0  ;;  %16346 = vmatmul.mubr.f32.gmra.mrb[206].mxu0 %v251_v33  ;;  %v22303_v19 = vmax.f32 %v2163_v27, %v2247_v29  ;;  %v975_v30 = vadd.f32 %v16188_v18, %v22163_v35  ;;  %v560_v27 = vadd.f32 %v22163_v35, %v21842_v42  ;;  %v575_v42 = vadd.f32 %v21850_v45, %v22163_v35  ;;  %v257_v45 = vld [vmem:[%s28310_s0 + $0x6a8] sm:$0xff] }
 0x1c1   :  { %16348 = vmatprep.mubr.f32.mxu0 %v252_v22  ;;  %v22309_v21 = vmax.f32 %v2162_v4, %v2246_v25  ;;  %v970_v43 = vadd.f32 %v22163_v35, %v969_v14  ;;  %v2167_v14 = vmax.f32 %v565_v38, 0.0 }
 0x1c2   :  { %v2249_v33 = vmax.f32 %v975_v30, 0.0  ;;  %v256_v30 = vld [vmem:[%s28310_s0 + $0x6a0] sm:$0xff] }
 0x1c3   :  { %v16191_v22 = vpop.f32.mrb[102].mxu0  ;;  %v2248_v29 = vmax.f32 %v970_v43, 0.0  ;;  %v2166_v43 = vmax.f32 %v560_v27, 0.0 }
 0x1c4   :  { %v979_v18 = vpop.f32.mrb[103].mxu0  ;;  %16349 = vmatmul.mubr.f32.gmra.mrb[208].mxu0 %v253_v37  ;;  %v22319_v4 = vmax.f32 %v2165_v12, %v2249_v33  ;;  %v985_v34 = vadd.f32 %v16191_v22, %v22163_v35  ;;  %v570_v12 = vadd.f32 %v22163_v35, %v21852_v46  ;;  %v585_v46 = vadd.f32 %v21860_v49, %v22163_v35  ;;  %v259_v49 = vld [vmem:[%s28310_s0 + $0x6b8] sm:$0xff] }
 0x1c5   :  { %16351 = vmatprep.mubr.f32.mxu0 %v254_v26  ;;  %v22325_v25 = vmax.f32 %v2164_v6, %v2248_v29  ;;  %v980_v36 = vadd.f32 %v22163_v35, %v979_v18  ;;  %v2169_v18 = vmax.f32 %v575_v42, 0.0 }
 0x1c6   :  { %v2251_v37 = vmax.f32 %v985_v34, 0.0  ;;  %v258_v34 = vld [vmem:[%s28310_s0 + $0x6b0] sm:$0xff] }
 0x1c7   :  { %v16194_v26 = vpop.f32.mrb[104].mxu0  ;;  %v2250_v33 = vmax.f32 %v980_v36, 0.0  ;;  %v2168_v36 = vmax.f32 %v570_v12, 0.0 }
 0x1c8   :  { %v989_v22 = vpop.f32.mrb[105].mxu0  ;;  %16352 = vmatmul.mubr.f32.gmra.mrb[210].mxu0 %v255_v41  ;;  %v22335_v6 = vmax.f32 %v2167_v14, %v2251_v37  ;;  %v995_v38 = vadd.f32 %v16194_v26, %v22163_v35  ;;  %v580_v14 = vadd.f32 %v22163_v35, %v21862_v50  ;;  %v595_v50 = vadd.f32 %v21870_v53, %v22163_v35  ;;  %v261_v53 = vld [vmem:[%s28310_s0 + $0x6c8] sm:$0xff] }
 0x1c9   :  { %16354 = vmatprep.mubr.f32.mxu0 %v256_v30  ;;  %v22341_v29 = vmax.f32 %v2166_v43, %v2250_v33  ;;  %v990_v27 = vadd.f32 %v22163_v35, %v989_v22  ;;  %v2171_v22 = vmax.f32 %v585_v46, 0.0 }
 0x1ca   :  { %v2253_v41 = vmax.f32 %v995_v38, 0.0  ;;  %v260_v38 = vld [vmem:[%s28310_s0 + $0x6c0] sm:$0xff] }
 0x1cb   :  { %v16197_v30 = vpop.f32.mrb[106].mxu0  ;;  %v2252_v37 = vmax.f32 %v990_v27, 0.0  ;;  %v2170_v27 = vmax.f32 %v580_v14, 0.0 }
 0x1cc   :  { %v999_v26 = vpop.f32.mrb[107].mxu0  ;;  %16355 = vmatmul.mubr.f32.gmra.mrb[212].mxu0 %v257_v45  ;;  %v22351_v43 = vmax.f32 %v2169_v18, %v2253_v41  ;;  %v1005_v42 = vadd.f32 %v16197_v30, %v22163_v35  ;;  %v590_v18 = vadd.f32 %v22163_v35, %v21872_v54  ;;  %v605_v54 = vadd.f32 %v21880_v57, %v22163_v35  ;;  %v263_v57 = vld [vmem:[%s28310_s0 + $0x6d8] sm:$0xff] }
 0x1cd   :  { %16357 = vmatprep.mubr.f32.mxu0 %v258_v34  ;;  %v22357_v33 = vmax.f32 %v2168_v36, %v2252_v37  ;;  %v1000_v12 = vadd.f32 %v22163_v35, %v999_v26  ;;  %v2173_v26 = vmax.f32 %v595_v50, 0.0 }
 0x1ce   :  { %v2255_v45 = vmax.f32 %v1005_v42, 0.0  ;;  %v262_v42 = vld [vmem:[%s28310_s0 + $0x6d0] sm:$0xff] }
 0x1cf   :  { %28378 = vst [vmem:[#allocation39_spill] sm:$0xff] %v22357_v33  ;;  %v16200_v34 = vpop.f32.mrb[108].mxu0  ;;  %v2254_v41 = vmax.f32 %v1000_v12, 0.0  ;;  %v2172_v12 = vmax.f32 %v590_v18, 0.0 }
 0x1d0   :  { %v1009_v30 = vpop.f32.mrb[109].mxu0  ;;  %16358 = vmatmul.mubr.f32.gmra.mrb[214].mxu0 %v259_v49  ;;  %v22367_v36 = vmax.f32 %v2171_v22, %v2255_v45  ;;  %v1015_v46 = vadd.f32 %v16200_v34, %v22163_v35  ;;  %v600_v22 = vadd.f32 %v22163_v35, %v21882_v58  ;;  %v615_v58 = vadd.f32 %v21890_v61, %v22163_v35  ;;  %v265_v61 = vld [vmem:[%s28310_s0 + $0x6e8] sm:$0xff] }
 0x1d1   :  { %16360 = vmatprep.mubr.f32.mxu0 %v260_v38  ;;  %v22373_v37 = vmax.f32 %v2170_v27, %v2254_v41  ;;  %v1010_v14 = vadd.f32 %v22163_v35, %v1009_v30  ;;  %v2175_v30 = vmax.f32 %v605_v54, 0.0 }
 0x1d2   :  { %28379 = vst [vmem:[#allocation40_spill] sm:$0xff] %v22367_v36  ;;  %v2257_v49 = vmax.f32 %v1015_v46, 0.0  ;;  %v264_v46 = vld [vmem:[%s28310_s0 + $0x6e0] sm:$0xff] }
 0x1d3   :  { %28380 = vst [vmem:[#allocation41_spill] sm:$0xff] %v22373_v37  ;;  %v16203_v38 = vpop.f32.mrb[110].mxu0  ;;  %v2256_v45 = vmax.f32 %v1010_v14, 0.0  ;;  %v2174_v14 = vmax.f32 %v600_v22, 0.0 }
 0x1d4   :  { %v1019_v34 = vpop.f32.mrb[111].mxu0  ;;  %16361 = vmatmul.mubr.f32.gmra.mrb[216].mxu0 %v261_v53  ;;  %v22383_v27 = vmax.f32 %v2173_v26, %v2257_v49  ;;  %v1025_v50 = vadd.f32 %v16203_v38, %v22163_v35  ;;  %v610_v26 = vadd.f32 %v22163_v35, %v21892_v62  ;;  %v625_v62 = vadd.f32 %v21900_v1, %v22163_v35  ;;  %v267_v1 = vld [vmem:[%s28310_s0 + $0x6f8] sm:$0xff] }
 0x1d5   :  { %16363 = vmatprep.mubr.f32.mxu0 %v262_v42  ;;  %v22389_v41 = vmax.f32 %v2172_v12, %v2256_v45  ;;  %v1020_v18 = vadd.f32 %v22163_v35, %v1019_v34  ;;  %v2177_v34 = vmax.f32 %v615_v58, 0.0 }
 0x1d6   :  { %28381 = vst [vmem:[#allocation42_spill] sm:$0xff] %v22383_v27  ;;  %v2259_v53 = vmax.f32 %v1025_v50, 0.0  ;;  %v266_v50 = vld [vmem:[%s28310_s0 + $0x6f0] sm:$0xff] }
 0x1d7   :  { %28382 = vst [vmem:[#allocation43_spill] sm:$0xff] %v22389_v41  ;;  %v16206_v42 = vpop.f32.mrb[112].mxu0  ;;  %v2258_v49 = vmax.f32 %v1020_v18, 0.0  ;;  %v2176_v18 = vmax.f32 %v610_v26, 0.0  ;;  %v13401_v41 = vld [vmem:[%s28312_s5 + $0x250] sm:$0xff] }
 0x1d8   :  { %v1029_v38 = vpop.f32.mrb[113].mxu0  ;;  %16364 = vmatmul.mubr.f32.gmra.mrb[218].mxu0 %v263_v57  ;;  %v22399_v12 = vmax.f32 %v2175_v30, %v2259_v53  ;;  %v1035_v54 = vadd.f32 %v16206_v42, %v22163_v35  ;;  %v620_v30 = vadd.f32 %v22163_v35, %v21902_v2  ;;  %v635_v2 = vadd.f32 %v21910_v7, %v22163_v35  ;;  %v269_v7 = vld [vmem:[%s28310_s0 + $0x708] sm:$0xff] }
 0x1d9   :  { %16366 = vmatprep.mubr.f32.mxu0 %v264_v46  ;;  %v22405_v45 = vmax.f32 %v2174_v14, %v2258_v49  ;;  %v1030_v22 = vadd.f32 %v22163_v35, %v1029_v38  ;;  %v2179_v38 = vmax.f32 %v625_v62, 0.0 }
 0x1da   :  { %28383 = vst [vmem:[#allocation44_spill] sm:$0xff] %v22399_v12  ;;  %v2261_v57 = vmax.f32 %v1035_v54, 0.0  ;;  %v268_v54 = vld [vmem:[%s28310_s0 + $0x700] sm:$0xff]  ;;  %v347_v12 = vld [vmem:[%s28310_s0 + $0x978] sm:$0xff] }
 0x1db   :  { %28384 = vst [vmem:[#allocation45_spill] sm:$0xff] %v22405_v45  ;;  %v16209_v46 = vpop.f32.mrb[114].mxu0  ;;  %v2260_v53 = vmax.f32 %v1030_v22, 0.0  ;;  %v2178_v22 = vmax.f32 %v620_v30, 0.0 }
 0x1dc   :  { %v1039_v42 = vpop.f32.mrb[115].mxu0  ;;  %16367 = vmatmul.mubr.f32.gmra.mrb[220].mxu0 %v265_v61  ;;  %v22415_v14 = vmax.f32 %v2177_v34, %v2261_v57  ;;  %v1045_v58 = vadd.f32 %v16209_v46, %v22163_v35  ;;  %v630_v34 = vadd.f32 %v22163_v35, %v21912_v8  ;;  %v645_v8 = vadd.f32 %v21920_v15, %v22163_v35  ;;  %v271_v15 = vld [vmem:[%s28310_s0 + $0x718] sm:$0xff] }
 0x1dd   :  { %16369 = vmatprep.mubr.f32.mxu0 %v266_v50  ;;  %v22421_v49 = vmax.f32 %v2176_v18, %v2260_v53  ;;  %v1040_v26 = vadd.f32 %v22163_v35, %v1039_v42  ;;  %v2181_v42 = vmax.f32 %v635_v2, 0.0 }
 0x1de   :  { %28385 = vst [vmem:[#allocation46_spill] sm:$0xff] %v22415_v14  ;;  %v2263_v61 = vmax.f32 %v1045_v58, 0.0  ;;  %v270_v58 = vld [vmem:[%s28310_s0 + $0x710] sm:$0xff]  ;;  %v345_v14 = vld [vmem:[%s28310_s0 + $0x968] sm:$0xff] }
 0x1df   :  { %28386 = vst [vmem:[#allocation47_spill] sm:$0xff] %v22421_v49  ;;  %v16212_v50 = vpop.f32.mrb[116].mxu0  ;;  %v2262_v57 = vmax.f32 %v1040_v26, 0.0  ;;  %v2180_v26 = vmax.f32 %v630_v34, 0.0 }
 0x1e0   :  { %v1049_v46 = vpop.f32.mrb[117].mxu0  ;;  %16370 = vmatmul.mubr.f32.gmra.mrb[222].mxu0 %v267_v1  ;;  %v22431_v18 = vmax.f32 %v2179_v38, %v2263_v61  ;;  %v1055_v62 = vadd.f32 %v16212_v50, %v22163_v35  ;;  %v640_v38 = vadd.f32 %v22163_v35, %v21922_v16  ;;  %v655_v16 = vadd.f32 %v21930_v23, %v22163_v35  ;;  %v273_v23 = vld [vmem:[%s28310_s0 + $0x728] sm:$0xff] }
 0x1e1   :  { %16372 = vmatprep.mubr.f32.mxu0 %v268_v54  ;;  %v22437_v53 = vmax.f32 %v2178_v22, %v2262_v57  ;;  %v1050_v30 = vadd.f32 %v22163_v35, %v1049_v46  ;;  %v2183_v46 = vmax.f32 %v645_v8, 0.0 }
 0x1e2   :  { %28387 = vst [vmem:[#allocation48_spill] sm:$0xff] %v22431_v18  ;;  %v2265_v1 = vmax.f32 %v1055_v62, 0.0  ;;  %v272_v62 = vld [vmem:[%s28310_s0 + $0x720] sm:$0xff]  ;;  %v343_v18 = vld [vmem:[%s28310_s0 + $0x958] sm:$0xff] }
 0x1e3   :  { %28388 = vst [vmem:[#allocation49_spill] sm:$0xff] %v22437_v53  ;;  %v16215_v54 = vpop.f32.mrb[118].mxu0  ;;  %v2264_v61 = vmax.f32 %v1050_v30, 0.0  ;;  %v2182_v30 = vmax.f32 %v640_v38, 0.0  ;;  %v2185_v38 = vmax.f32 %v655_v16, 0.0 }
 0x1e4   :  { %v1059_v50 = vpop.f32.mrb[119].mxu0  ;;  %16373 = vmatmul.mubr.f32.gmra.mrb[224].mxu0 %v269_v7  ;;  %v22447_v22 = vmax.f32 %v2181_v42, %v2265_v1  ;;  %v1065_v2 = vadd.f32 %v16215_v54, %v22163_v35  ;;  %v650_v42 = vadd.f32 %v22163_v35, %v21932_v24  ;;  %v665_v24 = vadd.f32 %v21940_v31, %v22163_v35 }
 0x1e5   :  { %16375 = vmatprep.mubr.f32.mxu0 %v270_v58  ;;  %v22453_v57 = vmax.f32 %v2180_v26, %v2264_v61  ;;  %v1060_v34 = vadd.f32 %v22163_v35, %v1059_v50 }
 0x1e6   :  { %28389 = vst [vmem:[#allocation50_spill] sm:$0xff] %v22447_v22  ;;  %v2267_v7 = vmax.f32 %v1065_v2, 0.0 }
 0x1e7   :  { %28390 = vst [vmem:[#allocation51_spill] sm:$0xff] %v22453_v57  ;;  %v16218_v58 = vpop.f32.mrb[120].mxu0  ;;  %v2266_v1 = vmax.f32 %v1060_v34, 0.0  ;;  %v2184_v34 = vmax.f32 %v650_v42, 0.0  ;;  %v275_v42 = vld [vmem:[%s28310_s0 + $0x738] sm:$0xff]  ;;  %v341_v57 = vld [vmem:[%s28310_s0 + $0x948] sm:$0xff] }
 0x1e8   :  { %v1075_v26 = vadd.f32 %v16218_v58, %v22163_v35  ;;  %v1069_v54 = vpop.f32.mrb[121].mxu0  ;;  %16376 = vmatmul.mubr.f32.gmra.mrb[226].mxu0 %v271_v15  ;;  %v22464_v61 = vmax.f32 %v2183_v46, %v2267_v7  ;;  %v274_v15 = vld [vmem:[%s28310_s0 + $0x730] sm:$0xff]  ;;  %v660_v46 = vadd.f32 %v22163_v35, %v21942_v32  ;;  %v675_v32 = vadd.f32 %v21950_v39, %v22163_v35 }
 0x1e9   :  { %v1070_v8 = vadd.f32 %v22163_v35, %v1069_v54  ;;  %16378 = vmatprep.mubr.f32.mxu0 %v272_v62  ;;  %v22470_v50 = vmax.f32 %v2182_v30, %v2266_v1 }
 0x1ea   :  { %28391 = vst [vmem:[#allocation52_spill] sm:$0xff] %v22464_v61  ;;  %v2269_v2 = vmax.f32 %v1075_v26, 0.0  ;;  %v2187_v26 = vmax.f32 %v665_v24, 0.0 }
 0x1eb   :  { %28392 = vst [vmem:[#allocation53_spill] sm:$0xff] %v22470_v50  ;;  %v2268_v62 = vmax.f32 %v1070_v8, 0.0  ;;  %v16221_v7 = vpop.f32.mrb[122].mxu0  ;;  %v276_v8 = vld [vmem:[%s28310_s0 + $0x740] sm:$0xff]  ;;  %v13392_v50 = vld [vmem:[%s28312_s5 + $0x208] sm:$0xff] }
 0x1ec   :  { %v22479_v58 = vmax.f32 %v2185_v38, %v2269_v2  ;;  %v1085_v30 = vadd.f32 %v16221_v7, %v22163_v35  ;;  %v1079_v1 = vpop.f32.mrb[123].mxu0  ;;  %16379 = vmatmul.mubr.f32.gmra.mrb[228].mxu0 %v273_v23  ;;  %v2186_v38 = vmax.f32 %v660_v46, 0.0  ;;  %v670_v23 = vadd.f32 %v22163_v35, %v21952_v40  ;;  %v277_v46 = vld [vmem:[%s28310_s0 + $0x748] sm:$0xff] }
 0x1ed   :  { %v22482_v16 = vmax.f32 %v2184_v34, %v2268_v62  ;;  %v1080_v31 = vadd.f32 %v22163_v35, %v1079_v1  ;;  %16381 = vmatprep.mubr.f32.mxu0 %v274_v15  ;;  %v685_v40 = vadd.f32 %v21960_v47, %v22163_v35 }
 0x1ee   :  { %28393 = vst [vmem:[#allocation54_spill] sm:$0xff] %v22479_v58  ;;  %v2271_v54 = vmax.f32 %v1085_v30, 0.0  ;;  %v2189_v30 = vmax.f32 %v675_v32, 0.0  ;;  %v13351_v58 = vld [vmem:[%s28312_s5 + $0xc0] sm:$0xff] }
 0x1ef   :  { %28394 = vst [vmem:[#allocation55_spill] sm:$0xff] %v22482_v16  ;;  %v2270_v2 = vmax.f32 %v1080_v31, 0.0  ;;  %v16224_v34 = vpop.f32.mrb[124].mxu0  ;;  %v278_v31 = vld [vmem:[%s28310_s0 + $0x750] sm:$0xff]  ;;  %v339_v16 = vld [vmem:[%s28310_s0 + $0x938] sm:$0xff] }
 0x1f0   :  { %v22495_v15 = vmax.f32 %v2187_v26, %v2271_v54  ;;  %v1095_v62 = vadd.f32 %v16224_v34, %v22163_v35  ;;  %v1089_v7 = vpop.f32.mrb[125].mxu0  ;;  %16382 = vmatmul.mubr.f32.gmra.mrb[230].mxu0 %v275_v42  ;;  %v2188_v26 = vmax.f32 %v670_v23, 0.0  ;;  %v680_v42 = vadd.f32 %v22163_v35, %v21962_v48  ;;  %v279_v23 = vld [vmem:[%s28310_s0 + $0x758] sm:$0xff] }
 0x1f1   :  { %v22498_v24 = vmax.f32 %v2186_v38, %v2270_v2  ;;  %v1090_v39 = vadd.f32 %v22163_v35, %v1089_v7  ;;  %16384 = vmatprep.mubr.f32.mxu0 %v276_v8  ;;  %v695_v48 = vadd.f32 %v21970_v55, %v22163_v35 }
 0x1f2   :  { %28395 = vst [vmem:[#allocation56_spill] sm:$0xff] %v22495_v15  ;;  %v2273_v1 = vmax.f32 %v1095_v62, 0.0  ;;  %v2191_v62 = vmax.f32 %v685_v40, 0.0  ;;  %v13349_v15 = vld [vmem:[%s28312_s5 + $0xb0] sm:$0xff] }
 0x1f3   :  { %28396 = vst [vmem:[#allocation57_spill] sm:$0xff] %v22498_v24  ;;  %v2272_v54 = vmax.f32 %v1090_v39, 0.0  ;;  %v16227_v38 = vpop.f32.mrb[126].mxu0  ;;  %v280_v39 = vld [vmem:[%s28310_s0 + $0x760] sm:$0xff]  ;;  %v337_v24 = vld [vmem:[%s28310_s0 + $0x928] sm:$0xff] }
 0x1f4   :  { %v22511_v8 = vmax.f32 %v2189_v30, %v2273_v1  ;;  %v1105_v2 = vadd.f32 %v16227_v38, %v22163_v35  ;;  %v1099_v34 = vpop.f32.mrb[127].mxu0  ;;  %16385 = vmatmul.mubr.f32.gmra.mrb[232].mxu0 %v277_v46  ;;  %v2190_v30 = vmax.f32 %v680_v42, 0.0  ;;  %v690_v46 = vadd.f32 %v22163_v35, %v21972_v56  ;;  %v281_v42 = vld [vmem:[%s28310_s0 + $0x768] sm:$0xff] }
 0x1f5   :  { %v22514_v32 = vmax.f32 %v2188_v26, %v2272_v54  ;;  %v1100_v47 = vadd.f32 %v22163_v35, %v1099_v34  ;;  %16387 = vmatprep.mubr.f32.mxu0 %v278_v31  ;;  %v705_v56 = vadd.f32 %v21980_v63, %v22163_v35 }
 0x1f6   :  { %28397 = vst [vmem:[#allocation58_spill] sm:$0xff] %v22511_v8  ;;  %v2275_v7 = vmax.f32 %v1105_v2, 0.0  ;;  %v2193_v2 = vmax.f32 %v695_v48, 0.0  ;;  %v13347_v8 = vld [vmem:[%s28312_s5 + $0xa0] sm:$0xff] }
 0x1f7   :  { %28398 = vst [vmem:[#allocation59_spill] sm:$0xff] %v22514_v32  ;;  %v2274_v1 = vmax.f32 %v1100_v47, 0.0  ;;  %v16230_v26 = vpop.f32.mrb[128].mxu0  ;;  %v282_v47 = vld [vmem:[%s28310_s0 + $0x770] sm:$0xff]  ;;  %v335_v32 = vld [vmem:[%s28310_s0 + $0x918] sm:$0xff] }
 0x1f8   :  { %v22527_v31 = vmax.f32 %v2191_v62, %v2275_v7  ;;  %v1115_v54 = vadd.f32 %v16230_v26, %v22163_v35  ;;  %v1109_v38 = vpop.f32.mrb[129].mxu0  ;;  %16388 = vmatmul.mubr.f32.gmra.mrb[234].mxu0 %v279_v23  ;;  %v2192_v62 = vmax.f32 %v690_v46, 0.0  ;;  %v700_v23 = vadd.f32 %v22163_v35, %v21982_v0  ;;  %v283_v46 = vld [vmem:[%s28310_s0 + $0x778] sm:$0xff] }
 0x1f9   :  { %v22530_v40 = vmax.f32 %v2190_v30, %v2274_v1  ;;  %v1110_v55 = vadd.f32 %v22163_v35, %v1109_v38  ;;  %16390 = vmatprep.mubr.f32.mxu0 %v280_v39  ;;  %v715_v0 = vadd.f32 %v21990_v11, %v22163_v35 }
 0x1fa   :  { %28399 = vst [vmem:[#allocation60_spill] sm:$0xff] %v22527_v31  ;;  %v2277_v34 = vmax.f32 %v1115_v54, 0.0  ;;  %v2195_v54 = vmax.f32 %v705_v56, 0.0  ;;  %v13345_v31 = vld [vmem:[%s28312_s5 + $0x90] sm:$0xff] }
 0x1fb   :  { %28400 = vst [vmem:[#allocation61_spill] sm:$0xff] %v22530_v40  ;;  %v2276_v7 = vmax.f32 %v1110_v55, 0.0  ;;  %v16233_v30 = vpop.f32.mrb[130].mxu0  ;;  %v284_v55 = vld [vmem:[%s28310_s0 + $0x780] sm:$0xff]  ;;  %v334_v40 = vld [vmem:[%s28310_s0 + $0x910] sm:$0xff] }
 0x1fc   :  { %v22543_v39 = vmax.f32 %v2193_v2, %v2277_v34  ;;  %v1125_v1 = vadd.f32 %v16233_v30, %v22163_v35  ;;  %v1119_v26 = vpop.f32.mrb[131].mxu0  ;;  %16391 = vmatmul.mubr.f32.gmra.mrb[236].mxu0 %v281_v42  ;;  %v2194_v2 = vmax.f32 %v700_v23, 0.0  ;;  %v28403_v42 = vld [vmem:[#allocation3_spill] sm:$0xff]  ;;  %v285_v23 = vld [vmem:[%s28310_s0 + $0x788] sm:$0xff] }
 0x1fd   :  { %v22546_v48 = vmax.f32 %v2192_v62, %v2276_v7  ;;  %v1120_v63 = vadd.f32 %v22163_v35, %v1119_v26  ;;  %16393 = vmatprep.mubr.f32.mxu0 %v282_v47  ;;  %v710_v34 = vadd.f32 %v22163_v35, %v28403_v42  ;;  %v28406_v42 = vld [vmem:[#allocation4_spill] sm:$0xff] }
 0x1fe   :  { %28401 = vst [vmem:[#allocation62_spill] sm:$0xff] %v22543_v39  ;;  %v2279_v38 = vmax.f32 %v1125_v1, 0.0  ;;  %v2197_v1 = vmax.f32 %v715_v0, 0.0  ;;  %v333_v39 = vld [vmem:[%s28310_s0 + $0x908] sm:$0xff] }
 0x1ff   :  { %28402 = vst [vmem:[#allocation63_spill] sm:$0xff] %v22546_v48  ;;  %v2278_v62 = vmax.f32 %v1120_v63, 0.0  ;;  %v16236_v7 = vpop.f32.mrb[132].mxu0  ;;  %v725_v63 = vadd.f32 %v28406_v42, %v22163_v35 }
 0x200   :  { %v22559_v47 = vmax.f32 %v2195_v54, %v2279_v38  ;;  %v1135_v30 = vadd.f32 %v16236_v7, %v22163_v35  ;;  %v1129_v26 = vpop.f32.mrb[133].mxu0  ;;  %16394 = vmatmul.mubr.f32.gmra.mrb[238].mxu0 %v283_v46  ;;  %v286_v54 = vld [vmem:[%s28310_s0 + $0x790] sm:$0xff]  ;;  %v2196_v38 = vmax.f32 %v710_v34, 0.0  ;;  %v287_v34 = vld [vmem:[%s28310_s0 + $0x798] sm:$0xff] }
 0x201   :  { %v22562_v56 = vmax.f32 %v2194_v2, %v2278_v62  ;;  %v1130_v11 = vadd.f32 %v22163_v35, %v1129_v26  ;;  %16396 = vmatprep.mubr.f32.mxu0 %v284_v55  ;;  %v28407_v46 = vld [vmem:[#allocation5_spill] sm:$0xff]  ;;  %v2199_v42 = vmax.f32 %v725_v63, 0.0 }
 0x202   :  { %28404 = vst [vmem:[#allocation3_spill] sm:$0xff] %v22559_v47  ;;  %v2281_v48 = vmax.f32 %v1135_v30, 0.0  ;;  %v720_v2 = vadd.f32 %v22163_v35, %v28407_v46  ;;  %v28410_v46 = vld [vmem:[#allocation6_spill] sm:$0xff] }
 0x203   :  { %28405 = vst [vmem:[#allocation64_spill] sm:$0xff] %v22562_v56  ;;  %v2280_v62 = vmax.f32 %v1130_v11, 0.0  ;;  %v16239_v7 = vpop.f32.mrb[134].mxu0  ;;  %v735_v11 = vadd.f32 %v28410_v46, %v22163_v35 }
 0x204   :  { %v22575_v55 = vmax.f32 %v2197_v1, %v2281_v48  ;;  %v1145_v26 = vadd.f32 %v16239_v7, %v22163_v35  ;;  %v1139_v56 = vpop.f32.mrb[135].mxu0  ;;  %16397 = vmatmul.mubr.f32.gmra.mrb[240].mxu0 %v285_v23  ;;  %v288_v48 = vld [vmem:[%s28310_s0 + $0x7a0] sm:$0xff]  ;;  %v2198_v1 = vmax.f32 %v720_v2, 0.0  ;;  %v289_v2 = vld [vmem:[%s28310_s0 + $0x7a8] sm:$0xff] }
 0x205   :  { %v22578_v0 = vmax.f32 %v2196_v38, %v2280_v62  ;;  %v1140_v30 = vadd.f32 %v22163_v35, %v1139_v56  ;;  %16399 = vmatprep.mubr.f32.mxu0 %v286_v54  ;;  %v28411_v23 = vld [vmem:[#allocation7_spill] sm:$0xff]  ;;  %v2201_v46 = vmax.f32 %v735_v11, 0.0 }
 0x206   :  { %28408 = vst [vmem:[#allocation4_spill] sm:$0xff] %v22575_v55  ;;  %v2283_v47 = vmax.f32 %v1145_v26, 0.0  ;;  %v730_v38 = vadd.f32 %v22163_v35, %v28411_v23  ;;  %v28414_v23 = vld [vmem:[#allocation8_spill] sm:$0xff] }
 0x207   :  { %28409 = vst [vmem:[#allocation5_spill] sm:$0xff] %v22578_v0  ;;  %v2282_v62 = vmax.f32 %v1140_v30, 0.0  ;;  %v16242_v56 = vpop.f32.mrb[136].mxu0  ;;  %v745_v30 = vadd.f32 %v28414_v23, %v22163_v35 }
 0x208   :  { %v22591_v54 = vmax.f32 %v2199_v42, %v2283_v47  ;;  %v1155_v7 = vadd.f32 %v16242_v56, %v22163_v35  ;;  %v1149_v0 = vpop.f32.mrb[137].mxu0  ;;  %16400 = vmatmul.mubr.f32.gmra.mrb[242].mxu0 %v287_v34  ;;  %v290_v47 = vld [vmem:[%s28310_s0 + $0x7b0] sm:$0xff]  ;;  %v2200_v42 = vmax.f32 %v730_v38, 0.0  ;;  %v291_v38 = vld [vmem:[%s28310_s0 + $0x7b8] sm:$0xff] }
 0x209   :  { %v22594_v63 = vmax.f32 %v2198_v1, %v2282_v62  ;;  %v1150_v26 = vadd.f32 %v22163_v35, %v1149_v0  ;;  %16402 = vmatprep.mubr.f32.mxu0 %v288_v48  ;;  %v28415_v34 = vld [vmem:[#allocation9_spill] sm:$0xff]  ;;  %v2203_v23 = vmax.f32 %v745_v30, 0.0 }
 0x20a   :  { %28412 = vst [vmem:[#allocation6_spill] sm:$0xff] %v22591_v54  ;;  %v2285_v55 = vmax.f32 %v1155_v7, 0.0  ;;  %v740_v1 = vadd.f32 %v22163_v35, %v28415_v34  ;;  %v28418_v34 = vld [vmem:[#allocation10_spill] sm:$0xff] }
 0x20b   :  { %28413 = vst [vmem:[#allocation7_spill] sm:$0xff] %v22594_v63  ;;  %v2284_v62 = vmax.f32 %v1150_v26, 0.0  ;;  %v16245_v0 = vpop.f32.mrb[138].mxu0  ;;  %v755_v26 = vadd.f32 %v28418_v34, %v22163_v35 }
 0x20c   :  { %v22607_v48 = vmax.f32 %v2201_v46, %v2285_v55  ;;  %v1165_v56 = vadd.f32 %v16245_v0, %v22163_v35  ;;  %v1159_v63 = vpop.f32.mrb[139].mxu0  ;;  %16403 = vmatmul.mubr.f32.gmra.mrb[244].mxu0 %v289_v2  ;;  %v292_v55 = vld [vmem:[%s28310_s0 + $0x7c0] sm:$0xff]  ;;  %v2202_v46 = vmax.f32 %v740_v1, 0.0  ;;  %v293_v1 = vld [vmem:[%s28310_s0 + $0x7c8] sm:$0xff] }
 0x20d   :  { %v22610_v11 = vmax.f32 %v2200_v42, %v2284_v62  ;;  %v1160_v7 = vadd.f32 %v22163_v35, %v1159_v63  ;;  %16405 = vmatprep.mubr.f32.mxu0 %v290_v47  ;;  %v28419_v2 = vld [vmem:[#allocation11_spill] sm:$0xff]  ;;  %v2205_v34 = vmax.f32 %v755_v26, 0.0 }
 0x20e   :  { %28416 = vst [vmem:[#allocation8_spill] sm:$0xff] %v22607_v48  ;;  %v2287_v54 = vmax.f32 %v1165_v56, 0.0  ;;  %v750_v42 = vadd.f32 %v22163_v35, %v28419_v2  ;;  %v28422_v2 = vld [vmem:[#allocation12_spill] sm:$0xff] }
 0x20f   :  { %28417 = vst [vmem:[#allocation9_spill] sm:$0xff] %v22610_v11  ;;  %v2286_v62 = vmax.f32 %v1160_v7, 0.0  ;;  %v16248_v63 = vpop.f32.mrb[140].mxu0  ;;  %v765_v7 = vadd.f32 %v28422_v2, %v22163_v35 }
 0x210   :  { %v22623_v47 = vmax.f32 %v2203_v23, %v2287_v54  ;;  %v1175_v0 = vadd.f32 %v16248_v63, %v22163_v35  ;;  %v1169_v11 = vpop.f32.mrb[141].mxu0  ;;  %16406 = vmatmul.mubr.f32.gmra.mrb[246].mxu0 %v291_v38  ;;  %v294_v54 = vld [vmem:[%s28310_s0 + $0x7d0] sm:$0xff]  ;;  %v2204_v23 = vmax.f32 %v750_v42, 0.0  ;;  %v295_v42 = vld [vmem:[%s28310_s0 + $0x7d8] sm:$0xff] }
 0x211   :  { %v22626_v30 = vmax.f32 %v2202_v46, %v2286_v62  ;;  %v1170_v56 = vadd.f32 %v22163_v35, %v1169_v11  ;;  %16408 = vmatprep.mubr.f32.mxu0 %v292_v55  ;;  %v28423_v38 = vld [vmem:[#allocation13_spill] sm:$0xff]  ;;  %v2207_v2 = vmax.f32 %v765_v7, 0.0 }
 0x212   :  { %28420 = vst [vmem:[#allocation10_spill] sm:$0xff] %v22623_v47  ;;  %v2289_v48 = vmax.f32 %v1175_v0, 0.0  ;;  %v760_v46 = vadd.f32 %v22163_v35, %v28423_v38  ;;  %v28426_v38 = vld [vmem:[#allocation14_spill] sm:$0xff] }
 0x213   :  { %28421 = vst [vmem:[#allocation11_spill] sm:$0xff] %v22626_v30  ;;  %v2288_v62 = vmax.f32 %v1170_v56, 0.0  ;;  %v16251_v11 = vpop.f32.mrb[142].mxu0  ;;  %v775_v56 = vadd.f32 %v28426_v38, %v22163_v35 }
 0x214   :  { %v22639_v55 = vmax.f32 %v2205_v34, %v2289_v48  ;;  %v1185_v63 = vadd.f32 %v16251_v11, %v22163_v35  ;;  %v1179_v30 = vpop.f32.mrb[143].mxu0  ;;  %16409 = vmatmul.mubr.f32.gmra.mrb[248].mxu0 %v293_v1  ;;  %v296_v48 = vld [vmem:[%s28310_s0 + $0x7e0] sm:$0xff]  ;;  %v2206_v34 = vmax.f32 %v760_v46, 0.0  ;;  %v297_v46 = vld [vmem:[%s28310_s0 + $0x7e8] sm:$0xff] }
 0x215   :  { %v22642_v26 = vmax.f32 %v2204_v23, %v2288_v62  ;;  %v1180_v0 = vadd.f32 %v22163_v35, %v1179_v30  ;;  %16411 = vmatprep.mubr.f32.mxu0 %v294_v54  ;;  %v28427_v1 = vld [vmem:[#allocation15_spill] sm:$0xff]  ;;  %v2209_v38 = vmax.f32 %v775_v56, 0.0 }
 0x216   :  { %28424 = vst [vmem:[#allocation12_spill] sm:$0xff] %v22639_v55  ;;  %v2291_v47 = vmax.f32 %v1185_v63, 0.0  ;;  %v770_v23 = vadd.f32 %v22163_v35, %v28427_v1  ;;  %v28430_v1 = vld [vmem:[#allocation16_spill] sm:$0xff] }
 0x217   :  { %28425 = vst [vmem:[#allocation13_spill] sm:$0xff] %v22642_v26  ;;  %v2290_v62 = vmax.f32 %v1180_v0, 0.0  ;;  %v16254_v30 = vpop.f32.mrb[144].mxu0  ;;  %v785_v0 = vadd.f32 %v28430_v1, %v22163_v35 }
 0x218   :  { %v22655_v54 = vmax.f32 %v2207_v2, %v2291_v47  ;;  %v1195_v11 = vadd.f32 %v16254_v30, %v22163_v35  ;;  %v1189_v26 = vpop.f32.mrb[145].mxu0  ;;  %16412 = vmatmul.mubr.f32.gmra.mrb[250].mxu0 %v295_v42  ;;  %v298_v47 = vld [vmem:[%s28310_s0 + $0x7f0] sm:$0xff]  ;;  %v2208_v2 = vmax.f32 %v770_v23, 0.0  ;;  %v299_v23 = vld [vmem:[%s28310_s0 + $0x7f8] sm:$0xff] }
 0x219   :  { %v22658_v7 = vmax.f32 %v2206_v34, %v2290_v62  ;;  %v1190_v63 = vadd.f32 %v22163_v35, %v1189_v26  ;;  %16414 = vmatprep.mubr.f32.mxu0 %v296_v48  ;;  %v28431_v42 = vld [vmem:[#allocation17_spill] sm:$0xff]  ;;  %v2211_v1 = vmax.f32 %v785_v0, 0.0 }
 0x21a   :  { %28428 = vst [vmem:[#allocation14_spill] sm:$0xff] %v22655_v54  ;;  %v2293_v55 = vmax.f32 %v1195_v11, 0.0  ;;  %v780_v34 = vadd.f32 %v22163_v35, %v28431_v42  ;;  %v28438_v54 = vld [vmem:[#allocation20_spill] sm:$0xff] }
 0x21b   :  { %28429 = vst [vmem:[#allocation15_spill] sm:$0xff] %v22658_v7  ;;  %v2292_v62 = vmax.f32 %v1190_v63, 0.0  ;;  %v16257_v26 = vpop.f32.mrb[146].mxu0  ;;  %v22683_v63 = vld [vmem:[%s28311_s4] ss:$0 sm:$0xff] }
 0x21c   :  { %v22671_v48 = vmax.f32 %v2209_v38, %v2293_v55  ;;  %v1205_v30 = vadd.f32 %v16257_v26, %v22163_v35  ;;  %v1199_v7 = vpop.f32.mrb[147].mxu0  ;;  %16415 = vmatmul.mubr.f32.gmra.mrb[252].mxu0 %v297_v46  ;;  %v28434_v55 = vld [vmem:[#allocation18_spill] sm:$0xff]  ;;  %v300_v46 = vld [vmem:[%s28310_s0 + $0x800] sm:$0xff] }
 0x21d   :  { %v22674_v56 = vmax.f32 %v2208_v2, %v2292_v62  ;;  %v1200_v11 = vadd.f32 %v22163_v35, %v1199_v7  ;;  %16417 = vmatprep.mubr.f32.mxu0 %v298_v47  ;;  %v795_v38 = vadd.f32 %v22683_v63, %v28434_v55  ;;  %v2210_v35 = vmax.f32 %v780_v34, 0.0  ;;  %v28435_v7 = vld [vmem:[#allocation19_spill] sm:$0xff]  ;;  %v301_v34 = vld [vmem:[%s28310_s0 + $0x808] sm:$0xff] }
 0x21e   :  { %28432 = vst [vmem:[#allocation16_spill] sm:$0xff] %v22671_v48  ;;  %v2295_v42 = vmax.f32 %v1205_v30, 0.0  ;;  %v790_v47 = vadd.f32 %v22683_v63, %v28435_v7 }
 0x21f   :  { %28433 = vst [vmem:[#allocation17_spill] sm:$0xff] %v22674_v56  ;;  %v2294_v2 = vmax.f32 %v1200_v11, 0.0  ;;  %v16260_v62 = vpop.f32.mrb[148].mxu0  ;;  %v2213_v55 = vmax.f32 %v795_v38, 0.0  ;;  %v805_v11 = vadd.f32 %v22683_v63, %v28438_v54 }
 0x220   :  { %v22692_v0 = vmax.f32 %v2211_v1, %v2295_v42  ;;  %v1215_v26 = vadd.f32 %v22683_v63, %v16260_v62  ;;  %v1209_v56 = vpop.f32.mrb[149].mxu0  ;;  %16418 = vmatmul.mubr.f32.gmra.mrb[254].mxu0 %v299_v23  ;;  %v302_v1 = vld [vmem:[%s28310_s0 + $0x810] sm:$0xff]  ;;  %v2212_v42 = vmax.f32 %v790_v47, 0.0  ;;  %v303_v47 = vld [vmem:[%s28310_s0 + $0x818] sm:$0xff] }
 0x221   :  { %v22695_v48 = vmax.f32 %v2210_v35, %v2294_v2  ;;  %v1210_v30 = vadd.f32 %v22683_v63, %v1209_v56  ;;  %16420 = vmatprep.mubr.f32.mxu0 %v300_v46  ;;  %v28439_v23 = vld [vmem:[#allocation21_spill] sm:$0xff] }
 0x222   :  { %28436 = vst [vmem:[#allocation18_spill] sm:$0xff] %v22692_v0  ;;  %v2297_v7 = vmax.f32 %v1215_v26, 0.0  ;;  %v800_v35 = vadd.f32 %v22683_v63, %v28439_v23  ;;  %v2215_v26 = vmax.f32 %v805_v11, 0.0  ;;  %v28442_v0 = vld [vmem:[#allocation22_spill] sm:$0xff] }
 0x223   :  { %28437 = vst [vmem:[#allocation19_spill] sm:$0xff] %v22695_v48  ;;  %v2296_v2 = vmax.f32 %v1210_v30, 0.0  ;;  %v16263_v56 = vpop.f32.mrb[150].mxu0  ;;  %v815_v30 = vadd.f32 %v22683_v63, %v28442_v0 }
 0x224   :  { %v22708_v46 = vmax.f32 %v2213_v55, %v2297_v7  ;;  %v1225_v62 = vadd.f32 %v22683_v63, %v16263_v56  ;;  %v1219_v48 = vpop.f32.mrb[151].mxu0  ;;  %16421 = vmatmul.mubr.f32.gmra.mrb[0].mxu0 %v301_v34  ;;  %v304_v55 = vld [vmem:[%s28310_s0 + $0x820] sm:$0xff]  ;;  %v2214_v7 = vmax.f32 %v800_v35, 0.0  ;;  %v305_v35 = vld [vmem:[%s28310_s0 + $0x828] sm:$0xff] }
 0x225   :  { %v22711_v38 = vmax.f32 %v2212_v42, %v2296_v2  ;;  %v1220_v54 = vadd.f32 %v22683_v63, %v1219_v48  ;;  %16423 = vmatprep.mubr.f32.mxu0 %v302_v1  ;;  %v28443_v34 = vld [vmem:[#allocation23_spill] sm:$0xff] }
 0x226   :  { %28440 = vst [vmem:[#allocation20_spill] sm:$0xff] %v22708_v46  ;;  %v2299_v23 = vmax.f32 %v1225_v62, 0.0  ;;  %v810_v42 = vadd.f32 %v22683_v63, %v28443_v34  ;;  %v2217_v62 = vmax.f32 %v815_v30, 0.0  ;;  %v28446_v46 = vld [vmem:[#allocation24_spill] sm:$0xff] }
 0x227   :  { %28441 = vst [vmem:[#allocation21_spill] sm:$0xff] %v22711_v38  ;;  %v2298_v2 = vmax.f32 %v1220_v54, 0.0  ;;  %v16266_v48 = vpop.f32.mrb[152].mxu0  ;;  %v825_v54 = vadd.f32 %v22683_v63, %v28446_v46 }
 0x228   :  { %v22724_v1 = vmax.f32 %v2215_v26, %v2299_v23  ;;  %v1235_v56 = vadd.f32 %v22683_v63, %v16266_v48  ;;  %v1229_v38 = vpop.f32.mrb[153].mxu0  ;;  %16424 = vmatmul.mubr.f32.gmra.mrb[2].mxu0 %v303_v47  ;;  %v306_v26 = vld [vmem:[%s28310_s0 + $0x830] sm:$0xff]  ;;  %v2216_v23 = vmax.f32 %v810_v42, 0.0  ;;  %v307_v42 = vld [vmem:[%s28310_s0 + $0x838] sm:$0xff] }
 0x229   :  { %v22727_v11 = vmax.f32 %v2214_v7, %v2298_v2  ;;  %v1230_v0 = vadd.f32 %v22683_v63, %v1229_v38  ;;  %16426 = vmatprep.mubr.f32.mxu0 %v304_v55  ;;  %v28447_v47 = vld [vmem:[#allocation25_spill] sm:$0xff] }
 0x22a   :  { %28444 = vst [vmem:[#allocation22_spill] sm:$0xff] %v22724_v1  ;;  %v2301_v34 = vmax.f32 %v1235_v56, 0.0  ;;  %v820_v7 = vadd.f32 %v22683_v63, %v28447_v47  ;;  %v2219_v56 = vmax.f32 %v825_v54, 0.0  ;;  %v28450_v1 = vld [vmem:[#allocation26_spill] sm:$0xff] }
 0x22b   :  { %28445 = vst [vmem:[#allocation23_spill] sm:$0xff] %v22727_v11  ;;  %v2300_v2 = vmax.f32 %v1230_v0, 0.0  ;;  %v16269_v38 = vpop.f32.mrb[154].mxu0  ;;  %v835_v0 = vadd.f32 %v22683_v63, %v28450_v1 }
 0x22c   :  { %v22740_v55 = vmax.f32 %v2217_v62, %v2301_v34  ;;  %v1245_v48 = vadd.f32 %v22683_v63, %v16269_v38  ;;  %v1239_v11 = vpop.f32.mrb[155].mxu0  ;;  %16427 = vmatmul.mubr.f32.gmra.mrb[4].mxu0 %v305_v35  ;;  %v308_v62 = vld [vmem:[%s28310_s0 + $0x840] sm:$0xff]  ;;  %v2218_v34 = vmax.f32 %v820_v7, 0.0  ;;  %v309_v7 = vld [vmem:[%s28310_s0 + $0x848] sm:$0xff] }
 0x22d   :  { %v22743_v30 = vmax.f32 %v2216_v23, %v2300_v2  ;;  %v1240_v46 = vadd.f32 %v22683_v63, %v1239_v11  ;;  %16429 = vmatprep.mubr.f32.mxu0 %v306_v26  ;;  %v28451_v35 = vld [vmem:[#allocation27_spill] sm:$0xff] }
 0x22e   :  { %28448 = vst [vmem:[#allocation24_spill] sm:$0xff] %v22740_v55  ;;  %v2303_v47 = vmax.f32 %v1245_v48, 0.0  ;;  %v830_v23 = vadd.f32 %v22683_v63, %v28451_v35  ;;  %v2221_v48 = vmax.f32 %v835_v0, 0.0  ;;  %v28454_v55 = vld [vmem:[#allocation28_spill] sm:$0xff] }
 0x22f   :  { %28449 = vst [vmem:[#allocation25_spill] sm:$0xff] %v22743_v30  ;;  %v2302_v2 = vmax.f32 %v1240_v46, 0.0  ;;  %v16272_v11 = vpop.f32.mrb[156].mxu0  ;;  %v845_v46 = vadd.f32 %v22683_v63, %v28454_v55 }
 0x230   :  { %v22756_v26 = vmax.f32 %v2219_v56, %v2303_v47  ;;  %v1255_v38 = vadd.f32 %v22683_v63, %v16272_v11  ;;  %v1249_v30 = vpop.f32.mrb[157].mxu0  ;;  %16430 = vmatmul.mubr.f32.gmra.mrb[6].mxu0 %v307_v42  ;;  %v310_v56 = vld [vmem:[%s28310_s0 + $0x850] sm:$0xff]  ;;  %v2220_v47 = vmax.f32 %v830_v23, 0.0  ;;  %v311_v23 = vld [vmem:[%s28310_s0 + $0x858] sm:$0xff] }
 0x231   :  { %v22759_v54 = vmax.f32 %v2218_v34, %v2302_v2  ;;  %v1250_v1 = vadd.f32 %v22683_v63, %v1249_v30  ;;  %16432 = vmatprep.mubr.f32.mxu0 %v308_v62  ;;  %v28455_v42 = vld [vmem:[#allocation29_spill] sm:$0xff] }
 0x232   :  { %28452 = vst [vmem:[#allocation26_spill] sm:$0xff] %v22756_v26  ;;  %v2305_v35 = vmax.f32 %v1255_v38, 0.0  ;;  %v840_v34 = vadd.f32 %v22683_v63, %v28455_v42  ;;  %v2223_v38 = vmax.f32 %v845_v46, 0.0  ;;  %v28458_v26 = vld [vmem:[#allocation30_spill] sm:$0xff] }
 0x233   :  { %28453 = vst [vmem:[#allocation27_spill] sm:$0xff] %v22759_v54  ;;  %v2304_v2 = vmax.f32 %v1250_v1, 0.0  ;;  %v16275_v30 = vpop.f32.mrb[158].mxu0  ;;  %v855_v1 = vadd.f32 %v22683_v63, %v28458_v26 }
 0x234   :  { %v22772_v62 = vmax.f32 %v2221_v48, %v2305_v35  ;;  %v1265_v11 = vadd.f32 %v22683_v63, %v16275_v30  ;;  %v1259_v54 = vpop.f32.mrb[159].mxu0  ;;  %16433 = vmatmul.mubr.f32.gmra.mrb[8].mxu0 %v309_v7  ;;  %v312_v48 = vld [vmem:[%s28310_s0 + $0x860] sm:$0xff]  ;;  %v2222_v35 = vmax.f32 %v840_v34, 0.0  ;;  %v313_v34 = vld [vmem:[%s28310_s0 + $0x868] sm:$0xff] }
 0x235   :  { %v22775_v0 = vmax.f32 %v2220_v47, %v2304_v2  ;;  %v1260_v55 = vadd.f32 %v22683_v63, %v1259_v54  ;;  %16435 = vmatprep.mubr.f32.mxu0 %v310_v56  ;;  %v28459_v7 = vld [vmem:[#allocation31_spill] sm:$0xff] }
 0x236   :  { %28456 = vst [vmem:[#allocation28_spill] sm:$0xff] %v22772_v62  ;;  %v2307_v42 = vmax.f32 %v1265_v11, 0.0  ;;  %v850_v47 = vadd.f32 %v22683_v63, %v28459_v7  ;;  %v2225_v11 = vmax.f32 %v855_v1, 0.0  ;;  %v28462_v62 = vld [vmem:[#allocation32_spill] sm:$0xff] }
 0x237   :  { %28457 = vst [vmem:[#allocation29_spill] sm:$0xff] %v22775_v0  ;;  %v2306_v2 = vmax.f32 %v1260_v55, 0.0  ;;  %v16278_v54 = vpop.f32.mrb[160].mxu0  ;;  %v865_v55 = vadd.f32 %v22683_v63, %v28462_v62 }
 0x238   :  { %v22788_v56 = vmax.f32 %v2223_v38, %v2307_v42  ;;  %v1275_v30 = vadd.f32 %v22683_v63, %v16278_v54  ;;  %v1269_v0 = vpop.f32.mrb[161].mxu0  ;;  %16436 = vmatmul.mubr.f32.gmra.mrb[10].mxu0 %v311_v23  ;;  %v314_v38 = vld [vmem:[%s28310_s0 + $0x870] sm:$0xff]  ;;  %v2224_v42 = vmax.f32 %v850_v47, 0.0  ;;  %v315_v47 = vld [vmem:[%s28310_s0 + $0x878] sm:$0xff] }
 0x239   :  { %v22791_v46 = vmax.f32 %v2222_v35, %v2306_v2  ;;  %v1270_v26 = vadd.f32 %v22683_v63, %v1269_v0  ;;  %16438 = vmatprep.mubr.f32.mxu0 %v312_v48  ;;  %v28463_v23 = vld [vmem:[#allocation33_spill] sm:$0xff] }
 0x23a   :  { %28460 = vst [vmem:[#allocation30_spill] sm:$0xff] %v22788_v56  ;;  %v2309_v7 = vmax.f32 %v1275_v30, 0.0  ;;  %v860_v35 = vadd.f32 %v22683_v63, %v28463_v23  ;;  %v2227_v30 = vmax.f32 %v865_v55, 0.0  ;;  %v28466_v23 = vld [vmem:[#allocation34_spill] sm:$0xff] }
 0x23b   :  { %28461 = vst [vmem:[#allocation31_spill] sm:$0xff] %v22791_v46  ;;  %v2308_v2 = vmax.f32 %v1270_v26, 0.0  ;;  %v16281_v0 = vpop.f32.mrb[162].mxu0  ;;  %v875_v26 = vadd.f32 %v22683_v63, %v28466_v23 }
 0x23c   :  { %v22804_v48 = vmax.f32 %v2225_v11, %v2309_v7  ;;  %v1285_v54 = vadd.f32 %v22683_v63, %v16281_v0  ;;  %v1279_v46 = vpop.f32.mrb[163].mxu0  ;;  %16439 = vmatmul.mubr.f32.gmra.mrb[12].mxu0 %v313_v34  ;;  %v316_v11 = vld [vmem:[%s28310_s0 + $0x880] sm:$0xff]  ;;  %v2226_v7 = vmax.f32 %v860_v35, 0.0  ;;  %v317_v35 = vld [vmem:[%s28310_s0 + $0x888] sm:$0xff] }
 0x23d   :  { %v22807_v1 = vmax.f32 %v2224_v42, %v2308_v2  ;;  %v1280_v62 = vadd.f32 %v22683_v63, %v1279_v46  ;;  %16441 = vmatprep.mubr.f32.mxu0 %v314_v38  ;;  %v28467_v2 = vld [vmem:[#allocation35_spill] sm:$0xff] }
 0x23e   :  { %28464 = vst [vmem:[#allocation32_spill] sm:$0xff] %v22804_v48  ;;  %v2311_v56 = vmax.f32 %v1285_v54, 0.0  ;;  %v870_v46 = vadd.f32 %v22683_v63, %v28467_v2  ;;  %v28470_v48 = vld [vmem:[#allocation36_spill] sm:$0xff] }
 0x23f   :  { %28465 = vst [vmem:[#allocation33_spill] sm:$0xff] %v22807_v1  ;;  %v2310_v34 = vmax.f32 %v1280_v62, 0.0  ;;  %v16284_v42 = vpop.f32.mrb[164].mxu0  ;;  %v2229_v62 = vmax.f32 %v875_v26, 0.0  ;;  %v885_v2 = vadd.f32 %v22683_v63, %v28470_v48 }
 0x240   :  { %v22820_v38 = vmax.f32 %v2227_v30, %v2311_v56  ;;  %v1295_v0 = vadd.f32 %v22683_v63, %v16284_v42  ;;  %v1289_v1 = vpop.f32.mrb[165].mxu0  ;;  %16442 = vmatmul.mubr.f32.gmra.mrb[14].mxu0 %v315_v47  ;;  %v318_v56 = vld [vmem:[%s28310_s0 + $0x890] sm:$0xff]  ;;  %v2228_v30 = vmax.f32 %v870_v46, 0.0  ;;  %v319_v46 = vld [vmem:[%s28310_s0 + $0x898] sm:$0xff] }
 0x241   :  { %v22823_v55 = vmax.f32 %v2226_v7, %v2310_v34  ;;  %v1290_v54 = vadd.f32 %v22683_v63, %v1289_v1  ;;  %16444 = vmatprep.mubr.f32.mxu0 %v316_v11  ;;  %v28471_v34 = vld [vmem:[#allocation37_spill] sm:$0xff] }
 0x242   :  { %28468 = vst [vmem:[#allocation34_spill] sm:$0xff] %v22820_v38  ;;  %v2313_v23 = vmax.f32 %v1295_v0, 0.0  ;;  %v880_v1 = vadd.f32 %v22683_v63, %v28471_v34  ;;  %v2231_v0 = vmax.f32 %v885_v2, 0.0  ;;  %v321_v2 = vld [vmem:[%s28310_s0 + $0x8a8] sm:$0xff] }
 0x243   :  { %28469 = vst [vmem:[#allocation35_spill] sm:$0xff] %v22823_v55  ;;  %v2312_v47 = vmax.f32 %v1290_v54, 0.0  ;;  %v16287_v7 = vpop.f32.mrb[166].mxu0 }
 0x244   :  { %v22836_v11 = vmax.f32 %v2229_v62, %v2313_v23  ;;  %v1305_v42 = vadd.f32 %v22683_v63, %v16287_v7  ;;  %v1299_v55 = vpop.f32.mrb[167].mxu0  ;;  %16445 = vmatmul.mubr.f32.gmra.mrb[16].mxu0 %v317_v35  ;;  %v320_v62 = vld [vmem:[%s28310_s0 + $0x8a0] sm:$0xff]  ;;  %v2230_v23 = vmax.f32 %v880_v1, 0.0 }
 0x245   :  { %v22839_v26 = vmax.f32 %v2228_v30, %v2312_v47  ;;  %v1300_v48 = vadd.f32 %v22683_v63, %v1299_v55  ;;  %16447 = vmatprep.mubr.f32.mxu0 %v318_v56  ;;  %v322_v56 = vld [vmem:[%s28310_s0 + $0x8b0] sm:$0xff] }
 0x246   :  { %28472 = vst [vmem:[#allocation36_spill] sm:$0xff] %v22836_v11  ;;  %v2315_v54 = vmax.f32 %v1305_v42, 0.0  ;;  %v323_v42 = vld [vmem:[%s28310_s0 + $0x8b8] sm:$0xff]  ;;  %v13344_v11 = vld [vmem:[%s28312_s5 + $0x88] sm:$0xff] }
 0x247   :  { %28473 = vst [vmem:[#allocation37_spill] sm:$0xff] %v22839_v26  ;;  %v2314_v34 = vmax.f32 %v1300_v48, 0.0  ;;  %v22848_v7 = vpop.f32.mrb[168].mxu0  ;;  %v324_v48 = vld [vmem:[%s28310_s0 + $0x8c0] sm:$0xff]  ;;  %v331_v26 = vld [vmem:[%s28310_s0 + $0x8f8] sm:$0xff] }
 0x248   :  { %v22850_v35 = vmax.f32 %v2231_v0, %v2315_v54  ;;  %v22852_v30 = vpop.f32.mrb[169].mxu0  ;;  %16448 = vmatmul.mubr.f32.gmra.mrb[18].mxu0 %v319_v46  ;;  %v325_v54 = vld [vmem:[%s28310_s0 + $0x8c8] sm:$0xff] }
 0x249   :  { %v22854_v55 = vmax.f32 %v2230_v23, %v2314_v34  ;;  %16450 = vmatprep.mubr.f32.mxu0 %v320_v62  ;;  %v326_v62 = vld [vmem:[%s28310_s0 + $0x8d0] sm:$0xff] }
 0x24a   :  { %28474 = vst [vmem:[#allocation65_spill] sm:$0xff] %v22850_v35 }
 0x24b   :  { %28475 = vst [vmem:[#allocation66_spill] sm:$0xff] %v22854_v55  ;;  %v22862_v47 = vpop.f32.mrb[170].mxu0  ;;  %v329_v55 = vld [vmem:[%s28310_s0 + $0x8e8] sm:$0xff] }
 0x24c   :  { %v22864_v1 = vpop.f32.mrb[171].mxu0  ;;  %16451 = vmatmul.mubr.f32.gmra.mrb[20].mxu0 %v321_v2  ;;  %v327_v2 = vld [vmem:[%s28310_s0 + $0x8d8] sm:$0xff] }
 0x24d   :  { %16453 = vmatprep.mubr.f32.mxu0 %v322_v56  ;;  %v328_v56 = vld [vmem:[%s28310_s0 + $0x8e0] sm:$0xff] }
 0x24f   :  { %v22872_v46 = vpop.f32.mrb[172].mxu0 }
 0x250   :  { %v22874_v0 = vpop.f32.mrb[173].mxu0  ;;  %16454 = vmatmul.mubr.f32.gmra.mrb[22].mxu0 %v323_v42 }
 0x251   :  { %16456 = vmatprep.mubr.f32.mxu0 %v324_v48 }
 0x253   :  { %v22882_v23 = vpop.f32.mrb[174].mxu0 }
 0x254   :  { %v22884_v34 = vpop.f32.mrb[175].mxu0  ;;  %16457 = vmatmul.mubr.f32.gmra.mrb[24].mxu0 %v325_v54  ;;  %v330_v54 = vld [vmem:[%s28310_s0 + $0x8f0] sm:$0xff] }
 0x255   :  { %16459 = vmatprep.mubr.f32.mxu0 %v326_v62 }
 0x257   :  { %v22892_v42 = vpop.f32.mrb[176].mxu0 }
 0x258   :  { %v22894_v48 = vpop.f32.mrb[177].mxu0  ;;  %16460 = vmatmul.mubr.f32.gmra.mrb[26].mxu0 %v327_v2  ;;  %v332_v2 = vld [vmem:[%s28310_s0 + $0x900] sm:$0xff] }
 0x259   :  { %16462 = vmatprep.mubr.f32.mxu0 %v328_v56  ;;  %v13343_v56 = vld [vmem:[%s28312_s5 + $0x80] sm:$0xff] }
 0x25b   :  { %v22902_v62 = vpop.f32.mrb[178].mxu0 }
 0x25c   :  { %v22904_v35 = vpop.f32.mrb[179].mxu0  ;;  %16463 = vmatmul.mubr.f32.gmra.mrb[28].mxu0 %v329_v55  ;;  %v18977_v55 = vpack.c.bf16 %v13344_v11, %v13343_v56  ;;  %v13346_v11 = vld [vmem:[%s28312_s5 + $0x98] sm:$0xff] }
 0x25d   :  { %16465 = vmatprep.mubr.f32.mxu0 %v330_v54 }
 0x25e   :  { %18978 = vmatprep.subr.bf16.mxu0 %v18977_v55 }
 0x25f   :  { %v22918_v38 = vpop.f32.mrb[180].mxu0  ;;  %18980 = vmatpush3.bf16.msra.mxu0 %v18977_v55  ;;  %v336_v55 = vld [vmem:[%s28310_s0 + $0x920] sm:$0xff] }
 0x260   :  { %v22920_v54 = vpop.f32.mrb[181].mxu0  ;;  %16466 = vmatmul.mubr.f32.gmra.mrb[30].mxu0 %v331_v26 }
 0x261   :  { %16468 = vmatprep.mubr.f32.mxu0 %v332_v2  ;;  %v18981_v2 = vpack.c.bf16 %v13346_v11, %v13345_v31  ;;  %v13348_v31 = vld [vmem:[%s28312_s5 + $0xa8] sm:$0xff] }
 0x263   :  { %v22934_v26 = vpop.f32.mrb[182].mxu0  ;;  %18982 = vmatprep.subr.bf16.mxu0 %v18981_v2 }
 0x264   :  { %v22936_v56 = vpop.f32.mrb[183].mxu0  ;;  %16469 = vmatmul.mubr.f32.gmra.mrb[32].mxu0 %v333_v39 }
 0x265   :  { %16471 = vmatprep.mubr.f32.mxu0 %v334_v40  ;;  %18984 = vmatpush3.bf16.msra.mxu0 %v18981_v2  ;;  %v18985_v40 = vpack.c.bf16 %v13348_v31, %v13347_v8  ;;  %v338_v2 = vld [vmem:[%s28310_s0 + $0x930] sm:$0xff]  ;;  %v13350_v8 = vld [vmem:[%s28312_s5 + $0xb8] sm:$0xff] }
 0x267   :  { %v22950_v39 = vpop.f32.mrb[184].mxu0  ;;  %18986 = vmatprep.subr.bf16.mxu0 %v18985_v40 }
 0x268   :  { %v22952_v11 = vpop.f32.mrb[185].mxu0  ;;  %16472 = vmatmul.mubr.f32.gmra.mrb[34].mxu0 %v335_v32 }
 0x269   :  { %16474 = vmatprep.mubr.f32.mxu0 %v336_v55  ;;  %18988 = vmatpush3.bf16.msra.mxu0 %v18985_v40  ;;  %v18989_v55 = vpack.c.bf16 %v13350_v8, %v13349_v15  ;;  %v340_v40 = vld [vmem:[%s28310_s0 + $0x940] sm:$0xff]  ;;  %v13352_v15 = vld [vmem:[%s28312_s5 + $0xc8] sm:$0xff] }
 0x26a   :  { %v13391_v8 = vld [vmem:[%s28312_s5 + $0x200] sm:$0xff] }
 0x26b   :  { %v22966_v32 = vpop.f32.mrb[186].mxu0  ;;  %18990 = vmatprep.subr.bf16.mxu0 %v18989_v55  ;;  %v19105_v61 = vpack.c.bf16 %v13392_v50, %v13391_v8  ;;  %v13354_v50 = vld [vmem:[%s28312_s5 + $0xd8] sm:$0xff]  ;;  %v13393_v8 = vld [vmem:[%s28312_s5 + $0x210] sm:$0xff] }
 0x26c   :  { %v22968_v31 = vpop.f32.mrb[187].mxu0  ;;  %16475 = vmatmul.mubr.f32.gmra.mrb[36].mxu0 %v337_v24 }
 0x26d   :  { %16477 = vmatprep.mubr.f32.mxu0 %v338_v2  ;;  %18992 = vmatpush3.bf16.msra.mxu0 %v18989_v55  ;;  %v18993_v2 = vpack.c.bf16 %v13352_v15, %v13351_v58  ;;  %v342_v58 = vld [vmem:[%s28310_s0 + $0x950] sm:$0xff] }
 0x26e   :  { %19106 = vmatprep.subr.bf16.mxu1 %v19105_v61  ;;  %v13353_v15 = vld [vmem:[%s28312_s5 + $0xd0] sm:$0xff] }
 0x26f   :  { %v22982_v24 = vpop.f32.mrb[188].mxu0  ;;  %18994 = vmatprep.subr.bf16.mxu0 %v18993_v2  ;;  %19108 = vmatpush3.bf16.msra.mxu1 %v19105_v61  ;;  %v344_v61 = vld [vmem:[%s28310_s0 + $0x960] sm:$0xff] }
 0x270   :  { %v22990_v55 = vpop.f32.mrb[189].mxu0  ;;  %16478 = vmatmul.mubr.f32.gmra.mrb[38].mxu0 %v339_v16 }
 0x271   :  { %16480 = vmatprep.mubr.f32.mxu0 %v340_v40  ;;  %18996 = vmatpush3.bf16.msra.mxu0 %v18993_v2  ;;  %v18997_v40 = vpack.c.bf16 %v13354_v50, %v13353_v15  ;;  %v13394_v2 = vld [vmem:[%s28312_s5 + $0x218] sm:$0xff]  ;;  %v13355_v15 = vld [vmem:[%s28312_s5 + $0xe0] sm:$0xff] }
 0x272   :  { %v19109_v53 = vpack.c.bf16 %v13394_v2, %v13393_v8  ;;  %v13395_v8 = vld [vmem:[%s28312_s5 + $0x220] sm:$0xff] }
 0x273   :  { %v23004_v16 = vpop.f32.mrb[190].mxu0  ;;  %18998 = vmatprep.subr.bf16.mxu0 %v18997_v40 }
 0x274   :  { %v23012_v22 = vpop.f32.mrb[191].mxu0  ;;  %16481 = vmatmul.mubr.f32.gmra.mrb[40].mxu0 %v341_v57  ;;  %19110 = vmatprep.subr.bf16.mxu1 %v19109_v53  ;;  %v13356_v57 = vld [vmem:[%s28312_s5 + $0xe8] sm:$0xff] }
 0x275   :  { %16483 = vmatprep.mubr.f32.mxu0 %v342_v58  ;;  %19000 = vmatpush3.bf16.msra.mxu0 %v18997_v40  ;;  %v19001_v50 = vpack.c.bf16 %v13356_v57, %v13355_v15  ;;  %v13396_v40 = vld [vmem:[%s28312_s5 + $0x228] sm:$0xff]  ;;  %v13357_v15 = vld [vmem:[%s28312_s5 + $0xf0] sm:$0xff] }
 0x276   :  { %19112 = vmatpush3.bf16.msra.mxu1 %v19109_v53  ;;  %v19113_v49 = vpack.c.bf16 %v13396_v40, %v13395_v8  ;;  %v346_v53 = vld [vmem:[%s28310_s0 + $0x970] sm:$0xff] }
 0x277   :  { %v23026_v58 = vpop.f32.mrb[192].mxu0  ;;  %19002 = vmatprep.subr.bf16.mxu0 %v19001_v50  ;;  %v13397_v8 = vld [vmem:[%s28312_s5 + $0x230] sm:$0xff] }
 0x278   :  { %v23034_v2 = vpop.f32.mrb[193].mxu0  ;;  %16484 = vmatmul.mubr.f32.gmra.mrb[42].mxu0 %v343_v18  ;;  %19114 = vmatprep.subr.bf16.mxu1 %v19113_v49  ;;  %v13358_v18 = vld [vmem:[%s28312_s5 + $0xf8] sm:$0xff] }
 0x279   :  { %28476 = vst [vmem:[#allocation67_spill] sm:$0xff] %v23034_v2  ;;  %16486 = vmatprep.mubr.f32.mxu0 %v344_v61  ;;  %19004 = vmatpush3.bf16.msra.mxu0 %v19001_v50  ;;  %v19005_v57 = vpack.c.bf16 %v13358_v18, %v13357_v15  ;;  %v13398_v50 = vld [vmem:[%s28312_s5 + $0x238] sm:$0xff] }
 0x27a   :  { %19116 = vmatpush3.bf16.msra.mxu1 %v19113_v49  ;;  %v19117_v45 = vpack.c.bf16 %v13398_v50, %v13397_v8  ;;  %v348_v49 = vld [vmem:[%s28310_s0 + $0x980] sm:$0xff] }
 0x27b   :  { %v23048_v61 = vpop.f32.mrb[194].mxu0  ;;  %19006 = vmatprep.subr.bf16.mxu0 %v19005_v57 }
 0x27c   :  { %28477 = vst [vmem:[#allocation68_spill] sm:$0xff] %v23048_v61  ;;  %v23056_v40 = vpop.f32.mrb[195].mxu0  ;;  %16487 = vmatmul.mubr.f32.gmra.mrb[44].mxu0 %v345_v14  ;;  %19118 = vmatprep.subr.bf16.mxu1 %v19117_v45  ;;  %v13399_v14 = vld [vmem:[%s28312_s5 + $0x240] sm:$0xff] }
 0x27d   :  { %28478 = vst [vmem:[#allocation69_spill] sm:$0xff] %v23056_v40  ;;  %16489 = vmatprep.mubr.f32.mxu0 %v346_v53  ;;  %19008 = vmatpush3.bf16.msra.mxu0 %v19005_v57  ;;  %v13400_v53 = vld [vmem:[%s28312_s5 + $0x248] sm:$0xff] }
 0x27e   :  { %19120 = vmatpush3.bf16.msra.mxu1 %v19117_v45  ;;  %v19121_v8 = vpack.c.bf16 %v13400_v53, %v13399_v14  ;;  %v349_v57 = vld [vmem:[%s28310_s0 + $0x988] sm:$0xff]  ;;  %v350_v45 = vld [vmem:[%s28310_s0 + $0x990] sm:$0xff]  ;;  %v351_v53 = vld [vmem:[%s28310_s0 + $0x998] sm:$0xff] }
 0x27f   :  { %v23064_v15 = vpop.f32.mrb[196].mxu0 }
 0x280   :  { %28479 = vst [vmem:[#allocation70_spill] sm:$0xff] %v23064_v15  ;;  %v23072_v18 = vpop.f32.mrb[197].mxu0  ;;  %16490 = vmatmul.mubr.f32.gmra.mrb[46].mxu0 %v347_v12  ;;  %19122 = vmatprep.subr.bf16.mxu1 %v19121_v8  ;;  %v13402_v12 = vld [vmem:[%s28312_s5 + $0x258] sm:$0xff] }
 0x281   :  { %28480 = vst [vmem:[#allocation71_spill] sm:$0xff] %v23072_v18  ;;  %16492 = vmatprep.mubr.f32.mxu0 %v348_v49  ;;  %v19125_v14 = vpack.c.bf16 %v13402_v12, %v13401_v41  ;;  %v13403_v18 = vld [vmem:[%s28312_s5 + $0x260] sm:$0xff]  ;;  %v13404_v41 = vld [vmem:[%s28312_s5 + $0x268] sm:$0xff] }
 0x282   :  { %19124 = vmatpush3.bf16.msra.mxu1 %v19121_v8  ;;  %v352_v8 = vld [vmem:[%s28310_s0 + $0x9a0] sm:$0xff]  ;;  %v353_v12 = vld [vmem:[%s28310_s0 + $0x9a8] sm:$0xff] }
 0x283   :  { %v23080_v50 = vpop.f32.mrb[198].mxu0  ;;  %19126 = vmatprep.subr.bf16.mxu1 %v19125_v14 }
 0x284   :  { %28481 = vst [vmem:[#allocation72_spill] sm:$0xff] %v23080_v50  ;;  %v23088_v49 = vpop.f32.mrb[199].mxu0  ;;  %16493 = vmatmul.mubr.f32.gmra.mrb[48].mxu0 %v349_v57 }
 0x285   :  { %28482 = vst [vmem:[#allocation73_spill] sm:$0xff] %v23088_v49  ;;  %16495 = vmatprep.mubr.f32.mxu0 %v350_v45  ;;  %v19129_v45 = vpack.c.bf16 %v13404_v41, %v13403_v18  ;;  %v13405_v49 = vld [vmem:[%s28312_s5 + $0x270] sm:$0xff]  ;;  %v13406_v18 = vld [vmem:[%s28312_s5 + $0x278] sm:$0xff] }
 0x286   :  { %19128 = vmatpush3.bf16.msra.mxu1 %v19125_v14  ;;  %v354_v14 = vld [vmem:[%s28310_s0 + $0x9b0] sm:$0xff]  ;;  %v355_v41 = vld [vmem:[%s28310_s0 + $0x9b8] sm:$0xff] }
 0x287   :  { %v23096_v50 = vpop.f32.mrb[200].mxu0  ;;  %19130 = vmatprep.subr.bf16.mxu1 %v19129_v45 }
 0x288   :  { %28483 = vst [vmem:[#allocation74_spill] sm:$0xff] %v23096_v50  ;;  %v23104_v57 = vpop.f32.mrb[201].mxu0  ;;  %16496 = vmatmul.mubr.f32.gmra.mrb[50].mxu0 %v351_v53 }
 0x289   :  { %28484 = vst [vmem:[#allocation75_spill] sm:$0xff] %v23104_v57  ;;  %16498 = vmatprep.mubr.f32.mxu0 %v352_v8  ;;  %v19133_v8 = vpack.c.bf16 %v13406_v18, %v13405_v49  ;;  %v357_v49 = vld [vmem:[%s28310_s0 + $0x9c8] sm:$0xff] }
 0x28a   :  { %19132 = vmatpush3.bf16.msra.mxu1 %v19129_v45  ;;  %v356_v45 = vld [vmem:[%s28310_s0 + $0x9c0] sm:$0xff] }
 0x28b   :  { %v23112_v50 = vpop.f32.mrb[202].mxu0  ;;  %19134 = vmatprep.subr.bf16.mxu1 %v19133_v8 }
 0x28c   :  { %28485 = vst [vmem:[#allocation76_spill] sm:$0xff] %v23112_v50  ;;  %v23120_v53 = vpop.f32.mrb[203].mxu0  ;;  %16499 = vmatmul.mubr.f32.gmra.mrb[52].mxu0 %v353_v12  ;;  %v358_v12 = vld [vmem:[%s28310_s0 + $0x9d0] sm:$0xff] }
 0x28d   :  { %28486 = vst [vmem:[#allocation77_spill] sm:$0xff] %v23120_v53  ;;  %16501 = vmatprep.mubr.f32.mxu0 %v354_v14 }
 0x28e   :  { %19136 = vmatpush3.bf16.msra.mxu1 %v19133_v8  ;;  %v359_v8 = vld [vmem:[%s28310_s0 + $0x9d8] sm:$0xff] }
 0x28f   :  { %v23128_v50 = vpop.f32.mrb[204].mxu0 }
 0x290   :  { %28487 = vst [vmem:[#allocation78_spill] sm:$0xff] %v23128_v50  ;;  %v23130_v57 = vpop.f32.mrb[205].mxu0  ;;  %16502 = vmatmul.mubr.f32.gmra.mrb[54].mxu0 %v355_v41  ;;  %v360_v41 = vld [vmem:[%s28310_s0 + $0x9e0] sm:$0xff] }
 0x291   :  { %28488 = vst [vmem:[#allocation79_spill] sm:$0xff] %v23130_v57  ;;  %16504 = vmatprep.mubr.f32.mxu0 %v356_v45 }
 0x293   :  { %v23138_v14 = vpop.f32.mrb[206].mxu0 }
 0x294   :  { %28489 = vst [vmem:[#allocation80_spill] sm:$0xff] %v23138_v14  ;;  %v23140_v18 = vpop.f32.mrb[207].mxu0  ;;  %16505 = vmatmul.mubr.f32.gmra.mrb[56].mxu0 %v357_v49  ;;  %v362_v49 = vld [vmem:[%s28310_s0 + $0x9f0] sm:$0xff] }
 0x295   :  { %28490 = vst [vmem:[#allocation81_spill] sm:$0xff] %v23140_v18  ;;  %16507 = vmatprep.mubr.f32.mxu0 %v358_v12  ;;  %v361_v18 = vld [vmem:[%s28310_s0 + $0x9e8] sm:$0xff] }
 0x297   :  { %v23148_v45 = vpop.f32.mrb[208].mxu0 }
 0x298   :  { %28491 = vst [vmem:[#allocation82_spill] sm:$0xff] %v23148_v45  ;;  %v23150_v57 = vpop.f32.mrb[209].mxu0  ;;  %16508 = vmatmul.mubr.f32.gmra.mrb[58].mxu0 %v359_v8  ;;  %v364_v8 = vld [vmem:[%s28310_s0 + $0xa00] sm:$0xff] }
 0x299   :  { %28492 = vst [vmem:[#allocation83_spill] sm:$0xff] %v23150_v57  ;;  %16510 = vmatprep.mubr.f32.mxu0 %v360_v41  ;;  %v363_v57 = vld [vmem:[%s28310_s0 + $0x9f8] sm:$0xff] }
 0x29b   :  { %v23158_v12 = vpop.f32.mrb[210].mxu0 }
 0x29c   :  { %28493 = vst [vmem:[#allocation84_spill] sm:$0xff] %v23158_v12  ;;  %v23160_v14 = vpop.f32.mrb[211].mxu0  ;;  %16511 = vmatmul.mubr.f32.gmra.mrb[60].mxu0 %v361_v18  ;;  %v366_v18 = vld [vmem:[%s28310_s0 + $0xa10] sm:$0xff] }
 0x29d   :  { %28494 = vst [vmem:[#allocation85_spill] sm:$0xff] %v23160_v14  ;;  %16513 = vmatprep.mubr.f32.mxu0 %v362_v49  ;;  %v365_v14 = vld [vmem:[%s28310_s0 + $0xa08] sm:$0xff] }
 0x29f   :  { %v23168_v41 = vpop.f32.mrb[212].mxu0 }
 0x2a0   :  { %28495 = vst [vmem:[#allocation86_spill] sm:$0xff] %v23168_v41  ;;  %v23170_v45 = vpop.f32.mrb[213].mxu0  ;;  %16514 = vmatmul.mubr.f32.gmra.mrb[62].mxu0 %v363_v57  ;;  %v368_v57 = vld [vmem:[%s28310_s0 + $0xa20] sm:$0xff] }
 0x2a1   :  { %28496 = vst [vmem:[#allocation87_spill] sm:$0xff] %v23170_v45  ;;  %16516 = vmatprep.mubr.f32.mxu0 %v364_v8  ;;  %v367_v45 = vld [vmem:[%s28310_s0 + $0xa18] sm:$0xff] }
 0x2a3   :  { %v23178_v49 = vpop.f32.mrb[214].mxu0 }
 0x2a4   :  { %28497 = vst [vmem:[#allocation88_spill] sm:$0xff] %v23178_v49  ;;  %v23180_v12 = vpop.f32.mrb[215].mxu0  ;;  %16517 = vmatmul.mubr.f32.gmra.mrb[64].mxu0 %v365_v14  ;;  %v370_v14 = vld [vmem:[%s28310_s0 + $0xa30] sm:$0xff] }
 0x2a5   :  { %28498 = vst [vmem:[#allocation89_spill] sm:$0xff] %v23180_v12  ;;  %16519 = vmatprep.mubr.f32.mxu0 %v366_v18  ;;  %v369_v12 = vld [vmem:[%s28310_s0 + $0xa28] sm:$0xff] }
 0x2a7   :  { %v23188_v8 = vpop.f32.mrb[216].mxu0 }
 0x2a8   :  { %28499 = vst [vmem:[#allocation90_spill] sm:$0xff] %v23188_v8  ;;  %v23190_v41 = vpop.f32.mrb[217].mxu0  ;;  %16520 = vmatmul.mubr.f32.gmra.mrb[66].mxu0 %v367_v45  ;;  %v372_v45 = vld [vmem:[%s28310_s0 + $0xa40] sm:$0xff] }
 0x2a9   :  { %28500 = vst [vmem:[#allocation91_spill] sm:$0xff] %v23190_v41  ;;  %16522 = vmatprep.mubr.f32.mxu0 %v368_v57  ;;  %v371_v41 = vld [vmem:[%s28310_s0 + $0xa38] sm:$0xff] }
 0x2ab   :  { %v23198_v18 = vpop.f32.mrb[218].mxu0 }
 0x2ac   :  { %28501 = vst [vmem:[#allocation92_spill] sm:$0xff] %v23198_v18  ;;  %v23200_v49 = vpop.f32.mrb[219].mxu0  ;;  %16523 = vmatmul.mubr.f32.gmra.mrb[68].mxu0 %v369_v12  ;;  %v374_v12 = vld [vmem:[%s28310_s0 + $0xa50] sm:$0xff] }
 0x2ad   :  { %28502 = vst [vmem:[#allocation93_spill] sm:$0xff] %v23200_v49  ;;  %16525 = vmatprep.mubr.f32.mxu0 %v370_v14  ;;  %v373_v49 = vld [vmem:[%s28310_s0 + $0xa48] sm:$0xff] }
 0x2af   :  { %v23208_v57 = vpop.f32.mrb[220].mxu0 }
 0x2b0   :  { %28503 = vst [vmem:[#allocation94_spill] sm:$0xff] %v23208_v57  ;;  %v23210_v8 = vpop.f32.mrb[221].mxu0  ;;  %16526 = vmatmul.mubr.f32.gmra.mrb[70].mxu0 %v371_v41  ;;  %v376_v41 = vld [vmem:[%s28310_s0 + $0xa60] sm:$0xff] }
 0x2b1   :  { %28504 = vst [vmem:[#allocation95_spill] sm:$0xff] %v23210_v8  ;;  %16528 = vmatprep.mubr.f32.mxu0 %v372_v45  ;;  %v375_v8 = vld [vmem:[%s28310_s0 + $0xa58] sm:$0xff] }
 0x2b3   :  { %v23218_v14 = vpop.f32.mrb[222].mxu0 }
 0x2b4   :  { %28505 = vst [vmem:[#allocation96_spill] sm:$0xff] %v23218_v14  ;;  %v23220_v18 = vpop.f32.mrb[223].mxu0  ;;  %16529 = vmatmul.mubr.f32.gmra.mrb[72].mxu0 %v373_v49  ;;  %v378_v49 = vld [vmem:[%s28310_s0 + $0xa70] sm:$0xff] }
 0x2b5   :  { %28506 = vst [vmem:[#allocation97_spill] sm:$0xff] %v23220_v18  ;;  %16531 = vmatprep.mubr.f32.mxu0 %v374_v12  ;;  %v377_v18 = vld [vmem:[%s28310_s0 + $0xa68] sm:$0xff] }
 0x2b7   :  { %v23228_v45 = vpop.f32.mrb[224].mxu0 }
 0x2b8   :  { %28507 = vst [vmem:[#allocation98_spill] sm:$0xff] %v23228_v45  ;;  %v23230_v57 = vpop.f32.mrb[225].mxu0  ;;  %16532 = vmatmul.mubr.f32.gmra.mrb[74].mxu0 %v375_v8 }
 0x2b9   :  { %28508 = vst [vmem:[#allocation99_spill] sm:$0xff] %v23230_v57  ;;  %16534 = vmatprep.mubr.f32.mxu0 %v376_v41  ;;  %v379_v57 = vld [vmem:[%s28310_s0 + $0xa78] sm:$0xff] }
 0x2bb   :  { %v23238_v12 = vpop.f32.mrb[226].mxu0 }
 0x2bc   :  { %28509 = vst [vmem:[#allocation100_spill] sm:$0xff] %v23238_v12  ;;  %v23240_v14 = vpop.f32.mrb[227].mxu0  ;;  %16535 = vmatmul.mubr.f32.gmra.mrb[76].mxu0 %v377_v18 }
 0x2bd   :  { %28510 = vst [vmem:[#allocation101_spill] sm:$0xff] %v23240_v14  ;;  %16537 = vmatprep.mubr.f32.mxu0 %v378_v49 }
 0x2bf   :  { %v23245_v8 = vpop.f32.mrb[228].mxu0 }
 0x2c0   :  { %28511 = vst [vmem:[#allocation102_spill] sm:$0xff] %v23245_v8  ;;  %v23247_v41 = vpop.f32.mrb[229].mxu0  ;;  %16538 = vmatmul.mubr.f32.gmra.mrb[78].mxu0 %v379_v57 }
 0x2c1   :  { %28512 = vst [vmem:[#allocation103_spill] sm:$0xff] %v23247_v41 }
 0x2c3   :  { %v23249_v45 = vpop.f32.mrb[230].mxu0 }
 0x2c4   :  { %28513 = vst [vmem:[#allocation104_spill] sm:$0xff] %v23249_v45  ;;  %v23251_v50 = vpop.f32.mrb[231].mxu0 }
 0x2c5   :  { %28514 = vst [vmem:[#allocation105_spill] sm:$0xff] %v23251_v50 }
 0x2c7   :  { %v23253_v53 = vpop.f32.mrb[232].mxu0 }
 0x2c8   :  { %28515 = vst [vmem:[#allocation106_spill] sm:$0xff] %v23253_v53  ;;  %v23255_v12 = vpop.f32.mrb[233].mxu0 }
 0x2c9   :  { %28516 = vst [vmem:[#allocation107_spill] sm:$0xff] %v23255_v12 }
 0x2cb   :  { %v23257_v14 = vpop.f32.mrb[234].mxu0 }
 0x2cc   :  { %28517 = vst [vmem:[#allocation108_spill] sm:$0xff] %v23257_v14  ;;  %v23259_v18 = vpop.f32.mrb[235].mxu0 }
 0x2cd   :  { %28518 = vst [vmem:[#allocation109_spill] sm:$0xff] %v23259_v18 }
 0x2cf   :  { %v23261_v49 = vpop.f32.mrb[236].mxu0 }
 0x2d0   :  { %28519 = vst [vmem:[#allocation110_spill] sm:$0xff] %v23261_v49  ;;  %v23263_v27 = vpop.f32.mrb[237].mxu0 }
 0x2d1   :  { %28520 = vst [vmem:[#allocation111_spill] sm:$0xff] %v23263_v27 }
 0x2d3   :  { %v23265_v8 = vpop.f32.mrb[238].mxu0 }
 0x2d4   :  { %28521 = vst [vmem:[#allocation112_spill] sm:$0xff] %v23265_v8  ;;  %v23267_v41 = vpop.f32.mrb[239].mxu0 }
 0x2d5   :  { %28522 = vst [vmem:[#allocation113_spill] sm:$0xff] %v23267_v41  ;;  %v13407_v41 = vld [vmem:[%s28312_s5 + $0x280] sm:$0xff] }
 0x2d7   :  { %v23269_v57 = vpop.f32.mrb[240].mxu0 }
 0x2d8   :  { %28523 = vst [vmem:[#allocation114_spill] sm:$0xff] %v23269_v57  ;;  %v23271_v45 = vpop.f32.mrb[241].mxu0 }
 0x2d9   :  { %28524 = vst [vmem:[#allocation115_spill] sm:$0xff] %v23271_v45  ;;  %v13408_v45 = vld [vmem:[%s28312_s5 + $0x288] sm:$0xff] }
 0x2da   :  { %v23291_v57 = vpack.c.bf16 %v13408_v45, %v13407_v41  ;;  %v1315_v41 = vadd.f32 %v22683_v63, %v22848_v7  ;;  %v1320_v7 = vadd.f32 %v22683_v63, %v22864_v1  ;;  %v1330_v1 = vadd.f32 %v22683_v63, %v22874_v0 }
 0x2db   :  { %v23273_v50 = vpop.f32.mrb[242].mxu0  ;;  %v1340_v0 = vadd.f32 %v22683_v63, %v22884_v34 }
 0x2dc   :  { %28525 = vst [vmem:[#allocation116_spill] sm:$0xff] %v23273_v50  ;;  %v23275_v53 = vpop.f32.mrb[243].mxu0  ;;  %19138 = vmatprep.subr.bf16.mxu1 %v23291_v57  ;;  %v2317_v15 = vmax.f32 %v1315_v41, 0.0  ;;  %v28535_v41 = vld [vmem:[#allocation38_spill] sm:$0xff] }
 0x2dd   :  { %28526 = vst [vmem:[#allocation117_spill] sm:$0xff] %v23275_v53 }
 0x2df   :  { %v23277_v12 = vpop.f32.mrb[244].mxu0 }
 0x2e0   :  { %28527 = vst [vmem:[#allocation118_spill] sm:$0xff] %v23277_v12  ;;  %v23279_v14 = vpop.f32.mrb[245].mxu0 }
 0x2e1   :  { %28528 = vst [vmem:[#allocation119_spill] sm:$0xff] %v23279_v14 }
 0x2e3   :  { %v23281_v18 = vpop.f32.mrb[246].mxu0 }
 0x2e4   :  { %28529 = vst [vmem:[#allocation120_spill] sm:$0xff] %v23281_v18  ;;  %v23283_v49 = vpop.f32.mrb[247].mxu0  ;;  %v2877_v18 = vld [vmem:[%s28312_s5 + $0x8] sm:$0xff] }
 0x2e5   :  { %28530 = vst [vmem:[#allocation121_spill] sm:$0xff] %v23283_v49  ;;  %v2876_v49 = vld [vmem:[%s28312_s5] sm:$0xff] }
 0x2e6   :  { %v23308_v45 = vpack.c.bf16 %v2877_v18, %v2876_v49 }
 0x2e7   :  { %v23293_v50 = vpop.f32.mrb[248].mxu0 }
 0x2e8   :  { %28531 = vst [vmem:[#allocation122_spill] sm:$0xff] %v23293_v50  ;;  %v23295_v53 = vpop.f32.mrb[249].mxu0  ;;  %19010 = vmatprep.subr.bf16.mxu0 %v23308_v45 }
 0x2e9   :  { %28532 = vst [vmem:[#allocation123_spill] sm:$0xff] %v23295_v53 }
 0x2eb   :  { %v23298_v14 = vpop.f32.mrb[250].mxu0 }
 0x2ec   :  { %28533 = vst [vmem:[#allocation124_spill] sm:$0xff] %v23298_v14  ;;  %v23306_v12 = vpop.f32.mrb[251].mxu0  ;;  %v1310_v14 = vadd.f32 %v22683_v63, %v22852_v30 }
 0x2ed   :  { %28534 = vst [vmem:[#allocation125_spill] sm:$0xff] %v23306_v12  ;;  %v1325_v12 = vadd.f32 %v22683_v63, %v22862_v47 }
 0x2ee   :  { %v2316_v49 = vmax.f32 %v1310_v14, 0.0  ;;  %v2318_v14 = vmax.f32 %v1320_v7, 0.0  ;;  %v2320_v7 = vmax.f32 %v1330_v1, 0.0 }
 0x2ef   :  { %v16416_v53 = vpop.f32.mrb[252].mxu0  ;;  %v2319_v2 = vmax.f32 %v1325_v12, 0.0  ;;  %v1345_v12 = vadd.f32 %v22683_v63, %v22882_v23 }
 0x2f0   :  { %v1735_v50 = vadd.f32 %v22683_v63, %v16416_v53  ;;  %v1729_v8 = vpop.f32.mrb[253].mxu0 }
 0x2f1   :  { %v1730_v27 = vadd.f32 %v22683_v63, %v1729_v8  ;;  %v1335_v8 = vadd.f32 %v22683_v63, %v22872_v46  ;;  %v2323_v34 = vmax.f32 %v1345_v12, 0.0 }
 0x2f2   :  { %v2401_v18 = vmax.f32 %v1735_v50, 0.0 }
 0x2f3   :  { %v2400_v37 = vmax.f32 %v1730_v27, 0.0  ;;  %v16419_v40 = vpop.f32.mrb[254].mxu0 }
 0x2f4   :  { %v2569_v36 = vmax.f32 %v2317_v15, %v2401_v18  ;;  %v1745_v30 = vadd.f32 %v22683_v63, %v16419_v40  ;;  %v1739_v61 = vpop.f32.mrb[255].mxu0 }
 0x2f5   :  { %v2568_v33 = vmax.f32 %v2316_v49, %v2400_v37  ;;  %v1740_v53 = vadd.f32 %v22683_v63, %v1739_v61  ;;  %v2321_v49 = vmax.f32 %v1335_v8, 0.0  ;;  %v2878_v8 = vld [vmem:[%s28312_s5 + $0x10] sm:$0xff] }
 0x2f6   :  { %v2653_v47 = vmax.f32 %v28535_v41, %v2569_v36  ;;  %v2403_v50 = vmax.f32 %v1745_v30, 0.0 }
 0x2f7   :  { %v2652_v27 = vmax.f32 %v22197_v20, %v2568_v33  ;;  %v2402_v15 = vmax.f32 %v1740_v53, 0.0  ;;  %v16422_v18 = vpop.f32.mrb[0].mxu0 }
 0x2f8   :  { %2737 = vst [vmem:[#allocation2 + $0x8] sm:$0xff] %v2653_v47  ;;  %v2571_v40 = vmax.f32 %v2319_v2, %v2403_v50  ;;  %v1755_v37 = vadd.f32 %v22683_v63, %v16422_v18  ;;  %v1749_v61 = vpop.f32.mrb[1].mxu0 }
 0x2f9   :  { %2736 = vst [vmem:[#allocation2] sm:$0xff] %v2652_v27  ;;  %v2570_v46 = vmax.f32 %v2318_v14, %v2402_v15  ;;  %v1750_v36 = vadd.f32 %v22683_v63, %v1749_v61  ;;  %v2322_v14 = vmax.f32 %v1340_v0, 0.0 }
 0x2fa   :  { %v2655_v20 = vmax.f32 %v22207_v28, %v2571_v40  ;;  %v2405_v33 = vmax.f32 %v1755_v37, 0.0  ;;  %v2879_v28 = vld [vmem:[%s28312_s5 + $0x18] sm:$0xff] }
 0x2fb   :  { %v2654_v2 = vmax.f32 %v22213_v44, %v2570_v46  ;;  %v2404_v30 = vmax.f32 %v1750_v36, 0.0  ;;  %v16425_v53 = vpop.f32.mrb[2].mxu0  ;;  %v23347_v44 = vld [vmem:[%s28311_s4] ss:$0 sm:$0xff]  ;;  %v19013_v12 = vpack.c.bf16 %v2879_v28, %v2878_v8 }
 0x2fc   :  { %2739 = vst [vmem:[#allocation2 + $0x18] sm:$0xff] %v2655_v20  ;;  %v2573_v41 = vmax.f32 %v2321_v49, %v2405_v33  ;;  %v1765_v23 = vadd.f32 %v22683_v63, %v16425_v53  ;;  %v1759_v47 = vpop.f32.mrb[3].mxu0  ;;  %16572 = vmatprep.mubr.f32.mxu0 %v2655_v20  ;;  %v1355_v1 = vadd.f32 %v23347_v44, %v22892_v42 }
 0x2fd   :  { %2738 = vst [vmem:[#allocation2 + $0x10] sm:$0xff] %v2654_v2  ;;  %v2572_v50 = vmax.f32 %v2320_v7, %v2404_v30  ;;  %v1760_v63 = vadd.f32 %v23347_v44, %v1759_v47  ;;  %v1350_v18 = vadd.f32 %v23347_v44, %v22894_v48  ;;  %v1365_v20 = vadd.f32 %v23347_v44, %v22902_v62 }
 0x2fe   :  { %v2657_v27 = vmax.f32 %v22223_v52, %v2573_v41  ;;  %v2407_v15 = vmax.f32 %v1765_v23, 0.0  ;;  %v2880_v52 = vld [vmem:[%s28312_s5 + $0x20] sm:$0xff]  ;;  %v2325_v48 = vmax.f32 %v1355_v1, 0.0  ;;  %v1360_v30 = vadd.f32 %v23347_v44, %v22904_v35  ;;  %v2882_v35 = vld [vmem:[%s28312_s5 + $0x30] sm:$0xff] }
 0x2ff   :  { %v2656_v40 = vmax.f32 %v22229_v10, %v2572_v50  ;;  %v2406_v37 = vmax.f32 %v1760_v63, 0.0  ;;  %v16428_v61 = vpop.f32.mrb[4].mxu0  ;;  %v2881_v10 = vld [vmem:[%s28312_s5 + $0x28] sm:$0xff]  ;;  %v2324_v2 = vmax.f32 %v1350_v18, 0.0  ;;  %v1375_v50 = vadd.f32 %v23347_v44, %v22918_v38 }
 0x300   :  { %2741 = vst [vmem:[#allocation2 + $0x28] sm:$0xff] %v2657_v27  ;;  %v2575_v46 = vmax.f32 %v2323_v34, %v2407_v15  ;;  %v1775_v36 = vadd.f32 %v23347_v44, %v16428_v61  ;;  %v1769_v49 = vpop.f32.mrb[5].mxu0  ;;  %v19017_v62 = vpack.c.bf16 %v2881_v10, %v2880_v52  ;;  %v2326_v1 = vmax.f32 %v1360_v30, 0.0 }
 0x301   :  { %2740 = vst [vmem:[#allocation2 + $0x20] sm:$0xff] %v2656_v40  ;;  %v2574_v0 = vmax.f32 %v2322_v14, %v2406_v37  ;;  %v1770_v42 = vadd.f32 %v23347_v44, %v1769_v49  ;;  %16573 = vmatmul.mubr.f32.vlgmr.msra.gmra.mrb[80].mxu0 %v2656_v40  ;;  %v1370_v27 = vadd.f32 %v23347_v44, %v22920_v54  ;;  %v2884_v54 = vld [vmem:[%s28312_s5 + $0x40] sm:$0xff] }
 0x302   :  { %v2659_v33 = vmax.f32 %v22239_v60, %v2575_v46  ;;  %v2409_v7 = vmax.f32 %v1775_v36, 0.0  ;;  %19012 = vmatpush3.bf16.msra.mxu0 %v23308_v45  ;;  %v2327_v45 = vmax.f32 %v1365_v20, 0.0  ;;  %v1385_v49 = vadd.f32 %v23347_v44, %v22934_v26 }
 0x303   :  { %v2658_v53 = vmax.f32 %v22245_v3, %v2574_v0  ;;  %v2408_v41 = vmax.f32 %v1770_v42, 0.0  ;;  %v16431_v23 = vpop.f32.mrb[6].mxu0  ;;  %19014 = vmatprep.subr.bf16.mxu0 %v19013_v12  ;;  %v2883_v3 = vld [vmem:[%s28312_s5 + $0x38] sm:$0xff]  ;;  %v2328_v52 = vmax.f32 %v1370_v27, 0.0  ;;  %v1380_v10 = vadd.f32 %v23347_v44, %v22936_v56  ;;  %v13409_v56 = vld [vmem:[%s28312_s5 + $0x290] sm:$0xff] }
 0x304   :  { %2743 = vst [vmem:[#allocation2 + $0x38] sm:$0xff] %v2659_v33  ;;  %v2577_v47 = vmax.f32 %v2325_v48, %v2409_v7  ;;  %v1785_v8 = vadd.f32 %v23347_v44, %v16431_v23  ;;  %v1779_v28 = vpop.f32.mrb[7].mxu0  ;;  %v19021_v38 = vpack.c.bf16 %v2883_v3, %v2882_v35  ;;  %v1395_v23 = vadd.f32 %v23347_v44, %v22950_v39 }
 0x305   :  { %2742 = vst [vmem:[#allocation2 + $0x30] sm:$0xff] %v2658_v53  ;;  %v2576_v60 = vmax.f32 %v2324_v2, %v2408_v41  ;;  %v1780_v34 = vadd.f32 %v23347_v44, %v1779_v28  ;;  %16575 = vmatprep.mubr.f32.mxu0 %v2658_v53  ;;  %v2331_v41 = vmax.f32 %v1385_v49, 0.0  ;;  %v2886_v28 = vld [vmem:[%s28312_s5 + $0x50] sm:$0xff] }
 0x306   :  { %v2661_v63 = vmax.f32 %v22255_v59, %v2577_v47  ;;  %v2411_v14 = vmax.f32 %v1785_v8, 0.0  ;;  %16576 = vmatmul.mubr.f32.gmra.mrb[82].mxu0 %v2659_v33 }
 0x307   :  { %v2660_v15 = vmax.f32 %v22261_v9, %v2576_v60  ;;  %v2410_v18 = vmax.f32 %v1780_v34, 0.0  ;;  %v16434_v40 = vpop.f32.mrb[8].mxu0  ;;  %19016 = vmatpush3.bf16.msra.mxu0 %v19013_v12  ;;  %v2885_v9 = vld [vmem:[%s28312_s5 + $0x48] sm:$0xff]  ;;  %v2329_v12 = vmax.f32 %v1375_v50, 0.0  ;;  %v2330_v60 = vmax.f32 %v1380_v10, 0.0  ;;  %v2890_v10 = vld [vmem:[%s28312_s5 + $0x70] sm:$0xff] }
 0x308   :  { %2745 = vst [vmem:[#allocation2 + $0x48] sm:$0xff] %v2661_v63  ;;  %v2579_v37 = vmax.f32 %v2327_v45, %v2411_v14  ;;  %v1795_v61 = vadd.f32 %v23347_v44, %v16434_v40  ;;  %v1789_v46 = vpop.f32.mrb[9].mxu0  ;;  %16578 = vmatprep.mubr.f32.mxu0 %v2661_v63  ;;  %19018 = vmatprep.subr.bf16.mxu0 %v19017_v62  ;;  %v2333_v40 = vmax.f32 %v1395_v23, 0.0 }
 0x309   :  { %2744 = vst [vmem:[#allocation2 + $0x40] sm:$0xff] %v2660_v15  ;;  %v2578_v59 = vmax.f32 %v2326_v1, %v2410_v18  ;;  %v1790_v36 = vadd.f32 %v23347_v44, %v1789_v46  ;;  %v19025_v53 = vpack.c.bf16 %v2885_v9, %v2884_v54  ;;  %v1390_v34 = vadd.f32 %v23347_v44, %v22952_v11  ;;  %v13411_v1 = vld [vmem:[%s28312_s5 + $0x2a0] sm:$0xff]  ;;  %v2889_v18 = vld [vmem:[%s28312_s5 + $0x68] sm:$0xff] }
 0x30a   :  { %v2663_v0 = vmax.f32 %v22271_v5, %v2579_v37  ;;  %v2413_v42 = vmax.f32 %v1795_v61, 0.0  ;;  %v2888_v15 = vld [vmem:[%s28312_s5 + $0x60] sm:$0xff]  ;;  %v1400_v37 = vadd.f32 %v23347_v44, %v22968_v31 }
 0x30b   :  { %v2662_v48 = vmax.f32 %v22277_v13, %v2578_v59  ;;  %v2412_v20 = vmax.f32 %v1790_v36, 0.0  ;;  %v16437_v33 = vpop.f32.mrb[10].mxu0  ;;  %19020 = vmatpush3.bf16.msra.mxu0 %v19017_v62  ;;  %v13410_v13 = vld [vmem:[%s28312_s5 + $0x298] sm:$0xff]  ;;  %v19033_v31 = vpack.c.bf16 %v2889_v18, %v2888_v15  ;;  %v28536_v15 = vld [vmem:[#allocation67_spill] sm:$0xff] }
 0x30c   :  { %2747 = vst [vmem:[#allocation2 + $0x58] sm:$0xff] %v2663_v0  ;;  %v2581_v7 = vmax.f32 %v2329_v12, %v2413_v42  ;;  %v1805_v2 = vadd.f32 %v23347_v44, %v16437_v33  ;;  %v1799_v30 = vpop.f32.mrb[11].mxu0  ;;  %19022 = vmatprep.subr.bf16.mxu0 %v19021_v38  ;;  %v2887_v62 = vld [vmem:[%s28312_s5 + $0x58] sm:$0xff]  ;;  %v19141_v14 = vpack.c.bf16 %v13410_v13, %v13409_v56 }
 0x30d   :  { %2746 = vst [vmem:[#allocation2 + $0x50] sm:$0xff] %v2662_v48  ;;  %v2580_v26 = vmax.f32 %v2328_v52, %v2412_v20  ;;  %v1800_v5 = vadd.f32 %v23347_v44, %v1799_v30  ;;  %16579 = vmatmul.mubr.f32.gmra.mrb[84].mxu0 %v2662_v48  ;;  %v2891_v48 = vld [vmem:[%s28312_s5 + $0x78] sm:$0xff]  ;;  %v2334_v20 = vmax.f32 %v1400_v37, 0.0  ;;  %v1415_v33 = vadd.f32 %v23347_v44, %v22982_v24 }
 0x30e   :  { %v2665_v47 = vmax.f32 %v22287_v51, %v2581_v7  ;;  %v2415_v8 = vmax.f32 %v1805_v2, 0.0  ;;  %v1405_v51 = vadd.f32 %v23347_v44, %v22966_v32  ;;  %v19029_v32 = vpack.c.bf16 %v2887_v62, %v2886_v28  ;;  %v13415_v62 = vld [vmem:[%s28312_s5 + $0x2c0] sm:$0xff] }
 0x30f   :  { %v2664_v35 = vmax.f32 %v22293_v17, %v2580_v26  ;;  %v2414_v3 = vmax.f32 %v1800_v5, 0.0  ;;  %v16440_v45 = vpop.f32.mrb[12].mxu0  ;;  %19024 = vmatpush3.bf16.msra.mxu0 %v19021_v38  ;;  %v13412_v17 = vld [vmem:[%s28312_s5 + $0x2a8] sm:$0xff]  ;;  %v2332_v38 = vmax.f32 %v1390_v34, 0.0  ;;  %v1410_v30 = vadd.f32 %v23347_v44, %v22990_v55 }
 0x310   :  { %2749 = vst [vmem:[#allocation2 + $0x68] sm:$0xff] %v2665_v47  ;;  %v2583_v39 = vmax.f32 %v2331_v41, %v2415_v8  ;;  %v1815_v50 = vadd.f32 %v23347_v44, %v16440_v45  ;;  %v1809_v63 = vpop.f32.mrb[13].mxu0  ;;  %19026 = vmatprep.subr.bf16.mxu0 %v19025_v53  ;;  %v19145_v9 = vpack.c.bf16 %v13412_v17, %v13411_v1  ;;  %v2335_v42 = vmax.f32 %v1405_v51, 0.0 }
 0x311   :  { %2748 = vst [vmem:[#allocation2 + $0x60] sm:$0xff] %v2664_v35  ;;  %v2582_v11 = vmax.f32 %v2330_v60, %v2414_v3  ;;  %v1810_v27 = vadd.f32 %v23347_v44, %v1809_v63  ;;  %16581 = vmatprep.mubr.f32.mxu0 %v2664_v35  ;;  %16940 = vmatprep.mubr.f32.mxu1 %v2664_v35  ;;  %v13416_v60 = vld [vmem:[%s28312_s5 + $0x2c8] sm:$0xff]  ;;  %v2336_v34 = vmax.f32 %v1410_v30, 0.0 }
 0x312   :  { %v2667_v61 = vmax.f32 %v22303_v19, %v2583_v39  ;;  %v2417_v46 = vmax.f32 %v1815_v50, 0.0  ;;  %16582 = vmatmul.mubr.f32.gmra.mrb[86].mxu0 %v2665_v47  ;;  %16941 = vmatmul.mubr.f32.vlgmr.msra.gmra.mrb[0].mxu1 %v2665_v47  ;;  %v13413_v19 = vld [vmem:[%s28312_s5 + $0x2b0] sm:$0xff]  ;;  %v19037_v24 = vpack.c.bf16 %v2891_v48, %v2890_v10  ;;  %v1425_v55 = vadd.f32 %v23347_v44, %v23004_v16 }
 0x313   :  { %v2666_v59 = vmax.f32 %v22309_v21, %v2582_v11  ;;  %v2416_v36 = vmax.f32 %v1810_v27, 0.0  ;;  %v16443_v54 = vpop.f32.mrb[14].mxu0  ;;  %19140 = vmatpush3.bf16.msra.mxu1 %v23291_v57  ;;  %19028 = vmatpush3.bf16.msra.mxu0 %v19025_v53  ;;  %v13414_v21 = vld [vmem:[%s28312_s5 + $0x2b8] sm:$0xff]  ;;  %v1420_v35 = vadd.f32 %v23347_v44, %v23012_v22  ;;  %v19153_v22 = vpack.c.bf16 %v13416_v60, %v13415_v62  ;;  %v28541_v48 = vld [vmem:[#allocation41_spill] sm:$0xff]  ;;  %v28545_v60 = vld [vmem:[#allocation43_spill] sm:$0xff] }
 0x314   :  { %2751 = vst [vmem:[#allocation2 + $0x78] sm:$0xff] %v2667_v61  ;;  %v2585_v12 = vmax.f32 %v2333_v40, %v2417_v46  ;;  %v1825_v49 = vadd.f32 %v23347_v44, %v16443_v54  ;;  %v1819_v0 = vpop.f32.mrb[15].mxu0  ;;  %16584 = vmatprep.mubr.f32.mxu0 %v2667_v61  ;;  %16943 = vmatprep.mubr.f32.mxu1 %v2667_v61  ;;  %v2339_v1 = vmax.f32 %v1425_v55, 0.0  ;;  %v28537_v40 = vld [vmem:[#allocation39_spill] sm:$0xff]  ;;  %v13422_v55 = vld [vmem:[%s28312_s5 + $0x2f8] sm:$0xff] }
 0x315   :  { %2750 = vst [vmem:[#allocation2 + $0x70] sm:$0xff] %v2666_v59  ;;  %v2584_v57 = vmax.f32 %v2332_v38, %v2416_v36  ;;  %v1820_v52 = vadd.f32 %v23347_v44, %v1819_v0  ;;  %19142 = vmatprep.subr.bf16.mxu1 %v19141_v14  ;;  %19030 = vmatprep.subr.bf16.mxu0 %v19029_v32  ;;  %v28538_v0 = vld [vmem:[#allocation68_spill] sm:$0xff] }
 0x316   :  { %v2669_v7 = vmax.f32 %v22319_v4, %v2585_v12  ;;  %v2419_v2 = vmax.f32 %v1825_v49, 0.0  ;;  %v19149_v56 = vpack.c.bf16 %v13414_v21, %v13413_v19  ;;  %v1435_v17 = vadd.f32 %v23347_v44, %v23026_v58  ;;  %v13420_v12 = vld [vmem:[%s28312_s5 + $0x2e8] sm:$0xff] }
 0x317   :  { %v2668_v53 = vmax.f32 %v22325_v25, %v2584_v57  ;;  %v2418_v26 = vmax.f32 %v1820_v52, 0.0  ;;  %v16446_v5 = vpop.f32.mrb[16].mxu0  ;;  %19144 = vmatpush3.bf16.msra.mxu1 %v19141_v14  ;;  %19032 = vmatpush3.bf16.msra.mxu0 %v19029_v32  ;;  %v2337_v25 = vmax.f32 %v1415_v33, 0.0  ;;  %v13418_v14 = vld [vmem:[%s28312_s5 + $0x2d8] sm:$0xff]  ;;  %v2338_v32 = vmax.f32 %v1420_v35, 0.0  ;;  %v28539_v21 = vld [vmem:[#allocation40_spill] sm:$0xff] }
 0x318   :  { %2753 = vst [vmem:[#allocation2 + $0x88] sm:$0xff] %v2669_v7  ;;  %v2587_v13 = vmax.f32 %v2335_v42, %v2419_v2  ;;  %v1835_v41 = vadd.f32 %v23347_v44, %v16446_v5  ;;  %v1829_v23 = vpop.f32.mrb[17].mxu0  ;;  %19146 = vmatprep.subr.bf16.mxu1 %v19145_v9  ;;  %19034 = vmatprep.subr.bf16.mxu0 %v19033_v31  ;;  %v2341_v49 = vmax.f32 %v1435_v17, 0.0  ;;  %v28540_v52 = vld [vmem:[#allocation69_spill] sm:$0xff]  ;;  %v28547_v17 = vld [vmem:[#allocation44_spill] sm:$0xff] }
 0x319   :  { %2752 = vst [vmem:[#allocation2 + $0x80] sm:$0xff] %v2668_v53  ;;  %v2586_v4 = vmax.f32 %v2334_v20, %v2418_v26  ;;  %v1830_v47 = vadd.f32 %v23347_v44, %v1829_v23  ;;  %16585 = vmatmul.mubr.f32.gmra.mrb[88].mxu0 %v2668_v53  ;;  %16944 = vmatmul.mubr.f32.gmra.mrb[2].mxu1 %v2668_v53 }
 0x31a   :  { %v2671_v8 = vmax.f32 %v22335_v6, %v2587_v13  ;;  %v2421_v28 = vmax.f32 %v1835_v41, 0.0  ;;  %v1430_v18 = vadd.f32 %v23347_v44, %v28536_v15  ;;  %v1445_v19 = vadd.f32 %v23347_v44, %v28538_v0  ;;  %v28542_v41 = vld [vmem:[#allocation70_spill] sm:$0xff]  ;;  %v28548_v15 = vld [vmem:[#allocation73_spill] sm:$0xff] }
 0x31b   :  { %v2670_v3 = vmax.f32 %v22341_v29, %v2586_v4  ;;  %v2420_v45 = vmax.f32 %v1830_v47, 0.0  ;;  %v16449_v51 = vpop.f32.mrb[18].mxu0  ;;  %19148 = vmatpush3.bf16.msra.mxu1 %v19145_v9  ;;  %19036 = vmatpush3.bf16.msra.mxu0 %v19033_v31  ;;  %v13417_v29 = vld [vmem:[%s28312_s5 + $0x2d0] sm:$0xff]  ;;  %v13419_v9 = vld [vmem:[%s28312_s5 + $0x2e0] sm:$0xff]  ;;  %v1440_v10 = vadd.f32 %v23347_v44, %v28540_v52  ;;  %v1455_v23 = vadd.f32 %v23347_v44, %v28542_v41  ;;  %v28551_v0 = vld [vmem:[#allocation46_spill] sm:$0xff] }
 0x31c   :  { %2755 = vst [vmem:[#allocation2 + $0x98] sm:$0xff] %v2671_v8  ;;  %v2589_v6 = vmax.f32 %v2337_v25, %v2421_v28  ;;  %v1845_v16 = vadd.f32 %v23347_v44, %v16449_v51  ;;  %v1839_v39 = vpop.f32.mrb[19].mxu0  ;;  %19150 = vmatprep.subr.bf16.mxu1 %v19149_v56  ;;  %19038 = vmatprep.subr.bf16.mxu0 %v19037_v24  ;;  %v2340_v57 = vmax.f32 %v1430_v18, 0.0  ;;  %v2343_v13 = vmax.f32 %v1445_v19, 0.0  ;;  %v13421_v25 = vld [vmem:[%s28312_s5 + $0x2f0] sm:$0xff]  ;;  %v28544_v28 = vld [vmem:[#allocation71_spill] sm:$0xff] }
 0x31d   :  { %2754 = vst [vmem:[#allocation2 + $0x90] sm:$0xff] %v2670_v3  ;;  %v2588_v50 = vmax.f32 %v2336_v34, %v2420_v45  ;;  %v1840_v63 = vadd.f32 %v23347_v44, %v1839_v39  ;;  %16587 = vmatprep.mubr.f32.mxu0 %v2670_v3  ;;  %16946 = vmatprep.mubr.f32.mxu1 %v2670_v3  ;;  %v28553_v52 = vld [vmem:[#allocation47_spill] sm:$0xff] }
 0x31e   :  { %v2673_v11 = vmax.f32 %v22351_v43, %v2589_v6  ;;  %v2423_v27 = vmax.f32 %v1845_v16, 0.0  ;;  %16588 = vmatmul.mubr.f32.gmra.mrb[90].mxu0 %v2671_v8  ;;  %16947 = vmatmul.mubr.f32.gmra.mrb[4].mxu1 %v2671_v8  ;;  %v19157_v43 = vpack.c.bf16 %v13418_v14, %v13417_v29  ;;  %v19161_v26 = vpack.c.bf16 %v13420_v12, %v13419_v9  ;;  %v28546_v14 = vld [vmem:[#allocation72_spill] sm:$0xff]  ;;  %v28550_v12 = vld [vmem:[#allocation74_spill] sm:$0xff] }
 0x31f   :  { %v2672_v37 = vmax.f32 %v28537_v40, %v2588_v50  ;;  %v2422_v61 = vmax.f32 %v1840_v63, 0.0  ;;  %v16452_v46 = vpop.f32.mrb[20].mxu0  ;;  %19152 = vmatpush3.bf16.msra.mxu1 %v19149_v56  ;;  %19040 = vmatpush3.bf16.msra.mxu0 %v19037_v24  ;;  %v28543_v24 = vld [vmem:[#allocation42_spill] sm:$0xff]  ;;  %v2342_v8 = vmax.f32 %v1440_v10, 0.0  ;;  %v1450_v62 = vadd.f32 %v23347_v44, %v28544_v28  ;;  %v13423_v63 = vld [vmem:[%s28312_s5 + $0x300] sm:$0xff]  ;;  %v28549_v40 = vld [vmem:[#allocation45_spill] sm:$0xff] }
 0x320   :  { %2757 = vst [vmem:[#allocation2 + $0xa8] sm:$0xff] %v2673_v11  ;;  %v2591_v38 = vmax.f32 %v2339_v1, %v2423_v27  ;;  %v1855_v59 = vadd.f32 %v23347_v44, %v16452_v46  ;;  %v1849_v58 = vpop.f32.mrb[21].mxu0  ;;  %16590 = vmatprep.mubr.f32.mxu0 %v2673_v11  ;;  %16949 = vmatprep.mubr.f32.mxu1 %v2673_v11  ;;  %v2345_v29 = vmax.f32 %v1455_v23, 0.0 }
 0x321   :  { %2756 = vst [vmem:[#allocation2 + $0xa0] sm:$0xff] %v2672_v37  ;;  %v2590_v36 = vmax.f32 %v2338_v32, %v2422_v61  ;;  %v1850_v54 = vadd.f32 %v23347_v44, %v1849_v58  ;;  %19154 = vmatprep.subr.bf16.mxu1 %v19153_v22  ;;  %v19165_v50 = vpack.c.bf16 %v13422_v55, %v13421_v25  ;;  %v2344_v32 = vmax.f32 %v1450_v62, 0.0  ;;  %v28557_v25 = vld [vmem:[#allocation49_spill] sm:$0xff] }
 0x322   :  { %v2675_v31 = vmax.f32 %v28539_v21, %v2591_v38  ;;  %v2425_v42 = vmax.f32 %v1855_v59, 0.0  ;;  %v1465_v1 = vadd.f32 %v23347_v44, %v28546_v14  ;;  %v1460_v18 = vadd.f32 %v23347_v44, %v28548_v15  ;;  %v28561_v14 = vld [vmem:[#allocation51_spill] sm:$0xff] }
 0x323   :  { %v2674_v20 = vmax.f32 %v28541_v48, %v2590_v36  ;;  %v2424_v33 = vmax.f32 %v1850_v54, 0.0  ;;  %v16455_v7 = vpop.f32.mrb[22].mxu0  ;;  %19156 = vmatpush3.bf16.msra.mxu1 %v19153_v22  ;;  %v13424_v22 = vld [vmem:[%s28312_s5 + $0x308] sm:$0xff] }
 0x324   :  { %2759 = vst [vmem:[#allocation2 + $0xb8] sm:$0xff] %v2675_v31  ;;  %v2593_v2 = vmax.f32 %v2341_v49, %v2425_v42  ;;  %v1865_v30 = vadd.f32 %v23347_v44, %v16455_v7  ;;  %v1859_v53 = vpop.f32.mrb[23].mxu0  ;;  %19158 = vmatprep.subr.bf16.mxu1 %v19157_v43  ;;  %v2347_v9 = vmax.f32 %v1465_v1, 0.0  ;;  %v1475_v49 = vadd.f32 %v23347_v44, %v28550_v12  ;;  %v28552_v42 = vld [vmem:[#allocation75_spill] sm:$0xff]  ;;  %v28565_v12 = vld [vmem:[#allocation53_spill] sm:$0xff] }
 0x325   :  { %2758 = vst [vmem:[#allocation2 + $0xb0] sm:$0xff] %v2674_v20  ;;  %v2592_v5 = vmax.f32 %v2340_v57, %v2424_v33  ;;  %v1860_v56 = vadd.f32 %v23347_v44, %v1859_v53  ;;  %16591 = vmatmul.mubr.f32.gmra.mrb[92].mxu0 %v2674_v20  ;;  %16950 = vmatmul.mubr.f32.gmra.mrb[6].mxu1 %v2674_v20  ;;  %v2346_v31 = vmax.f32 %v1460_v18, 0.0 }
 0x326   :  { %v2677_v4 = vmax.f32 %v28543_v24, %v2593_v2  ;;  %v2427_v47 = vmax.f32 %v1865_v30, 0.0  ;;  %v1470_v57 = vadd.f32 %v23347_v44, %v28552_v42 }
 0x327   :  { %v2676_v34 = vmax.f32 %v28545_v60, %v2592_v5  ;;  %v2426_v35 = vmax.f32 %v1860_v56, 0.0  ;;  %v16458_v3 = vpop.f32.mrb[24].mxu0  ;;  %19160 = vmatpush3.bf16.msra.mxu1 %v19157_v43  ;;  %v23531_v43 = vpack.c.bf16 %v13424_v22, %v13423_v63  ;;  %v28554_v5 = vld [vmem:[#allocation76_spill] sm:$0xff]  ;;  %v28560_v22 = vld [vmem:[#allocation79_spill] sm:$0xff] }
 0x328   :  { %2761 = vst [vmem:[#allocation2 + $0xc8] sm:$0xff] %v2677_v4  ;;  %v2595_v45 = vmax.f32 %v2343_v13, %v2427_v47  ;;  %v1875_v51 = vadd.f32 %v23347_v44, %v16458_v3  ;;  %v1869_v6 = vpop.f32.mrb[25].mxu0  ;;  %19162 = vmatprep.subr.bf16.mxu1 %v19161_v26  ;;  %v1485_v56 = vadd.f32 %v23347_v44, %v28554_v5  ;;  %v28555_v13 = vld [vmem:[#allocation48_spill] sm:$0xff]  ;;  %v2348_v24 = vmax.f32 %v1470_v57, 0.0 }
 0x329   :  { %2760 = vst [vmem:[#allocation2 + $0xc0] sm:$0xff] %v2676_v34  ;;  %v2594_v16 = vmax.f32 %v2342_v8, %v2426_v35  ;;  %v1870_v39 = vadd.f32 %v23347_v44, %v1869_v6  ;;  %16593 = vmatprep.mubr.f32.mxu0 %v2676_v34  ;;  %16952 = vmatprep.mubr.f32.mxu1 %v2676_v34 }
 0x32a   :  { %v2679_v11 = vmax.f32 %v28547_v17, %v2595_v45  ;;  %v2429_v27 = vmax.f32 %v1875_v51, 0.0  ;;  %16594 = vmatmul.mubr.f32.gmra.mrb[94].mxu0 %v2677_v4  ;;  %16953 = vmatmul.mubr.f32.gmra.mrb[8].mxu1 %v2677_v4  ;;  %v28556_v4 = vld [vmem:[#allocation77_spill] sm:$0xff]  ;;  %v2351_v45 = vmax.f32 %v1485_v56, 0.0  ;;  %v28558_v51 = vld [vmem:[#allocation78_spill] sm:$0xff]  ;;  %v28568_v56 = vld [vmem:[#allocation83_spill] sm:$0xff] }
 0x32b   :  { %v2678_v37 = vmax.f32 %v28549_v40, %v2594_v16  ;;  %v2428_v61 = vmax.f32 %v1870_v39, 0.0  ;;  %v16461_v46 = vpop.f32.mrb[26].mxu0  ;;  %19164 = vmatpush3.bf16.msra.mxu1 %v19161_v26  ;;  %v2349_v26 = vmax.f32 %v1475_v49, 0.0  ;;  %v1480_v47 = vadd.f32 %v23347_v44, %v28556_v4  ;;  %v28559_v16 = vld [vmem:[#allocation50_spill] sm:$0xff] }
 0x32c   :  { %2763 = vst [vmem:[#allocation2 + $0xd8] sm:$0xff] %v2679_v11  ;;  %v2597_v38 = vmax.f32 %v2345_v29, %v2429_v27  ;;  %v1885_v59 = vadd.f32 %v23347_v44, %v16461_v46  ;;  %v1879_v58 = vpop.f32.mrb[27].mxu0  ;;  %16596 = vmatprep.mubr.f32.mxu0 %v2679_v11  ;;  %16955 = vmatprep.mubr.f32.mxu1 %v2679_v11 }
 0x32d   :  { %2762 = vst [vmem:[#allocation2 + $0xd0] sm:$0xff] %v2678_v37  ;;  %v2596_v36 = vmax.f32 %v2344_v32, %v2428_v61  ;;  %v1880_v54 = vadd.f32 %v23347_v44, %v1879_v58  ;;  %19166 = vmatprep.subr.bf16.mxu1 %v19165_v50  ;;  %v1495_v6 = vadd.f32 %v23347_v44, %v28558_v51  ;;  %v2350_v63 = vmax.f32 %v1480_v47, 0.0  ;;  %v28562_v61 = vld [vmem:[#allocation80_spill] sm:$0xff] }
 0x32e   :  { %v2681_v19 = vmax.f32 %v28551_v0, %v2597_v38  ;;  %v2431_v21 = vmax.f32 %v1885_v59, 0.0  ;;  %v1490_v29 = vadd.f32 %v23347_v44, %v28560_v22  ;;  %v1505_v46 = vadd.f32 %v23347_v44, %v28562_v61  ;;  %v28563_v38 = vld [vmem:[#allocation52_spill] sm:$0xff] }
 0x32f   :  { %v2680_v10 = vmax.f32 %v28553_v52, %v2596_v36  ;;  %v2430_v48 = vmax.f32 %v1880_v54, 0.0  ;;  %v16464_v20 = vpop.f32.mrb[28].mxu0  ;;  %19168 = vmatpush3.bf16.msra.mxu1 %v19165_v50  ;;  %v2353_v37 = vmax.f32 %v1495_v6, 0.0  ;;  %v28564_v54 = vld [vmem:[#allocation81_spill] sm:$0xff] }
 0x330   :  { %2765 = vst [vmem:[#allocation2 + $0xe8] sm:$0xff] %v2681_v19  ;;  %v2599_v33 = vmax.f32 %v2347_v9, %v2431_v21  ;;  %v1895_v7 = vadd.f32 %v23347_v44, %v16464_v20  ;;  %v1889_v2 = vpop.f32.mrb[29].mxu0  ;;  %19170 = vmatprep.subr.bf16.mxu1 %v23531_v43  ;;  %v2352_v36 = vmax.f32 %v1490_v29, 0.0  ;;  %v1500_v9 = vadd.f32 %v23347_v44, %v28564_v54  ;;  %v13359_v21 = vld [vmem:[%s28312_s5 + $0x100] sm:$0xff]  ;;  %v28572_v6 = vld [vmem:[#allocation85_spill] sm:$0xff] }
 0x331   :  { %2764 = vst [vmem:[#allocation2 + $0xe0] sm:$0xff] %v2680_v10  ;;  %v2598_v30 = vmax.f32 %v2346_v31, %v2430_v48  ;;  %v1890_v53 = vadd.f32 %v23347_v44, %v1889_v2  ;;  %16597 = vmatmul.mubr.f32.gmra.mrb[96].mxu0 %v2680_v10  ;;  %16956 = vmatmul.mubr.f32.gmra.mrb[10].mxu1 %v2680_v10  ;;  %v13360_v31 = vld [vmem:[%s28312_s5 + $0x108] sm:$0xff] }
 0x332   :  { %v2683_v41 = vmax.f32 %v28555_v13, %v2599_v33  ;;  %v2433_v23 = vmax.f32 %v1895_v7, 0.0  ;;  %v23572_v10 = vpack.c.bf16 %v13360_v31, %v13359_v21  ;;  %v2355_v33 = vmax.f32 %v1505_v46, 0.0  ;;  %v28566_v7 = vld [vmem:[#allocation82_spill] sm:$0xff]  ;;  %v28576_v46 = vld [vmem:[#allocation87_spill] sm:$0xff]  ;;  %v28578_v31 = vld [vmem:[#allocation88_spill] sm:$0xff] }
 0x333   :  { %v2682_v55 = vmax.f32 %v28557_v25, %v2598_v30  ;;  %v2432_v8 = vmax.f32 %v1890_v53, 0.0  ;;  %v16467_v28 = vpop.f32.mrb[30].mxu0  ;;  %v1515_v2 = vadd.f32 %v23347_v44, %v28566_v7  ;;  %v28567_v30 = vld [vmem:[#allocation54_spill] sm:$0xff]  ;;  %v2354_v5 = vmax.f32 %v1500_v9, 0.0 }
 0x334   :  { %2767 = vst [vmem:[#allocation2 + $0xf8] sm:$0xff] %v2683_v41  ;;  %v2601_v62 = vmax.f32 %v2349_v26, %v2433_v23  ;;  %v1905_v60 = vadd.f32 %v23347_v44, %v16467_v28  ;;  %v1899_v34 = vpop.f32.mrb[31].mxu0  ;;  %19042 = vmatprep.subr.bf16.mxu0 %v23572_v10  ;;  %v1510_v13 = vadd.f32 %v23347_v44, %v28568_v56 }
 0x335   :  { %2766 = vst [vmem:[#allocation2 + $0xf0] sm:$0xff] %v2682_v55  ;;  %v2600_v35 = vmax.f32 %v2348_v24, %v2432_v8  ;;  %v1900_v3 = vadd.f32 %v23347_v44, %v1899_v34  ;;  %16599 = vmatprep.mubr.f32.mxu0 %v2682_v55  ;;  %16958 = vmatprep.mubr.f32.mxu1 %v2682_v55 }
 0x336   :  { %v2685_v39 = vmax.f32 %v28559_v16, %v2601_v62  ;;  %v2435_v50 = vmax.f32 %v1905_v60, 0.0  ;;  %16600 = vmatmul.mubr.f32.gmra.mrb[98].mxu0 %v2683_v41  ;;  %16959 = vmatmul.mubr.f32.gmra.mrb[12].mxu1 %v2683_v41  ;;  %v28569_v41 = vld [vmem:[#allocation55_spill] sm:$0xff]  ;;  %v2357_v62 = vmax.f32 %v1515_v2, 0.0  ;;  %v28570_v60 = vld [vmem:[#allocation84_spill] sm:$0xff]  ;;  %v2356_v51 = vmax.f32 %v1510_v13, 0.0  ;;  %v28581_v2 = vld [vmem:[#allocation61_spill] sm:$0xff] }
 0x337   :  { %v2684_v1 = vmax.f32 %v28561_v14, %v2600_v35  ;;  %v2434_v17 = vmax.f32 %v1900_v3, 0.0  ;;  %v16470_v11 = vpop.f32.mrb[32].mxu0  ;;  %v1525_v34 = vadd.f32 %v23347_v44, %v28570_v60  ;;  %v28571_v35 = vld [vmem:[#allocation56_spill] sm:$0xff]  ;;  %v1520_v16 = vadd.f32 %v23347_v44, %v28572_v6 }
 0x338   :  { %2769 = vst [vmem:[#allocation2 + $0x108] sm:$0xff] %v2685_v39  ;;  %v2603_v27 = vmax.f32 %v2351_v45, %v2435_v50  ;;  %v1915_v32 = vadd.f32 %v23347_v44, %v16470_v11  ;;  %v1909_v15 = vpop.f32.mrb[33].mxu0  ;;  %16961 = vmatprep.mubr.f32.mxu1 %v2685_v39  ;;  %v28573_v39 = vld [vmem:[#allocation57_spill] sm:$0xff] }
 0x339   :  { %2768 = vst [vmem:[#allocation2 + $0x100] sm:$0xff] %v2684_v1  ;;  %v2602_v18 = vmax.f32 %v2350_v63, %v2434_v17  ;;  %v1910_v40 = vadd.f32 %v23347_v44, %v1909_v15  ;;  %v2358_v61 = vmax.f32 %v1520_v16, 0.0 }
 0x33a   :  { %v2687_v59 = vmax.f32 %v28563_v38, %v2603_v27  ;;  %v2437_v58 = vmax.f32 %v1915_v32, 0.0  ;;  %v2359_v27 = vmax.f32 %v1525_v34, 0.0  ;;  %v28574_v32 = vld [vmem:[#allocation86_spill] sm:$0xff]  ;;  %v1530_v38 = vadd.f32 %v23347_v44, %v28576_v46  ;;  %v28585_v34 = vld [vmem:[#allocation63_spill] sm:$0xff] }
 0x33b   :  { %v2686_v49 = vmax.f32 %v28565_v12, %v2602_v18  ;;  %v2436_v0 = vmax.f32 %v1910_v40, 0.0  ;;  %v16473_v19 = vpop.f32.mrb[34].mxu0  ;;  %v1535_v15 = vadd.f32 %v23347_v44, %v28574_v32  ;;  %v28575_v18 = vld [vmem:[#allocation58_spill] sm:$0xff] }
 0x33c   :  { %2771 = vst [vmem:[#allocation2 + $0x118] sm:$0xff] %v2687_v59  ;;  %v2605_v42 = vmax.f32 %v2353_v37, %v2437_v58  ;;  %v1925_v57 = vadd.f32 %v23347_v44, %v16473_v19  ;;  %v1919_v52 = vpop.f32.mrb[35].mxu0  ;;  %v28577_v59 = vld [vmem:[#allocation59_spill] sm:$0xff] }
 0x33d   :  { %2770 = vst [vmem:[#allocation2 + $0x110] sm:$0xff] %v2686_v49  ;;  %v2604_v48 = vmax.f32 %v2352_v36, %v2436_v0  ;;  %v1920_v20 = vadd.f32 %v23347_v44, %v1919_v52  ;;  %16962 = vmatmul.mubr.f32.gmra.mrb[14].mxu1 %v2686_v49  ;;  %v2361_v21 = vmax.f32 %v1535_v15, 0.0  ;;  %v28589_v15 = vld [vmem:[#allocation64_spill] sm:$0xff] }
 0x33e   :  { %v2689_v53 = vmax.f32 %v28567_v30, %v2605_v42  ;;  %v2439_v26 = vmax.f32 %v1925_v57, 0.0  ;;  %v1545_v42 = vadd.f32 %v23347_v44, %v28578_v31  ;;  %v28579_v57 = vld [vmem:[#allocation60_spill] sm:$0xff] }
 0x33f   :  { %v2688_v23 = vmax.f32 %v28569_v41, %v2604_v48  ;;  %v2438_v24 = vmax.f32 %v1920_v20, 0.0  ;;  %v16476_v4 = vpop.f32.mrb[36].mxu0  ;;  %v2360_v20 = vmax.f32 %v1530_v38, 0.0 }
 0x340   :  { %2773 = vst [vmem:[#allocation2 + $0x128] sm:$0xff] %v2689_v53  ;;  %v2607_v47 = vmax.f32 %v2355_v33, %v2439_v26  ;;  %v1935_v25 = vadd.f32 %v23347_v44, %v16476_v4  ;;  %v1929_v55 = vpop.f32.mrb[37].mxu0  ;;  %v28580_v33 = vld [vmem:[#allocation89_spill] sm:$0xff]  ;;  %v28582_v4 = vld [vmem:[#allocation90_spill] sm:$0xff] }
 0x341   :  { %2772 = vst [vmem:[#allocation2 + $0x120] sm:$0xff] %v2688_v23  ;;  %v2606_v8 = vmax.f32 %v2354_v5, %v2438_v24  ;;  %v1930_v28 = vadd.f32 %v23347_v44, %v1929_v55  ;;  %16964 = vmatprep.mubr.f32.mxu1 %v2688_v23  ;;  %v1540_v7 = vadd.f32 %v23347_v44, %v28580_v33  ;;  %v2363_v24 = vmax.f32 %v1545_v42, 0.0  ;;  %v28593_v42 = vld [vmem:[#allocation5_spill] sm:$0xff] }
 0x342   :  { %v2691_v3 = vmax.f32 %v28571_v35, %v2607_v47  ;;  %v2441_v45 = vmax.f32 %v1935_v25, 0.0  ;;  %16965 = vmatmul.mubr.f32.gmra.mrb[16].mxu1 %v2689_v53  ;;  %v1555_v47 = vadd.f32 %v23347_v44, %v28582_v4  ;;  %v28583_v25 = vld [vmem:[#allocation62_spill] sm:$0xff] }
 0x343   :  { %v2690_v50 = vmax.f32 %v28573_v39, %v2606_v8  ;;  %v2440_v63 = vmax.f32 %v1930_v28, 0.0  ;;  %v16479_v22 = vpop.f32.mrb[38].mxu0  ;;  %v2362_v28 = vmax.f32 %v1540_v7, 0.0 }
 0x344   :  { %2775 = vst [vmem:[#allocation2 + $0x138] sm:$0xff] %v2691_v3  ;;  %v2609_v29 = vmax.f32 %v2357_v62, %v2441_v45  ;;  %v1945_v14 = vadd.f32 %v23347_v44, %v16479_v22  ;;  %v1939_v1 = vpop.f32.mrb[39].mxu0  ;;  %16967 = vmatprep.mubr.f32.mxu1 %v2691_v3  ;;  %v28584_v62 = vld [vmem:[#allocation91_spill] sm:$0xff]  ;;  %v28586_v22 = vld [vmem:[#allocation92_spill] sm:$0xff] }
 0x345   :  { %2774 = vst [vmem:[#allocation2 + $0x130] sm:$0xff] %v2690_v50  ;;  %v2608_v17 = vmax.f32 %v2356_v51, %v2440_v63  ;;  %v1940_v11 = vadd.f32 %v23347_v44, %v1939_v1  ;;  %v1550_v60 = vadd.f32 %v23347_v44, %v28584_v62  ;;  %v2365_v63 = vmax.f32 %v1555_v47, 0.0  ;;  %v28596_v47 = vld [vmem:[#allocation97_spill] sm:$0xff] }
 0x346   :  { %v2693_v40 = vmax.f32 %v28575_v18, %v2609_v29  ;;  %v2443_v37 = vmax.f32 %v1945_v14, 0.0  ;;  %v1565_v29 = vadd.f32 %v23347_v44, %v28586_v22  ;;  %v28587_v14 = vld [vmem:[#allocation3_spill] sm:$0xff] }
 0x347   :  { %v2692_v58 = vmax.f32 %v28577_v59, %v2608_v17  ;;  %v2442_v36 = vmax.f32 %v1940_v11, 0.0  ;;  %v16482_v54 = vpop.f32.mrb[40].mxu0  ;;  %v2364_v11 = vmax.f32 %v1550_v60, 0.0 }
 0x348   :  { %2777 = vst [vmem:[#allocation2 + $0x148] sm:$0xff] %v2693_v40  ;;  %v2611_v9 = vmax.f32 %v2359_v27, %v2443_v37  ;;  %v1955_v12 = vadd.f32 %v23347_v44, %v16482_v54  ;;  %v1949_v49 = vpop.f32.mrb[41].mxu0  ;;  %v28588_v27 = vld [vmem:[#allocation93_spill] sm:$0xff]  ;;  %v28590_v54 = vld [vmem:[#allocation94_spill] sm:$0xff] }
 0x349   :  { %2776 = vst [vmem:[#allocation2 + $0x140] sm:$0xff] %v2692_v58  ;;  %v2610_v0 = vmax.f32 %v2358_v61, %v2442_v36  ;;  %v1950_v19 = vadd.f32 %v23347_v44, %v1949_v49  ;;  %16968 = vmatmul.mubr.f32.gmra.mrb[18].mxu1 %v2692_v58  ;;  %v1560_v32 = vadd.f32 %v23347_v44, %v28588_v27  ;;  %v2367_v36 = vmax.f32 %v1565_v29, 0.0 }
 0x34a   :  { %v23603_v52 = vmax.f32 %v28579_v57, %v2611_v9  ;;  %v2445_v48 = vmax.f32 %v1955_v12, 0.0  ;;  %v1575_v9 = vadd.f32 %v23347_v44, %v28590_v54  ;;  %v28591_v12 = vld [vmem:[#allocation4_spill] sm:$0xff] }
 0x34b   :  { %v23608_v30 = vmax.f32 %v28581_v2, %v2610_v0  ;;  %v2444_v53 = vmax.f32 %v1950_v19, 0.0  ;;  %v16485_v26 = vpop.f32.mrb[42].mxu0  ;;  %v2366_v19 = vmax.f32 %v1560_v32, 0.0 }
 0x34c   :  { %2779 = vst [vmem:[#allocation2 + $0x158] sm:$0xff] %v23603_v52  ;;  %v2613_v5 = vmax.f32 %v2361_v21, %v2445_v48  ;;  %v1965_v56 = vadd.f32 %v23347_v44, %v16485_v26  ;;  %v1959_v13 = vpop.f32.mrb[43].mxu0  ;;  %v28592_v21 = vld [vmem:[#allocation95_spill] sm:$0xff] }
 0x34d   :  { %2778 = vst [vmem:[#allocation2 + $0x150] sm:$0xff] %v23608_v30  ;;  %v2612_v41 = vmax.f32 %v2360_v20, %v2444_v53  ;;  %v1960_v23 = vadd.f32 %v23347_v44, %v1959_v13  ;;  %v1570_v31 = vadd.f32 %v23347_v44, %v28592_v21  ;;  %v28605_v21 = vld [vmem:[#allocation11_spill] sm:$0xff] }
 0x34e   :  { %v23617_v55 = vmax.f32 %v28583_v25, %v2613_v5  ;;  %v2447_v8 = vmax.f32 %v1965_v56, 0.0  ;;  %v2369_v5 = vmax.f32 %v1575_v9, 0.0  ;;  %v28594_v56 = vld [vmem:[#allocation96_spill] sm:$0xff]  ;;  %v1580_v25 = vadd.f32 %v23347_v44, %v28596_v47  ;;  %v28608_v47 = vld [vmem:[#allocation103_spill] sm:$0xff] }
 0x34f   :  { %v2696_v35 = vmax.f32 %v28585_v34, %v2612_v41  ;;  %v2446_v3 = vmax.f32 %v1960_v23, 0.0  ;;  %v16488_v45 = vpop.f32.mrb[44].mxu0  ;;  %v1585_v13 = vadd.f32 %v23347_v44, %v28594_v56  ;;  %v28595_v41 = vld [vmem:[#allocation6_spill] sm:$0xff]  ;;  %v2368_v4 = vmax.f32 %v1570_v31, 0.0 }
 0x350   :  { %2781 = vst [vmem:[#allocation2 + $0x168] sm:$0xff] %v23617_v55  ;;  %v2615_v51 = vmax.f32 %v2363_v24, %v2447_v8  ;;  %v1975_v6 = vadd.f32 %v23347_v44, %v16488_v45  ;;  %v1969_v16 = vpop.f32.mrb[45].mxu0  ;;  %16602 = vmatprep.mubr.f32.mxu0 %v23617_v55  ;;  %v28597_v8 = vld [vmem:[#allocation7_spill] sm:$0xff]  ;;  %v2370_v29 = vmax.f32 %v1580_v25, 0.0 }
 0x351   :  { %2780 = vst [vmem:[#allocation2 + $0x160] sm:$0xff] %v2696_v35  ;;  %v2614_v39 = vmax.f32 %v2362_v28, %v2446_v3  ;;  %v1970_v50 = vadd.f32 %v23347_v44, %v1969_v16  ;;  %v28598_v16 = vld [vmem:[#allocation98_spill] sm:$0xff] }
 0x352   :  { %v2699_v1 = vmax.f32 %v28587_v14, %v2615_v51  ;;  %v2449_v17 = vmax.f32 %v1975_v6, 0.0  ;;  %v2371_v6 = vmax.f32 %v1585_v13, 0.0  ;;  %v28600_v14 = vld [vmem:[#allocation99_spill] sm:$0xff]  ;;  %v28607_v13 = vld [vmem:[#allocation12_spill] sm:$0xff] }
 0x353   :  { %v23632_v18 = vmax.f32 %v28589_v15, %v2614_v39  ;;  %v2448_v40 = vmax.f32 %v1970_v50, 0.0  ;;  %v16491_v37 = vpop.f32.mrb[46].mxu0  ;;  %v1595_v39 = vadd.f32 %v23347_v44, %v28598_v16  ;;  %v28599_v50 = vld [vmem:[#allocation8_spill] sm:$0xff] }
 0x354   :  { %2783 = vst [vmem:[#allocation2 + $0x178] sm:$0xff] %v2699_v1  ;;  %v2617_v61 = vmax.f32 %v2365_v63, %v2449_v17  ;;  %v1985_v46 = vadd.f32 %v23347_v44, %v16491_v37  ;;  %v1979_v38 = vpop.f32.mrb[47].mxu0  ;;  %v1590_v1 = vadd.f32 %v23347_v44, %v28600_v14  ;;  %v28601_v17 = vld [vmem:[#allocation9_spill] sm:$0xff]  ;;  %v28610_v16 = vld [vmem:[#allocation104_spill] sm:$0xff] }
 0x355   :  { %2782 = vst [vmem:[#allocation2 + $0x170] sm:$0xff] %v23632_v18  ;;  %v2616_v59 = vmax.f32 %v2364_v11, %v2448_v40  ;;  %v1980_v58 = vadd.f32 %v23347_v44, %v1979_v38  ;;  %16603 = vmatmul.mubr.f32.gmra.mrb[100].mxu0 %v23632_v18  ;;  %v23677_v40 = vld [vmem:[%s28311_s4] ss:$0 sm:$0xff]  ;;  %v2373_v38 = vmax.f32 %v1595_v39, 0.0  ;;  %v28612_v14 = vld [vmem:[#allocation105_spill] sm:$0xff] }
 0x356   :  { %v23641_v49 = vmax.f32 %v28591_v12, %v2617_v61  ;;  %v2451_v0 = vmax.f32 %v1985_v46, 0.0  ;;  %v2372_v12 = vmax.f32 %v1590_v1, 0.0  ;;  %v1610_v25 = vadd.f32 %v23677_v40, %v28608_v47  ;;  %v28619_v47 = vld [vmem:[#allocation18_spill] sm:$0xff] }
 0x357   :  { %v23646_v57 = vmax.f32 %v28593_v42, %v2616_v59  ;;  %v2450_v48 = vmax.f32 %v1980_v58, 0.0  ;;  %v16494_v20 = vpop.f32.mrb[48].mxu0  ;;  %v28602_v59 = vld [vmem:[#allocation100_spill] sm:$0xff]  ;;  %v1625_v39 = vadd.f32 %v23677_v40, %v28610_v16  ;;  %v1620_v1 = vadd.f32 %v23677_v40, %v28612_v14 }
 0x358   :  { %2785 = vst [vmem:[#allocation2 + $0x188] sm:$0xff] %v23641_v49  ;;  %v2619_v33 = vmax.f32 %v2367_v36, %v2451_v0  ;;  %v1995_v7 = vadd.f32 %v23347_v44, %v16494_v20  ;;  %v1989_v2 = vpop.f32.mrb[49].mxu0  ;;  %v1605_v58 = vadd.f32 %v23677_v40, %v28602_v59  ;;  %v28603_v36 = vld [vmem:[#allocation10_spill] sm:$0xff]  ;;  %v28604_v0 = vld [vmem:[#allocation101_spill] sm:$0xff]  ;;  %v28623_v14 = vld [vmem:[#allocation20_spill] sm:$0xff] }
 0x359   :  { %2784 = vst [vmem:[#allocation2 + $0x180] sm:$0xff] %v23646_v57  ;;  %v2618_v53 = vmax.f32 %v2366_v19, %v2450_v48  ;;  %v1990_v26 = vadd.f32 %v23347_v44, %v1989_v2  ;;  %16605 = vmatprep.mubr.f32.mxu0 %v23646_v57  ;;  %v1600_v19 = vadd.f32 %v23677_v40, %v28604_v0  ;;  %v2379_v59 = vmax.f32 %v1625_v39, 0.0 }
 0x35a   :  { %v23656_v23 = vmax.f32 %v28595_v41, %v2619_v33  ;;  %v2453_v24 = vmax.f32 %v1995_v7, 0.0  ;;  %16606 = vmatmul.mubr.f32.gmra.mrb[102].mxu0 %v23641_v49 }
 0x35b   :  { %v2702_v28 = vmax.f32 %v28597_v8, %v2618_v53  ;;  %v2452_v62 = vmax.f32 %v1990_v26, 0.0  ;;  %v16497_v60 = vpop.f32.mrb[50].mxu0  ;;  %v2375_v26 = vmax.f32 %v1605_v58, 0.0  ;;  %v28609_v8 = vld [vmem:[#allocation13_spill] sm:$0xff]  ;;  %v28614_v58 = vld [vmem:[#allocation106_spill] sm:$0xff] }
 0x35c   :  { %2787 = vst [vmem:[#allocation2 + $0x198] sm:$0xff] %v23656_v23  ;;  %v2621_v34 = vmax.f32 %v2369_v5, %v2453_v24  ;;  %v2005_v35 = vadd.f32 %v23347_v44, %v16497_v60  ;;  %v1999_v3 = vpop.f32.mrb[51].mxu0  ;;  %16608 = vmatprep.mubr.f32.mxu0 %v23656_v23  ;;  %v28606_v5 = vld [vmem:[#allocation102_spill] sm:$0xff] }
 0x35d   :  { %2786 = vst [vmem:[#allocation2 + $0x190] sm:$0xff] %v2702_v28  ;;  %v2620_v45 = vmax.f32 %v2368_v4, %v2452_v62  ;;  %v2000_v51 = vadd.f32 %v23347_v44, %v1999_v3  ;;  %v1615_v56 = vadd.f32 %v23677_v40, %v28606_v5  ;;  %v2374_v4 = vmax.f32 %v1600_v19, 0.0 }
 0x35e   :  { %v2705_v63 = vmax.f32 %v28599_v50, %v2621_v34  ;;  %v2455_v22 = vmax.f32 %v2005_v35, 0.0  ;;  %v28611_v50 = vld [vmem:[#allocation14_spill] sm:$0xff]  ;;  %v2378_v19 = vmax.f32 %v1620_v1, 0.0 }
 0x35f   :  { %v23672_v11 = vmax.f32 %v28601_v17, %v2620_v45  ;;  %v2454_v27 = vmax.f32 %v2000_v51, 0.0  ;;  %v16500_v32 = vpop.f32.mrb[52].mxu0  ;;  %v28613_v17 = vld [vmem:[#allocation15_spill] sm:$0xff] }
 0x360   :  { %2789 = vst [vmem:[#allocation2 + $0x1a8] sm:$0xff] %v2705_v63  ;;  %v2623_v15 = vmax.f32 %v2371_v6, %v2455_v22  ;;  %v2015_v37 = vadd.f32 %v23677_v40, %v16500_v32  ;;  %v2009_v61 = vpop.f32.mrb[53].mxu0  ;;  %v2377_v6 = vmax.f32 %v1615_v56, 0.0 }
 0x361   :  { %2788 = vst [vmem:[#allocation2 + $0x1a0] sm:$0xff] %v23672_v11  ;;  %v2622_v46 = vmax.f32 %v2370_v29, %v2454_v27  ;;  %v2010_v44 = vadd.f32 %v23677_v40, %v2009_v61  ;;  %16609 = vmatmul.mubr.f32.gmra.mrb[104].mxu0 %v23672_v11  ;;  %v2376_v29 = vmax.f32 %v1610_v25, 0.0 }
 0x362   :  { %v23686_v54 = vmax.f32 %v28603_v36, %v2623_v15  ;;  %v2457_v9 = vmax.f32 %v2015_v37, 0.0  ;;  %v1635_v36 = vadd.f32 %v23677_v40, %v28614_v58 }
 0x363   :  { %v23691_v31 = vmax.f32 %v28605_v21, %v2622_v46  ;;  %v2456_v42 = vmax.f32 %v2010_v44, 0.0  ;;  %v16503_v48 = vpop.f32.mrb[54].mxu0  ;;  %v28616_v21 = vld [vmem:[#allocation107_spill] sm:$0xff] }
 0x364   :  { %2791 = vst [vmem:[#allocation2 + $0x1b8] sm:$0xff] %v23686_v54  ;;  %v2625_v20 = vmax.f32 %v2373_v38, %v2457_v9  ;;  %v2025_v33 = vadd.f32 %v23677_v40, %v16503_v48  ;;  %v2019_v7 = vpop.f32.mrb[55].mxu0  ;;  %v28615_v9 = vld [vmem:[#allocation16_spill] sm:$0xff]  ;;  %v28617_v48 = vld [vmem:[#allocation17_spill] sm:$0xff] }
 0x365   :  { %2790 = vst [vmem:[#allocation2 + $0x1b0] sm:$0xff] %v23691_v31  ;;  %v2624_v2 = vmax.f32 %v2372_v12, %v2456_v42  ;;  %v2020_v53 = vadd.f32 %v23677_v40, %v2019_v7  ;;  %16611 = vmatprep.mubr.f32.mxu0 %v23691_v31  ;;  %16970 = vmatprep.mubr.f32.mxu1 %v23691_v31 }
 0x366   :  { %v23702_v41 = vmax.f32 %v28607_v13, %v2625_v20  ;;  %v2459_v24 = vmax.f32 %v2025_v33, 0.0  ;;  %16612 = vmatmul.mubr.f32.gmra.mrb[106].mxu0 %v23686_v54  ;;  %16971 = vmatmul.mubr.f32.gmra.mrb[20].mxu1 %v23686_v54  ;;  %v1630_v42 = vadd.f32 %v23677_v40, %v28616_v21  ;;  %v2381_v13 = vmax.f32 %v1635_v36, 0.0  ;;  %v28626_v21 = vld [vmem:[#allocation112_spill] sm:$0xff] }
 0x367   :  { %v2708_v28 = vmax.f32 %v28609_v8, %v2624_v2  ;;  %v2458_v62 = vmax.f32 %v2020_v53, 0.0  ;;  %v16506_v60 = vpop.f32.mrb[56].mxu0 }
 0x368   :  { %2793 = vst [vmem:[#allocation2 + $0x1c8] sm:$0xff] %v23702_v41  ;;  %v2627_v34 = vmax.f32 %v2375_v26, %v2459_v24  ;;  %v2035_v35 = vadd.f32 %v23677_v40, %v16506_v60  ;;  %v2029_v3 = vpop.f32.mrb[57].mxu0  ;;  %16614 = vmatprep.mubr.f32.mxu0 %v23702_v41  ;;  %16973 = vmatprep.mubr.f32.mxu1 %v23702_v41  ;;  %v28618_v24 = vld [vmem:[#allocation108_spill] sm:$0xff] }
 0x369   :  { %2792 = vst [vmem:[#allocation2 + $0x1c0] sm:$0xff] %v2708_v28  ;;  %v2626_v45 = vmax.f32 %v2374_v4, %v2458_v62  ;;  %v2030_v51 = vadd.f32 %v23677_v40, %v2029_v3  ;;  %v1645_v4 = vadd.f32 %v23677_v40, %v28618_v24  ;;  %v2380_v28 = vmax.f32 %v1630_v42, 0.0  ;;  %v28620_v62 = vld [vmem:[#allocation109_spill] sm:$0xff] }
 0x36a   :  { %v2711_v63 = vmax.f32 %v28611_v50, %v2627_v34  ;;  %v2461_v22 = vmax.f32 %v2035_v35, 0.0  ;;  %v1640_v60 = vadd.f32 %v23677_v40, %v28620_v62  ;;  %v28621_v34 = vld [vmem:[#allocation19_spill] sm:$0xff]  ;;  %v1665_v42 = vadd.f32 %v23677_v40, %v28626_v21 }
 0x36b   :  { %v23720_v27 = vmax.f32 %v28613_v17, %v2626_v45  ;;  %v2460_v32 = vmax.f32 %v2030_v51, 0.0  ;;  %v16509_v15 = vpop.f32.mrb[58].mxu0 }
 0x36c   :  { %2795 = vst [vmem:[#allocation2 + $0x1d8] sm:$0xff] %v2711_v63  ;;  %v2629_v37 = vmax.f32 %v2377_v6, %v2461_v22  ;;  %v2045_v61 = vadd.f32 %v23677_v40, %v16509_v15  ;;  %v2039_v46 = vpop.f32.mrb[59].mxu0  ;;  %v2383_v63 = vmax.f32 %v1645_v4, 0.0  ;;  %v28622_v22 = vld [vmem:[#allocation110_spill] sm:$0xff]  ;;  %v28624_v15 = vld [vmem:[#allocation111_spill] sm:$0xff] }
 0x36d   :  { %2794 = vst [vmem:[#allocation2 + $0x1d0] sm:$0xff] %v23720_v27  ;;  %v2628_v44 = vmax.f32 %v2376_v29, %v2460_v32  ;;  %v2040_v38 = vadd.f32 %v23677_v40, %v2039_v46  ;;  %16615 = vmatmul.mubr.f32.gmra.mrb[108].mxu0 %v23720_v27  ;;  %16974 = vmatmul.mubr.f32.gmra.mrb[22].mxu1 %v23720_v27  ;;  %v2382_v32 = vmax.f32 %v1640_v60, 0.0  ;;  %v2387_v60 = vmax.f32 %v1665_v42, 0.0 }
 0x36e   :  { %v23730_v12 = vmax.f32 %v28615_v9, %v2629_v37  ;;  %v2463_v0 = vmax.f32 %v2045_v61, 0.0  ;;  %v1655_v29 = vadd.f32 %v23677_v40, %v28622_v22  ;;  %v1650_v37 = vadd.f32 %v23677_v40, %v28624_v15  ;;  %v28625_v61 = vld [vmem:[#allocation21_spill] sm:$0xff] }
 0x36f   :  { %v23735_v20 = vmax.f32 %v28617_v48, %v2628_v44  ;;  %v2462_v33 = vmax.f32 %v2040_v38, 0.0  ;;  %v16512_v7 = vpop.f32.mrb[60].mxu0  ;;  %v28627_v48 = vld [vmem:[#allocation22_spill] sm:$0xff] }
 0x370   :  { %2797 = vst [vmem:[#allocation2 + $0x1e8] sm:$0xff] %v23730_v12  ;;  %v2631_v2 = vmax.f32 %v2379_v59, %v2463_v0  ;;  %v2055_v53 = vadd.f32 %v23677_v40, %v16512_v7  ;;  %v2049_v26 = vpop.f32.mrb[61].mxu0 }
 0x371   :  { %2796 = vst [vmem:[#allocation2 + $0x1e0] sm:$0xff] %v23735_v20  ;;  %v2630_v5 = vmax.f32 %v2378_v19, %v2462_v33  ;;  %v2050_v56 = vadd.f32 %v23677_v40, %v2049_v26  ;;  %16617 = vmatprep.mubr.f32.mxu0 %v23735_v20  ;;  %16976 = vmatprep.mubr.f32.mxu1 %v23735_v20  ;;  %v2385_v19 = vmax.f32 %v1655_v29, 0.0 }
 0x372   :  { %v23746_v25 = vmax.f32 %v28619_v47, %v2631_v2  ;;  %v2465_v8 = vmax.f32 %v2055_v53, 0.0  ;;  %16618 = vmatmul.mubr.f32.gmra.mrb[110].mxu0 %v23730_v12  ;;  %16977 = vmatmul.mubr.f32.gmra.mrb[24].mxu1 %v23730_v12  ;;  %v2384_v2 = vmax.f32 %v1650_v37, 0.0  ;;  %v28628_v53 = vld [vmem:[#allocation113_spill] sm:$0xff] }
 0x373   :  { %v2714_v35 = vmax.f32 %v28621_v34, %v2630_v5  ;;  %v2464_v3 = vmax.f32 %v2050_v56, 0.0  ;;  %v16515_v45 = vpop.f32.mrb[62].mxu0  ;;  %v1660_v26 = vadd.f32 %v23677_v40, %v28628_v53  ;;  %v28629_v5 = vld [vmem:[#allocation23_spill] sm:$0xff]  ;;  %v28630_v34 = vld [vmem:[#allocation114_spill] sm:$0xff] }
 0x374   :  { %2799 = vst [vmem:[#allocation2 + $0x1f8] sm:$0xff] %v23746_v25  ;;  %v2633_v51 = vmax.f32 %v2381_v13, %v2465_v8  ;;  %v2065_v6 = vadd.f32 %v23677_v40, %v16515_v45  ;;  %v2059_v16 = vpop.f32.mrb[63].mxu0  ;;  %16620 = vmatprep.mubr.f32.mxu0 %v23746_v25  ;;  %16979 = vmatprep.mubr.f32.mxu1 %v23746_v25 }
 0x375   :  { %2798 = vst [vmem:[#allocation2 + $0x1f0] sm:$0xff] %v2714_v35  ;;  %v2632_v39 = vmax.f32 %v2380_v28, %v2464_v3  ;;  %v2060_v50 = vadd.f32 %v23677_v40, %v2059_v16  ;;  %v1675_v35 = vadd.f32 %v23677_v40, %v28630_v34  ;;  %v28631_v3 = vld [vmem:[#allocation24_spill] sm:$0xff]  ;;  %v28632_v16 = vld [vmem:[#allocation115_spill] sm:$0xff] }
 0x376   :  { %v2717_v1 = vmax.f32 %v28623_v14, %v2633_v51  ;;  %v2467_v17 = vmax.f32 %v2065_v6, 0.0  ;;  %v2386_v6 = vmax.f32 %v1660_v26, 0.0 }
 0x377   :  { %v23764_v46 = vmax.f32 %v28625_v61, %v2632_v39  ;;  %v2466_v44 = vmax.f32 %v2060_v50, 0.0  ;;  %v16518_v38 = vpop.f32.mrb[64].mxu0  ;;  %v1670_v39 = vadd.f32 %v23677_v40, %v28632_v16  ;;  %v28633_v50 = vld [vmem:[#allocation25_spill] sm:$0xff]  ;;  %v2389_v37 = vmax.f32 %v1675_v35, 0.0  ;;  %v28634_v61 = vld [vmem:[#allocation116_spill] sm:$0xff] }
 0x378   :  { %2801 = vst [vmem:[#allocation2 + $0x208] sm:$0xff] %v2717_v1  ;;  %v2635_v59 = vmax.f32 %v2383_v63, %v2467_v17  ;;  %v2075_v58 = vadd.f32 %v23677_v40, %v16518_v38  ;;  %v2069_v36 = vpop.f32.mrb[65].mxu0  ;;  %v28635_v38 = vld [vmem:[#allocation26_spill] sm:$0xff]  ;;  %v28641_v35 = vld [vmem:[#allocation29_spill] sm:$0xff] }
 0x379   :  { %2800 = vst [vmem:[#allocation2 + $0x200] sm:$0xff] %v23764_v46  ;;  %v2634_v9 = vmax.f32 %v2382_v32, %v2466_v44  ;;  %v2070_v0 = vadd.f32 %v23677_v40, %v2069_v36  ;;  %16621 = vmatmul.mubr.f32.gmra.mrb[112].mxu0 %v23764_v46  ;;  %16980 = vmatmul.mubr.f32.gmra.mrb[26].mxu1 %v23764_v46  ;;  %v2388_v36 = vmax.f32 %v1670_v39, 0.0 }
 0x37a   :  { %v23774_v33 = vmax.f32 %v28627_v48, %v2635_v59  ;;  %v2469_v7 = vmax.f32 %v2075_v58, 0.0  ;;  %v1685_v44 = vadd.f32 %v23677_v40, %v28634_v61 }
 0x37b   :  { %v23779_v56 = vmax.f32 %v28629_v5, %v2634_v9  ;;  %v2468_v13 = vmax.f32 %v2070_v0, 0.0  ;;  %v16521_v24 = vpop.f32.mrb[66].mxu0  ;;  %v28636_v9 = vld [vmem:[#allocation117_spill] sm:$0xff] }
 0x37c   :  { %2803 = vst [vmem:[#allocation2 + $0x218] sm:$0xff] %v23774_v33  ;;  %v2637_v4 = vmax.f32 %v2385_v19, %v2469_v7  ;;  %v2085_v47 = vadd.f32 %v23677_v40, %v16521_v24  ;;  %v2079_v8 = vpop.f32.mrb[67].mxu0  ;;  %v1680_v0 = vadd.f32 %v23677_v40, %v28636_v9  ;;  %v28637_v19 = vld [vmem:[#allocation27_spill] sm:$0xff]  ;;  %v28638_v24 = vld [vmem:[#allocation118_spill] sm:$0xff] }
 0x37d   :  { %2802 = vst [vmem:[#allocation2 + $0x210] sm:$0xff] %v23779_v56  ;;  %v2636_v28 = vmax.f32 %v2384_v2, %v2468_v13  ;;  %v2080_v62 = vadd.f32 %v23677_v40, %v2079_v8  ;;  %16623 = vmatprep.mubr.f32.mxu0 %v23779_v56  ;;  %16982 = vmatprep.mubr.f32.mxu1 %v23779_v56  ;;  %v2391_v13 = vmax.f32 %v1685_v44, 0.0  ;;  %v2820_v44 = vld [vmem:[#allocation2] sm:$0xff] }
 0x37e   :  { %v23790_v45 = vmax.f32 %v28631_v3, %v2637_v4  ;;  %v2471_v51 = vmax.f32 %v2085_v47, 0.0  ;;  %16624 = vmatmul.mubr.f32.gmra.mrb[114].mxu0 %v23774_v33  ;;  %16983 = vmatmul.mubr.f32.gmra.mrb[28].mxu1 %v23774_v33  ;;  %v1695_v4 = vadd.f32 %v23677_v40, %v28638_v24  ;;  %v28639_v47 = vld [vmem:[#allocation28_spill] sm:$0xff] }
 0x37f   :  { %v2720_v63 = vmax.f32 %v28633_v50, %v2636_v28  ;;  %v2470_v22 = vmax.f32 %v2080_v62, 0.0  ;;  %v16524_v29 = vpop.f32.mrb[68].mxu0  ;;  %v2390_v62 = vmax.f32 %v1680_v0, 0.0  ;;  %v13364_v24 = vld [vmem:[%s28312_s5 + $0x128] sm:$0xff] }
 0x380   :  { %2805 = vst [vmem:[#allocation2 + $0x228] sm:$0xff] %v23790_v45  ;;  %v2639_v14 = vmax.f32 %v2387_v60, %v2471_v51  ;;  %v2095_v1 = vadd.f32 %v23677_v40, %v16524_v29  ;;  %v2089_v17 = vpop.f32.mrb[69].mxu0  ;;  %16626 = vmatprep.mubr.f32.mxu0 %v23790_v45  ;;  %16985 = vmatprep.mubr.f32.mxu1 %v23790_v45  ;;  %v28640_v60 = vld [vmem:[#allocation119_spill] sm:$0xff]  ;;  %v13361_v29 = vld [vmem:[%s28312_s5 + $0x110] sm:$0xff] }
 0x381   :  { %2804 = vst [vmem:[#allocation2 + $0x220] sm:$0xff] %v2720_v63  ;;  %v2638_v32 = vmax.f32 %v2386_v6, %v2470_v22  ;;  %v2090_v15 = vadd.f32 %v23677_v40, %v2089_v17  ;;  %v1690_v34 = vadd.f32 %v23677_v40, %v28640_v60  ;;  %v28642_v17 = vld [vmem:[#allocation120_spill] sm:$0xff] }
 0x382   :  { %v2723_v59 = vmax.f32 %v28635_v38, %v2639_v14  ;;  %v2473_v58 = vmax.f32 %v2095_v1, 0.0  ;;  %v13362_v14 = vld [vmem:[%s28312_s5 + $0x118] sm:$0xff]  ;;  %v2393_v1 = vmax.f32 %v1695_v4, 0.0 }
 0x383   :  { %v23808_v21 = vmax.f32 %v28637_v19, %v2638_v32  ;;  %v2472_v42 = vmax.f32 %v2090_v15, 0.0  ;;  %v16527_v48 = vpop.f32.mrb[70].mxu0  ;;  %v1705_v32 = vadd.f32 %v23677_v40, %v28642_v17  ;;  %v28643_v15 = vld [vmem:[#allocation30_spill] sm:$0xff]  ;;  %v2392_v38 = vmax.f32 %v1690_v34, 0.0 }
 0x384   :  { %2807 = vst [vmem:[#allocation2 + $0x238] sm:$0xff] %v2723_v59  ;;  %v2641_v7 = vmax.f32 %v2389_v37, %v2473_v58  ;;  %v2105_v2 = vadd.f32 %v23677_v40, %v16527_v48  ;;  %v2099_v53 = vpop.f32.mrb[71].mxu0  ;;  %v28644_v59 = vld [vmem:[#allocation121_spill] sm:$0xff] }
 0x385   :  { %2806 = vst [vmem:[#allocation2 + $0x230] sm:$0xff] %v23808_v21  ;;  %v2640_v26 = vmax.f32 %v2388_v36, %v2472_v42  ;;  %v2100_v5 = vadd.f32 %v23677_v40, %v2099_v53  ;;  %16627 = vmatmul.mubr.f32.gmra.mrb[116].mxu0 %v23808_v21  ;;  %16986 = vmatmul.mubr.f32.gmra.mrb[30].mxu1 %v23808_v21  ;;  %v28645_v36 = vld [vmem:[#allocation31_spill] sm:$0xff]  ;;  %v2395_v4 = vmax.f32 %v1705_v32, 0.0 }
 0x386   :  { %v23818_v8 = vmax.f32 %v28639_v47, %v2641_v7  ;;  %v2475_v28 = vmax.f32 %v2105_v2, 0.0  ;;  %v1700_v58 = vadd.f32 %v23677_v40, %v28644_v59  ;;  %v19045_v2 = vpack.c.bf16 %v13362_v14, %v13361_v29  ;;  %v28646_v47 = vld [vmem:[#allocation122_spill] sm:$0xff] }
 0x387   :  { %v23823_v3 = vmax.f32 %v28641_v35, %v2640_v26  ;;  %v2474_v51 = vmax.f32 %v2100_v5, 0.0  ;;  %v16530_v6 = vpop.f32.mrb[72].mxu0  ;;  %v2821_v5 = vld [vmem:[#allocation2 + $0x8] sm:$0xff] }
 0x388   :  { %2809 = vst [vmem:[#allocation2 + $0x248] sm:$0xff] %v23818_v8  ;;  %v2643_v16 = vmax.f32 %v2391_v13, %v2475_v28  ;;  %v2115_v39 = vadd.f32 %v23677_v40, %v16530_v6  ;;  %v2109_v50 = vpop.f32.mrb[73].mxu0  ;;  %v13363_v13 = vld [vmem:[%s28312_s5 + $0x120] sm:$0xff]  ;;  %v1715_v28 = vadd.f32 %v23677_v40, %v28646_v47  ;;  %v2394_v35 = vmax.f32 %v1700_v58, 0.0  ;;  %v28651_v58 = vld [vmem:[#allocation34_spill] sm:$0xff] }
 0x389   :  { %2808 = vst [vmem:[#allocation2 + $0x240] sm:$0xff] %v23823_v3  ;;  %v2642_v63 = vmax.f32 %v2390_v62, %v2474_v51  ;;  %v2110_v22 = vadd.f32 %v23677_v40, %v2109_v50  ;;  %16629 = vmatprep.mubr.f32.mxu0 %v23823_v3  ;;  %16988 = vmatprep.mubr.f32.mxu1 %v23823_v3  ;;  %v28647_v62 = vld [vmem:[#allocation32_spill] sm:$0xff]  ;;  %v28648_v51 = vld [vmem:[#allocation123_spill] sm:$0xff] }
 0x38a   :  { %v23840_v37 = vmax.f32 %v28643_v15, %v2643_v16  ;;  %v2477_v61 = vmax.f32 %v2115_v39, 0.0  ;;  %16630 = vmatmul.mubr.f32.gmra.mrb[118].mxu0 %v23818_v8  ;;  %16989 = vmatmul.mubr.f32.gmra.mrb[32].mxu1 %v23818_v8  ;;  %v1710_v6 = vadd.f32 %v23677_v40, %v28648_v51  ;;  %v28649_v16 = vld [vmem:[#allocation33_spill] sm:$0xff]  ;;  %v19049_v17 = vpack.c.bf16 %v13364_v24, %v13363_v13  ;;  %v28656_v51 = vld [vmem:[#allocation36_spill] sm:$0xff] }
 0x38b   :  { %v2726_v9 = vmax.f32 %v28645_v36, %v2642_v63  ;;  %v2476_v0 = vmax.f32 %v2110_v22, 0.0  ;;  %v16533_v19 = vpop.f32.mrb[74].mxu0  ;;  %16664 = vmatprep.mubr.f32.mxu0 %v2820_v44  ;;  %v21259_v22 = vld [vmem:[#allocation2 + $0x18] sm:$0xff]  ;;  %v2397_v44 = vmax.f32 %v1715_v28, 0.0  ;;  %v23886_v13 = vld [vmem:[#allocation2 + $0x30] sm:$0xff] }
 0x38c   :  { %2811 = vst [vmem:[#allocation2 + $0x258] sm:$0xff] %v23840_v37  ;;  %v2645_v42 = vmax.f32 %v2393_v1, %v2477_v61  ;;  %v2125_v48 = vadd.f32 %v23677_v40, %v16533_v19  ;;  %v2119_v7 = vpop.f32.mrb[75].mxu0  ;;  %16991 = vmatprep.mubr.f32.mxu1 %v23840_v37  ;;  %v13365_v61 = vld [vmem:[%s28312_s5 + $0x130] sm:$0xff]  ;;  %v2396_v19 = vmax.f32 %v1710_v6, 0.0 }
 0x38d   :  { %2810 = vst [vmem:[#allocation2 + $0x250] sm:$0xff] %v2726_v9  ;;  %v2644_v53 = vmax.f32 %v2392_v38, %v2476_v0  ;;  %v2120_v26 = vadd.f32 %v23677_v40, %v2119_v7  ;;  %v28650_v38 = vld [vmem:[#allocation124_spill] sm:$0xff]  ;;  %v21260_v0 = vld [vmem:[#allocation2 + $0x20] sm:$0xff] }
 0x38e   :  { %v2729_v60 = vmax.f32 %v28647_v62, %v2645_v42  ;;  %v2479_v34 = vmax.f32 %v2125_v48, 0.0  ;;  %16665 = vmatmul.mubr.f32.vlgmr.msra.gmra.mrb[80].mxu0 %v2821_v5  ;;  %v1725_v59 = vadd.f32 %v23677_v40, %v28650_v38  ;;  %v28653_v42 = vld [vmem:[#allocation125_spill] sm:$0xff]  ;;  %v28654_v7 = vld [vmem:[#allocation35_spill] sm:$0xff] }
 0x38f   :  { %v23863_v39 = vmax.f32 %v28649_v16, %v2644_v53  ;;  %v2478_v50 = vmax.f32 %v2120_v26, 0.0  ;;  %v16536_v63 = vpop.f32.mrb[76].mxu0  ;;  %16667 = vmatprep.mubr.f32.mxu0 %v21259_v22  ;;  %19044 = vmatpush3.bf16.msra.mxu0 %v23572_v10  ;;  %v13366_v10 = vld [vmem:[%s28312_s5 + $0x138] sm:$0xff]  ;;  %v1720_v48 = vadd.f32 %v23677_v40, %v28653_v42  ;;  %v13425_v42 = vld [vmem:[%s28312_s5 + $0x310] sm:$0xff] }
 0x390   :  { %2813 = vst [vmem:[#allocation2 + $0x268] sm:$0xff] %v2729_v60  ;;  %v2647_v29 = vmax.f32 %v2395_v4, %v2479_v34  ;;  %v2135_v14 = vadd.f32 %v23677_v40, %v16536_v63  ;;  %v2129_v1 = vpop.f32.mrb[77].mxu0  ;;  %19046 = vmatprep.subr.bf16.mxu0 %v19045_v2  ;;  %v19053_v28 = vpack.c.bf16 %v13366_v10, %v13365_v61  ;;  %v13367_v34 = vld [vmem:[%s28312_s5 + $0x140] sm:$0xff]  ;;  %v28657_v63 = vld [vmem:[#allocation37_spill] sm:$0xff]  ;;  %v13370_v10 = vld [vmem:[%s28312_s5 + $0x158] sm:$0xff] }
 0x391   :  { %2812 = vst [vmem:[#allocation2 + $0x260] sm:$0xff] %v23863_v39  ;;  %v2646_v32 = vmax.f32 %v2394_v35, %v2478_v50  ;;  %v2130_v15 = vadd.f32 %v23677_v40, %v2129_v1  ;;  %16992 = vmatmul.mubr.f32.gmra.mrb[34].mxu1 %v23863_v39  ;;  %v2399_v35 = vmax.f32 %v1725_v59, 0.0  ;;  %v23901_v50 = vld [vmem:[#allocation2 + $0x38] sm:$0xff]  ;;  %v13369_v61 = vld [vmem:[%s28312_s5 + $0x150] sm:$0xff] }
 0x392   :  { %v23879_v36 = vmax.f32 %v28651_v58, %v2647_v29  ;;  %v2481_v9 = vmax.f32 %v2135_v14, 0.0  ;;  %16668 = vmatmul.mubr.f32.gmra.mrb[82].mxu0 %v21260_v0  ;;  %v23906_v14 = vld [vmem:[#allocation2 + $0x48] sm:$0xff]  ;;  %v23916_v59 = vld [vmem:[#allocation2 + $0x50] sm:$0xff]  ;;  %v19061_v0 = vpack.c.bf16 %v13370_v10, %v13369_v61  ;;  %v23987_v10 = vld [vmem:[#allocation2 + $0x39] sm:$0xff] }
 0x393   :  { %v23884_v53 = vmax.f32 %v28654_v7, %v2646_v32  ;;  %v2480_v26 = vmax.f32 %v2130_v15, 0.0  ;;  %v16539_v5 = vpop.f32.mrb[78].mxu0  ;;  %16670 = vmatprep.mubr.f32.mxu0 %v23886_v13  ;;  %19048 = vmatpush3.bf16.msra.mxu0 %v19045_v2  ;;  %v13368_v2 = vld [vmem:[%s28312_s5 + $0x148] sm:$0xff]  ;;  %28659 = vst [vmem:[#allocation39_spill] sm:$0xff] %v23916_v59 }
 0x394   :  { %28652 = vst [vmem:[#allocation38_spill] sm:$0xff] %v23879_v36  ;;  %2815 = vst [vmem:[#allocation2 + $0x278] sm:$0xff] %v23879_v36  ;;  %v2649_v24 = vmax.f32 %v2397_v44, %v2481_v9  ;;  %v2145_v4 = vadd.f32 %v23677_v40, %v16539_v5  ;;  %v2139_v47 = vpop.f32.mrb[79].mxu0  ;;  %19050 = vmatprep.subr.bf16.mxu0 %v19049_v17  ;;  %v19057_v32 = vpack.c.bf16 %v13368_v2, %v13367_v34  ;;  %v28658_v44 = vld [vmem:[#allocation65_spill] sm:$0xff]  ;;  %v23920_v9 = vld [vmem:[#allocation2 + $0x60] sm:$0xff] }
 0x395   :  { %28655 = vst [vmem:[#allocation67_spill] sm:$0xff] %v23884_v53  ;;  %2814 = vst [vmem:[#allocation2 + $0x270] sm:$0xff] %v23884_v53  ;;  %v2648_v62 = vmax.f32 %v2396_v19, %v2480_v26  ;;  %v2140_v60 = vadd.f32 %v23677_v40, %v2139_v47  ;;  %16994 = vmatprep.mubr.f32.mxu1 %v23884_v53  ;;  %v2398_v40 = vmax.f32 %v1720_v48, 0.0  ;;  %v4405_v19 = vld [vmem:[#allocation2 + $0x1] sm:$0xff]  ;;  %v13426_v48 = vld [vmem:[%s28312_s5 + $0x318] sm:$0xff] }
 0x396   :  { %v2733_v6 = vmax.f32 %v28656_v51, %v2649_v24  ;;  %v2483_v16 = vmax.f32 %v2145_v4, 0.0  ;;  %16671 = vmatmul.mubr.f32.gmra.mrb[84].mxu0 %v23901_v50  ;;  %16995 = vmatmul.mubr.f32.gmra.mrb[36].mxu1 %v23879_v36  ;;  %v23929_v7 = vld [vmem:[#allocation2 + $0x68] sm:$0xff]  ;;  %v13371_v26 = vld [vmem:[%s28312_s5 + $0x160] sm:$0xff]  ;;  %v23938_v24 = vld [vmem:[#allocation2 + $0x78] sm:$0xff]  ;;  %v19173_v47 = vpack.c.bf16 %v13426_v48, %v13425_v42 }
 0x397   :  { %v2732_v22 = vmax.f32 %v28657_v63, %v2648_v62  ;;  %v2482_v29 = vmax.f32 %v2140_v60, 0.0  ;;  %16673 = vmatprep.mubr.f32.mxu0 %v23906_v14  ;;  %19052 = vmatpush3.bf16.msra.mxu0 %v19049_v17  ;;  %v28660_v17 = vld [vmem:[#allocation66_spill] sm:$0xff]  ;;  %28661 = vst [vmem:[#allocation68_spill] sm:$0xff] %v23929_v7  ;;  %v13372_v5 = vld [vmem:[%s28312_s5 + $0x168] sm:$0xff]  ;;  %v13427_v62 = vld [vmem:[%s28312_s5 + $0x320] sm:$0xff] }
 0x398   :  { %2817 = vst [vmem:[#allocation2 + $0x288] sm:$0xff] %v2733_v6  ;;  %v2651_v1 = vmax.f32 %v2399_v35, %v2483_v16  ;;  %16997 = vmatprep.mubr.f32.mxu1 %v2733_v6  ;;  %19054 = vmatprep.subr.bf16.mxu0 %v19053_v28  ;;  %v4406_v4 = vld [vmem:[#allocation2 + $0x9] sm:$0xff]  ;;  %v19065_v34 = vpack.c.bf16 %v13372_v5, %v13371_v26  ;;  %v23949_v2 = vld [vmem:[#allocation2 + $0x80] sm:$0xff]  ;;  %v13374_v51 = vld [vmem:[%s28312_s5 + $0x178] sm:$0xff] }
 0x399   :  { %2816 = vst [vmem:[#allocation2 + $0x280] sm:$0xff] %v2732_v22  ;;  %v2650_v15 = vmax.f32 %v2398_v40, %v2482_v29  ;;  %v13428_v60 = vld [vmem:[%s28312_s5 + $0x328] sm:$0xff]  ;;  %v13373_v35 = vld [vmem:[%s28312_s5 + $0x170] sm:$0xff]  ;;  %v13430_v29 = vld [vmem:[%s28312_s5 + $0x338] sm:$0xff] }
 0x39a   :  { %v2735_v38 = vmax.f32 %v28658_v44, %v2651_v1  ;;  %16674 = vmatmul.mubr.f32.gmra.mrb[86].mxu0 %v23916_v59  ;;  %v23959_v6 = vld [vmem:[#allocation2 + $0x90] sm:$0xff]  ;;  %v23963_v16 = vld [vmem:[#allocation2 + $0x21] sm:$0xff]  ;;  %v19177_v40 = vpack.c.bf16 %v13428_v60, %v13427_v62  ;;  %v19069_v1 = vpack.c.bf16 %v13374_v51, %v13373_v35  ;;  %v24023_v60 = vld [vmem:[#allocation2 + $0xd8] sm:$0xff] }
 0x39b   :  { %v2734_v58 = vmax.f32 %v28660_v17, %v2650_v15  ;;  %16676 = vmatprep.mubr.f32.mxu0 %v23920_v9  ;;  %19056 = vmatpush3.bf16.msra.mxu0 %v19053_v28  ;;  %v23941_v28 = vld [vmem:[#allocation2 + $0x19] sm:$0xff]  ;;  %v23966_v63 = vld [vmem:[#allocation2 + $0x31] sm:$0xff]  ;;  %v13376_v15 = vld [vmem:[%s28312_s5 + $0x188] sm:$0xff] }
 0x39c   :  { %2819 = vst [vmem:[#allocation2 + $0x298] sm:$0xff] %v2735_v38  ;;  %19058 = vmatprep.subr.bf16.mxu0 %v19057_v32  ;;  %v13429_v22 = vld [vmem:[%s28312_s5 + $0x330] sm:$0xff]  ;;  %v23984_v61 = vld [vmem:[#allocation2 + $0xa8] sm:$0xff]  ;;  %v13431_v17 = vld [vmem:[%s28312_s5 + $0x340] sm:$0xff] }
 0x39d   :  { %2818 = vst [vmem:[#allocation2 + $0x290] sm:$0xff] %v2734_v58  ;;  %16998 = vmatmul.mubr.f32.gmra.mrb[38].mxu1 %v2734_v58  ;;  %v19181_v44 = vpack.c.bf16 %v13430_v29, %v13429_v22  ;;  %v23990_v38 = vld [vmem:[#allocation2 + $0x49] sm:$0xff]  ;;  %v24004_v42 = vld [vmem:[#allocation2 + $0xc0] sm:$0xff]  ;;  %v24007_v48 = vld [vmem:[#allocation2 + $0x51] sm:$0xff] }
 0x39e   :  { %16677 = vmatmul.mubr.f32.gmra.mrb[88].mxu0 %v23929_v7  ;;  %17032 = vmatprep.mubr.f32.mxu1 %v4405_v19  ;;  %v13432_v58 = vld [vmem:[%s28312_s5 + $0x348] sm:$0xff]  ;;  %v24000_v19 = vld [vmem:[#allocation2 + $0xb0] sm:$0xff]  ;;  %v24029_v51 = vld [vmem:[#allocation2 + $0x79] sm:$0xff] }
 0x39f   :  { %16679 = vmatprep.mubr.f32.mxu0 %v23938_v24  ;;  %19060 = vmatpush3.bf16.msra.mxu0 %v19057_v32  ;;  %v13375_v32 = vld [vmem:[%s28312_s5 + $0x180] sm:$0xff]  ;;  %v19185_v26 = vpack.c.bf16 %v13432_v58, %v13431_v17  ;;  %v24019_v62 = vld [vmem:[#allocation2 + $0xc8] sm:$0xff]  ;;  %v13438_v17 = vld [vmem:[%s28312_s5 + $0x378] sm:$0xff] }
 0x3a0   :  { %19062 = vmatprep.subr.bf16.mxu0 %v19061_v0  ;;  %v24010_v5 = vld [vmem:[#allocation2 + $0x61] sm:$0xff]  ;;  %v13381_v36 = vld [vmem:[%s28312_s5 + $0x1b0] sm:$0xff] }
 0x3a1   :  { %17033 = vmatmul.mubr.f32.vlgmr.msra.gmra.mrb[0].mxu1 %v4406_v4  ;;  %v13433_v4 = vld [vmem:[%s28312_s5 + $0x350] sm:$0xff]  ;;  %v13436_v22 = vld [vmem:[%s28312_s5 + $0x368] sm:$0xff]  ;;  %v24037_v29 = vld [vmem:[#allocation2 + $0xe0] sm:$0xff] }
 0x3a2   :  { %16680 = vmatmul.mubr.f32.gmra.mrb[90].mxu0 %v23949_v2  ;;  %17035 = vmatprep.mubr.f32.mxu1 %v23941_v28  ;;  %v13383_v53 = vld [vmem:[%s28312_s5 + $0x1c0] sm:$0xff] }
 0x3a3   :  { %16682 = vmatprep.mubr.f32.mxu0 %v23959_v6  ;;  %19172 = vmatpush3.bf16.msra.mxu1 %v23531_v43  ;;  %v23974_v43 = vld [vmem:[#allocation2 + $0x98] sm:$0xff] }
 0x3a4   :  { %19174 = vmatprep.subr.bf16.mxu1 %v19173_v47  ;;  %19064 = vmatpush3.bf16.msra.mxu0 %v19061_v0  ;;  %28662 = vst [vmem:[#allocation40_spill] sm:$0xff] %v23974_v43  ;;  %v23998_v0 = vpack.c.bf16 %v13376_v15, %v13375_v32  ;;  %v24045_v15 = vld [vmem:[#allocation2 + $0x91] sm:$0xff] }
 0x3a5   :  { %17036 = vmatmul.mubr.f32.gmra.mrb[2].mxu1 %v23963_v16  ;;  %19066 = vmatprep.subr.bf16.mxu0 %v19065_v34  ;;  %28664 = vst [vmem:[#allocation41_spill] sm:$0xff] %v24045_v15 }
 0x3a6   :  { %16683 = vmatmul.mubr.f32.gmra.mrb[92].mxu0 %v23974_v43  ;;  %17038 = vmatprep.mubr.f32.mxu1 %v23966_v63 }
 0x3a7   :  { %16685 = vmatprep.mubr.f32.mxu0 %v23984_v61  ;;  %19176 = vmatpush3.bf16.msra.mxu1 %v19173_v47  ;;  %v13434_v47 = vld [vmem:[%s28312_s5 + $0x358] sm:$0xff] }
 0x3a8   :  { %19178 = vmatprep.subr.bf16.mxu1 %v19177_v40  ;;  %19068 = vmatpush3.bf16.msra.mxu0 %v19065_v34  ;;  %v24026_v34 = vld [vmem:[#allocation2 + $0x69] sm:$0xff]  ;;  %v19189_v35 = vpack.c.bf16 %v13434_v47, %v13433_v4  ;;  %v13439_v4 = vld [vmem:[%s28312_s5 + $0x380] sm:$0xff] }
 0x3a9   :  { %17039 = vmatmul.mubr.f32.gmra.mrb[4].mxu1 %v23987_v10  ;;  %19070 = vmatprep.subr.bf16.mxu0 %v19069_v1 }
 0x3aa   :  { %16686 = vmatmul.mubr.f32.gmra.mrb[94].mxu0 %v24000_v19  ;;  %17041 = vmatprep.mubr.f32.mxu1 %v23990_v38 }
 0x3ab   :  { %16688 = vmatprep.mubr.f32.mxu0 %v24004_v42  ;;  %19180 = vmatpush3.bf16.msra.mxu1 %v19177_v40  ;;  %v13435_v40 = vld [vmem:[%s28312_s5 + $0x360] sm:$0xff] }
 0x3ac   :  { %19182 = vmatprep.subr.bf16.mxu1 %v19181_v44  ;;  %19072 = vmatpush3.bf16.msra.mxu0 %v19069_v1  ;;  %v24042_v1 = vld [vmem:[#allocation2 + $0x81] sm:$0xff]  ;;  %v19193_v32 = vpack.c.bf16 %v13436_v22, %v13435_v40  ;;  %v4434_v40 = vld [vmem:[#allocation2 + $0x159] sm:$0xff]  ;;  %v24094_v22 = vld [vmem:[#allocation2 + $0x169] sm:$0xff] }
 0x3ad   :  { %17042 = vmatmul.mubr.f32.gmra.mrb[6].mxu1 %v24007_v48  ;;  %19074 = vmatprep.subr.bf16.mxu0 %v23998_v0  ;;  %28663 = vst [vmem:[#allocation69_spill] sm:$0xff] %v24042_v1 }
 0x3ae   :  { %16689 = vmatmul.mubr.f32.gmra.mrb[96].mxu0 %v24019_v62  ;;  %17044 = vmatprep.mubr.f32.mxu1 %v24010_v5 }
 0x3af   :  { %16691 = vmatprep.mubr.f32.mxu0 %v24023_v60  ;;  %19184 = vmatpush3.bf16.msra.mxu1 %v19181_v44  ;;  %v13437_v44 = vld [vmem:[%s28312_s5 + $0x370] sm:$0xff] }
 0x3b0   :  { %19186 = vmatprep.subr.bf16.mxu1 %v19185_v26  ;;  %v19197_v58 = vpack.c.bf16 %v13438_v17, %v13437_v44  ;;  %v13377_v44 = vld [vmem:[%s28312_s5 + $0x190] sm:$0xff]  ;;  %v13378_v17 = vld [vmem:[%s28312_s5 + $0x198] sm:$0xff] }
 0x3b1   :  { %17045 = vmatmul.mubr.f32.gmra.mrb[8].mxu1 %v24026_v34 }
 0x3b2   :  { %16692 = vmatmul.mubr.f32.gmra.mrb[98].mxu0 %v24037_v29  ;;  %17047 = vmatprep.mubr.f32.mxu1 %v24029_v51 }
 0x3b3   :  { %16694 = vmatprep.mubr.f32.mxu0 %v23608_v30  ;;  %19188 = vmatpush3.bf16.msra.mxu1 %v19185_v26  ;;  %v24056_v30 = vld [vmem:[#allocation2 + $0x99] sm:$0xff]  ;;  %v24059_v26 = vld [vmem:[#allocation2 + $0xa9] sm:$0xff] }
 0x3b4   :  { %19190 = vmatprep.subr.bf16.mxu1 %v19189_v35 }
 0x3b5   :  { %17048 = vmatmul.mubr.f32.gmra.mrb[10].mxu1 %v24042_v1 }
 0x3b6   :  { %16695 = vmatmul.mubr.f32.gmra.mrb[100].mxu0 %v23603_v52  ;;  %17050 = vmatprep.mubr.f32.mxu1 %v24045_v15  ;;  %v13440_v52 = vld [vmem:[%s28312_s5 + $0x388] sm:$0xff] }
 0x3b7   :  { %16697 = vmatprep.mubr.f32.mxu0 %v23617_v55  ;;  %19192 = vmatpush3.bf16.msra.mxu1 %v19189_v35  ;;  %v24070_v55 = vld [vmem:[#allocation2 + $0xb1] sm:$0xff]  ;;  %v24072_v47 = vpack.c.bf16 %v13440_v52, %v13439_v4  ;;  %v24075_v35 = vld [vmem:[#allocation2 + $0xc1] sm:$0xff]  ;;  %v19077_v4 = vpack.c.bf16 %v13378_v17, %v13377_v44  ;;  %v24155_v17 = vld [vmem:[#allocation2 + $0x1f9] sm:$0xff] }
 0x3b8   :  { %19194 = vmatprep.subr.bf16.mxu1 %v19193_v32  ;;  %v24140_v52 = vld [vmem:[#allocation2 + $0x1e1] sm:$0xff] }
 0x3b9   :  { %17051 = vmatmul.mubr.f32.gmra.mrb[12].mxu1 %v24056_v30 }
 0x3ba   :  { %16698 = vmatmul.mubr.f32.gmra.mrb[102].mxu0 %v23632_v18  ;;  %17053 = vmatprep.mubr.f32.mxu1 %v24059_v26  ;;  %v24080_v18 = vld [vmem:[#allocation2 + $0xc9] sm:$0xff] }
 0x3bb   :  { %16700 = vmatprep.mubr.f32.mxu0 %v23646_v57  ;;  %19196 = vmatpush3.bf16.msra.mxu1 %v19193_v32  ;;  %v24084_v57 = vld [vmem:[#allocation2 + $0xd9] sm:$0xff]  ;;  %v24126_v32 = vld [vmem:[#allocation2 + $0x1c9] sm:$0xff] }
 0x3bc   :  { %19198 = vmatprep.subr.bf16.mxu1 %v19197_v58  ;;  %28665 = vst [vmem:[#allocation70_spill] sm:$0xff] %v24084_v57 }
 0x3bd   :  { %17054 = vmatmul.mubr.f32.gmra.mrb[14].mxu1 %v24070_v55 }
 0x3be   :  { %16701 = vmatmul.mubr.f32.gmra.mrb[104].mxu0 %v23641_v49  ;;  %17056 = vmatprep.mubr.f32.mxu1 %v24075_v35  ;;  %v24089_v49 = vld [vmem:[#allocation2 + $0xe1] sm:$0xff] }
 0x3bf   :  { %16703 = vmatprep.mubr.f32.mxu0 %v23656_v23  ;;  %19200 = vmatpush3.bf16.msra.mxu1 %v19197_v58  ;;  %v4433_v23 = vld [vmem:[#allocation2 + $0x151] sm:$0xff] }
 0x3c0   :  { %19202 = vmatprep.subr.bf16.mxu1 %v24072_v47  ;;  %v24137_v58 = vld [vmem:[#allocation2 + $0x1d1] sm:$0xff] }
 0x3c1   :  { %17057 = vmatmul.mubr.f32.gmra.mrb[16].mxu1 %v24080_v18 }
 0x3c2   :  { %16704 = vmatmul.mubr.f32.gmra.mrb[106].mxu0 %v23672_v11  ;;  %17059 = vmatprep.mubr.f32.mxu1 %v24084_v57  ;;  %v24099_v11 = vld [vmem:[#allocation2 + $0x171] sm:$0xff] }
 0x3c3   :  { %16706 = vmatprep.mubr.f32.mxu0 %v23691_v31  ;;  %v24102_v31 = vld [vmem:[#allocation2 + $0x181] sm:$0xff] }
 0x3c5   :  { %17060 = vmatmul.mubr.f32.gmra.mrb[18].mxu1 %v24089_v49 }
 0x3c6   :  { %16707 = vmatmul.mubr.f32.gmra.mrb[108].mxu0 %v23686_v54  ;;  %17062 = vmatprep.mubr.f32.mxu1 %v4433_v23  ;;  %v24107_v54 = vld [vmem:[#allocation2 + $0x189] sm:$0xff]  ;;  %v13379_v23 = vld [vmem:[%s28312_s5 + $0x1a0] sm:$0xff] }
 0x3c7   :  { %16709 = vmatprep.mubr.f32.mxu0 %v23702_v41  ;;  %v24110_v41 = vld [vmem:[#allocation2 + $0x199] sm:$0xff] }
 0x3c9   :  { %17063 = vmatmul.mubr.f32.gmra.mrb[20].mxu1 %v4434_v40  ;;  %v13380_v40 = vld [vmem:[%s28312_s5 + $0x1a8] sm:$0xff] }
 0x3ca   :  { %16710 = vmatmul.mubr.f32.gmra.mrb[110].mxu0 %v23720_v27  ;;  %17065 = vmatprep.mubr.f32.mxu1 %v24094_v22  ;;  %v24115_v27 = vld [vmem:[#allocation2 + $0x1a1] sm:$0xff]  ;;  %v19081_v44 = vpack.c.bf16 %v13380_v40, %v13379_v23  ;;  %v24169_v40 = vld [vmem:[#allocation2 + $0x211] sm:$0xff] }
 0x3cb   :  { %16712 = vmatprep.mubr.f32.mxu0 %v23735_v20  ;;  %v24123_v20 = vld [vmem:[#allocation2 + $0x1b9] sm:$0xff] }
 0x3cd   :  { %17066 = vmatmul.mubr.f32.gmra.mrb[22].mxu1 %v24099_v11 }
 0x3ce   :  { %16713 = vmatmul.mubr.f32.gmra.mrb[112].mxu0 %v23730_v12  ;;  %17068 = vmatprep.mubr.f32.mxu1 %v24102_v31  ;;  %v24118_v12 = vld [vmem:[#allocation2 + $0x1b1] sm:$0xff] }
 0x3cf   :  { %16715 = vmatprep.mubr.f32.mxu0 %v23746_v25 }
 0x3d1   :  { %17069 = vmatmul.mubr.f32.gmra.mrb[24].mxu1 %v24107_v54 }
 0x3d2   :  { %16716 = vmatmul.mubr.f32.gmra.mrb[114].mxu0 %v23764_v46  ;;  %17071 = vmatprep.mubr.f32.mxu1 %v24110_v41 }
 0x3d3   :  { %16718 = vmatprep.mubr.f32.mxu0 %v23779_v56 }
 0x3d5   :  { %17072 = vmatmul.mubr.f32.gmra.mrb[26].mxu1 %v24115_v27 }
 0x3d6   :  { %16719 = vmatmul.mubr.f32.gmra.mrb[116].mxu0 %v23774_v33  ;;  %17074 = vmatprep.mubr.f32.mxu1 %v24118_v12 }
 0x3d7   :  { %16721 = vmatprep.mubr.f32.mxu0 %v23790_v45 }
 0x3d9   :  { %17075 = vmatmul.mubr.f32.gmra.mrb[28].mxu1 %v24123_v20 }
 0x3da   :  { %16722 = vmatmul.mubr.f32.gmra.mrb[118].mxu0 %v23808_v21  ;;  %17077 = vmatprep.mubr.f32.mxu1 %v24126_v32 }
 0x3db   :  { %16756 = vmatprep.mubr.f32.mxu0 %v23886_v13  ;;  %v24152_v13 = vld [vmem:[#allocation2 + $0x1e9] sm:$0xff] }
 0x3dd   :  { %17078 = vmatmul.mubr.f32.gmra.mrb[30].mxu1 %v24137_v58 }
 0x3de   :  { %16757 = vmatmul.mubr.f32.vlgmr.msra.gmra.mrb[80].mxu0 %v23901_v50  ;;  %17080 = vmatprep.mubr.f32.mxu1 %v24140_v52  ;;  %v13382_v50 = vld [vmem:[%s28312_s5 + $0x1b8] sm:$0xff] }
 0x3df   :  { %16759 = vmatprep.mubr.f32.mxu0 %v23906_v14  ;;  %19076 = vmatpush3.bf16.msra.mxu0 %v23998_v0  ;;  %v24166_v0 = vld [vmem:[#allocation2 + $0x201] sm:$0xff]  ;;  %v19085_v23 = vpack.c.bf16 %v13382_v50, %v13381_v36  ;;  %v24180_v36 = vld [vmem:[#allocation2 + $0x219] sm:$0xff]  ;;  %v24183_v50 = vld [vmem:[#allocation2 + $0x229] sm:$0xff] }
 0x3e0   :  { %19078 = vmatprep.subr.bf16.mxu0 %v19077_v4  ;;  %28666 = vst [vmem:[#allocation42_spill] sm:$0xff] %v24166_v0  ;;  %28667 = vst [vmem:[#allocation71_spill] sm:$0xff] %v24180_v36 }
 0x3e1   :  { %17081 = vmatmul.mubr.f32.gmra.mrb[32].mxu1 %v24152_v13 }
 0x3e2   :  { %16760 = vmatmul.mubr.f32.gmra.mrb[82].mxu0 %v23916_v59  ;;  %17083 = vmatprep.mubr.f32.mxu1 %v24155_v17  ;;  %v13384_v59 = vld [vmem:[%s28312_s5 + $0x1c8] sm:$0xff] }
 0x3e3   :  { %16762 = vmatprep.mubr.f32.mxu0 %v23920_v9  ;;  %19080 = vmatpush3.bf16.msra.mxu0 %v19077_v4  ;;  %v19089_v4 = vpack.c.bf16 %v13384_v59, %v13383_v53  ;;  %v24194_v53 = vld [vmem:[#allocation2 + $0x231] sm:$0xff] }
 0x3e4   :  { %19082 = vmatprep.subr.bf16.mxu0 %v19081_v44  ;;  %28668 = vst [vmem:[#allocation43_spill] sm:$0xff] %v24194_v53 }
 0x3e5   :  { %17084 = vmatmul.mubr.f32.gmra.mrb[34].mxu1 %v24166_v0  ;;  %v13385_v0 = vld [vmem:[%s28312_s5 + $0x1d0] sm:$0xff] }
 0x3e6   :  { %16763 = vmatmul.mubr.f32.gmra.mrb[84].mxu0 %v23929_v7  ;;  %17086 = vmatprep.mubr.f32.mxu1 %v24169_v40  ;;  %v13386_v7 = vld [vmem:[%s28312_s5 + $0x1d8] sm:$0xff] }
 0x3e7   :  { %16765 = vmatprep.mubr.f32.mxu0 %v23938_v24  ;;  %19084 = vmatpush3.bf16.msra.mxu0 %v19081_v44  ;;  %v19093_v59 = vpack.c.bf16 %v13386_v7, %v13385_v0  ;;  %v13441_v44 = vld [vmem:[%s28312_s5 + $0x390] sm:$0xff]  ;;  %v13388_v7 = vld [vmem:[%s28312_s5 + $0x1e8] sm:$0xff] }
 0x3e8   :  { %19086 = vmatprep.subr.bf16.mxu0 %v19085_v23 }
 0x3e9   :  { %17087 = vmatmul.mubr.f32.gmra.mrb[36].mxu1 %v24180_v36  ;;  %v13442_v36 = vld [vmem:[%s28312_s5 + $0x398] sm:$0xff] }
 0x3ea   :  { %16766 = vmatmul.mubr.f32.gmra.mrb[86].mxu0 %v23949_v2  ;;  %17089 = vmatprep.mubr.f32.mxu1 %v24183_v50  ;;  %v19205_v0 = vpack.c.bf16 %v13442_v36, %v13441_v44  ;;  %v13389_v36 = vld [vmem:[%s28312_s5 + $0x1f0] sm:$0xff] }
 0x3eb   :  { %16768 = vmatprep.mubr.f32.mxu0 %v23959_v6  ;;  %19088 = vmatpush3.bf16.msra.mxu0 %v19085_v23  ;;  %v13387_v23 = vld [vmem:[%s28312_s5 + $0x1e0] sm:$0xff]  ;;  %v13445_v44 = vld [vmem:[%s28312_s5 + $0x3b0] sm:$0xff] }
 0x3ec   :  { %19090 = vmatprep.subr.bf16.mxu0 %v19089_v4 }
 0x3ed   :  { %17090 = vmatmul.mubr.f32.gmra.mrb[38].mxu1 %v24194_v53  ;;  %v19097_v53 = vpack.c.bf16 %v13388_v7, %v13387_v23  ;;  %v13446_v23 = vld [vmem:[%s28312_s5 + $0x3b8] sm:$0xff] }
 0x3ee   :  { %16769 = vmatmul.mubr.f32.gmra.mrb[88].mxu0 %v23974_v43  ;;  %17124 = vmatprep.mubr.f32.mxu1 %v23941_v28  ;;  %v13443_v43 = vld [vmem:[%s28312_s5 + $0x3a0] sm:$0xff]  ;;  %v13444_v28 = vld [vmem:[%s28312_s5 + $0x3a8] sm:$0xff] }
 0x3ef   :  { %16771 = vmatprep.mubr.f32.mxu0 %v23984_v61  ;;  %19092 = vmatpush3.bf16.msra.mxu0 %v19089_v4  ;;  %v19209_v4 = vpack.c.bf16 %v13444_v28, %v13443_v43  ;;  %v19213_v43 = vpack.c.bf16 %v13446_v23, %v13445_v44  ;;  %v24248_v28 = vld [vmem:[#allocation2 + $0xf0] sm:$0xff]  ;;  %v13451_v23 = vld [vmem:[%s28312_s5 + $0x3e0] sm:$0xff] }
 0x3f0   :  { %19094 = vmatprep.subr.bf16.mxu0 %v19093_v59 }
 0x3f1   :  { %17125 = vmatmul.mubr.f32.vlgmr.msra.gmra.mrb[0].mxu1 %v23963_v16  ;;  %v13390_v16 = vld [vmem:[%s28312_s5 + $0x1f8] sm:$0xff] }
 0x3f2   :  { %16772 = vmatmul.mubr.f32.gmra.mrb[90].mxu0 %v24000_v19  ;;  %17127 = vmatprep.mubr.f32.mxu1 %v23966_v63  ;;  %v19101_v7 = vpack.c.bf16 %v13390_v16, %v13389_v36  ;;  %v13450_v36 = vld [vmem:[%s28312_s5 + $0x3d8] sm:$0xff] }
 0x3f3   :  { %16774 = vmatprep.mubr.f32.mxu0 %v24004_v42  ;;  %19204 = vmatpush3.bf16.msra.mxu1 %v24072_v47  ;;  %v13447_v47 = vld [vmem:[%s28312_s5 + $0x3c0] sm:$0xff]  ;;  %v24258_v16 = vld [vmem:[#allocation2 + $0xf8] sm:$0xff] }
 0x3f4   :  { %19206 = vmatprep.subr.bf16.mxu1 %v19205_v0  ;;  %19096 = vmatpush3.bf16.msra.mxu0 %v19093_v59  ;;  %v13448_v59 = vld [vmem:[%s28312_s5 + $0x3c8] sm:$0xff] }
 0x3f5   :  { %17128 = vmatmul.mubr.f32.gmra.mrb[2].mxu1 %v23987_v10  ;;  %19098 = vmatprep.subr.bf16.mxu0 %v19097_v53 }
 0x3f6   :  { %16775 = vmatmul.mubr.f32.gmra.mrb[92].mxu0 %v24019_v62  ;;  %17130 = vmatprep.mubr.f32.mxu1 %v23990_v38 }
 0x3f7   :  { %16777 = vmatprep.mubr.f32.mxu0 %v24023_v60  ;;  %19208 = vmatpush3.bf16.msra.mxu1 %v19205_v0  ;;  %v13449_v0 = vld [vmem:[%s28312_s5 + $0x3d0] sm:$0xff] }
 0x3f8   :  { %19210 = vmatprep.subr.bf16.mxu1 %v19209_v4  ;;  %19100 = vmatpush3.bf16.msra.mxu0 %v19097_v53  ;;  %v19217_v53 = vpack.c.bf16 %v13448_v59, %v13447_v47  ;;  %v19221_v44 = vpack.c.bf16 %v13450_v36, %v13449_v0  ;;  %v24272_v47 = vld [vmem:[#allocation2 + $0x110] sm:$0xff]  ;;  %v21281_v59 = vld [vmem:[#allocation2 + $0x180] sm:$0xff]  ;;  %v13454_v36 = vld [vmem:[%s28312_s5 + $0x3f8] sm:$0xff] }
 0x3f9   :  { %17131 = vmatmul.mubr.f32.gmra.mrb[4].mxu1 %v24007_v48  ;;  %19102 = vmatprep.subr.bf16.mxu0 %v19101_v7  ;;  %v13453_v0 = vld [vmem:[%s28312_s5 + $0x3f0] sm:$0xff] }
 0x3fa   :  { %16778 = vmatmul.mubr.f32.gmra.mrb[94].mxu0 %v24037_v29  ;;  %17133 = vmatprep.mubr.f32.mxu1 %v24010_v5 }
 0x3fb   :  { %16780 = vmatprep.mubr.f32.mxu0 %v24248_v28  ;;  %19212 = vmatpush3.bf16.msra.mxu1 %v19209_v4  ;;  %v24262_v4 = vld [vmem:[#allocation2 + $0x108] sm:$0xff] }
 0x3fc   :  { %19214 = vmatprep.subr.bf16.mxu1 %v19213_v43  ;;  %19104 = vmatpush3.bf16.msra.mxu0 %v19101_v7  ;;  %v13452_v7 = vld [vmem:[%s28312_s5 + $0x3e8] sm:$0xff] }
 0x3fd   :  { %17134 = vmatmul.mubr.f32.gmra.mrb[6].mxu1 %v24026_v34 }
 0x3fe   :  { %16781 = vmatmul.mubr.f32.gmra.mrb[96].mxu0 %v24258_v16  ;;  %17136 = vmatprep.mubr.f32.mxu1 %v24029_v51 }
 0x3ff   :  { %16783 = vmatprep.mubr.f32.mxu0 %v24262_v4  ;;  %19216 = vmatpush3.bf16.msra.mxu1 %v19213_v43  ;;  %v19225_v43 = vpack.c.bf16 %v13452_v7, %v13451_v23  ;;  %v13455_v23 = vld [vmem:[%s28312_s5 + $0x400] sm:$0xff]  ;;  %v13456_v7 = vld [vmem:[%s28312_s5 + $0x408] sm:$0xff] }
 0x400   :  { %19218 = vmatprep.subr.bf16.mxu1 %v19217_v53 }
 0x401   :  { %17137 = vmatmul.mubr.f32.gmra.mrb[8].mxu1 %v24042_v1  ;;  %v21282_v1 = vld [vmem:[#allocation2 + $0x188] sm:$0xff] }
 0x402   :  { %16784 = vmatmul.mubr.f32.gmra.mrb[98].mxu0 %v24272_v47  ;;  %17139 = vmatprep.mubr.f32.mxu1 %v24045_v15  ;;  %v24284_v15 = vld [vmem:[#allocation2 + $0x198] sm:$0xff] }
 0x403   :  { %16786 = vmatprep.mubr.f32.mxu0 %v21281_v59  ;;  %19220 = vmatpush3.bf16.msra.mxu1 %v19217_v53  ;;  %v19229_v53 = vpack.c.bf16 %v13454_v36, %v13453_v0  ;;  %v24298_v59 = vld [vmem:[#allocation2 + $0x1b0] sm:$0xff]  ;;  %v24304_v0 = vld [vmem:[#allocation2 + $0x1b8] sm:$0xff]  ;;  %v24308_v36 = vld [vmem:[#allocation2 + $0x1c8] sm:$0xff] }
 0x404   :  { %19222 = vmatprep.subr.bf16.mxu1 %v19221_v44 }
 0x405   :  { %17140 = vmatmul.mubr.f32.gmra.mrb[10].mxu1 %v24056_v30 }
 0x406   :  { %16787 = vmatmul.mubr.f32.gmra.mrb[100].mxu0 %v21282_v1  ;;  %17142 = vmatprep.mubr.f32.mxu1 %v24059_v26  ;;  %v24294_v1 = vld [vmem:[#allocation2 + $0x1a0] sm:$0xff] }
 0x407   :  { %16789 = vmatprep.mubr.f32.mxu0 %v24284_v15  ;;  %19224 = vmatpush3.bf16.msra.mxu1 %v19221_v44  ;;  %v24301_v44 = vpack.c.bf16 %v13456_v7, %v13455_v23  ;;  %v24315_v23 = vld [vmem:[#allocation2 + $0x1d0] sm:$0xff]  ;;  %v24319_v7 = vld [vmem:[#allocation2 + $0x1e0] sm:$0xff] }
 0x408   :  { %19226 = vmatprep.subr.bf16.mxu1 %v19225_v43 }
 0x409   :  { %17143 = vmatmul.mubr.f32.gmra.mrb[12].mxu1 %v24070_v55 }
 0x40a   :  { %16790 = vmatmul.mubr.f32.gmra.mrb[102].mxu0 %v24294_v1  ;;  %17145 = vmatprep.mubr.f32.mxu1 %v24075_v35 }
 0x40b   :  { %16792 = vmatprep.mubr.f32.mxu0 %v24298_v59  ;;  %19228 = vmatpush3.bf16.msra.mxu1 %v19225_v43  ;;  %v24313_v43 = vld [vmem:[#allocation2 + $0xf1] sm:$0xff] }
 0x40c   :  { %19230 = vmatprep.subr.bf16.mxu1 %v19229_v53 }
 0x40d   :  { %17146 = vmatmul.mubr.f32.gmra.mrb[14].mxu1 %v24080_v18 }
 0x40e   :  { %16793 = vmatmul.mubr.f32.gmra.mrb[104].mxu0 %v24304_v0  ;;  %17148 = vmatprep.mubr.f32.mxu1 %v24084_v57  ;;  %v24322_v57 = vld [vmem:[#allocation2 + $0xf9] sm:$0xff] }
 0x40f   :  { %16795 = vmatprep.mubr.f32.mxu0 %v24308_v36  ;;  %19232 = vmatpush3.bf16.msra.mxu1 %v19229_v53  ;;  %v24325_v53 = vld [vmem:[#allocation2 + $0x1e8] sm:$0xff] }
 0x410   :  { %19234 = vmatprep.subr.bf16.mxu1 %v24301_v44 }
 0x411   :  { %17149 = vmatmul.mubr.f32.gmra.mrb[16].mxu1 %v24089_v49 }
 0x412   :  { %16796 = vmatmul.mubr.f32.gmra.mrb[106].mxu0 %v24315_v23  ;;  %17151 = vmatprep.mubr.f32.mxu1 %v24313_v43 }
 0x413   :  { %16798 = vmatprep.mubr.f32.mxu0 %v24319_v7 }
 0x415   :  { %17152 = vmatmul.mubr.f32.gmra.mrb[18].mxu1 %v24322_v57 }
 0x416   :  { %16799 = vmatmul.mubr.f32.gmra.mrb[108].mxu0 %v24325_v53  ;;  %17154 = vmatprep.mubr.f32.mxu1 %v24094_v22  ;;  %v13466_v22 = vld [vmem:[%s28312_s5 + $0x458] sm:$0xff] }
 0x417   :  { %16801 = vmatprep.mubr.f32.mxu0 %v23746_v25  ;;  %v28669_v25 = vld [vmem:[#allocation39_spill] sm:$0xff] }
 0x419   :  { %17155 = vmatmul.mubr.f32.gmra.mrb[20].mxu1 %v24099_v11  ;;  %v28676_v11 = vld [vmem:[#allocation41_spill] sm:$0xff] }
 0x41a   :  { %16802 = vmatmul.mubr.f32.gmra.mrb[110].mxu0 %v23764_v46  ;;  %17157 = vmatprep.mubr.f32.mxu1 %v24102_v31  ;;  %v28670_v46 = vld [vmem:[#allocation42_spill] sm:$0xff] }
 0x41b   :  { %16804 = vmatprep.mubr.f32.mxu0 %v23779_v56  ;;  %v28672_v56 = vld [vmem:[#allocation71_spill] sm:$0xff] }
 0x41d   :  { %17158 = vmatmul.mubr.f32.gmra.mrb[22].mxu1 %v24107_v54 }
 0x41e   :  { %16805 = vmatmul.mubr.f32.gmra.mrb[112].mxu0 %v23774_v33  ;;  %17160 = vmatprep.mubr.f32.mxu1 %v24110_v41  ;;  %v28671_v33 = vld [vmem:[#allocation68_spill] sm:$0xff] }
 0x41f   :  { %16807 = vmatprep.mubr.f32.mxu0 %v23790_v45  ;;  %v28673_v45 = vld [vmem:[#allocation43_spill] sm:$0xff] }
 0x421   :  { %17161 = vmatmul.mubr.f32.gmra.mrb[24].mxu1 %v24115_v27 }
 0x422   :  { %16808 = vmatmul.mubr.f32.gmra.mrb[114].mxu0 %v23808_v21  ;;  %17163 = vmatprep.mubr.f32.mxu1 %v24118_v12  ;;  %v24363_v21 = vld [vmem:[#allocation2 + $0x241] sm:$0xff] }
 0x423   :  { %16810 = vmatprep.mubr.f32.mxu0 %v23823_v3  ;;  %v24368_v3 = vld [vmem:[#allocation2 + $0x249] sm:$0xff] }
 0x425   :  { %17164 = vmatmul.mubr.f32.gmra.mrb[26].mxu1 %v24123_v20 }
 0x426   :  { %16811 = vmatmul.mubr.f32.gmra.mrb[116].mxu0 %v23818_v8  ;;  %17166 = vmatprep.mubr.f32.mxu1 %v24126_v32  ;;  %v28674_v8 = vld [vmem:[#allocation40_spill] sm:$0xff] }
 0x427   :  { %16813 = vmatprep.mubr.f32.mxu0 %v23840_v37  ;;  %v13457_v37 = vld [vmem:[%s28312_s5 + $0x410] sm:$0xff] }
 0x429   :  { %17167 = vmatmul.mubr.f32.gmra.mrb[28].mxu1 %v24137_v58 }
 0x42a   :  { %16814 = vmatmul.mubr.f32.gmra.mrb[118].mxu0 %v23863_v39  ;;  %17169 = vmatprep.mubr.f32.mxu1 %v24140_v52 }
 0x42b   :  { %16848 = vmatprep.mubr.f32.mxu0 %v23906_v14  ;;  %v13458_v14 = vld [vmem:[%s28312_s5 + $0x418] sm:$0xff] }
 0x42d   :  { %17170 = vmatmul.mubr.f32.gmra.mrb[30].mxu1 %v24152_v13 }
 0x42e   :  { %16849 = vmatmul.mubr.f32.vlgmr.msra.gmra.mrb[80].mxu0 %v28669_v25  ;;  %17172 = vmatprep.mubr.f32.mxu1 %v24155_v17  ;;  %v21292_v25 = vld [vmem:[#allocation2 + $0x128] sm:$0xff] }
 0x42f   :  { %16851 = vmatprep.mubr.f32.mxu0 %v23920_v9  ;;  %v19237_v9 = vpack.c.bf16 %v13458_v14, %v13457_v37  ;;  %v13471_v37 = vld [vmem:[%s28312_s5 + $0x480] sm:$0xff]  ;;  %v13472_v14 = vld [vmem:[%s28312_s5 + $0x488] sm:$0xff] }
 0x431   :  { %17173 = vmatmul.mubr.f32.gmra.mrb[32].mxu1 %v28670_v46 }
 0x432   :  { %16852 = vmatmul.mubr.f32.gmra.mrb[82].mxu0 %v28671_v33  ;;  %17175 = vmatprep.mubr.f32.mxu1 %v24169_v40  ;;  %v13469_v33 = vld [vmem:[%s28312_s5 + $0x470] sm:$0xff] }
 0x433   :  { %16854 = vmatprep.mubr.f32.mxu0 %v23938_v24  ;;  %v13459_v24 = vld [vmem:[%s28312_s5 + $0x420] sm:$0xff] }
 0x435   :  { %17176 = vmatmul.mubr.f32.gmra.mrb[34].mxu1 %v28672_v56 }
 0x436   :  { %16855 = vmatmul.mubr.f32.gmra.mrb[84].mxu0 %v23949_v2  ;;  %17178 = vmatprep.mubr.f32.mxu1 %v24183_v50  ;;  %v13460_v2 = vld [vmem:[%s28312_s5 + $0x428] sm:$0xff] }
 0x437   :  { %16857 = vmatprep.mubr.f32.mxu0 %v23959_v6  ;;  %v19241_v6 = vpack.c.bf16 %v13460_v2, %v13459_v24  ;;  %v21296_v24 = vld [vmem:[#allocation2 + $0x218] sm:$0xff]  ;;  %v21298_v2 = vld [vmem:[#allocation2 + $0x230] sm:$0xff] }
 0x439   :  { %17179 = vmatmul.mubr.f32.gmra.mrb[36].mxu1 %v28673_v45 }
 0x43a   :  { %16858 = vmatmul.mubr.f32.gmra.mrb[86].mxu0 %v28674_v8  ;;  %17181 = vmatprep.mubr.f32.mxu1 %v24363_v21  ;;  %v13470_v8 = vld [vmem:[%s28312_s5 + $0x478] sm:$0xff] }
 0x43b   :  { %16860 = vmatprep.mubr.f32.mxu0 %v23984_v61  ;;  %v13462_v61 = vld [vmem:[%s28312_s5 + $0x438] sm:$0xff] }
 0x43d   :  { %17182 = vmatmul.mubr.f32.gmra.mrb[38].mxu1 %v24368_v3 }
 0x43e   :  { %16861 = vmatmul.mubr.f32.gmra.mrb[88].mxu0 %v24000_v19  ;;  %17216 = vmatprep.mubr.f32.mxu1 %v23966_v63  ;;  %v13461_v63 = vld [vmem:[%s28312_s5 + $0x430] sm:$0xff]  ;;  %v13463_v19 = vld [vmem:[%s28312_s5 + $0x440] sm:$0xff] }
 0x43f   :  { %16863 = vmatprep.mubr.f32.mxu0 %v24004_v42  ;;  %v13464_v42 = vld [vmem:[%s28312_s5 + $0x448] sm:$0xff] }
 0x441   :  { %17217 = vmatmul.mubr.f32.vlgmr.msra.gmra.mrb[0].mxu1 %v23987_v10  ;;  %v19245_v10 = vpack.c.bf16 %v13462_v61, %v13461_v63  ;;  %v28678_v63 = vld [vmem:[#allocation67_spill] sm:$0xff]  ;;  %v28679_v61 = vld [vmem:[#allocation38_spill] sm:$0xff] }
 0x442   :  { %16864 = vmatmul.mubr.f32.gmra.mrb[90].mxu0 %v24019_v62  ;;  %17219 = vmatprep.mubr.f32.mxu1 %v23990_v38  ;;  %v19249_v62 = vpack.c.bf16 %v13464_v42, %v13463_v19  ;;  %v13473_v19 = vld [vmem:[%s28312_s5 + $0x490] sm:$0xff]  ;;  %v13474_v42 = vld [vmem:[%s28312_s5 + $0x498] sm:$0xff] }
 0x443   :  { %16866 = vmatprep.mubr.f32.mxu0 %v24023_v60  ;;  %19236 = vmatpush3.bf16.msra.mxu1 %v24301_v44  ;;  %v28675_v60 = vld [vmem:[#allocation69_spill] sm:$0xff]  ;;  %v13468_v44 = vld [vmem:[%s28312_s5 + $0x468] sm:$0xff] }
 0x444   :  { %19238 = vmatprep.subr.bf16.mxu1 %v19237_v9 }
 0x445   :  { %17220 = vmatmul.mubr.f32.gmra.mrb[2].mxu1 %v24007_v48 }
 0x446   :  { %16867 = vmatmul.mubr.f32.gmra.mrb[92].mxu0 %v24037_v29  ;;  %17222 = vmatprep.mubr.f32.mxu1 %v24010_v5  ;;  %v13465_v29 = vld [vmem:[%s28312_s5 + $0x450] sm:$0xff] }
 0x447   :  { %16869 = vmatprep.mubr.f32.mxu0 %v24248_v28  ;;  %19240 = vmatpush3.bf16.msra.mxu1 %v19237_v9  ;;  %v21291_v28 = vld [vmem:[#allocation2 + $0x120] sm:$0xff]  ;;  %v24461_v9 = vld [vmem:[#allocation2 + $0x111] sm:$0xff] }
 0x448   :  { %19242 = vmatprep.subr.bf16.mxu1 %v19241_v6 }
 0x449   :  { %17223 = vmatmul.mubr.f32.gmra.mrb[4].mxu1 %v24026_v34 }
 0x44a   :  { %16870 = vmatmul.mubr.f32.gmra.mrb[94].mxu0 %v24258_v16  ;;  %17225 = vmatprep.mubr.f32.mxu1 %v24029_v51  ;;  %v19253_v16 = vpack.c.bf16 %v13466_v22, %v13465_v29  ;;  %v13475_v29 = vld [vmem:[%s28312_s5 + $0x4a0] sm:$0xff]  ;;  %v13476_v22 = vld [vmem:[%s28312_s5 + $0x4a8] sm:$0xff] }
 0x44b   :  { %16872 = vmatprep.mubr.f32.mxu0 %v24262_v4  ;;  %19244 = vmatpush3.bf16.msra.mxu1 %v19241_v6  ;;  %v13467_v4 = vld [vmem:[%s28312_s5 + $0x460] sm:$0xff] }
 0x44c   :  { %19246 = vmatprep.subr.bf16.mxu1 %v19245_v10  ;;  %v21299_v6 = vld [vmem:[#allocation2 + $0x240] sm:$0xff] }
 0x44d   :  { %17226 = vmatmul.mubr.f32.gmra.mrb[6].mxu1 %v28675_v60 }
 0x44e   :  { %16873 = vmatmul.mubr.f32.gmra.mrb[96].mxu0 %v24272_v47  ;;  %17228 = vmatprep.mubr.f32.mxu1 %v28676_v11  ;;  %v19257_v47 = vpack.c.bf16 %v13468_v44, %v13467_v4  ;;  %v13479_v4 = vld [vmem:[%s28312_s5 + $0x4c0] sm:$0xff]  ;;  %v13480_v44 = vld [vmem:[%s28312_s5 + $0x4c8] sm:$0xff] }
 0x44f   :  { %16875 = vmatprep.mubr.f32.mxu0 %v21291_v28  ;;  %19248 = vmatpush3.bf16.msra.mxu1 %v19245_v10  ;;  %v24488_v10 = vld [vmem:[#allocation2 + $0x261] sm:$0xff]  ;;  %v19273_v28 = vpack.c.bf16 %v13476_v22, %v13475_v29  ;;  %v13498_v22 = vld [vmem:[%s28312_s5 + $0x558] sm:$0xff] }
 0x450   :  { %19250 = vmatprep.subr.bf16.mxu1 %v19249_v62  ;;  %v13496_v29 = vld [vmem:[%s28312_s5 + $0x548] sm:$0xff] }
 0x451   :  { %17229 = vmatmul.mubr.f32.gmra.mrb[8].mxu1 %v24056_v30 }
 0x452   :  { %16876 = vmatmul.mubr.f32.gmra.mrb[98].mxu0 %v21292_v25  ;;  %17231 = vmatprep.mubr.f32.mxu1 %v24059_v26  ;;  %v19281_v25 = vpack.c.bf16 %v13480_v44, %v13479_v4 }
 0x453   :  { %16878 = vmatprep.mubr.f32.mxu0 %v24284_v15  ;;  %19252 = vmatpush3.bf16.msra.mxu1 %v19249_v62  ;;  %v19261_v15 = vpack.c.bf16 %v13470_v8, %v13469_v33  ;;  %v19269_v62 = vpack.c.bf16 %v13474_v42, %v13473_v19  ;;  %v13482_v33 = vld [vmem:[%s28312_s5 + $0x4d8] sm:$0xff]  ;;  %v13492_v19 = vld [vmem:[%s28312_s5 + $0x528] sm:$0xff] }
 0x454   :  { %19254 = vmatprep.subr.bf16.mxu1 %v19253_v16 }
 0x455   :  { %17232 = vmatmul.mubr.f32.gmra.mrb[10].mxu1 %v24070_v55 }
 0x456   :  { %16879 = vmatmul.mubr.f32.gmra.mrb[100].mxu0 %v24294_v1  ;;  %17234 = vmatprep.mubr.f32.mxu1 %v24075_v35  ;;  %v28677_v1 = vld [vmem:[#allocation70_spill] sm:$0xff] }
 0x457   :  { %16881 = vmatprep.mubr.f32.mxu0 %v24298_v59  ;;  %19256 = vmatpush3.bf16.msra.mxu1 %v19253_v16  ;;  %v24449_v59 = vpack.c.bf16 %v13472_v14, %v13471_v37  ;;  %v13478_v16 = vld [vmem:[%s28312_s5 + $0x4b8] sm:$0xff]  ;;  %v13484_v37 = vld [vmem:[%s28312_s5 + $0x4e8] sm:$0xff] }
 0x458   :  { %19258 = vmatprep.subr.bf16.mxu1 %v19257_v47 }
 0x459   :  { %17235 = vmatmul.mubr.f32.gmra.mrb[12].mxu1 %v24080_v18 }
 0x45a   :  { %16882 = vmatmul.mubr.f32.gmra.mrb[102].mxu0 %v24304_v0  ;;  %17237 = vmatprep.mubr.f32.mxu1 %v28677_v1  ;;  %v24457_v0 = vld [vmem:[#allocation2 + $0x109] sm:$0xff] }
 0x45b   :  { %16884 = vmatprep.mubr.f32.mxu0 %v24308_v36  ;;  %19260 = vmatpush3.bf16.msra.mxu1 %v19257_v47  ;;  %v21293_v36 = vld [vmem:[#allocation2 + $0x1f8] sm:$0xff]  ;;  %v13481_v47 = vld [vmem:[%s28312_s5 + $0x4d0] sm:$0xff] }
 0x45c   :  { %19262 = vmatprep.subr.bf16.mxu1 %v19261_v15  ;;  %v19285_v8 = vpack.c.bf16 %v13482_v33, %v13481_v47 }
 0x45d   :  { %17238 = vmatmul.mubr.f32.gmra.mrb[14].mxu1 %v24089_v49 }
 0x45e   :  { %16885 = vmatmul.mubr.f32.gmra.mrb[104].mxu0 %v24315_v23  ;;  %17240 = vmatprep.mubr.f32.mxu1 %v24313_v43  ;;  %v21294_v23 = vld [vmem:[#allocation2 + $0x200] sm:$0xff] }
 0x45f   :  { %16887 = vmatprep.mubr.f32.mxu0 %v24319_v7  ;;  %19264 = vmatpush3.bf16.msra.mxu1 %v19261_v15  ;;  %v21295_v7 = vld [vmem:[#allocation2 + $0x210] sm:$0xff]  ;;  %v13483_v15 = vld [vmem:[%s28312_s5 + $0x4e0] sm:$0xff] }
 0x460   :  { %19266 = vmatprep.subr.bf16.mxu1 %v24449_v59  ;;  %v19289_v14 = vpack.c.bf16 %v13484_v37, %v13483_v15 }
 0x461   :  { %17241 = vmatmul.mubr.f32.gmra.mrb[16].mxu1 %v24322_v57 }
 0x462   :  { %16888 = vmatmul.mubr.f32.gmra.mrb[106].mxu0 %v24325_v53  ;;  %17243 = vmatprep.mubr.f32.mxu1 %v24457_v0  ;;  %v21297_v53 = vld [vmem:[#allocation2 + $0x228] sm:$0xff] }
 0x463   :  { %16890 = vmatprep.mubr.f32.mxu0 %v21293_v36  ;;  %v13486_v36 = vld [vmem:[%s28312_s5 + $0x4f8] sm:$0xff] }
 0x465   :  { %17244 = vmatmul.mubr.f32.gmra.mrb[18].mxu1 %v24461_v9 }
 0x466   :  { %16891 = vmatmul.mubr.f32.gmra.mrb[108].mxu0 %v21294_v23  ;;  %17246 = vmatprep.mubr.f32.mxu1 %v24102_v31  ;;  %v21300_v31 = vld [vmem:[#allocation2 + $0x248] sm:$0xff] }
 0x467   :  { %16893 = vmatprep.mubr.f32.mxu0 %v21295_v7  ;;  %v13487_v7 = vld [vmem:[%s28312_s5 + $0x500] sm:$0xff] }
 0x469   :  { %17247 = vmatmul.mubr.f32.gmra.mrb[20].mxu1 %v24107_v54  ;;  %v21301_v54 = vld [vmem:[#allocation2 + $0x258] sm:$0xff] }
 0x46a   :  { %16894 = vmatmul.mubr.f32.gmra.mrb[110].mxu0 %v21296_v24  ;;  %17249 = vmatprep.mubr.f32.mxu1 %v24110_v41  ;;  %v13488_v24 = vld [vmem:[%s28312_s5 + $0x508] sm:$0xff] }
 0x46b   :  { %16896 = vmatprep.mubr.f32.mxu0 %v21297_v53  ;;  %v19297_v53 = vpack.c.bf16 %v13488_v24, %v13487_v7  ;;  %v13507_v7 = vld [vmem:[%s28312_s5 + $0x5a0] sm:$0xff]  ;;  %v13508_v24 = vld [vmem:[%s28312_s5 + $0x5a8] sm:$0xff] }
 0x46d   :  { %17250 = vmatmul.mubr.f32.gmra.mrb[22].mxu1 %v24115_v27 }
 0x46e   :  { %16897 = vmatmul.mubr.f32.gmra.mrb[112].mxu0 %v21298_v2  ;;  %17252 = vmatprep.mubr.f32.mxu1 %v24118_v12  ;;  %v24558_v2 = vld [vmem:[#allocation2 + $0x121] sm:$0xff] }
 0x46f   :  { %16899 = vmatprep.mubr.f32.mxu0 %v21299_v6  ;;  %v24561_v6 = vld [vmem:[#allocation2 + $0x129] sm:$0xff] }
 0x471   :  { %17253 = vmatmul.mubr.f32.gmra.mrb[24].mxu1 %v24123_v20 }
 0x472   :  { %16900 = vmatmul.mubr.f32.gmra.mrb[114].mxu0 %v21300_v31  ;;  %17255 = vmatprep.mubr.f32.mxu1 %v24126_v32  ;;  %v13489_v31 = vld [vmem:[%s28312_s5 + $0x510] sm:$0xff] }
 0x473   :  { %16902 = vmatprep.mubr.f32.mxu0 %v21301_v54  ;;  %v13490_v54 = vld [vmem:[%s28312_s5 + $0x518] sm:$0xff] }
 0x475   :  { %17256 = vmatmul.mubr.f32.gmra.mrb[26].mxu1 %v24137_v58 }
 0x476   :  { %16903 = vmatmul.mubr.f32.gmra.mrb[116].mxu0 %v23863_v39  ;;  %17258 = vmatprep.mubr.f32.mxu1 %v24140_v52  ;;  %v24485_v39 = vld [vmem:[#allocation2 + $0x259] sm:$0xff] }
 0x477   :  { %16905 = vmatprep.mubr.f32.mxu0 %v28678_v63  ;;  %v19301_v63 = vpack.c.bf16 %v13490_v54, %v13489_v31  ;;  %v13509_v31 = vld [vmem:[%s28312_s5 + $0x5b0] sm:$0xff]  ;;  %v13510_v54 = vld [vmem:[%s28312_s5 + $0x5b8] sm:$0xff] }
 0x479   :  { %17259 = vmatmul.mubr.f32.gmra.mrb[28].mxu1 %v24152_v13 }
 0x47a   :  { %16906 = vmatmul.mubr.f32.gmra.mrb[118].mxu0 %v28679_v61  ;;  %17261 = vmatprep.mubr.f32.mxu1 %v24155_v17  ;;  %v13491_v61 = vld [vmem:[%s28312_s5 + $0x520] sm:$0xff] }
 0x47b   :  { %v19305_v42 = vpack.c.bf16 %v13492_v19, %v13491_v61  ;;  %v24754_v61 = vld [vmem:[#allocation2 + $0x32] sm:$0xff] }
 0x47d   :  { %17262 = vmatmul.mubr.f32.gmra.mrb[30].mxu1 %v28670_v46 }
 0x47e   :  { %17264 = vmatprep.mubr.f32.mxu1 %v24169_v40 }
 0x481   :  { %17265 = vmatmul.mubr.f32.gmra.mrb[32].mxu1 %v28672_v56 }
 0x482   :  { %17267 = vmatprep.mubr.f32.mxu1 %v24183_v50 }
 0x485   :  { %17268 = vmatmul.mubr.f32.gmra.mrb[34].mxu1 %v28673_v45 }
 0x486   :  { %17270 = vmatprep.mubr.f32.mxu1 %v24363_v21 }
 0x489   :  { %17271 = vmatmul.mubr.f32.gmra.mrb[36].mxu1 %v24368_v3 }
 0x48a   :  { %17273 = vmatprep.mubr.f32.mxu1 %v24485_v39 }
 0x48d   :  { %17274 = vmatmul.mubr.f32.gmra.mrb[38].mxu1 %v24488_v10 }
 0x48e   :  { %17308 = vmatprep.mubr.f32.mxu1 %v23990_v38  ;;  %v13477_v38 = vld [vmem:[%s28312_s5 + $0x4b0] sm:$0xff] }
 0x491   :  { %17309 = vmatmul.mubr.f32.vlgmr.msra.gmra.mrb[0].mxu1 %v24007_v48  ;;  %v19277_v48 = vpack.c.bf16 %v13478_v16, %v13477_v38  ;;  %v13502_v38 = vld [vmem:[%s28312_s5 + $0x578] sm:$0xff]  ;;  %v13504_v16 = vld [vmem:[%s28312_s5 + $0x588] sm:$0xff] }
 0x492   :  { %17311 = vmatprep.mubr.f32.mxu1 %v24010_v5  ;;  %19268 = vmatpush3.bf16.msra.mxu1 %v24449_v59  ;;  %v13485_v59 = vld [vmem:[%s28312_s5 + $0x4f0] sm:$0xff] }
 0x493   :  { %19270 = vmatprep.subr.bf16.mxu1 %v19269_v62  ;;  %v19293_v23 = vpack.c.bf16 %v13486_v36, %v13485_v59 }
 0x495   :  { %17312 = vmatmul.mubr.f32.gmra.mrb[2].mxu1 %v24026_v34 }
 0x496   :  { %17314 = vmatprep.mubr.f32.mxu1 %v24029_v51  ;;  %19272 = vmatpush3.bf16.msra.mxu1 %v19269_v62  ;;  %v13494_v62 = vld [vmem:[%s28312_s5 + $0x538] sm:$0xff] }
 0x497   :  { %19274 = vmatprep.subr.bf16.mxu1 %v19273_v28 }
 0x499   :  { %17315 = vmatmul.mubr.f32.gmra.mrb[4].mxu1 %v28675_v60 }
 0x49a   :  { %17317 = vmatprep.mubr.f32.mxu1 %v28676_v11  ;;  %19276 = vmatpush3.bf16.msra.mxu1 %v19273_v28  ;;  %v13500_v28 = vld [vmem:[%s28312_s5 + $0x568] sm:$0xff] }
 0x49b   :  { %19278 = vmatprep.subr.bf16.mxu1 %v19277_v48 }
 0x49d   :  { %17318 = vmatmul.mubr.f32.gmra.mrb[6].mxu1 %v24056_v30 }
 0x49e   :  { %17320 = vmatprep.mubr.f32.mxu1 %v24059_v26  ;;  %19280 = vmatpush3.bf16.msra.mxu1 %v19277_v48  ;;  %v4431_v48 = vld [vmem:[#allocation2 + $0x139] sm:$0xff] }
 0x49f   :  { %19282 = vmatprep.subr.bf16.mxu1 %v19281_v25 }
 0x4a1   :  { %17321 = vmatmul.mubr.f32.gmra.mrb[8].mxu1 %v24070_v55 }
 0x4a2   :  { %17323 = vmatprep.mubr.f32.mxu1 %v24075_v35  ;;  %19284 = vmatpush3.bf16.msra.mxu1 %v19281_v25 }
 0x4a3   :  { %19286 = vmatprep.subr.bf16.mxu1 %v19285_v8 }
 0x4a5   :  { %17324 = vmatmul.mubr.f32.gmra.mrb[10].mxu1 %v24080_v18 }
 0x4a6   :  { %17326 = vmatprep.mubr.f32.mxu1 %v28677_v1  ;;  %19288 = vmatpush3.bf16.msra.mxu1 %v19285_v8 }
 0x4a7   :  { %19290 = vmatprep.subr.bf16.mxu1 %v19289_v14 }
 0x4a9   :  { %17327 = vmatmul.mubr.f32.gmra.mrb[12].mxu1 %v24089_v49 }
 0x4aa   :  { %17329 = vmatprep.mubr.f32.mxu1 %v24313_v43  ;;  %19292 = vmatpush3.bf16.msra.mxu1 %v19289_v14  ;;  %v6071_v14 = vld [vmem:[#allocation2 + $0x2] sm:$0xff] }
 0x4ab   :  { %19294 = vmatprep.subr.bf16.mxu1 %v19293_v23 }
 0x4ad   :  { %17330 = vmatmul.mubr.f32.gmra.mrb[14].mxu1 %v24322_v57 }
 0x4ae   :  { %17332 = vmatprep.mubr.f32.mxu1 %v24457_v0  ;;  %19296 = vmatpush3.bf16.msra.mxu1 %v19293_v23  ;;  %v6072_v23 = vld [vmem:[#allocation2 + $0xa] sm:$0xff] }
 0x4af   :  { %19298 = vmatprep.subr.bf16.mxu1 %v19297_v53 }
 0x4b1   :  { %17333 = vmatmul.mubr.f32.gmra.mrb[16].mxu1 %v24461_v9 }
 0x4b2   :  { %17335 = vmatprep.mubr.f32.mxu1 %v24558_v2 }
 0x4b5   :  { %17336 = vmatmul.mubr.f32.gmra.mrb[18].mxu1 %v24561_v6 }
 0x4b6   :  { %17338 = vmatprep.mubr.f32.mxu1 %v24110_v41  ;;  %v24582_v41 = vld [vmem:[#allocation2 + $0x271] sm:$0xff] }
 0x4b9   :  { %17339 = vmatmul.mubr.f32.gmra.mrb[20].mxu1 %v24115_v27  ;;  %v24585_v27 = vld [vmem:[#allocation2 + $0x279] sm:$0xff] }
 0x4ba   :  { %17341 = vmatprep.mubr.f32.mxu1 %v24118_v12 }
 0x4bd   :  { %17342 = vmatmul.mubr.f32.gmra.mrb[22].mxu1 %v24123_v20 }
 0x4be   :  { %17344 = vmatprep.mubr.f32.mxu1 %v24126_v32 }
 0x4c1   :  { %17345 = vmatmul.mubr.f32.gmra.mrb[24].mxu1 %v24137_v58 }
 0x4c2   :  { %17347 = vmatprep.mubr.f32.mxu1 %v24140_v52 }
 0x4c5   :  { %17348 = vmatmul.mubr.f32.gmra.mrb[26].mxu1 %v24152_v13 }
 0x4c6   :  { %17350 = vmatprep.mubr.f32.mxu1 %v24155_v17 }
 0x4c9   :  { %17351 = vmatmul.mubr.f32.gmra.mrb[28].mxu1 %v28670_v46 }
 0x4ca   :  { %17353 = vmatprep.mubr.f32.mxu1 %v24169_v40 }
 0x4cd   :  { %17354 = vmatmul.mubr.f32.gmra.mrb[30].mxu1 %v28672_v56 }
 0x4ce   :  { %17356 = vmatprep.mubr.f32.mxu1 %v24183_v50 }
 0x4d1   :  { %17357 = vmatmul.mubr.f32.gmra.mrb[32].mxu1 %v28673_v45 }
 0x4d2   :  { %17359 = vmatprep.mubr.f32.mxu1 %v24363_v21 }
 0x4d5   :  { %17360 = vmatmul.mubr.f32.gmra.mrb[34].mxu1 %v24368_v3 }
 0x4d6   :  { %17362 = vmatprep.mubr.f32.mxu1 %v24485_v39 }
 0x4d9   :  { %17363 = vmatmul.mubr.f32.gmra.mrb[36].mxu1 %v24488_v10 }
 0x4da   :  { %17365 = vmatprep.mubr.f32.mxu1 %v24582_v41 }
 0x4dd   :  { %17366 = vmatmul.mubr.f32.gmra.mrb[38].mxu1 %v24585_v27 }
 0x4de   :  { %17400 = vmatprep.mubr.f32.mxu1 %v24010_v5  ;;  %v13493_v5 = vld [vmem:[%s28312_s5 + $0x530] sm:$0xff] }
 0x4e1   :  { %17401 = vmatmul.mubr.f32.vlgmr.msra.gmra.mrb[0].mxu1 %v24026_v34  ;;  %v19309_v34 = vpack.c.bf16 %v13494_v62, %v13493_v5  ;;  %v24759_v5 = vld [vmem:[#allocation2 + $0x3a] sm:$0xff] }
 0x4e2   :  { %17403 = vmatprep.mubr.f32.mxu1 %v24029_v51  ;;  %19300 = vmatpush3.bf16.msra.mxu1 %v19297_v53  ;;  %v13495_v51 = vld [vmem:[%s28312_s5 + $0x540] sm:$0xff] }
 0x4e3   :  { %19302 = vmatprep.subr.bf16.mxu1 %v19301_v63  ;;  %v13511_v62 = vld [vmem:[%s28312_s5 + $0x5c0] sm:$0xff] }
 0x4e5   :  { %17404 = vmatmul.mubr.f32.gmra.mrb[2].mxu1 %v28675_v60  ;;  %v19313_v60 = vpack.c.bf16 %v13496_v29, %v13495_v51  ;;  %v24770_v29 = vld [vmem:[#allocation2 + $0x4a] sm:$0xff] }
 0x4e6   :  { %17406 = vmatprep.mubr.f32.mxu1 %v28676_v11  ;;  %19304 = vmatpush3.bf16.msra.mxu1 %v19301_v63  ;;  %v13497_v11 = vld [vmem:[%s28312_s5 + $0x550] sm:$0xff] }
 0x4e7   :  { %19306 = vmatprep.subr.bf16.mxu1 %v19305_v42 }
 0x4e9   :  { %17407 = vmatmul.mubr.f32.gmra.mrb[4].mxu1 %v24056_v30  ;;  %v19317_v30 = vpack.c.bf16 %v13498_v22, %v13497_v11  ;;  %v24775_v22 = vld [vmem:[#allocation2 + $0x52] sm:$0xff] }
 0x4ea   :  { %17409 = vmatprep.mubr.f32.mxu1 %v24059_v26  ;;  %19308 = vmatpush3.bf16.msra.mxu1 %v19305_v42  ;;  %v13499_v26 = vld [vmem:[%s28312_s5 + $0x560] sm:$0xff]  ;;  %v19341_v42 = vpack.c.bf16 %v13510_v54, %v13509_v31  ;;  %v13520_v31 = vld [vmem:[%s28312_s5 + $0x608] sm:$0xff] }
 0x4eb   :  { %19310 = vmatprep.subr.bf16.mxu1 %v19309_v34 }
 0x4ed   :  { %17410 = vmatmul.mubr.f32.gmra.mrb[6].mxu1 %v24070_v55  ;;  %v19321_v55 = vpack.c.bf16 %v13500_v28, %v13499_v26  ;;  %v13514_v26 = vld [vmem:[%s28312_s5 + $0x5d8] sm:$0xff] }
 0x4ee   :  { %17412 = vmatprep.mubr.f32.mxu1 %v24075_v35  ;;  %19312 = vmatpush3.bf16.msra.mxu1 %v19309_v34  ;;  %v13501_v35 = vld [vmem:[%s28312_s5 + $0x570] sm:$0xff]  ;;  %v13512_v34 = vld [vmem:[%s28312_s5 + $0x5c8] sm:$0xff] }
 0x4ef   :  { %19314 = vmatprep.subr.bf16.mxu1 %v19313_v60  ;;  %v19345_v11 = vpack.c.bf16 %v13512_v34, %v13511_v62 }
 0x4f1   :  { %17413 = vmatmul.mubr.f32.gmra.mrb[8].mxu1 %v24080_v18  ;;  %v19325_v18 = vpack.c.bf16 %v13502_v38, %v13501_v35 }
 0x4f2   :  { %17415 = vmatprep.mubr.f32.mxu1 %v28677_v1  ;;  %19316 = vmatpush3.bf16.msra.mxu1 %v19313_v60  ;;  %v13503_v1 = vld [vmem:[%s28312_s5 + $0x580] sm:$0xff] }
 0x4f3   :  { %19318 = vmatprep.subr.bf16.mxu1 %v19317_v30 }
 0x4f5   :  { %17416 = vmatmul.mubr.f32.gmra.mrb[10].mxu1 %v24089_v49  ;;  %v24651_v49 = vpack.c.bf16 %v13504_v16, %v13503_v1  ;;  %v13515_v1 = vld [vmem:[%s28312_s5 + $0x5e0] sm:$0xff]  ;;  %v13516_v16 = vld [vmem:[%s28312_s5 + $0x5e8] sm:$0xff] }
 0x4f6   :  { %17418 = vmatprep.mubr.f32.mxu1 %v24313_v43  ;;  %19320 = vmatpush3.bf16.msra.mxu1 %v19317_v30  ;;  %v13513_v30 = vld [vmem:[%s28312_s5 + $0x5d0] sm:$0xff] }
 0x4f7   :  { %19322 = vmatprep.subr.bf16.mxu1 %v19321_v55  ;;  %v19349_v38 = vpack.c.bf16 %v13514_v26, %v13513_v30  ;;  %v24844_v26 = vld [vmem:[#allocation2 + $0xc2] sm:$0xff] }
 0x4f9   :  { %17419 = vmatmul.mubr.f32.gmra.mrb[12].mxu1 %v24322_v57  ;;  %v4432_v57 = vld [vmem:[#allocation2 + $0x141] sm:$0xff] }
 0x4fa   :  { %17421 = vmatprep.mubr.f32.mxu1 %v24457_v0  ;;  %19324 = vmatpush3.bf16.msra.mxu1 %v19321_v55  ;;  %v24786_v55 = vld [vmem:[#allocation2 + $0x62] sm:$0xff] }
 0x4fb   :  { %19326 = vmatprep.subr.bf16.mxu1 %v19325_v18 }
 0x4fd   :  { %17422 = vmatmul.mubr.f32.gmra.mrb[14].mxu1 %v24461_v9 }
 0x4fe   :  { %17424 = vmatprep.mubr.f32.mxu1 %v24558_v2  ;;  %19328 = vmatpush3.bf16.msra.mxu1 %v19325_v18  ;;  %v24737_v2 = vld [vmem:[#allocation2 + $0x1a] sm:$0xff]  ;;  %v24791_v18 = vld [vmem:[#allocation2 + $0x6a] sm:$0xff] }
 0x4ff   :  { %19330 = vmatprep.subr.bf16.mxu1 %v24651_v49 }
 0x501   :  { %v24656_v43 = vpop.f32.mrb[80].mxu0  ;;  %17425 = vmatmul.mubr.f32.gmra.mrb[16].mxu1 %v24561_v6 }
 0x502   :  { %v24659_v4 = vpop.f32.mrb[81].mxu0  ;;  %17427 = vmatprep.mubr.f32.mxu1 %v4431_v48  ;;  %v24802_v48 = vld [vmem:[#allocation2 + $0x7a] sm:$0xff] }
 0x505   :  { %v24661_v0 = vpop.f32.mrb[82].mxu0  ;;  %17428 = vmatmul.mubr.f32.gmra.mrb[18].mxu1 %v4432_v57 }
 0x506   :  { %v24663_v44 = vpop.f32.mrb[83].mxu0  ;;  %17430 = vmatprep.mubr.f32.mxu1 %v24118_v12 }
 0x509   :  { %v24666_v9 = vpop.f32.mrb[84].mxu0  ;;  %17431 = vmatmul.mubr.f32.gmra.mrb[20].mxu1 %v24123_v20 }
 0x50a   :  { %v24669_v25 = vpop.f32.mrb[85].mxu0  ;;  %17433 = vmatprep.mubr.f32.mxu1 %v24126_v32 }
 0x50d   :  { %v24672_v47 = vpop.f32.mrb[86].mxu0  ;;  %17434 = vmatmul.mubr.f32.gmra.mrb[22].mxu1 %v24137_v58 }
 0x50e   :  { %v24675_v33 = vpop.f32.mrb[87].mxu0  ;;  %17436 = vmatprep.mubr.f32.mxu1 %v24140_v52 }
 0x511   :  { %v24678_v8 = vpop.f32.mrb[88].mxu0  ;;  %17437 = vmatmul.mubr.f32.gmra.mrb[24].mxu1 %v24152_v13 }
 0x512   :  { %v24681_v12 = vpop.f32.mrb[89].mxu0  ;;  %17439 = vmatprep.mubr.f32.mxu1 %v24155_v17 }
 0x515   :  { %v24684_v20 = vpop.f32.mrb[90].mxu0  ;;  %17440 = vmatmul.mubr.f32.gmra.mrb[26].mxu1 %v28670_v46 }
 0x516   :  { %v24687_v32 = vpop.f32.mrb[91].mxu0  ;;  %17442 = vmatprep.mubr.f32.mxu1 %v24169_v40 }
 0x519   :  { %v24690_v58 = vpop.f32.mrb[92].mxu0  ;;  %17443 = vmatmul.mubr.f32.gmra.mrb[28].mxu1 %v28672_v56 }
 0x51a   :  { %v24693_v52 = vpop.f32.mrb[93].mxu0  ;;  %17445 = vmatprep.mubr.f32.mxu1 %v24183_v50 }
 0x51d   :  { %v24696_v13 = vpop.f32.mrb[94].mxu0  ;;  %17446 = vmatmul.mubr.f32.gmra.mrb[30].mxu1 %v28673_v45 }
 0x51e   :  { %v24699_v17 = vpop.f32.mrb[95].mxu0  ;;  %17448 = vmatprep.mubr.f32.mxu1 %v24363_v21  ;;  %v4459_v21 = vld [vmem:[#allocation2 + $0x289] sm:$0xff] }
 0x521   :  { %v24702_v46 = vpop.f32.mrb[96].mxu0  ;;  %17449 = vmatmul.mubr.f32.gmra.mrb[32].mxu1 %v24368_v3  ;;  %v4460_v3 = vld [vmem:[#allocation2 + $0x291] sm:$0xff] }
 0x522   :  { %v24705_v40 = vpop.f32.mrb[97].mxu0  ;;  %17451 = vmatprep.mubr.f32.mxu1 %v24485_v39  ;;  %v13505_v39 = vld [vmem:[%s28312_s5 + $0x590] sm:$0xff] }
 0x525   :  { %v24708_v56 = vpop.f32.mrb[98].mxu0  ;;  %17452 = vmatmul.mubr.f32.gmra.mrb[34].mxu1 %v24488_v10  ;;  %v13506_v10 = vld [vmem:[%s28312_s5 + $0x598] sm:$0xff] }
 0x526   :  { %v24711_v50 = vpop.f32.mrb[99].mxu0  ;;  %17454 = vmatprep.mubr.f32.mxu1 %v24582_v41  ;;  %v19333_v36 = vpack.c.bf16 %v13506_v10, %v13505_v39  ;;  %v19337_v41 = vpack.c.bf16 %v13508_v24, %v13507_v7  ;;  %v13517_v39 = vld [vmem:[%s28312_s5 + $0x5f0] sm:$0xff]  ;;  %v13518_v10 = vld [vmem:[%s28312_s5 + $0x5f8] sm:$0xff] }
 0x527   :  { %v19357_v7 = vpack.c.bf16 %v13518_v10, %v13517_v39  ;;  %v24823_v24 = vld [vmem:[#allocation2 + $0x9a] sm:$0xff]  ;;  %v6099_v39 = vld [vmem:[#allocation2 + $0x152] sm:$0xff] }
 0x528   :  { %v6100_v10 = vld [vmem:[#allocation2 + $0x15a] sm:$0xff] }
 0x529   :  { %v24714_v45 = vpop.f32.mrb[100].mxu0  ;;  %17455 = vmatmul.mubr.f32.gmra.mrb[36].mxu1 %v24585_v27  ;;  %v24743_v27 = vld [vmem:[#allocation2 + $0x22] sm:$0xff] }
 0x52a   :  { %v24717_v15 = vpop.f32.mrb[101].mxu0  ;;  %17457 = vmatprep.mubr.f32.mxu1 %v4459_v21  ;;  %v19353_v21 = vpack.c.bf16 %v13516_v16, %v13515_v1  ;;  %v24849_v1 = vld [vmem:[#allocation2 + $0xca] sm:$0xff]  ;;  %v24852_v16 = vld [vmem:[#allocation2 + $0xda] sm:$0xff] }
 0x52b   :  { %28680 = vst [vmem:[#allocation72_spill] sm:$0xff] %v24717_v15 }
 0x52d   :  { %v24725_v37 = vpop.f32.mrb[102].mxu0  ;;  %17458 = vmatmul.mubr.f32.gmra.mrb[38].mxu1 %v4460_v3  ;;  %v24807_v3 = vld [vmem:[#allocation2 + $0x82] sm:$0xff] }
 0x52e   :  { %28681 = vst [vmem:[#allocation44_spill] sm:$0xff] %v24725_v37  ;;  %v24727_v59 = vpop.f32.mrb[103].mxu0  ;;  %17492 = vmatprep.mubr.f32.mxu1 %v6071_v14  ;;  %v13524_v37 = vld [vmem:[%s28312_s5 + $0x628] sm:$0xff] }
 0x52f   :  { %28682 = vst [vmem:[#allocation73_spill] sm:$0xff] %v24727_v59  ;;  %v13523_v59 = vld [vmem:[%s28312_s5 + $0x620] sm:$0xff] }
 0x530   :  { %v19369_v15 = vpack.c.bf16 %v13524_v37, %v13523_v59  ;;  %v13528_v37 = vld [vmem:[%s28312_s5 + $0x648] sm:$0xff] }
 0x531   :  { %v24735_v53 = vpop.f32.mrb[104].mxu0  ;;  %17493 = vmatmul.mubr.f32.vlgmr.msra.gmra.mrb[0].mxu1 %v6072_v23 }
 0x532   :  { %28683 = vst [vmem:[#allocation45_spill] sm:$0xff] %v24735_v53  ;;  %v24739_v6 = vpop.f32.mrb[105].mxu0  ;;  %17495 = vmatprep.mubr.f32.mxu1 %v24737_v2  ;;  %19332 = vmatpush3.bf16.msra.mxu1 %v24651_v49 }
 0x533   :  { %28684 = vst [vmem:[#allocation74_spill] sm:$0xff] %v24739_v6  ;;  %19334 = vmatprep.subr.bf16.mxu1 %v19333_v36  ;;  %v13522_v6 = vld [vmem:[%s28312_s5 + $0x618] sm:$0xff] }
 0x535   :  { %v24751_v63 = vpop.f32.mrb[106].mxu0  ;;  %17496 = vmatmul.mubr.f32.gmra.mrb[2].mxu1 %v24743_v27 }
 0x536   :  { %28685 = vst [vmem:[#allocation46_spill] sm:$0xff] %v24751_v63  ;;  %v24756_v19 = vpop.f32.mrb[107].mxu0  ;;  %17498 = vmatprep.mubr.f32.mxu1 %v24754_v61  ;;  %19336 = vmatpush3.bf16.msra.mxu1 %v19333_v36  ;;  %v24818_v36 = vld [vmem:[#allocation2 + $0x92] sm:$0xff] }
 0x537   :  { %28686 = vst [vmem:[#allocation75_spill] sm:$0xff] %v24756_v19  ;;  %19338 = vmatprep.subr.bf16.mxu1 %v19337_v41  ;;  %v24909_v19 = vld [vmem:[#allocation2 + $0x232] sm:$0xff] }
 0x538   :  { %v13521_v63 = vld [vmem:[%s28312_s5 + $0x610] sm:$0xff] }
 0x539   :  { %v24767_v51 = vpop.f32.mrb[108].mxu0  ;;  %17499 = vmatmul.mubr.f32.gmra.mrb[4].mxu1 %v24759_v5  ;;  %v19365_v53 = vpack.c.bf16 %v13522_v6, %v13521_v63  ;;  %v13526_v6 = vld [vmem:[%s28312_s5 + $0x638] sm:$0xff]  ;;  %v13527_v63 = vld [vmem:[%s28312_s5 + $0x640] sm:$0xff] }
 0x53a   :  { %28687 = vst [vmem:[#allocation47_spill] sm:$0xff] %v24767_v51  ;;  %v24772_v60 = vpop.f32.mrb[109].mxu0  ;;  %17501 = vmatprep.mubr.f32.mxu1 %v24770_v29  ;;  %19340 = vmatpush3.bf16.msra.mxu1 %v19337_v41  ;;  %v13519_v41 = vld [vmem:[%s28312_s5 + $0x600] sm:$0xff]  ;;  %v24906_v51 = vld [vmem:[#allocation2 + $0x22a] sm:$0xff]  ;;  %v19377_v59 = vpack.c.bf16 %v13528_v37, %v13527_v63  ;;  %v13534_v37 = vld [vmem:[%s28312_s5 + $0x678] sm:$0xff] }
 0x53b   :  { %28688 = vst [vmem:[#allocation76_spill] sm:$0xff] %v24772_v60  ;;  %19342 = vmatprep.subr.bf16.mxu1 %v19341_v42  ;;  %v19361_v34 = vpack.c.bf16 %v13520_v31, %v13519_v41  ;;  %v24858_v41 = vld [vmem:[#allocation2 + $0x16a] sm:$0xff]  ;;  %v24864_v31 = vld [vmem:[#allocation2 + $0x182] sm:$0xff]  ;;  %v24903_v60 = vld [vmem:[#allocation2 + $0x21a] sm:$0xff] }
 0x53d   :  { %v24783_v28 = vpop.f32.mrb[110].mxu0  ;;  %17502 = vmatmul.mubr.f32.gmra.mrb[6].mxu1 %v24775_v22 }
 0x53e   :  { %28689 = vst [vmem:[#allocation48_spill] sm:$0xff] %v24783_v28  ;;  %v24788_v35 = vpop.f32.mrb[111].mxu0  ;;  %17504 = vmatprep.mubr.f32.mxu1 %v24786_v55  ;;  %19344 = vmatpush3.bf16.msra.mxu1 %v19341_v42  ;;  %v24834_v42 = vld [vmem:[#allocation2 + $0xaa] sm:$0xff]  ;;  %v24900_v28 = vld [vmem:[#allocation2 + $0x212] sm:$0xff] }
 0x53f   :  { %28690 = vst [vmem:[#allocation77_spill] sm:$0xff] %v24788_v35  ;;  %19346 = vmatprep.subr.bf16.mxu1 %v19345_v11  ;;  %v24897_v35 = vld [vmem:[#allocation2 + $0x202] sm:$0xff] }
 0x541   :  { %v24799_v49 = vpop.f32.mrb[112].mxu0  ;;  %17505 = vmatmul.mubr.f32.gmra.mrb[8].mxu1 %v24791_v18 }
 0x542   :  { %28691 = vst [vmem:[#allocation49_spill] sm:$0xff] %v24799_v49  ;;  %v24804_v57 = vpop.f32.mrb[113].mxu0  ;;  %17507 = vmatprep.mubr.f32.mxu1 %v24802_v48  ;;  %19348 = vmatpush3.bf16.msra.mxu1 %v19345_v11  ;;  %v24839_v11 = vld [vmem:[#allocation2 + $0xb2] sm:$0xff]  ;;  %v24894_v49 = vld [vmem:[#allocation2 + $0x1fa] sm:$0xff] }
 0x543   :  { %28692 = vst [vmem:[#allocation78_spill] sm:$0xff] %v24804_v57  ;;  %19350 = vmatprep.subr.bf16.mxu1 %v19349_v38  ;;  %v24891_v57 = vld [vmem:[#allocation2 + $0x1ea] sm:$0xff] }
 0x545   :  { %v24815_v14 = vpop.f32.mrb[114].mxu0  ;;  %17508 = vmatmul.mubr.f32.gmra.mrb[10].mxu1 %v24807_v3 }
 0x546   :  { %28693 = vst [vmem:[#allocation50_spill] sm:$0xff] %v24815_v14  ;;  %v24820_v23 = vpop.f32.mrb[115].mxu0  ;;  %17510 = vmatprep.mubr.f32.mxu1 %v24818_v36  ;;  %19352 = vmatpush3.bf16.msra.mxu1 %v19349_v38  ;;  %v24888_v14 = vld [vmem:[#allocation2 + $0x1e2] sm:$0xff] }
 0x547   :  { %28694 = vst [vmem:[#allocation79_spill] sm:$0xff] %v24820_v23  ;;  %19354 = vmatprep.subr.bf16.mxu1 %v19353_v21  ;;  %v24885_v23 = vld [vmem:[#allocation2 + $0x1d2] sm:$0xff] }
 0x549   :  { %v24831_v54 = vpop.f32.mrb[116].mxu0  ;;  %17511 = vmatmul.mubr.f32.gmra.mrb[12].mxu1 %v24823_v24 }
 0x54a   :  { %28695 = vst [vmem:[#allocation51_spill] sm:$0xff] %v24831_v54  ;;  %v24836_v62 = vpop.f32.mrb[117].mxu0  ;;  %17513 = vmatprep.mubr.f32.mxu1 %v24834_v42  ;;  %19356 = vmatpush3.bf16.msra.mxu1 %v19353_v21  ;;  %v24855_v21 = vld [vmem:[#allocation2 + $0xe2] sm:$0xff]  ;;  %v24882_v54 = vld [vmem:[#allocation2 + $0x1ca] sm:$0xff] }
 0x54b   :  { %28696 = vst [vmem:[#allocation80_spill] sm:$0xff] %v24836_v62  ;;  %19358 = vmatprep.subr.bf16.mxu1 %v19357_v7  ;;  %v24879_v62 = vld [vmem:[#allocation2 + $0x1ba] sm:$0xff] }
 0x54d   :  { %v24841_v30 = vpop.f32.mrb[118].mxu0  ;;  %17514 = vmatmul.mubr.f32.gmra.mrb[14].mxu1 %v24839_v11 }
 0x54e   :  { %28697 = vst [vmem:[#allocation52_spill] sm:$0xff] %v24841_v30  ;;  %v24846_v38 = vpop.f32.mrb[119].mxu0  ;;  %17516 = vmatprep.mubr.f32.mxu1 %v24844_v26  ;;  %19360 = vmatpush3.bf16.msra.mxu1 %v19357_v7  ;;  %v24861_v7 = vld [vmem:[#allocation2 + $0x172] sm:$0xff]  ;;  %v24870_v30 = vld [vmem:[#allocation2 + $0x19a] sm:$0xff] }
 0x54f   :  { %28698 = vst [vmem:[#allocation81_spill] sm:$0xff] %v24846_v38  ;;  %19362 = vmatprep.subr.bf16.mxu1 %v19361_v34  ;;  %v24867_v38 = vld [vmem:[#allocation2 + $0x18a] sm:$0xff] }
 0x551   :  { %17517 = vmatmul.mubr.f32.gmra.mrb[16].mxu1 %v24849_v1 }
 0x552   :  { %17519 = vmatprep.mubr.f32.mxu1 %v24852_v16 }
 0x555   :  { %17520 = vmatmul.mubr.f32.gmra.mrb[18].mxu1 %v24855_v21 }
 0x556   :  { %17522 = vmatprep.mubr.f32.mxu1 %v6099_v39  ;;  %v24873_v39 = vld [vmem:[#allocation2 + $0x1a2] sm:$0xff] }
 0x559   :  { %17523 = vmatmul.mubr.f32.gmra.mrb[20].mxu1 %v6100_v10  ;;  %v24876_v10 = vld [vmem:[#allocation2 + $0x1b2] sm:$0xff] }
 0x55a   :  { %17525 = vmatprep.mubr.f32.mxu1 %v24858_v41 }
 0x55d   :  { %17526 = vmatmul.mubr.f32.gmra.mrb[22].mxu1 %v24861_v7 }
 0x55e   :  { %17528 = vmatprep.mubr.f32.mxu1 %v24864_v31 }
 0x561   :  { %17529 = vmatmul.mubr.f32.gmra.mrb[24].mxu1 %v24867_v38 }
 0x562   :  { %17531 = vmatprep.mubr.f32.mxu1 %v24870_v30 }
 0x565   :  { %17532 = vmatmul.mubr.f32.gmra.mrb[26].mxu1 %v24873_v39 }
 0x566   :  { %17534 = vmatprep.mubr.f32.mxu1 %v24876_v10 }
 0x569   :  { %17535 = vmatmul.mubr.f32.gmra.mrb[28].mxu1 %v24879_v62 }
 0x56a   :  { %17537 = vmatprep.mubr.f32.mxu1 %v24882_v54 }
 0x56d   :  { %17538 = vmatmul.mubr.f32.gmra.mrb[30].mxu1 %v24885_v23 }
 0x56e   :  { %17540 = vmatprep.mubr.f32.mxu1 %v24888_v14 }
 0x571   :  { %17541 = vmatmul.mubr.f32.gmra.mrb[32].mxu1 %v24891_v57 }
 0x572   :  { %17543 = vmatprep.mubr.f32.mxu1 %v24894_v49 }
 0x575   :  { %17544 = vmatmul.mubr.f32.gmra.mrb[34].mxu1 %v24897_v35 }
 0x576   :  { %17546 = vmatprep.mubr.f32.mxu1 %v24900_v28 }
 0x579   :  { %17547 = vmatmul.mubr.f32.gmra.mrb[36].mxu1 %v24903_v60 }
 0x57a   :  { %17549 = vmatprep.mubr.f32.mxu1 %v24906_v51 }
 0x57d   :  { %17550 = vmatmul.mubr.f32.gmra.mrb[38].mxu1 %v24909_v19 }
 0x57e   :  { %17584 = vmatprep.mubr.f32.mxu1 %v24737_v2  ;;  %v13525_v2 = vld [vmem:[%s28312_s5 + $0x630] sm:$0xff] }
 0x581   :  { %17585 = vmatmul.mubr.f32.vlgmr.msra.gmra.mrb[0].mxu1 %v24743_v27  ;;  %v19373_v27 = vpack.c.bf16 %v13526_v6, %v13525_v2  ;;  %v13532_v6 = vld [vmem:[%s28312_s5 + $0x668] sm:$0xff] }
 0x582   :  { %17587 = vmatprep.mubr.f32.mxu1 %v24754_v61  ;;  %19364 = vmatpush3.bf16.msra.mxu1 %v19361_v34  ;;  %v13530_v34 = vld [vmem:[%s28312_s5 + $0x658] sm:$0xff] }
 0x583   :  { %19366 = vmatprep.subr.bf16.mxu1 %v19365_v53 }
 0x585   :  { %17588 = vmatmul.mubr.f32.gmra.mrb[2].mxu1 %v24759_v5 }
 0x586   :  { %17590 = vmatprep.mubr.f32.mxu1 %v24770_v29  ;;  %19368 = vmatpush3.bf16.msra.mxu1 %v19365_v53  ;;  %v13529_v53 = vld [vmem:[%s28312_s5 + $0x650] sm:$0xff] }
 0x587   :  { %19370 = vmatprep.subr.bf16.mxu1 %v19369_v15  ;;  %v19381_v2 = vpack.c.bf16 %v13530_v34, %v13529_v53  ;;  %v13536_v34 = vld [vmem:[%s28312_s5 + $0x688] sm:$0xff] }
 0x589   :  { %17591 = vmatmul.mubr.f32.gmra.mrb[4].mxu1 %v24775_v22 }
 0x58a   :  { %17593 = vmatprep.mubr.f32.mxu1 %v24786_v55  ;;  %19372 = vmatpush3.bf16.msra.mxu1 %v19369_v15  ;;  %v13531_v15 = vld [vmem:[%s28312_s5 + $0x660] sm:$0xff] }
 0x58b   :  { %19374 = vmatprep.subr.bf16.mxu1 %v19373_v27  ;;  %v19385_v63 = vpack.c.bf16 %v13532_v6, %v13531_v15  ;;  %v24981_v6 = vld [vmem:[#allocation2 + $0xfa] sm:$0xff] }
 0x58d   :  { %17594 = vmatmul.mubr.f32.gmra.mrb[6].mxu1 %v24791_v18 }
 0x58e   :  { %17596 = vmatprep.mubr.f32.mxu1 %v24802_v48  ;;  %19376 = vmatpush3.bf16.msra.mxu1 %v19373_v27  ;;  %v13533_v27 = vld [vmem:[%s28312_s5 + $0x670] sm:$0xff] }
 0x58f   :  { %19378 = vmatprep.subr.bf16.mxu1 %v19377_v59  ;;  %v19389_v53 = vpack.c.bf16 %v13534_v37, %v13533_v27  ;;  %v13538_v27 = vld [vmem:[%s28312_s5 + $0x698] sm:$0xff] }
 0x591   :  { %17597 = vmatmul.mubr.f32.gmra.mrb[8].mxu1 %v24807_v3 }
 0x592   :  { %17599 = vmatprep.mubr.f32.mxu1 %v24818_v36  ;;  %19380 = vmatpush3.bf16.msra.mxu1 %v19377_v59  ;;  %v13535_v59 = vld [vmem:[%s28312_s5 + $0x680] sm:$0xff] }
 0x593   :  { %19382 = vmatprep.subr.bf16.mxu1 %v19381_v2  ;;  %v19393_v15 = vpack.c.bf16 %v13536_v34, %v13535_v59  ;;  %v13540_v59 = vld [vmem:[%s28312_s5 + $0x6a8] sm:$0xff] }
 0x595   :  { %17600 = vmatmul.mubr.f32.gmra.mrb[10].mxu1 %v24823_v24 }
 0x596   :  { %17602 = vmatprep.mubr.f32.mxu1 %v24834_v42  ;;  %19384 = vmatpush3.bf16.msra.mxu1 %v19381_v2  ;;  %v24978_v2 = vld [vmem:[#allocation2 + $0xf2] sm:$0xff] }
 0x597   :  { %19386 = vmatprep.subr.bf16.mxu1 %v19385_v63 }
 0x599   :  { %17603 = vmatmul.mubr.f32.gmra.mrb[12].mxu1 %v24839_v11 }
 0x59a   :  { %17605 = vmatprep.mubr.f32.mxu1 %v24844_v26  ;;  %19388 = vmatpush3.bf16.msra.mxu1 %v19385_v63  ;;  %v13537_v63 = vld [vmem:[%s28312_s5 + $0x690] sm:$0xff] }
 0x59b   :  { %19390 = vmatprep.subr.bf16.mxu1 %v19389_v53  ;;  %v19397_v37 = vpack.c.bf16 %v13538_v27, %v13537_v63  ;;  %v13542_v63 = vld [vmem:[%s28312_s5 + $0x6b8] sm:$0xff]  ;;  %v13544_v27 = vld [vmem:[%s28312_s5 + $0x6c8] sm:$0xff] }
 0x59d   :  { %17606 = vmatmul.mubr.f32.gmra.mrb[14].mxu1 %v24849_v1 }
 0x59e   :  { %17608 = vmatprep.mubr.f32.mxu1 %v24852_v16  ;;  %19392 = vmatpush3.bf16.msra.mxu1 %v19389_v53  ;;  %v13539_v53 = vld [vmem:[%s28312_s5 + $0x6a0] sm:$0xff] }
 0x59f   :  { %19394 = vmatprep.subr.bf16.mxu1 %v19393_v15  ;;  %v19401_v34 = vpack.c.bf16 %v13540_v59, %v13539_v53  ;;  %v13546_v59 = vld [vmem:[%s28312_s5 + $0x6d8] sm:$0xff] }
 0x5a1   :  { %17609 = vmatmul.mubr.f32.gmra.mrb[16].mxu1 %v24855_v21 }
 0x5a2   :  { %17611 = vmatprep.mubr.f32.mxu1 %v24978_v2 }
 0x5a5   :  { %17612 = vmatmul.mubr.f32.gmra.mrb[18].mxu1 %v24981_v6 }
 0x5a6   :  { %17614 = vmatprep.mubr.f32.mxu1 %v24858_v41  ;;  %v25002_v41 = vld [vmem:[#allocation2 + $0x242] sm:$0xff] }
 0x5a9   :  { %17615 = vmatmul.mubr.f32.gmra.mrb[20].mxu1 %v24861_v7  ;;  %v25005_v7 = vld [vmem:[#allocation2 + $0x24a] sm:$0xff] }
 0x5aa   :  { %17617 = vmatprep.mubr.f32.mxu1 %v24864_v31 }
 0x5ad   :  { %17618 = vmatmul.mubr.f32.gmra.mrb[22].mxu1 %v24867_v38 }
 0x5ae   :  { %17620 = vmatprep.mubr.f32.mxu1 %v24870_v30 }
 0x5b1   :  { %17621 = vmatmul.mubr.f32.gmra.mrb[24].mxu1 %v24873_v39 }
 0x5b2   :  { %17623 = vmatprep.mubr.f32.mxu1 %v24876_v10 }
 0x5b5   :  { %17624 = vmatmul.mubr.f32.gmra.mrb[26].mxu1 %v24879_v62 }
 0x5b6   :  { %17626 = vmatprep.mubr.f32.mxu1 %v24882_v54 }
 0x5b9   :  { %17627 = vmatmul.mubr.f32.gmra.mrb[28].mxu1 %v24885_v23 }
 0x5ba   :  { %17629 = vmatprep.mubr.f32.mxu1 %v24888_v14 }
 0x5bd   :  { %17630 = vmatmul.mubr.f32.gmra.mrb[30].mxu1 %v24891_v57 }
 0x5be   :  { %17632 = vmatprep.mubr.f32.mxu1 %v24894_v49 }
 0x5c1   :  { %17633 = vmatmul.mubr.f32.gmra.mrb[32].mxu1 %v24897_v35 }
 0x5c2   :  { %17635 = vmatprep.mubr.f32.mxu1 %v24900_v28 }
 0x5c5   :  { %17636 = vmatmul.mubr.f32.gmra.mrb[34].mxu1 %v24903_v60 }
 0x5c6   :  { %17638 = vmatprep.mubr.f32.mxu1 %v24906_v51 }
 0x5c9   :  { %17639 = vmatmul.mubr.f32.gmra.mrb[36].mxu1 %v24909_v19 }
 0x5ca   :  { %17641 = vmatprep.mubr.f32.mxu1 %v25002_v41 }
 0x5cd   :  { %17642 = vmatmul.mubr.f32.gmra.mrb[38].mxu1 %v25005_v7 }
 0x5ce   :  { %17676 = vmatprep.mubr.f32.mxu1 %v24754_v61  ;;  %v13541_v61 = vld [vmem:[%s28312_s5 + $0x6b0] sm:$0xff] }
 0x5d1   :  { %17677 = vmatmul.mubr.f32.vlgmr.msra.gmra.mrb[0].mxu1 %v24759_v5  ;;  %v19405_v5 = vpack.c.bf16 %v13542_v63, %v13541_v61  ;;  %v13548_v63 = vld [vmem:[%s28312_s5 + $0x6e8] sm:$0xff] }
 0x5d2   :  { %17679 = vmatprep.mubr.f32.mxu1 %v24770_v29  ;;  %19396 = vmatpush3.bf16.msra.mxu1 %v19393_v15  ;;  %v13543_v15 = vld [vmem:[%s28312_s5 + $0x6c0] sm:$0xff] }
 0x5d3   :  { %19398 = vmatprep.subr.bf16.mxu1 %v19397_v37  ;;  %v19409_v53 = vpack.c.bf16 %v13544_v27, %v13543_v15  ;;  %v13550_v27 = vld [vmem:[%s28312_s5 + $0x6f8] sm:$0xff] }
 0x5d5   :  { %17680 = vmatmul.mubr.f32.gmra.mrb[2].mxu1 %v24775_v22 }
 0x5d6   :  { %17682 = vmatprep.mubr.f32.mxu1 %v24786_v55  ;;  %19400 = vmatpush3.bf16.msra.mxu1 %v19397_v37  ;;  %v13545_v37 = vld [vmem:[%s28312_s5 + $0x6d0] sm:$0xff] }
 0x5d7   :  { %19402 = vmatprep.subr.bf16.mxu1 %v19401_v34  ;;  %v19413_v61 = vpack.c.bf16 %v13546_v59, %v13545_v37  ;;  %v13552_v59 = vld [vmem:[%s28312_s5 + $0x708] sm:$0xff] }
 0x5d9   :  { %17683 = vmatmul.mubr.f32.gmra.mrb[4].mxu1 %v24791_v18 }
 0x5da   :  { %17685 = vmatprep.mubr.f32.mxu1 %v24802_v48  ;;  %19404 = vmatpush3.bf16.msra.mxu1 %v19401_v34  ;;  %v13547_v34 = vld [vmem:[%s28312_s5 + $0x6e0] sm:$0xff] }
 0x5db   :  { %19406 = vmatprep.subr.bf16.mxu1 %v19405_v5  ;;  %v19417_v15 = vpack.c.bf16 %v13548_v63, %v13547_v34  ;;  %v25077_v63 = vld [vmem:[#allocation2 + $0x112] sm:$0xff] }
 0x5dd   :  { %17686 = vmatmul.mubr.f32.gmra.mrb[6].mxu1 %v24807_v3 }
 0x5de   :  { %17688 = vmatprep.mubr.f32.mxu1 %v24818_v36  ;;  %19408 = vmatpush3.bf16.msra.mxu1 %v19405_v5  ;;  %v13549_v5 = vld [vmem:[%s28312_s5 + $0x6f0] sm:$0xff] }
 0x5df   :  { %19410 = vmatprep.subr.bf16.mxu1 %v19409_v53  ;;  %v19421_v37 = vpack.c.bf16 %v13550_v27, %v13549_v5  ;;  %v13554_v5 = vld [vmem:[%s28312_s5 + $0x718] sm:$0xff] }
 0x5e1   :  { %17689 = vmatmul.mubr.f32.gmra.mrb[8].mxu1 %v24823_v24 }
 0x5e2   :  { %17691 = vmatprep.mubr.f32.mxu1 %v24834_v42  ;;  %19412 = vmatpush3.bf16.msra.mxu1 %v19409_v53  ;;  %v13551_v53 = vld [vmem:[%s28312_s5 + $0x700] sm:$0xff] }
 0x5e3   :  { %19414 = vmatprep.subr.bf16.mxu1 %v19413_v61  ;;  %v19425_v34 = vpack.c.bf16 %v13552_v59, %v13551_v53  ;;  %v13556_v53 = vld [vmem:[%s28312_s5 + $0x728] sm:$0xff] }
 0x5e5   :  { %17692 = vmatmul.mubr.f32.gmra.mrb[10].mxu1 %v24839_v11 }
 0x5e6   :  { %17694 = vmatprep.mubr.f32.mxu1 %v24844_v26  ;;  %19416 = vmatpush3.bf16.msra.mxu1 %v19413_v61  ;;  %v25074_v61 = vld [vmem:[#allocation2 + $0x10a] sm:$0xff] }
 0x5e7   :  { %19418 = vmatprep.subr.bf16.mxu1 %v19417_v15 }
 0x5e9   :  { %17695 = vmatmul.mubr.f32.gmra.mrb[12].mxu1 %v24849_v1 }
 0x5ea   :  { %17697 = vmatprep.mubr.f32.mxu1 %v24852_v16  ;;  %19420 = vmatpush3.bf16.msra.mxu1 %v19417_v15  ;;  %v13553_v15 = vld [vmem:[%s28312_s5 + $0x710] sm:$0xff] }
 0x5eb   :  { %19422 = vmatprep.subr.bf16.mxu1 %v19421_v37  ;;  %v19429_v27 = vpack.c.bf16 %v13554_v5, %v13553_v15  ;;  %v13558_v15 = vld [vmem:[%s28312_s5 + $0x738] sm:$0xff]  ;;  %v13560_v5 = vld [vmem:[%s28312_s5 + $0x748] sm:$0xff] }
 0x5ed   :  { %17698 = vmatmul.mubr.f32.gmra.mrb[14].mxu1 %v24855_v21 }
 0x5ee   :  { %17700 = vmatprep.mubr.f32.mxu1 %v24978_v2  ;;  %19424 = vmatpush3.bf16.msra.mxu1 %v19421_v37  ;;  %v13555_v37 = vld [vmem:[%s28312_s5 + $0x720] sm:$0xff] }
 0x5ef   :  { %19426 = vmatprep.subr.bf16.mxu1 %v19425_v34  ;;  %v19433_v59 = vpack.c.bf16 %v13556_v53, %v13555_v37  ;;  %v13562_v53 = vld [vmem:[%s28312_s5 + $0x758] sm:$0xff] }
 0x5f1   :  { %17701 = vmatmul.mubr.f32.gmra.mrb[16].mxu1 %v24981_v6 }
 0x5f2   :  { %17703 = vmatprep.mubr.f32.mxu1 %v25074_v61 }
 0x5f5   :  { %17704 = vmatmul.mubr.f32.gmra.mrb[18].mxu1 %v25077_v63 }
 0x5f6   :  { %17706 = vmatprep.mubr.f32.mxu1 %v24864_v31  ;;  %v25101_v31 = vld [vmem:[#allocation2 + $0x262] sm:$0xff] }
 0x5f9   :  { %17707 = vmatmul.mubr.f32.gmra.mrb[20].mxu1 %v24867_v38  ;;  %v25098_v38 = vld [vmem:[#allocation2 + $0x25a] sm:$0xff] }
 0x5fa   :  { %17709 = vmatprep.mubr.f32.mxu1 %v24870_v30 }
 0x5fd   :  { %17710 = vmatmul.mubr.f32.gmra.mrb[22].mxu1 %v24873_v39 }
 0x5fe   :  { %17712 = vmatprep.mubr.f32.mxu1 %v24876_v10 }
 0x601   :  { %17713 = vmatmul.mubr.f32.gmra.mrb[24].mxu1 %v24879_v62 }
 0x602   :  { %17715 = vmatprep.mubr.f32.mxu1 %v24882_v54 }
 0x605   :  { %17716 = vmatmul.mubr.f32.gmra.mrb[26].mxu1 %v24885_v23 }
 0x606   :  { %17718 = vmatprep.mubr.f32.mxu1 %v24888_v14 }
 0x609   :  { %17719 = vmatmul.mubr.f32.gmra.mrb[28].mxu1 %v24891_v57 }
 0x60a   :  { %17721 = vmatprep.mubr.f32.mxu1 %v24894_v49 }
 0x60d   :  { %17722 = vmatmul.mubr.f32.gmra.mrb[30].mxu1 %v24897_v35 }
 0x60e   :  { %17724 = vmatprep.mubr.f32.mxu1 %v24900_v28 }
 0x611   :  { %17725 = vmatmul.mubr.f32.gmra.mrb[32].mxu1 %v24903_v60 }
 0x612   :  { %17727 = vmatprep.mubr.f32.mxu1 %v24906_v51 }
 0x615   :  { %17728 = vmatmul.mubr.f32.gmra.mrb[34].mxu1 %v24909_v19 }
 0x616   :  { %17730 = vmatprep.mubr.f32.mxu1 %v25002_v41 }
 0x619   :  { %17731 = vmatmul.mubr.f32.gmra.mrb[36].mxu1 %v25005_v7 }
 0x61a   :  { %17733 = vmatprep.mubr.f32.mxu1 %v25098_v38 }
 0x61d   :  { %17734 = vmatmul.mubr.f32.gmra.mrb[38].mxu1 %v25101_v31 }
 0x61e   :  { %17768 = vmatprep.mubr.f32.mxu1 %v24770_v29  ;;  %v13557_v29 = vld [vmem:[%s28312_s5 + $0x730] sm:$0xff] }
 0x621   :  { %17769 = vmatmul.mubr.f32.vlgmr.msra.gmra.mrb[0].mxu1 %v24775_v22  ;;  %v19437_v22 = vpack.c.bf16 %v13558_v15, %v13557_v29  ;;  %v13564_v15 = vld [vmem:[%s28312_s5 + $0x768] sm:$0xff] }
 0x622   :  { %17771 = vmatprep.mubr.f32.mxu1 %v24786_v55  ;;  %19428 = vmatpush3.bf16.msra.mxu1 %v19425_v34  ;;  %v13559_v34 = vld [vmem:[%s28312_s5 + $0x740] sm:$0xff] }
 0x623   :  { %19430 = vmatprep.subr.bf16.mxu1 %v19429_v27  ;;  %v19441_v37 = vpack.c.bf16 %v13560_v5, %v13559_v34  ;;  %v13566_v5 = vld [vmem:[%s28312_s5 + $0x778] sm:$0xff] }
 0x625   :  { %17772 = vmatmul.mubr.f32.gmra.mrb[2].mxu1 %v24791_v18 }
 0x626   :  { %17774 = vmatprep.mubr.f32.mxu1 %v24802_v48  ;;  %19432 = vmatpush3.bf16.msra.mxu1 %v19429_v27  ;;  %v13561_v27 = vld [vmem:[%s28312_s5 + $0x750] sm:$0xff] }
 0x627   :  { %19434 = vmatprep.subr.bf16.mxu1 %v19433_v59  ;;  %v19445_v29 = vpack.c.bf16 %v13562_v53, %v13561_v27  ;;  %v13568_v53 = vld [vmem:[%s28312_s5 + $0x788] sm:$0xff] }
 0x629   :  { %17775 = vmatmul.mubr.f32.gmra.mrb[4].mxu1 %v24807_v3 }
 0x62a   :  { %17777 = vmatprep.mubr.f32.mxu1 %v24818_v36  ;;  %19436 = vmatpush3.bf16.msra.mxu1 %v19433_v59  ;;  %v13563_v59 = vld [vmem:[%s28312_s5 + $0x760] sm:$0xff] }
 0x62b   :  { %19438 = vmatprep.subr.bf16.mxu1 %v19437_v22  ;;  %v19449_v34 = vpack.c.bf16 %v13564_v15, %v13563_v59  ;;  %v25173_v15 = vld [vmem:[#allocation2 + $0x12a] sm:$0xff] }
 0x62d   :  { %17778 = vmatmul.mubr.f32.gmra.mrb[6].mxu1 %v24823_v24 }
 0x62e   :  { %17780 = vmatprep.mubr.f32.mxu1 %v24834_v42  ;;  %19440 = vmatpush3.bf16.msra.mxu1 %v19437_v22  ;;  %v13565_v22 = vld [vmem:[%s28312_s5 + $0x770] sm:$0xff] }
 0x62f   :  { %19442 = vmatprep.subr.bf16.mxu1 %v19441_v37  ;;  %v19453_v27 = vpack.c.bf16 %v13566_v5, %v13565_v22  ;;  %v13570_v22 = vld [vmem:[%s28312_s5 + $0x798] sm:$0xff] }
 0x631   :  { %17781 = vmatmul.mubr.f32.gmra.mrb[8].mxu1 %v24839_v11 }
 0x632   :  { %17783 = vmatprep.mubr.f32.mxu1 %v24844_v26  ;;  %19444 = vmatpush3.bf16.msra.mxu1 %v19441_v37  ;;  %v13567_v37 = vld [vmem:[%s28312_s5 + $0x780] sm:$0xff] }
 0x633   :  { %19446 = vmatprep.subr.bf16.mxu1 %v19445_v29  ;;  %v19457_v59 = vpack.c.bf16 %v13568_v53, %v13567_v37  ;;  %v13572_v37 = vld [vmem:[%s28312_s5 + $0x7a8] sm:$0xff] }
 0x635   :  { %17784 = vmatmul.mubr.f32.gmra.mrb[10].mxu1 %v24849_v1 }
 0x636   :  { %17786 = vmatprep.mubr.f32.mxu1 %v24852_v16  ;;  %19448 = vmatpush3.bf16.msra.mxu1 %v19445_v29  ;;  %v25170_v29 = vld [vmem:[#allocation2 + $0x122] sm:$0xff] }
 0x637   :  { %19450 = vmatprep.subr.bf16.mxu1 %v19449_v34 }
 0x639   :  { %17787 = vmatmul.mubr.f32.gmra.mrb[12].mxu1 %v24855_v21 }
 0x63a   :  { %17789 = vmatprep.mubr.f32.mxu1 %v24978_v2  ;;  %19452 = vmatpush3.bf16.msra.mxu1 %v19449_v34  ;;  %v13569_v34 = vld [vmem:[%s28312_s5 + $0x790] sm:$0xff] }
 0x63b   :  { %19454 = vmatprep.subr.bf16.mxu1 %v19453_v27  ;;  %v19461_v5 = vpack.c.bf16 %v13570_v22, %v13569_v34  ;;  %v13574_v34 = vld [vmem:[%s28312_s5 + $0x7b8] sm:$0xff] }
 0x63c   :  { %v13578_v22 = vld [vmem:[%s28312_s5 + $0x7d8] sm:$0xff] }
 0x63d   :  { %17790 = vmatmul.mubr.f32.gmra.mrb[14].mxu1 %v24981_v6 }
 0x63e   :  { %17792 = vmatprep.mubr.f32.mxu1 %v25074_v61  ;;  %19456 = vmatpush3.bf16.msra.mxu1 %v19453_v27  ;;  %v13571_v27 = vld [vmem:[%s28312_s5 + $0x7a0] sm:$0xff] }
 0x63f   :  { %19458 = vmatprep.subr.bf16.mxu1 %v19457_v59  ;;  %v19465_v53 = vpack.c.bf16 %v13572_v37, %v13571_v27  ;;  %v13582_v27 = vld [vmem:[%s28312_s5 + $0x7f8] sm:$0xff]  ;;  %v13584_v37 = vld [vmem:[%s28312_s5 + $0x808] sm:$0xff] }
 0x641   :  { %17793 = vmatmul.mubr.f32.gmra.mrb[16].mxu1 %v25077_v63 }
 0x642   :  { %17795 = vmatprep.mubr.f32.mxu1 %v25170_v29 }
 0x645   :  { %17796 = vmatmul.mubr.f32.gmra.mrb[18].mxu1 %v25173_v15 }
 0x646   :  { %17798 = vmatprep.mubr.f32.mxu1 %v24870_v30  ;;  %v25194_v30 = vld [vmem:[#allocation2 + $0x272] sm:$0xff] }
 0x649   :  { %17799 = vmatmul.mubr.f32.gmra.mrb[20].mxu1 %v24873_v39  ;;  %v25197_v39 = vld [vmem:[#allocation2 + $0x27a] sm:$0xff] }
 0x64a   :  { %17801 = vmatprep.mubr.f32.mxu1 %v24876_v10 }
 0x64d   :  { %17802 = vmatmul.mubr.f32.gmra.mrb[22].mxu1 %v24879_v62 }
 0x64e   :  { %17804 = vmatprep.mubr.f32.mxu1 %v24882_v54 }
 0x651   :  { %17805 = vmatmul.mubr.f32.gmra.mrb[24].mxu1 %v24885_v23 }
 0x652   :  { %17807 = vmatprep.mubr.f32.mxu1 %v24888_v14 }
 0x655   :  { %17808 = vmatmul.mubr.f32.gmra.mrb[26].mxu1 %v24891_v57 }
 0x656   :  { %17810 = vmatprep.mubr.f32.mxu1 %v24894_v49 }
 0x659   :  { %17811 = vmatmul.mubr.f32.gmra.mrb[28].mxu1 %v24897_v35 }
 0x65a   :  { %17813 = vmatprep.mubr.f32.mxu1 %v24900_v28 }
 0x65d   :  { %17814 = vmatmul.mubr.f32.gmra.mrb[30].mxu1 %v24903_v60 }
 0x65e   :  { %17816 = vmatprep.mubr.f32.mxu1 %v24906_v51 }
 0x661   :  { %17817 = vmatmul.mubr.f32.gmra.mrb[32].mxu1 %v24909_v19 }
 0x662   :  { %17819 = vmatprep.mubr.f32.mxu1 %v25002_v41 }
 0x665   :  { %17820 = vmatmul.mubr.f32.gmra.mrb[34].mxu1 %v25005_v7 }
 0x666   :  { %17822 = vmatprep.mubr.f32.mxu1 %v25098_v38 }
 0x669   :  { %17823 = vmatmul.mubr.f32.gmra.mrb[36].mxu1 %v25101_v31 }
 0x66a   :  { %17825 = vmatprep.mubr.f32.mxu1 %v25194_v30 }
 0x66d   :  { %17826 = vmatmul.mubr.f32.gmra.mrb[38].mxu1 %v25197_v39 }
 0x66e   :  { %17860 = vmatprep.mubr.f32.mxu1 %v24786_v55  ;;  %v13573_v55 = vld [vmem:[%s28312_s5 + $0x7b0] sm:$0xff] }
 0x671   :  { %17861 = vmatmul.mubr.f32.vlgmr.msra.gmra.mrb[0].mxu1 %v24791_v18  ;;  %v19469_v18 = vpack.c.bf16 %v13574_v34, %v13573_v55  ;;  %v13594_v55 = vld [vmem:[%s28312_s5 + $0x858] sm:$0xff]  ;;  %v25332_v34 = vld [vmem:[#allocation2 + $0x63] sm:$0xff] }
 0x672   :  { %17863 = vmatprep.mubr.f32.mxu1 %v24802_v48  ;;  %19460 = vmatpush3.bf16.msra.mxu1 %v19457_v59  ;;  %v13575_v48 = vld [vmem:[%s28312_s5 + $0x7c0] sm:$0xff]  ;;  %v13576_v59 = vld [vmem:[%s28312_s5 + $0x7c8] sm:$0xff] }
 0x673   :  { %19462 = vmatprep.subr.bf16.mxu1 %v19461_v5 }
 0x675   :  { %17864 = vmatmul.mubr.f32.gmra.mrb[2].mxu1 %v24807_v3  ;;  %v19473_v3 = vpack.c.bf16 %v13576_v59, %v13575_v48  ;;  %v25335_v48 = vld [vmem:[#allocation2 + $0x6b] sm:$0xff]  ;;  %v13595_v59 = vld [vmem:[%s28312_s5 + $0x860] sm:$0xff] }
 0x676   :  { %17866 = vmatprep.mubr.f32.mxu1 %v24818_v36  ;;  %19464 = vmatpush3.bf16.msra.mxu1 %v19461_v5  ;;  %v13577_v36 = vld [vmem:[%s28312_s5 + $0x7d0] sm:$0xff]  ;;  %v13580_v5 = vld [vmem:[%s28312_s5 + $0x7e8] sm:$0xff] }
 0x677   :  { %19466 = vmatprep.subr.bf16.mxu1 %v19465_v53 }
 0x679   :  { %17867 = vmatmul.mubr.f32.gmra.mrb[4].mxu1 %v24823_v24  ;;  %v19477_v24 = vpack.c.bf16 %v13578_v22, %v13577_v36  ;;  %v25344_v36 = vld [vmem:[#allocation2 + $0x7b] sm:$0xff] }
 0x67a   :  { %17869 = vmatprep.mubr.f32.mxu1 %v24834_v42  ;;  %19468 = vmatpush3.bf16.msra.mxu1 %v19465_v53  ;;  %v13579_v42 = vld [vmem:[%s28312_s5 + $0x7e0] sm:$0xff] }
 0x67b   :  { %19470 = vmatprep.subr.bf16.mxu1 %v19469_v18  ;;  %v6098_v53 = vld [vmem:[#allocation2 + $0x142] sm:$0xff] }
 0x67d   :  { %17870 = vmatmul.mubr.f32.gmra.mrb[6].mxu1 %v24839_v11  ;;  %v19481_v11 = vpack.c.bf16 %v13580_v5, %v13579_v42  ;;  %v13597_v42 = vld [vmem:[%s28312_s5 + $0x870] sm:$0xff]  ;;  %v13598_v5 = vld [vmem:[%s28312_s5 + $0x878] sm:$0xff] }
 0x67e   :  { %17872 = vmatprep.mubr.f32.mxu1 %v24844_v26  ;;  %19472 = vmatpush3.bf16.msra.mxu1 %v19469_v18  ;;  %v13581_v26 = vld [vmem:[%s28312_s5 + $0x7f0] sm:$0xff] }
 0x67f   :  { %19474 = vmatprep.subr.bf16.mxu1 %v19473_v3 }
 0x681   :  { %17873 = vmatmul.mubr.f32.gmra.mrb[8].mxu1 %v24849_v1  ;;  %v19485_v1 = vpack.c.bf16 %v13582_v27, %v13581_v26  ;;  %v19517_v26 = vpack.c.bf16 %v13598_v5, %v13597_v42  ;;  %v25359_v27 = vld [vmem:[#allocation2 + $0x9b] sm:$0xff]  ;;  %v25437_v42 = vld [vmem:[#allocation2 + $0x233] sm:$0xff] }
 0x682   :  { %17875 = vmatprep.mubr.f32.mxu1 %v24852_v16  ;;  %19476 = vmatpush3.bf16.msra.mxu1 %v19473_v3  ;;  %v13583_v16 = vld [vmem:[%s28312_s5 + $0x800] sm:$0xff]  ;;  %v13596_v3 = vld [vmem:[%s28312_s5 + $0x868] sm:$0xff]  ;;  %v13601_v5 = vld [vmem:[%s28312_s5 + $0x890] sm:$0xff] }
 0x683   :  { %19478 = vmatprep.subr.bf16.mxu1 %v19477_v24  ;;  %v19513_v22 = vpack.c.bf16 %v13596_v3, %v13595_v59  ;;  %v25428_v59 = vld [vmem:[#allocation2 + $0x213] sm:$0xff]  ;;  %v25431_v3 = vld [vmem:[#allocation2 + $0x21b] sm:$0xff] }
 0x685   :  { %17876 = vmatmul.mubr.f32.gmra.mrb[10].mxu1 %v24855_v21  ;;  %v19489_v21 = vpack.c.bf16 %v13584_v37, %v13583_v16  ;;  %v13600_v16 = vld [vmem:[%s28312_s5 + $0x888] sm:$0xff] }
 0x686   :  { %17878 = vmatprep.mubr.f32.mxu1 %v24978_v2  ;;  %19480 = vmatpush3.bf16.msra.mxu1 %v19477_v24  ;;  %v6097_v2 = vld [vmem:[#allocation2 + $0x13a] sm:$0xff]  ;;  %v25347_v24 = vld [vmem:[#allocation2 + $0x83] sm:$0xff]  ;;  %v25368_v37 = vld [vmem:[#allocation2 + $0xab] sm:$0xff] }
 0x687   :  { %19482 = vmatprep.subr.bf16.mxu1 %v19481_v11 }
 0x689   :  { %17879 = vmatmul.mubr.f32.gmra.mrb[12].mxu1 %v24981_v6  ;;  %v13589_v6 = vld [vmem:[%s28312_s5 + $0x830] sm:$0xff] }
 0x68a   :  { %17881 = vmatprep.mubr.f32.mxu1 %v25074_v61  ;;  %19484 = vmatpush3.bf16.msra.mxu1 %v19481_v11  ;;  %v25356_v11 = vld [vmem:[#allocation2 + $0x93] sm:$0xff] }
 0x68b   :  { %19486 = vmatprep.subr.bf16.mxu1 %v19485_v1 }
 0x68d   :  { %17882 = vmatmul.mubr.f32.gmra.mrb[14].mxu1 %v25077_v63  ;;  %v25311_v63 = vld [vmem:[#allocation2 + $0x3b] sm:$0xff] }
 0x68e   :  { %17884 = vmatprep.mubr.f32.mxu1 %v25170_v29  ;;  %19488 = vmatpush3.bf16.msra.mxu1 %v19485_v1  ;;  %v25320_v29 = vld [vmem:[#allocation2 + $0x4b] sm:$0xff]  ;;  %v13599_v1 = vld [vmem:[%s28312_s5 + $0x880] sm:$0xff] }
 0x68f   :  { %19490 = vmatprep.subr.bf16.mxu1 %v19489_v21 }
 0x691   :  { %17885 = vmatmul.mubr.f32.gmra.mrb[16].mxu1 %v25173_v15 }
 0x692   :  { %17887 = vmatprep.mubr.f32.mxu1 %v6097_v2  ;;  %v25371_v2 = vld [vmem:[#allocation2 + $0xb3] sm:$0xff] }
 0x695   :  { %17888 = vmatmul.mubr.f32.gmra.mrb[18].mxu1 %v6098_v53  ;;  %v25374_v53 = vld [vmem:[#allocation2 + $0xc3] sm:$0xff] }
 0x696   :  { %17890 = vmatprep.mubr.f32.mxu1 %v24876_v10  ;;  %v25299_v10 = vld [vmem:[#allocation2 + $0x23] sm:$0xff] }
 0x699   :  { %17891 = vmatmul.mubr.f32.gmra.mrb[20].mxu1 %v24879_v62 }
 0x69a   :  { %17893 = vmatprep.mubr.f32.mxu1 %v24882_v54  ;;  %v25296_v54 = vld [vmem:[#allocation2 + $0x1b] sm:$0xff] }
 0x69d   :  { %17894 = vmatmul.mubr.f32.gmra.mrb[22].mxu1 %v24885_v23  ;;  %v13588_v23 = vld [vmem:[%s28312_s5 + $0x828] sm:$0xff] }
 0x69e   :  { %17896 = vmatprep.mubr.f32.mxu1 %v24888_v14  ;;  %v13587_v14 = vld [vmem:[%s28312_s5 + $0x820] sm:$0xff] }
 0x69f   :  { %v19497_v62 = vpack.c.bf16 %v13588_v23, %v13587_v14  ;;  %v25392_v14 = vld [vmem:[#allocation2 + $0x183] sm:$0xff]  ;;  %v25395_v23 = vld [vmem:[#allocation2 + $0x18b] sm:$0xff] }
 0x6a1   :  { %17897 = vmatmul.mubr.f32.gmra.mrb[24].mxu1 %v24891_v57  ;;  %v7738_v57 = vld [vmem:[#allocation2 + $0xb] sm:$0xff] }
 0x6a2   :  { %17899 = vmatprep.mubr.f32.mxu1 %v24894_v49 }
 0x6a5   :  { %17900 = vmatmul.mubr.f32.gmra.mrb[26].mxu1 %v24897_v35  ;;  %v6125_v35 = vld [vmem:[#allocation2 + $0x28a] sm:$0xff] }
 0x6a6   :  { %17902 = vmatprep.mubr.f32.mxu1 %v24900_v28  ;;  %v6126_v28 = vld [vmem:[#allocation2 + $0x292] sm:$0xff] }
 0x6a9   :  { %17903 = vmatmul.mubr.f32.gmra.mrb[28].mxu1 %v24903_v60  ;;  %v7737_v60 = vld [vmem:[#allocation2 + $0x3] sm:$0xff] }
 0x6aa   :  { %17905 = vmatprep.mubr.f32.mxu1 %v24906_v51  ;;  %v13585_v51 = vld [vmem:[%s28312_s5 + $0x810] sm:$0xff] }
 0x6ad   :  { %17906 = vmatmul.mubr.f32.gmra.mrb[30].mxu1 %v24909_v19  ;;  %v13586_v19 = vld [vmem:[%s28312_s5 + $0x818] sm:$0xff] }
 0x6ae   :  { %17908 = vmatprep.mubr.f32.mxu1 %v25002_v41  ;;  %v19493_v49 = vpack.c.bf16 %v13586_v19, %v13585_v51  ;;  %v13590_v41 = vld [vmem:[%s28312_s5 + $0x838] sm:$0xff]  ;;  %v25383_v51 = vld [vmem:[#allocation2 + $0xe3] sm:$0xff] }
 0x6af   :  { %v19501_v61 = vpack.c.bf16 %v13590_v41, %v13589_v6  ;;  %v7765_v19 = vld [vmem:[#allocation2 + $0x153] sm:$0xff]  ;;  %v25401_v6 = vld [vmem:[#allocation2 + $0x1a3] sm:$0xff] }
 0x6b0   :  { %v25404_v41 = vld [vmem:[#allocation2 + $0x1b3] sm:$0xff] }
 0x6b1   :  { %17909 = vmatmul.mubr.f32.gmra.mrb[32].mxu1 %v25005_v7  ;;  %v25308_v7 = vld [vmem:[#allocation2 + $0x33] sm:$0xff] }
 0x6b2   :  { %17911 = vmatprep.mubr.f32.mxu1 %v25098_v38  ;;  %v13591_v38 = vld [vmem:[%s28312_s5 + $0x840] sm:$0xff] }
 0x6b5   :  { %17912 = vmatmul.mubr.f32.gmra.mrb[34].mxu1 %v25101_v31  ;;  %v13592_v31 = vld [vmem:[%s28312_s5 + $0x848] sm:$0xff] }
 0x6b6   :  { %17914 = vmatprep.mubr.f32.mxu1 %v25194_v30  ;;  %v19505_v15 = vpack.c.bf16 %v13592_v31, %v13591_v38  ;;  %v25323_v30 = vld [vmem:[#allocation2 + $0x53] sm:$0xff]  ;;  %v25410_v38 = vld [vmem:[#allocation2 + $0x1cb] sm:$0xff] }
 0x6b7   :  { %v25413_v31 = vld [vmem:[#allocation2 + $0x1d3] sm:$0xff] }
 0x6b9   :  { %17915 = vmatmul.mubr.f32.gmra.mrb[36].mxu1 %v25197_v39  ;;  %v13593_v39 = vld [vmem:[%s28312_s5 + $0x850] sm:$0xff] }
 0x6ba   :  { %17917 = vmatprep.mubr.f32.mxu1 %v6125_v35  ;;  %v19509_v18 = vpack.c.bf16 %v13594_v55, %v13593_v39  ;;  %v25377_v35 = vld [vmem:[#allocation2 + $0xcb] sm:$0xff]  ;;  %v25422_v55 = vld [vmem:[#allocation2 + $0x1fb] sm:$0xff] }
 0x6bb   :  { %v25419_v39 = vld [vmem:[#allocation2 + $0x1eb] sm:$0xff] }
 0x6bd   :  { %17918 = vmatmul.mubr.f32.gmra.mrb[38].mxu1 %v6126_v28  ;;  %v25380_v28 = vld [vmem:[#allocation2 + $0xdb] sm:$0xff] }
 0x6be   :  { %17952 = vmatprep.mubr.f32.mxu1 %v7737_v60  ;;  %v7766_v60 = vld [vmem:[#allocation2 + $0x15b] sm:$0xff] }
 0x6c1   :  { %17953 = vmatmul.mubr.f32.vlgmr.msra.gmra.mrb[0].mxu1 %v7738_v57  ;;  %v25389_v57 = vld [vmem:[#allocation2 + $0x173] sm:$0xff] }
 0x6c2   :  { %17955 = vmatprep.mubr.f32.mxu1 %v25296_v54  ;;  %19492 = vmatpush3.bf16.msra.mxu1 %v19489_v21  ;;  %v19521_v21 = vpack.c.bf16 %v13600_v16, %v13599_v1  ;;  %v13603_v16 = vld [vmem:[%s28312_s5 + $0x8a0] sm:$0xff] }
 0x6c3   :  { %19494 = vmatprep.subr.bf16.mxu1 %v19493_v49 }
 0x6c5   :  { %17956 = vmatmul.mubr.f32.gmra.mrb[2].mxu1 %v25299_v10 }
 0x6c6   :  { %17958 = vmatprep.mubr.f32.mxu1 %v25308_v7  ;;  %19496 = vmatpush3.bf16.msra.mxu1 %v19493_v49  ;;  %v25386_v49 = vld [vmem:[#allocation2 + $0x16b] sm:$0xff] }
 0x6c7   :  { %19498 = vmatprep.subr.bf16.mxu1 %v19497_v62 }
 0x6c9   :  { %17959 = vmatmul.mubr.f32.gmra.mrb[4].mxu1 %v25311_v63 }
 0x6ca   :  { %17961 = vmatprep.mubr.f32.mxu1 %v25320_v29  ;;  %19500 = vmatpush3.bf16.msra.mxu1 %v19497_v62  ;;  %v25398_v62 = vld [vmem:[#allocation2 + $0x19b] sm:$0xff] }
 0x6cb   :  { %19502 = vmatprep.subr.bf16.mxu1 %v19501_v61 }
 0x6cd   :  { %17962 = vmatmul.mubr.f32.gmra.mrb[6].mxu1 %v25323_v30 }
 0x6ce   :  { %17964 = vmatprep.mubr.f32.mxu1 %v25332_v34  ;;  %19504 = vmatpush3.bf16.msra.mxu1 %v19501_v61  ;;  %v25407_v61 = vld [vmem:[#allocation2 + $0x1bb] sm:$0xff] }
 0x6cf   :  { %19506 = vmatprep.subr.bf16.mxu1 %v19505_v15 }
 0x6d1   :  { %17965 = vmatmul.mubr.f32.gmra.mrb[8].mxu1 %v25335_v48 }
 0x6d2   :  { %17967 = vmatprep.mubr.f32.mxu1 %v25344_v36  ;;  %19508 = vmatpush3.bf16.msra.mxu1 %v19505_v15  ;;  %v25416_v15 = vld [vmem:[#allocation2 + $0x1e3] sm:$0xff] }
 0x6d3   :  { %19510 = vmatprep.subr.bf16.mxu1 %v19509_v18 }
 0x6d5   :  { %17968 = vmatmul.mubr.f32.gmra.mrb[10].mxu1 %v25347_v24 }
 0x6d6   :  { %17970 = vmatprep.mubr.f32.mxu1 %v25356_v11  ;;  %19512 = vmatpush3.bf16.msra.mxu1 %v19509_v18  ;;  %v25425_v18 = vld [vmem:[#allocation2 + $0x203] sm:$0xff] }
 0x6d7   :  { %19514 = vmatprep.subr.bf16.mxu1 %v19513_v22 }
 0x6d9   :  { %17971 = vmatmul.mubr.f32.gmra.mrb[12].mxu1 %v25359_v27 }
 0x6da   :  { %17973 = vmatprep.mubr.f32.mxu1 %v25368_v37  ;;  %19516 = vmatpush3.bf16.msra.mxu1 %v19513_v22  ;;  %v25434_v22 = vld [vmem:[#allocation2 + $0x22b] sm:$0xff] }
 0x6db   :  { %19518 = vmatprep.subr.bf16.mxu1 %v19517_v26 }
 0x6dd   :  { %17974 = vmatmul.mubr.f32.gmra.mrb[14].mxu1 %v25371_v2 }
 0x6de   :  { %17976 = vmatprep.mubr.f32.mxu1 %v25374_v53  ;;  %19520 = vmatpush3.bf16.msra.mxu1 %v19517_v26  ;;  %v13602_v26 = vld [vmem:[%s28312_s5 + $0x898] sm:$0xff] }
 0x6df   :  { %19522 = vmatprep.subr.bf16.mxu1 %v19521_v21  ;;  %v19525_v1 = vpack.c.bf16 %v13602_v26, %v13601_v5  ;;  %v13606_v5 = vld [vmem:[%s28312_s5 + $0x8b8] sm:$0xff]  ;;  %v13608_v26 = vld [vmem:[%s28312_s5 + $0x8c8] sm:$0xff] }
 0x6e1   :  { %17977 = vmatmul.mubr.f32.gmra.mrb[16].mxu1 %v25377_v35 }
 0x6e2   :  { %17979 = vmatprep.mubr.f32.mxu1 %v25380_v28 }
 0x6e5   :  { %17980 = vmatmul.mubr.f32.gmra.mrb[18].mxu1 %v25383_v51 }
 0x6e6   :  { %17982 = vmatprep.mubr.f32.mxu1 %v7765_v19  ;;  %v13604_v19 = vld [vmem:[%s28312_s5 + $0x8a8] sm:$0xff] }
 0x6e9   :  { %17983 = vmatmul.mubr.f32.gmra.mrb[20].mxu1 %v7766_v60  ;;  %v19529_v60 = vpack.c.bf16 %v13604_v19, %v13603_v16  ;;  %v13610_v19 = vld [vmem:[%s28312_s5 + $0x8d8] sm:$0xff] }
 0x6ea   :  { %17985 = vmatprep.mubr.f32.mxu1 %v25386_v49 }
 0x6ed   :  { %17986 = vmatmul.mubr.f32.gmra.mrb[22].mxu1 %v25389_v57 }
 0x6ee   :  { %17988 = vmatprep.mubr.f32.mxu1 %v25392_v14 }
 0x6f1   :  { %17989 = vmatmul.mubr.f32.gmra.mrb[24].mxu1 %v25395_v23 }
 0x6f2   :  { %17991 = vmatprep.mubr.f32.mxu1 %v25398_v62 }
 0x6f5   :  { %17992 = vmatmul.mubr.f32.gmra.mrb[26].mxu1 %v25401_v6 }
 0x6f6   :  { %17994 = vmatprep.mubr.f32.mxu1 %v25404_v41 }
 0x6f9   :  { %17995 = vmatmul.mubr.f32.gmra.mrb[28].mxu1 %v25407_v61 }
 0x6fa   :  { %17997 = vmatprep.mubr.f32.mxu1 %v25410_v38 }
 0x6fd   :  { %17998 = vmatmul.mubr.f32.gmra.mrb[30].mxu1 %v25413_v31 }
 0x6fe   :  { %18000 = vmatprep.mubr.f32.mxu1 %v25416_v15 }
 0x701   :  { %18001 = vmatmul.mubr.f32.gmra.mrb[32].mxu1 %v25419_v39 }
 0x702   :  { %18003 = vmatprep.mubr.f32.mxu1 %v25422_v55 }
 0x705   :  { %18004 = vmatmul.mubr.f32.gmra.mrb[34].mxu1 %v25425_v18 }
 0x706   :  { %18006 = vmatprep.mubr.f32.mxu1 %v25428_v59 }
 0x709   :  { %18007 = vmatmul.mubr.f32.gmra.mrb[36].mxu1 %v25431_v3 }
 0x70a   :  { %18009 = vmatprep.mubr.f32.mxu1 %v25434_v22 }
 0x70d   :  { %18010 = vmatmul.mubr.f32.gmra.mrb[38].mxu1 %v25437_v42 }
 0x70e   :  { %18044 = vmatprep.mubr.f32.mxu1 %v25296_v54  ;;  %v13605_v54 = vld [vmem:[%s28312_s5 + $0x8b0] sm:$0xff] }
 0x711   :  { %18045 = vmatmul.mubr.f32.vlgmr.msra.gmra.mrb[0].mxu1 %v25299_v10  ;;  %v19533_v10 = vpack.c.bf16 %v13606_v5, %v13605_v54  ;;  %v13612_v5 = vld [vmem:[%s28312_s5 + $0x8e8] sm:$0xff] }
 0x712   :  { %18047 = vmatprep.mubr.f32.mxu1 %v25308_v7  ;;  %19524 = vmatpush3.bf16.msra.mxu1 %v19521_v21  ;;  %v13607_v21 = vld [vmem:[%s28312_s5 + $0x8c0] sm:$0xff] }
 0x713   :  { %19526 = vmatprep.subr.bf16.mxu1 %v19525_v1  ;;  %v19537_v16 = vpack.c.bf16 %v13608_v26, %v13607_v21  ;;  %v13614_v26 = vld [vmem:[%s28312_s5 + $0x8f8] sm:$0xff] }
 0x715   :  { %18048 = vmatmul.mubr.f32.gmra.mrb[2].mxu1 %v25311_v63 }
 0x716   :  { %18050 = vmatprep.mubr.f32.mxu1 %v25320_v29  ;;  %19528 = vmatpush3.bf16.msra.mxu1 %v19525_v1  ;;  %v13609_v1 = vld [vmem:[%s28312_s5 + $0x8d0] sm:$0xff] }
 0x717   :  { %19530 = vmatprep.subr.bf16.mxu1 %v19529_v60  ;;  %v19541_v54 = vpack.c.bf16 %v13610_v19, %v13609_v1  ;;  %v13616_v19 = vld [vmem:[%s28312_s5 + $0x908] sm:$0xff] }
 0x719   :  { %18051 = vmatmul.mubr.f32.gmra.mrb[4].mxu1 %v25323_v30 }
 0x71a   :  { %18053 = vmatprep.mubr.f32.mxu1 %v25332_v34  ;;  %19532 = vmatpush3.bf16.msra.mxu1 %v19529_v60  ;;  %v13611_v60 = vld [vmem:[%s28312_s5 + $0x8e0] sm:$0xff] }
 0x71b   :  { %19534 = vmatprep.subr.bf16.mxu1 %v19533_v10  ;;  %v19545_v21 = vpack.c.bf16 %v13612_v5, %v13611_v60  ;;  %v25509_v5 = vld [vmem:[#allocation2 + $0xfb] sm:$0xff] }
 0x71d   :  { %18054 = vmatmul.mubr.f32.gmra.mrb[6].mxu1 %v25335_v48 }
 0x71e   :  { %18056 = vmatprep.mubr.f32.mxu1 %v25344_v36  ;;  %19536 = vmatpush3.bf16.msra.mxu1 %v19533_v10  ;;  %v13613_v10 = vld [vmem:[%s28312_s5 + $0x8f0] sm:$0xff] }
 0x71f   :  { %19538 = vmatprep.subr.bf16.mxu1 %v19537_v16  ;;  %v19549_v1 = vpack.c.bf16 %v13614_v26, %v13613_v10  ;;  %v13618_v10 = vld [vmem:[%s28312_s5 + $0x918] sm:$0xff] }
 0x721   :  { %18057 = vmatmul.mubr.f32.gmra.mrb[8].mxu1 %v25347_v24 }
 0x722   :  { %18059 = vmatprep.mubr.f32.mxu1 %v25356_v11  ;;  %19540 = vmatpush3.bf16.msra.mxu1 %v19537_v16  ;;  %v13615_v16 = vld [vmem:[%s28312_s5 + $0x900] sm:$0xff] }
 0x723   :  { %19542 = vmatprep.subr.bf16.mxu1 %v19541_v54  ;;  %v19553_v60 = vpack.c.bf16 %v13616_v19, %v13615_v16  ;;  %v13620_v16 = vld [vmem:[%s28312_s5 + $0x928] sm:$0xff] }
 0x725   :  { %18060 = vmatmul.mubr.f32.gmra.mrb[10].mxu1 %v25359_v27 }
 0x726   :  { %18062 = vmatprep.mubr.f32.mxu1 %v25368_v37  ;;  %19544 = vmatpush3.bf16.msra.mxu1 %v19541_v54  ;;  %v25506_v54 = vld [vmem:[#allocation2 + $0xf3] sm:$0xff] }
 0x727   :  { %19546 = vmatprep.subr.bf16.mxu1 %v19545_v21 }
 0x729   :  { %18063 = vmatmul.mubr.f32.gmra.mrb[12].mxu1 %v25371_v2 }
 0x72a   :  { %18065 = vmatprep.mubr.f32.mxu1 %v25374_v53  ;;  %19548 = vmatpush3.bf16.msra.mxu1 %v19545_v21  ;;  %v13617_v21 = vld [vmem:[%s28312_s5 + $0x910] sm:$0xff] }
 0x72b   :  { %19550 = vmatprep.subr.bf16.mxu1 %v19549_v1  ;;  %v19557_v26 = vpack.c.bf16 %v13618_v10, %v13617_v21  ;;  %v13622_v21 = vld [vmem:[%s28312_s5 + $0x938] sm:$0xff]  ;;  %v13624_v10 = vld [vmem:[%s28312_s5 + $0x948] sm:$0xff] }
 0x72d   :  { %18066 = vmatmul.mubr.f32.gmra.mrb[14].mxu1 %v25377_v35 }
 0x72e   :  { %18068 = vmatprep.mubr.f32.mxu1 %v25380_v28  ;;  %19552 = vmatpush3.bf16.msra.mxu1 %v19549_v1  ;;  %v13619_v1 = vld [vmem:[%s28312_s5 + $0x920] sm:$0xff] }
 0x72f   :  { %19554 = vmatprep.subr.bf16.mxu1 %v19553_v60  ;;  %v19561_v19 = vpack.c.bf16 %v13620_v16, %v13619_v1  ;;  %v13626_v16 = vld [vmem:[%s28312_s5 + $0x958] sm:$0xff] }
 0x731   :  { %18069 = vmatmul.mubr.f32.gmra.mrb[16].mxu1 %v25383_v51 }
 0x732   :  { %18071 = vmatprep.mubr.f32.mxu1 %v25506_v54 }
 0x735   :  { %18072 = vmatmul.mubr.f32.gmra.mrb[18].mxu1 %v25509_v5 }
 0x736   :  { %18074 = vmatprep.mubr.f32.mxu1 %v25386_v49  ;;  %v25530_v49 = vld [vmem:[#allocation2 + $0x243] sm:$0xff] }
 0x739   :  { %18075 = vmatmul.mubr.f32.gmra.mrb[20].mxu1 %v25389_v57  ;;  %v25533_v57 = vld [vmem:[#allocation2 + $0x24b] sm:$0xff] }
 0x73a   :  { %18077 = vmatprep.mubr.f32.mxu1 %v25392_v14 }
 0x73d   :  { %18078 = vmatmul.mubr.f32.gmra.mrb[22].mxu1 %v25395_v23 }
 0x73e   :  { %18080 = vmatprep.mubr.f32.mxu1 %v25398_v62 }
 0x741   :  { %18081 = vmatmul.mubr.f32.gmra.mrb[24].mxu1 %v25401_v6 }
 0x742   :  { %18083 = vmatprep.mubr.f32.mxu1 %v25404_v41 }
 0x745   :  { %18084 = vmatmul.mubr.f32.gmra.mrb[26].mxu1 %v25407_v61 }
 0x746   :  { %18086 = vmatprep.mubr.f32.mxu1 %v25410_v38 }
 0x749   :  { %18087 = vmatmul.mubr.f32.gmra.mrb[28].mxu1 %v25413_v31 }
 0x74a   :  { %18089 = vmatprep.mubr.f32.mxu1 %v25416_v15 }
 0x74d   :  { %18090 = vmatmul.mubr.f32.gmra.mrb[30].mxu1 %v25419_v39 }
 0x74e   :  { %18092 = vmatprep.mubr.f32.mxu1 %v25422_v55 }
 0x751   :  { %18093 = vmatmul.mubr.f32.gmra.mrb[32].mxu1 %v25425_v18 }
 0x752   :  { %18095 = vmatprep.mubr.f32.mxu1 %v25428_v59 }
 0x755   :  { %18096 = vmatmul.mubr.f32.gmra.mrb[34].mxu1 %v25431_v3 }
 0x756   :  { %18098 = vmatprep.mubr.f32.mxu1 %v25434_v22 }
 0x759   :  { %18099 = vmatmul.mubr.f32.gmra.mrb[36].mxu1 %v25437_v42 }
 0x75a   :  { %18101 = vmatprep.mubr.f32.mxu1 %v25530_v49 }
 0x75d   :  { %18102 = vmatmul.mubr.f32.gmra.mrb[38].mxu1 %v25533_v57 }
 0x75e   :  { %18136 = vmatprep.mubr.f32.mxu1 %v25308_v7  ;;  %v13621_v7 = vld [vmem:[%s28312_s5 + $0x930] sm:$0xff] }
 0x761   :  { %18137 = vmatmul.mubr.f32.vlgmr.msra.gmra.mrb[0].mxu1 %v25311_v63  ;;  %v19565_v63 = vpack.c.bf16 %v13622_v21, %v13621_v7  ;;  %v13628_v21 = vld [vmem:[%s28312_s5 + $0x968] sm:$0xff] }
 0x762   :  { %18139 = vmatprep.mubr.f32.mxu1 %v25320_v29  ;;  %19556 = vmatpush3.bf16.msra.mxu1 %v19553_v60  ;;  %v13623_v60 = vld [vmem:[%s28312_s5 + $0x940] sm:$0xff] }
 0x763   :  { %19558 = vmatprep.subr.bf16.mxu1 %v19557_v26  ;;  %v19569_v1 = vpack.c.bf16 %v13624_v10, %v13623_v60  ;;  %v13630_v10 = vld [vmem:[%s28312_s5 + $0x978] sm:$0xff] }
 0x765   :  { %18140 = vmatmul.mubr.f32.gmra.mrb[2].mxu1 %v25323_v30 }
 0x766   :  { %18142 = vmatprep.mubr.f32.mxu1 %v25332_v34  ;;  %19560 = vmatpush3.bf16.msra.mxu1 %v19557_v26  ;;  %v13625_v26 = vld [vmem:[%s28312_s5 + $0x950] sm:$0xff] }
 0x767   :  { %19562 = vmatprep.subr.bf16.mxu1 %v19561_v19  ;;  %v19573_v7 = vpack.c.bf16 %v13626_v16, %v13625_v26  ;;  %v13632_v16 = vld [vmem:[%s28312_s5 + $0x988] sm:$0xff] }
 0x769   :  { %18143 = vmatmul.mubr.f32.gmra.mrb[4].mxu1 %v25335_v48 }
 0x76a   :  { %18145 = vmatprep.mubr.f32.mxu1 %v25344_v36  ;;  %19564 = vmatpush3.bf16.msra.mxu1 %v19561_v19  ;;  %v13627_v19 = vld [vmem:[%s28312_s5 + $0x960] sm:$0xff] }
 0x76b   :  { %19566 = vmatprep.subr.bf16.mxu1 %v19565_v63  ;;  %v19577_v60 = vpack.c.bf16 %v13628_v21, %v13627_v19  ;;  %v25605_v21 = vld [vmem:[#allocation2 + $0x113] sm:$0xff] }
 0x76d   :  { %18146 = vmatmul.mubr.f32.gmra.mrb[6].mxu1 %v25347_v24 }
 0x76e   :  { %18148 = vmatprep.mubr.f32.mxu1 %v25356_v11  ;;  %19568 = vmatpush3.bf16.msra.mxu1 %v19565_v63  ;;  %v13629_v63 = vld [vmem:[%s28312_s5 + $0x970] sm:$0xff] }
 0x76f   :  { %19570 = vmatprep.subr.bf16.mxu1 %v19569_v1  ;;  %v19581_v26 = vpack.c.bf16 %v13630_v10, %v13629_v63  ;;  %v13634_v63 = vld [vmem:[%s28312_s5 + $0x998] sm:$0xff] }
 0x771   :  { %18149 = vmatmul.mubr.f32.gmra.mrb[8].mxu1 %v25359_v27 }
 0x772   :  { %18151 = vmatprep.mubr.f32.mxu1 %v25368_v37  ;;  %19572 = vmatpush3.bf16.msra.mxu1 %v19569_v1  ;;  %v13631_v1 = vld [vmem:[%s28312_s5 + $0x980] sm:$0xff] }
 0x773   :  { %19574 = vmatprep.subr.bf16.mxu1 %v19573_v7  ;;  %v19585_v19 = vpack.c.bf16 %v13632_v16, %v13631_v1  ;;  %v13636_v1 = vld [vmem:[%s28312_s5 + $0x9a8] sm:$0xff] }
 0x775   :  { %18152 = vmatmul.mubr.f32.gmra.mrb[10].mxu1 %v25371_v2 }
 0x776   :  { %18154 = vmatprep.mubr.f32.mxu1 %v25374_v53  ;;  %19576 = vmatpush3.bf16.msra.mxu1 %v19573_v7  ;;  %v25602_v7 = vld [vmem:[#allocation2 + $0x10b] sm:$0xff] }
 0x777   :  { %19578 = vmatprep.subr.bf16.mxu1 %v19577_v60 }
 0x779   :  { %18155 = vmatmul.mubr.f32.gmra.mrb[12].mxu1 %v25377_v35 }
 0x77a   :  { %18157 = vmatprep.mubr.f32.mxu1 %v25380_v28  ;;  %19580 = vmatpush3.bf16.msra.mxu1 %v19577_v60  ;;  %v13633_v60 = vld [vmem:[%s28312_s5 + $0x990] sm:$0xff] }
 0x77b   :  { %19582 = vmatprep.subr.bf16.mxu1 %v19581_v26  ;;  %v19589_v10 = vpack.c.bf16 %v13634_v63, %v13633_v60  ;;  %v13638_v60 = vld [vmem:[%s28312_s5 + $0x9b8] sm:$0xff]  ;;  %v13640_v63 = vld [vmem:[%s28312_s5 + $0x9c8] sm:$0xff] }
 0x77d   :  { %18158 = vmatmul.mubr.f32.gmra.mrb[14].mxu1 %v25383_v51 }
 0x77e   :  { %18160 = vmatprep.mubr.f32.mxu1 %v25506_v54  ;;  %19584 = vmatpush3.bf16.msra.mxu1 %v19581_v26  ;;  %v13635_v26 = vld [vmem:[%s28312_s5 + $0x9a0] sm:$0xff] }
 0x77f   :  { %19586 = vmatprep.subr.bf16.mxu1 %v19585_v19  ;;  %v19593_v16 = vpack.c.bf16 %v13636_v1, %v13635_v26  ;;  %v13642_v1 = vld [vmem:[%s28312_s5 + $0x9d8] sm:$0xff] }
 0x781   :  { %18161 = vmatmul.mubr.f32.gmra.mrb[16].mxu1 %v25509_v5 }
 0x782   :  { %18163 = vmatprep.mubr.f32.mxu1 %v25602_v7 }
 0x785   :  { %18164 = vmatmul.mubr.f32.gmra.mrb[18].mxu1 %v25605_v21 }
 0x786   :  { %18166 = vmatprep.mubr.f32.mxu1 %v25392_v14  ;;  %v25626_v14 = vld [vmem:[#allocation2 + $0x25b] sm:$0xff] }
 0x789   :  { %18167 = vmatmul.mubr.f32.gmra.mrb[20].mxu1 %v25395_v23  ;;  %v25629_v23 = vld [vmem:[#allocation2 + $0x263] sm:$0xff] }
 0x78a   :  { %18169 = vmatprep.mubr.f32.mxu1 %v25398_v62 }
 0x78d   :  { %18170 = vmatmul.mubr.f32.gmra.mrb[22].mxu1 %v25401_v6 }
 0x78e   :  { %18172 = vmatprep.mubr.f32.mxu1 %v25404_v41 }
 0x791   :  { %18173 = vmatmul.mubr.f32.gmra.mrb[24].mxu1 %v25407_v61 }
 0x792   :  { %18175 = vmatprep.mubr.f32.mxu1 %v25410_v38 }
 0x795   :  { %18176 = vmatmul.mubr.f32.gmra.mrb[26].mxu1 %v25413_v31 }
 0x796   :  { %18178 = vmatprep.mubr.f32.mxu1 %v25416_v15 }
 0x799   :  { %18179 = vmatmul.mubr.f32.gmra.mrb[28].mxu1 %v25419_v39 }
 0x79a   :  { %18181 = vmatprep.mubr.f32.mxu1 %v25422_v55 }
 0x79d   :  { %18182 = vmatmul.mubr.f32.gmra.mrb[30].mxu1 %v25425_v18 }
 0x79e   :  { %18184 = vmatprep.mubr.f32.mxu1 %v25428_v59 }
 0x7a1   :  { %18185 = vmatmul.mubr.f32.gmra.mrb[32].mxu1 %v25431_v3 }
 0x7a2   :  { %18187 = vmatprep.mubr.f32.mxu1 %v25434_v22 }
 0x7a5   :  { %18188 = vmatmul.mubr.f32.gmra.mrb[34].mxu1 %v25437_v42 }
 0x7a6   :  { %18190 = vmatprep.mubr.f32.mxu1 %v25530_v49 }
 0x7a9   :  { %18191 = vmatmul.mubr.f32.gmra.mrb[36].mxu1 %v25533_v57 }
 0x7aa   :  { %18193 = vmatprep.mubr.f32.mxu1 %v25626_v14 }
 0x7ad   :  { %18194 = vmatmul.mubr.f32.gmra.mrb[38].mxu1 %v25629_v23 }
 0x7ae   :  { %18228 = vmatprep.mubr.f32.mxu1 %v25320_v29  ;;  %v13637_v29 = vld [vmem:[%s28312_s5 + $0x9b0] sm:$0xff] }
 0x7b1   :  { %18229 = vmatmul.mubr.f32.vlgmr.msra.gmra.mrb[0].mxu1 %v25323_v30  ;;  %v19597_v30 = vpack.c.bf16 %v13638_v60, %v13637_v29  ;;  %v13644_v60 = vld [vmem:[%s28312_s5 + $0x9e8] sm:$0xff] }
 0x7b2   :  { %18231 = vmatprep.mubr.f32.mxu1 %v25332_v34  ;;  %19588 = vmatpush3.bf16.msra.mxu1 %v19585_v19  ;;  %v13639_v19 = vld [vmem:[%s28312_s5 + $0x9c0] sm:$0xff] }
 0x7b3   :  { %19590 = vmatprep.subr.bf16.mxu1 %v19589_v10  ;;  %v19601_v26 = vpack.c.bf16 %v13640_v63, %v13639_v19  ;;  %v13646_v63 = vld [vmem:[%s28312_s5 + $0x9f8] sm:$0xff] }
 0x7b5   :  { %18232 = vmatmul.mubr.f32.gmra.mrb[2].mxu1 %v25335_v48 }
 0x7b6   :  { %18234 = vmatprep.mubr.f32.mxu1 %v25344_v36  ;;  %19592 = vmatpush3.bf16.msra.mxu1 %v19589_v10  ;;  %v13641_v10 = vld [vmem:[%s28312_s5 + $0x9d0] sm:$0xff] }
 0x7b7   :  { %19594 = vmatprep.subr.bf16.mxu1 %v19593_v16  ;;  %v19605_v29 = vpack.c.bf16 %v13642_v1, %v13641_v10  ;;  %v13648_v1 = vld [vmem:[%s28312_s5 + $0xa08] sm:$0xff] }
 0x7b9   :  { %18235 = vmatmul.mubr.f32.gmra.mrb[4].mxu1 %v25347_v24 }
 0x7ba   :  { %18237 = vmatprep.mubr.f32.mxu1 %v25356_v11  ;;  %19596 = vmatpush3.bf16.msra.mxu1 %v19593_v16  ;;  %v13643_v16 = vld [vmem:[%s28312_s5 + $0x9e0] sm:$0xff] }
 0x7bb   :  { %19598 = vmatprep.subr.bf16.mxu1 %v19597_v30  ;;  %v19609_v19 = vpack.c.bf16 %v13644_v60, %v13643_v16  ;;  %v25701_v60 = vld [vmem:[#allocation2 + $0x12b] sm:$0xff] }
 0x7bd   :  { %18238 = vmatmul.mubr.f32.gmra.mrb[6].mxu1 %v25359_v27 }
 0x7be   :  { %18240 = vmatprep.mubr.f32.mxu1 %v25368_v37  ;;  %19600 = vmatpush3.bf16.msra.mxu1 %v19597_v30  ;;  %v13645_v30 = vld [vmem:[%s28312_s5 + $0x9f0] sm:$0xff] }
 0x7bf   :  { %19602 = vmatprep.subr.bf16.mxu1 %v19601_v26  ;;  %v19613_v10 = vpack.c.bf16 %v13646_v63, %v13645_v30  ;;  %v13650_v30 = vld [vmem:[%s28312_s5 + $0xa18] sm:$0xff] }
 0x7c1   :  { %18241 = vmatmul.mubr.f32.gmra.mrb[8].mxu1 %v25371_v2 }
 0x7c2   :  { %18243 = vmatprep.mubr.f32.mxu1 %v25374_v53  ;;  %19604 = vmatpush3.bf16.msra.mxu1 %v19601_v26  ;;  %v13647_v26 = vld [vmem:[%s28312_s5 + $0xa00] sm:$0xff] }
 0x7c3   :  { %19606 = vmatprep.subr.bf16.mxu1 %v19605_v29  ;;  %v19617_v16 = vpack.c.bf16 %v13648_v1, %v13647_v26  ;;  %v13652_v26 = vld [vmem:[%s28312_s5 + $0xa28] sm:$0xff] }
 0x7c5   :  { %18244 = vmatmul.mubr.f32.gmra.mrb[10].mxu1 %v25377_v35 }
 0x7c6   :  { %18246 = vmatprep.mubr.f32.mxu1 %v25380_v28  ;;  %19608 = vmatpush3.bf16.msra.mxu1 %v19605_v29  ;;  %v25698_v29 = vld [vmem:[#allocation2 + $0x123] sm:$0xff] }
 0x7c7   :  { %19610 = vmatprep.subr.bf16.mxu1 %v19609_v19 }
 0x7c9   :  { %18247 = vmatmul.mubr.f32.gmra.mrb[12].mxu1 %v25383_v51 }
 0x7ca   :  { %18249 = vmatprep.mubr.f32.mxu1 %v25506_v54  ;;  %19612 = vmatpush3.bf16.msra.mxu1 %v19609_v19  ;;  %v13649_v19 = vld [vmem:[%s28312_s5 + $0xa10] sm:$0xff] }
 0x7cb   :  { %19614 = vmatprep.subr.bf16.mxu1 %v19613_v10  ;;  %v19621_v63 = vpack.c.bf16 %v13650_v30, %v13649_v19  ;;  %v13654_v19 = vld [vmem:[%s28312_s5 + $0xa38] sm:$0xff] }
 0x7cc   :  { %v13658_v30 = vld [vmem:[%s28312_s5 + $0xa58] sm:$0xff] }
 0x7cd   :  { %18250 = vmatmul.mubr.f32.gmra.mrb[14].mxu1 %v25509_v5 }
 0x7ce   :  { %18252 = vmatprep.mubr.f32.mxu1 %v25602_v7  ;;  %19616 = vmatpush3.bf16.msra.mxu1 %v19613_v10  ;;  %v13651_v10 = vld [vmem:[%s28312_s5 + $0xa20] sm:$0xff] }
 0x7cf   :  { %19618 = vmatprep.subr.bf16.mxu1 %v19617_v16  ;;  %v19625_v1 = vpack.c.bf16 %v13652_v26, %v13651_v10  ;;  %v13662_v10 = vld [vmem:[%s28312_s5 + $0xa78] sm:$0xff]  ;;  %v13664_v26 = vld [vmem:[%s28312_s5 + $0xa88] sm:$0xff] }
 0x7d1   :  { %18253 = vmatmul.mubr.f32.gmra.mrb[16].mxu1 %v25605_v21 }
 0x7d2   :  { %18255 = vmatprep.mubr.f32.mxu1 %v25698_v29 }
 0x7d5   :  { %18256 = vmatmul.mubr.f32.gmra.mrb[18].mxu1 %v25701_v60 }
 0x7d6   :  { %18258 = vmatprep.mubr.f32.mxu1 %v25398_v62  ;;  %v25722_v62 = vld [vmem:[#allocation2 + $0x273] sm:$0xff] }
 0x7d9   :  { %18259 = vmatmul.mubr.f32.gmra.mrb[20].mxu1 %v25401_v6  ;;  %v25725_v6 = vld [vmem:[#allocation2 + $0x27b] sm:$0xff] }
 0x7da   :  { %18261 = vmatprep.mubr.f32.mxu1 %v25404_v41 }
 0x7dd   :  { %18262 = vmatmul.mubr.f32.gmra.mrb[22].mxu1 %v25407_v61 }
 0x7de   :  { %18264 = vmatprep.mubr.f32.mxu1 %v25410_v38 }
 0x7e1   :  { %18265 = vmatmul.mubr.f32.gmra.mrb[24].mxu1 %v25413_v31 }
 0x7e2   :  { %18267 = vmatprep.mubr.f32.mxu1 %v25416_v15 }
 0x7e5   :  { %18268 = vmatmul.mubr.f32.gmra.mrb[26].mxu1 %v25419_v39 }
 0x7e6   :  { %18270 = vmatprep.mubr.f32.mxu1 %v25422_v55 }
 0x7e9   :  { %18271 = vmatmul.mubr.f32.gmra.mrb[28].mxu1 %v25425_v18 }
 0x7ea   :  { %18273 = vmatprep.mubr.f32.mxu1 %v25428_v59 }
 0x7ed   :  { %18274 = vmatmul.mubr.f32.gmra.mrb[30].mxu1 %v25431_v3 }
 0x7ee   :  { %18276 = vmatprep.mubr.f32.mxu1 %v25434_v22 }
 0x7f1   :  { %18277 = vmatmul.mubr.f32.gmra.mrb[32].mxu1 %v25437_v42 }
 0x7f2   :  { %18279 = vmatprep.mubr.f32.mxu1 %v25530_v49 }
 0x7f5   :  { %18280 = vmatmul.mubr.f32.gmra.mrb[34].mxu1 %v25533_v57 }
 0x7f6   :  { %18282 = vmatprep.mubr.f32.mxu1 %v25626_v14 }
 0x7f9   :  { %18283 = vmatmul.mubr.f32.gmra.mrb[36].mxu1 %v25629_v23 }
 0x7fa   :  { %18285 = vmatprep.mubr.f32.mxu1 %v25722_v62 }
 0x7fd   :  { %18286 = vmatmul.mubr.f32.gmra.mrb[38].mxu1 %v25725_v6 }
 0x7fe   :  { %18320 = vmatprep.mubr.f32.mxu1 %v25332_v34  ;;  %v13653_v34 = vld [vmem:[%s28312_s5 + $0xa30] sm:$0xff] }
 0x801   :  { %18321 = vmatmul.mubr.f32.vlgmr.msra.gmra.mrb[0].mxu1 %v25335_v48  ;;  %v19629_v48 = vpack.c.bf16 %v13654_v19, %v13653_v34  ;;  %v13674_v34 = vld [vmem:[%s28312_s5 + $0xad8] sm:$0xff]  ;;  %v25860_v19 = vld [vmem:[#allocation2 + $0x64] sm:$0xff] }
 0x802   :  { %18323 = vmatprep.mubr.f32.mxu1 %v25344_v36  ;;  %19620 = vmatpush3.bf16.msra.mxu1 %v19617_v16  ;;  %v13655_v36 = vld [vmem:[%s28312_s5 + $0xa40] sm:$0xff]  ;;  %v13656_v16 = vld [vmem:[%s28312_s5 + $0xa48] sm:$0xff] }
 0x803   :  { %19622 = vmatprep.subr.bf16.mxu1 %v19621_v63 }
 0x805   :  { %18324 = vmatmul.mubr.f32.gmra.mrb[2].mxu1 %v25347_v24  ;;  %v19633_v24 = vpack.c.bf16 %v13656_v16, %v13655_v36  ;;  %v25863_v36 = vld [vmem:[#allocation2 + $0x6c] sm:$0xff]  ;;  %v13675_v16 = vld [vmem:[%s28312_s5 + $0xae0] sm:$0xff] }
 0x806   :  { %18326 = vmatprep.mubr.f32.mxu1 %v25356_v11  ;;  %19624 = vmatpush3.bf16.msra.mxu1 %v19621_v63  ;;  %v13657_v11 = vld [vmem:[%s28312_s5 + $0xa50] sm:$0xff]  ;;  %v13660_v63 = vld [vmem:[%s28312_s5 + $0xa68] sm:$0xff] }
 0x807   :  { %19626 = vmatprep.subr.bf16.mxu1 %v19625_v1 }
 0x809   :  { %18327 = vmatmul.mubr.f32.gmra.mrb[4].mxu1 %v25359_v27  ;;  %v19637_v27 = vpack.c.bf16 %v13658_v30, %v13657_v11  ;;  %v25872_v11 = vld [vmem:[#allocation2 + $0x7c] sm:$0xff] }
 0x80a   :  { %18329 = vmatprep.mubr.f32.mxu1 %v25368_v37  ;;  %19628 = vmatpush3.bf16.msra.mxu1 %v19625_v1  ;;  %v13659_v37 = vld [vmem:[%s28312_s5 + $0xa60] sm:$0xff] }
 0x80b   :  { %19630 = vmatprep.subr.bf16.mxu1 %v19629_v48  ;;  %v7764_v1 = vld [vmem:[#allocation2 + $0x143] sm:$0xff] }
 0x80d   :  { %18330 = vmatmul.mubr.f32.gmra.mrb[6].mxu1 %v25371_v2  ;;  %v19641_v2 = vpack.c.bf16 %v13660_v63, %v13659_v37  ;;  %v13677_v37 = vld [vmem:[%s28312_s5 + $0xaf0] sm:$0xff]  ;;  %v13678_v63 = vld [vmem:[%s28312_s5 + $0xaf8] sm:$0xff] }
 0x80e   :  { %18332 = vmatprep.mubr.f32.mxu1 %v25374_v53  ;;  %19632 = vmatpush3.bf16.msra.mxu1 %v19629_v48  ;;  %v13661_v53 = vld [vmem:[%s28312_s5 + $0xa70] sm:$0xff] }
 0x80f   :  { %19634 = vmatprep.subr.bf16.mxu1 %v19633_v24 }
 0x811   :  { %18333 = vmatmul.mubr.f32.gmra.mrb[8].mxu1 %v25377_v35  ;;  %v19645_v35 = vpack.c.bf16 %v13662_v10, %v13661_v53  ;;  %v19677_v53 = vpack.c.bf16 %v13678_v63, %v13677_v37  ;;  %v25887_v10 = vld [vmem:[#allocation2 + $0x9c] sm:$0xff]  ;;  %v25965_v37 = vld [vmem:[#allocation2 + $0x234] sm:$0xff] }
 0x812   :  { %18335 = vmatprep.mubr.f32.mxu1 %v25380_v28  ;;  %19636 = vmatpush3.bf16.msra.mxu1 %v19633_v24  ;;  %v13663_v28 = vld [vmem:[%s28312_s5 + $0xa80] sm:$0xff]  ;;  %v13676_v24 = vld [vmem:[%s28312_s5 + $0xae8] sm:$0xff]  ;;  %v13681_v63 = vld [vmem:[%s28312_s5 + $0xb10] sm:$0xff] }
 0x813   :  { %19638 = vmatprep.subr.bf16.mxu1 %v19637_v27  ;;  %v19673_v30 = vpack.c.bf16 %v13676_v24, %v13675_v16  ;;  %v25956_v16 = vld [vmem:[#allocation2 + $0x214] sm:$0xff]  ;;  %v25959_v24 = vld [vmem:[#allocation2 + $0x21c] sm:$0xff] }
 0x815   :  { %18336 = vmatmul.mubr.f32.gmra.mrb[10].mxu1 %v25383_v51  ;;  %v19649_v51 = vpack.c.bf16 %v13664_v26, %v13663_v28  ;;  %v13680_v28 = vld [vmem:[%s28312_s5 + $0xb08] sm:$0xff] }
 0x816   :  { %18338 = vmatprep.mubr.f32.mxu1 %v25506_v54  ;;  %19640 = vmatpush3.bf16.msra.mxu1 %v19637_v27  ;;  %v7763_v54 = vld [vmem:[#allocation2 + $0x13b] sm:$0xff]  ;;  %v25875_v27 = vld [vmem:[#allocation2 + $0x84] sm:$0xff]  ;;  %v25896_v26 = vld [vmem:[#allocation2 + $0xac] sm:$0xff] }
 0x817   :  { %19642 = vmatprep.subr.bf16.mxu1 %v19641_v2 }
 0x819   :  { %18339 = vmatmul.mubr.f32.gmra.mrb[12].mxu1 %v25509_v5  ;;  %v13669_v5 = vld [vmem:[%s28312_s5 + $0xab0] sm:$0xff] }
 0x81a   :  { %18341 = vmatprep.mubr.f32.mxu1 %v25602_v7  ;;  %19644 = vmatpush3.bf16.msra.mxu1 %v19641_v2  ;;  %v25884_v2 = vld [vmem:[#allocation2 + $0x94] sm:$0xff] }
 0x81b   :  { %19646 = vmatprep.subr.bf16.mxu1 %v19645_v35 }
 0x81d   :  { %18342 = vmatmul.mubr.f32.gmra.mrb[14].mxu1 %v25605_v21  ;;  %v25839_v21 = vld [vmem:[#allocation2 + $0x3c] sm:$0xff] }
 0x81e   :  { %18344 = vmatprep.mubr.f32.mxu1 %v25698_v29  ;;  %19648 = vmatpush3.bf16.msra.mxu1 %v19645_v35  ;;  %v25848_v29 = vld [vmem:[#allocation2 + $0x4c] sm:$0xff]  ;;  %v13679_v35 = vld [vmem:[%s28312_s5 + $0xb00] sm:$0xff] }
 0x81f   :  { %19650 = vmatprep.subr.bf16.mxu1 %v19649_v51 }
 0x821   :  { %18345 = vmatmul.mubr.f32.gmra.mrb[16].mxu1 %v25701_v60 }
 0x822   :  { %18347 = vmatprep.mubr.f32.mxu1 %v7763_v54  ;;  %v25899_v54 = vld [vmem:[#allocation2 + $0xb4] sm:$0xff] }
 0x825   :  { %18348 = vmatmul.mubr.f32.gmra.mrb[18].mxu1 %v7764_v1  ;;  %v25902_v1 = vld [vmem:[#allocation2 + $0xc4] sm:$0xff] }
 0x826   :  { %18350 = vmatprep.mubr.f32.mxu1 %v25404_v41  ;;  %v7791_v41 = vld [vmem:[#allocation2 + $0x28b] sm:$0xff] }
 0x829   :  { %18351 = vmatmul.mubr.f32.gmra.mrb[20].mxu1 %v25407_v61  ;;  %v7792_v61 = vld [vmem:[#allocation2 + $0x293] sm:$0xff] }
 0x82a   :  { %18353 = vmatprep.mubr.f32.mxu1 %v25410_v38  ;;  %v13665_v38 = vld [vmem:[%s28312_s5 + $0xa90] sm:$0xff] }
 0x82d   :  { %18354 = vmatmul.mubr.f32.gmra.mrb[22].mxu1 %v25413_v31  ;;  %v13666_v31 = vld [vmem:[%s28312_s5 + $0xa98] sm:$0xff] }
 0x82e   :  { %18356 = vmatprep.mubr.f32.mxu1 %v25416_v15  ;;  %v9403_v15 = vld [vmem:[#allocation2 + $0x4] sm:$0xff] }
 0x831   :  { %18357 = vmatmul.mubr.f32.gmra.mrb[24].mxu1 %v25419_v39  ;;  %v19653_v39 = vpack.c.bf16 %v13666_v31, %v13665_v38  ;;  %v25911_v38 = vld [vmem:[#allocation2 + $0xe4] sm:$0xff]  ;;  %v9431_v31 = vld [vmem:[#allocation2 + $0x154] sm:$0xff] }
 0x832   :  { %18359 = vmatprep.mubr.f32.mxu1 %v25422_v55  ;;  %v9404_v55 = vld [vmem:[#allocation2 + $0xc] sm:$0xff] }
 0x835   :  { %18360 = vmatmul.mubr.f32.gmra.mrb[26].mxu1 %v25425_v18  ;;  %v13667_v18 = vld [vmem:[%s28312_s5 + $0xaa0] sm:$0xff] }
 0x836   :  { %18362 = vmatprep.mubr.f32.mxu1 %v25428_v59  ;;  %v13668_v59 = vld [vmem:[%s28312_s5 + $0xaa8] sm:$0xff] }
 0x839   :  { %18363 = vmatmul.mubr.f32.gmra.mrb[28].mxu1 %v25431_v3  ;;  %v25824_v3 = vld [vmem:[#allocation2 + $0x1c] sm:$0xff] }
 0x83a   :  { %18365 = vmatprep.mubr.f32.mxu1 %v25434_v22  ;;  %v19657_v22 = vpack.c.bf16 %v13668_v59, %v13667_v18  ;;  %v25920_v18 = vld [vmem:[#allocation2 + $0x184] sm:$0xff]  ;;  %v25923_v59 = vld [vmem:[#allocation2 + $0x18c] sm:$0xff] }
 0x83d   :  { %18366 = vmatmul.mubr.f32.gmra.mrb[30].mxu1 %v25437_v42  ;;  %v25827_v42 = vld [vmem:[#allocation2 + $0x24] sm:$0xff] }
 0x83e   :  { %18368 = vmatprep.mubr.f32.mxu1 %v25530_v49  ;;  %v13670_v49 = vld [vmem:[%s28312_s5 + $0xab8] sm:$0xff] }
 0x83f   :  { %v19661_v7 = vpack.c.bf16 %v13670_v49, %v13669_v5  ;;  %v25929_v5 = vld [vmem:[#allocation2 + $0x1a4] sm:$0xff]  ;;  %v25932_v49 = vld [vmem:[#allocation2 + $0x1b4] sm:$0xff] }
 0x841   :  { %18369 = vmatmul.mubr.f32.gmra.mrb[32].mxu1 %v25533_v57  ;;  %v25836_v57 = vld [vmem:[#allocation2 + $0x34] sm:$0xff] }
 0x842   :  { %18371 = vmatprep.mubr.f32.mxu1 %v25626_v14  ;;  %v13671_v14 = vld [vmem:[%s28312_s5 + $0xac0] sm:$0xff] }
 0x845   :  { %18372 = vmatmul.mubr.f32.gmra.mrb[34].mxu1 %v25629_v23  ;;  %v13672_v23 = vld [vmem:[%s28312_s5 + $0xac8] sm:$0xff] }
 0x846   :  { %18374 = vmatprep.mubr.f32.mxu1 %v25722_v62  ;;  %v19665_v60 = vpack.c.bf16 %v13672_v23, %v13671_v14  ;;  %v25851_v62 = vld [vmem:[#allocation2 + $0x54] sm:$0xff]  ;;  %v25938_v14 = vld [vmem:[#allocation2 + $0x1cc] sm:$0xff] }
 0x847   :  { %v25941_v23 = vld [vmem:[#allocation2 + $0x1d4] sm:$0xff] }
 0x849   :  { %18375 = vmatmul.mubr.f32.gmra.mrb[36].mxu1 %v25725_v6  ;;  %v13673_v6 = vld [vmem:[%s28312_s5 + $0xad0] sm:$0xff] }
 0x84a   :  { %18377 = vmatprep.mubr.f32.mxu1 %v7791_v41  ;;  %v19669_v48 = vpack.c.bf16 %v13674_v34, %v13673_v6  ;;  %v25905_v41 = vld [vmem:[#allocation2 + $0xcc] sm:$0xff]  ;;  %v25950_v34 = vld [vmem:[#allocation2 + $0x1fc] sm:$0xff] }
 0x84b   :  { %v25947_v6 = vld [vmem:[#allocation2 + $0x1ec] sm:$0xff] }
 0x84d   :  { %18378 = vmatmul.mubr.f32.gmra.mrb[38].mxu1 %v7792_v61  ;;  %v25908_v61 = vld [vmem:[#allocation2 + $0xdc] sm:$0xff] }
 0x84e   :  { %18412 = vmatprep.mubr.f32.mxu1 %v9403_v15  ;;  %v9432_v15 = vld [vmem:[#allocation2 + $0x15c] sm:$0xff] }
 0x851   :  { %18413 = vmatmul.mubr.f32.vlgmr.msra.gmra.mrb[0].mxu1 %v9404_v55  ;;  %v25917_v55 = vld [vmem:[#allocation2 + $0x174] sm:$0xff] }
 0x852   :  { %18415 = vmatprep.mubr.f32.mxu1 %v25824_v3  ;;  %19652 = vmatpush3.bf16.msra.mxu1 %v19649_v51  ;;  %v19681_v51 = vpack.c.bf16 %v13680_v28, %v13679_v35  ;;  %v13683_v28 = vld [vmem:[%s28312_s5 + $0xb20] sm:$0xff] }
 0x853   :  { %19654 = vmatprep.subr.bf16.mxu1 %v19653_v39 }
 0x855   :  { %18416 = vmatmul.mubr.f32.gmra.mrb[2].mxu1 %v25827_v42 }
 0x856   :  { %18418 = vmatprep.mubr.f32.mxu1 %v25836_v57  ;;  %19656 = vmatpush3.bf16.msra.mxu1 %v19653_v39  ;;  %v25914_v39 = vld [vmem:[#allocation2 + $0x16c] sm:$0xff] }
 0x857   :  { %19658 = vmatprep.subr.bf16.mxu1 %v19657_v22 }
 0x859   :  { %18419 = vmatmul.mubr.f32.gmra.mrb[4].mxu1 %v25839_v21 }
 0x85a   :  { %18421 = vmatprep.mubr.f32.mxu1 %v25848_v29  ;;  %19660 = vmatpush3.bf16.msra.mxu1 %v19657_v22  ;;  %v25926_v22 = vld [vmem:[#allocation2 + $0x19c] sm:$0xff] }
 0x85b   :  { %19662 = vmatprep.subr.bf16.mxu1 %v19661_v7 }
 0x85d   :  { %18422 = vmatmul.mubr.f32.gmra.mrb[6].mxu1 %v25851_v62 }
 0x85e   :  { %18424 = vmatprep.mubr.f32.mxu1 %v25860_v19  ;;  %19664 = vmatpush3.bf16.msra.mxu1 %v19661_v7  ;;  %v25935_v7 = vld [vmem:[#allocation2 + $0x1bc] sm:$0xff] }
 0x85f   :  { %19666 = vmatprep.subr.bf16.mxu1 %v19665_v60 }
 0x861   :  { %18425 = vmatmul.mubr.f32.gmra.mrb[8].mxu1 %v25863_v36 }
 0x862   :  { %18427 = vmatprep.mubr.f32.mxu1 %v25872_v11  ;;  %19668 = vmatpush3.bf16.msra.mxu1 %v19665_v60  ;;  %v25944_v60 = vld [vmem:[#allocation2 + $0x1e4] sm:$0xff] }
 0x863   :  { %19670 = vmatprep.subr.bf16.mxu1 %v19669_v48 }
 0x865   :  { %18428 = vmatmul.mubr.f32.gmra.mrb[10].mxu1 %v25875_v27 }
 0x866   :  { %18430 = vmatprep.mubr.f32.mxu1 %v25884_v2  ;;  %19672 = vmatpush3.bf16.msra.mxu1 %v19669_v48  ;;  %v25953_v48 = vld [vmem:[#allocation2 + $0x204] sm:$0xff] }
 0x867   :  { %19674 = vmatprep.subr.bf16.mxu1 %v19673_v30 }
 0x869   :  { %18431 = vmatmul.mubr.f32.gmra.mrb[12].mxu1 %v25887_v10 }
 0x86a   :  { %18433 = vmatprep.mubr.f32.mxu1 %v25896_v26  ;;  %19676 = vmatpush3.bf16.msra.mxu1 %v19673_v30  ;;  %v25962_v30 = vld [vmem:[#allocation2 + $0x22c] sm:$0xff] }
 0x86b   :  { %19678 = vmatprep.subr.bf16.mxu1 %v19677_v53 }
 0x86d   :  { %18434 = vmatmul.mubr.f32.gmra.mrb[14].mxu1 %v25899_v54 }
 0x86e   :  { %18436 = vmatprep.mubr.f32.mxu1 %v25902_v1  ;;  %19680 = vmatpush3.bf16.msra.mxu1 %v19677_v53  ;;  %v13682_v53 = vld [vmem:[%s28312_s5 + $0xb18] sm:$0xff] }
 0x86f   :  { %19682 = vmatprep.subr.bf16.mxu1 %v19681_v51  ;;  %v19685_v35 = vpack.c.bf16 %v13682_v53, %v13681_v63  ;;  %v13686_v63 = vld [vmem:[%s28312_s5 + $0xb38] sm:$0xff]  ;;  %v13688_v53 = vld [vmem:[%s28312_s5 + $0xb48] sm:$0xff] }
 0x871   :  { %18437 = vmatmul.mubr.f32.gmra.mrb[16].mxu1 %v25905_v41 }
 0x872   :  { %18439 = vmatprep.mubr.f32.mxu1 %v25908_v61 }
 0x875   :  { %18440 = vmatmul.mubr.f32.gmra.mrb[18].mxu1 %v25911_v38 }
 0x876   :  { %18442 = vmatprep.mubr.f32.mxu1 %v9431_v31  ;;  %v13684_v31 = vld [vmem:[%s28312_s5 + $0xb28] sm:$0xff] }
 0x879   :  { %18443 = vmatmul.mubr.f32.gmra.mrb[20].mxu1 %v9432_v15  ;;  %v19689_v15 = vpack.c.bf16 %v13684_v31, %v13683_v28  ;;  %v13690_v31 = vld [vmem:[%s28312_s5 + $0xb58] sm:$0xff] }
 0x87a   :  { %18445 = vmatprep.mubr.f32.mxu1 %v25914_v39 }
 0x87d   :  { %18446 = vmatmul.mubr.f32.gmra.mrb[22].mxu1 %v25917_v55 }
 0x87e   :  { %18448 = vmatprep.mubr.f32.mxu1 %v25920_v18 }
 0x881   :  { %18449 = vmatmul.mubr.f32.gmra.mrb[24].mxu1 %v25923_v59 }
 0x882   :  { %18451 = vmatprep.mubr.f32.mxu1 %v25926_v22 }
 0x885   :  { %18452 = vmatmul.mubr.f32.gmra.mrb[26].mxu1 %v25929_v5 }
 0x886   :  { %18454 = vmatprep.mubr.f32.mxu1 %v25932_v49 }
 0x889   :  { %18455 = vmatmul.mubr.f32.gmra.mrb[28].mxu1 %v25935_v7 }
 0x88a   :  { %18457 = vmatprep.mubr.f32.mxu1 %v25938_v14 }
 0x88d   :  { %18458 = vmatmul.mubr.f32.gmra.mrb[30].mxu1 %v25941_v23 }
 0x88e   :  { %18460 = vmatprep.mubr.f32.mxu1 %v25944_v60 }
 0x891   :  { %18461 = vmatmul.mubr.f32.gmra.mrb[32].mxu1 %v25947_v6 }
 0x892   :  { %18463 = vmatprep.mubr.f32.mxu1 %v25950_v34 }
 0x895   :  { %18464 = vmatmul.mubr.f32.gmra.mrb[34].mxu1 %v25953_v48 }
 0x896   :  { %18466 = vmatprep.mubr.f32.mxu1 %v25956_v16 }
 0x899   :  { %18467 = vmatmul.mubr.f32.gmra.mrb[36].mxu1 %v25959_v24 }
 0x89a   :  { %18469 = vmatprep.mubr.f32.mxu1 %v25962_v30 }
 0x89d   :  { %18470 = vmatmul.mubr.f32.gmra.mrb[38].mxu1 %v25965_v37 }
 0x89e   :  { %18504 = vmatprep.mubr.f32.mxu1 %v25824_v3  ;;  %v13685_v3 = vld [vmem:[%s28312_s5 + $0xb30] sm:$0xff] }
 0x8a1   :  { %18505 = vmatmul.mubr.f32.vlgmr.msra.gmra.mrb[0].mxu1 %v25827_v42  ;;  %v19693_v42 = vpack.c.bf16 %v13686_v63, %v13685_v3  ;;  %v13692_v63 = vld [vmem:[%s28312_s5 + $0xb68] sm:$0xff] }
 0x8a2   :  { %18507 = vmatprep.mubr.f32.mxu1 %v25836_v57  ;;  %19684 = vmatpush3.bf16.msra.mxu1 %v19681_v51  ;;  %v13687_v51 = vld [vmem:[%s28312_s5 + $0xb40] sm:$0xff] }
 0x8a3   :  { %19686 = vmatprep.subr.bf16.mxu1 %v19685_v35  ;;  %v19697_v28 = vpack.c.bf16 %v13688_v53, %v13687_v51  ;;  %v13694_v53 = vld [vmem:[%s28312_s5 + $0xb78] sm:$0xff] }
 0x8a5   :  { %18508 = vmatmul.mubr.f32.gmra.mrb[2].mxu1 %v25839_v21 }
 0x8a6   :  { %18510 = vmatprep.mubr.f32.mxu1 %v25848_v29  ;;  %19688 = vmatpush3.bf16.msra.mxu1 %v19685_v35  ;;  %v13689_v35 = vld [vmem:[%s28312_s5 + $0xb50] sm:$0xff] }
 0x8a7   :  { %19690 = vmatprep.subr.bf16.mxu1 %v19689_v15  ;;  %v19701_v3 = vpack.c.bf16 %v13690_v31, %v13689_v35  ;;  %v13696_v31 = vld [vmem:[%s28312_s5 + $0xb88] sm:$0xff] }
 0x8a9   :  { %18511 = vmatmul.mubr.f32.gmra.mrb[4].mxu1 %v25851_v62 }
 0x8aa   :  { %18513 = vmatprep.mubr.f32.mxu1 %v25860_v19  ;;  %19692 = vmatpush3.bf16.msra.mxu1 %v19689_v15  ;;  %v13691_v15 = vld [vmem:[%s28312_s5 + $0xb60] sm:$0xff] }
 0x8ab   :  { %19694 = vmatprep.subr.bf16.mxu1 %v19693_v42  ;;  %v19705_v51 = vpack.c.bf16 %v13692_v63, %v13691_v15  ;;  %v26037_v63 = vld [vmem:[#allocation2 + $0xfc] sm:$0xff] }
 0x8ad   :  { %18514 = vmatmul.mubr.f32.gmra.mrb[6].mxu1 %v25863_v36 }
 0x8ae   :  { %18516 = vmatprep.mubr.f32.mxu1 %v25872_v11  ;;  %19696 = vmatpush3.bf16.msra.mxu1 %v19693_v42  ;;  %v13693_v42 = vld [vmem:[%s28312_s5 + $0xb70] sm:$0xff] }
 0x8af   :  { %19698 = vmatprep.subr.bf16.mxu1 %v19697_v28  ;;  %v19709_v35 = vpack.c.bf16 %v13694_v53, %v13693_v42  ;;  %v13698_v42 = vld [vmem:[%s28312_s5 + $0xb98] sm:$0xff] }
 0x8b1   :  { %18517 = vmatmul.mubr.f32.gmra.mrb[8].mxu1 %v25875_v27 }
 0x8b2   :  { %18519 = vmatprep.mubr.f32.mxu1 %v25884_v2  ;;  %19700 = vmatpush3.bf16.msra.mxu1 %v19697_v28  ;;  %v13695_v28 = vld [vmem:[%s28312_s5 + $0xb80] sm:$0xff] }
 0x8b3   :  { %19702 = vmatprep.subr.bf16.mxu1 %v19701_v3  ;;  %v19713_v15 = vpack.c.bf16 %v13696_v31, %v13695_v28  ;;  %v13700_v28 = vld [vmem:[%s28312_s5 + $0xba8] sm:$0xff] }
 0x8b5   :  { %18520 = vmatmul.mubr.f32.gmra.mrb[10].mxu1 %v25887_v10 }
 0x8b6   :  { %18522 = vmatprep.mubr.f32.mxu1 %v25896_v26  ;;  %19704 = vmatpush3.bf16.msra.mxu1 %v19701_v3  ;;  %v26034_v3 = vld [vmem:[#allocation2 + $0xf4] sm:$0xff] }
 0x8b7   :  { %19706 = vmatprep.subr.bf16.mxu1 %v19705_v51 }
 0x8b9   :  { %18523 = vmatmul.mubr.f32.gmra.mrb[12].mxu1 %v25899_v54 }
 0x8ba   :  { %18525 = vmatprep.mubr.f32.mxu1 %v25902_v1  ;;  %19708 = vmatpush3.bf16.msra.mxu1 %v19705_v51  ;;  %v13697_v51 = vld [vmem:[%s28312_s5 + $0xb90] sm:$0xff] }
 0x8bb   :  { %19710 = vmatprep.subr.bf16.mxu1 %v19709_v35  ;;  %v19717_v53 = vpack.c.bf16 %v13698_v42, %v13697_v51  ;;  %v13702_v51 = vld [vmem:[%s28312_s5 + $0xbb8] sm:$0xff]  ;;  %v13704_v42 = vld [vmem:[%s28312_s5 + $0xbc8] sm:$0xff] }
 0x8bd   :  { %18526 = vmatmul.mubr.f32.gmra.mrb[14].mxu1 %v25905_v41 }
 0x8be   :  { %18528 = vmatprep.mubr.f32.mxu1 %v25908_v61  ;;  %19712 = vmatpush3.bf16.msra.mxu1 %v19709_v35  ;;  %v13699_v35 = vld [vmem:[%s28312_s5 + $0xba0] sm:$0xff] }
 0x8bf   :  { %19714 = vmatprep.subr.bf16.mxu1 %v19713_v15  ;;  %v19721_v31 = vpack.c.bf16 %v13700_v28, %v13699_v35  ;;  %v13706_v28 = vld [vmem:[%s28312_s5 + $0xbd8] sm:$0xff] }
 0x8c1   :  { %18529 = vmatmul.mubr.f32.gmra.mrb[16].mxu1 %v25911_v38 }
 0x8c2   :  { %18531 = vmatprep.mubr.f32.mxu1 %v26034_v3 }
 0x8c5   :  { %18532 = vmatmul.mubr.f32.gmra.mrb[18].mxu1 %v26037_v63 }
 0x8c6   :  { %18534 = vmatprep.mubr.f32.mxu1 %v25914_v39  ;;  %v26058_v39 = vld [vmem:[#allocation2 + $0x244] sm:$0xff] }
 0x8c9   :  { %18535 = vmatmul.mubr.f32.gmra.mrb[20].mxu1 %v25917_v55  ;;  %v26061_v55 = vld [vmem:[#allocation2 + $0x24c] sm:$0xff] }
 0x8ca   :  { %18537 = vmatprep.mubr.f32.mxu1 %v25920_v18 }
 0x8cd   :  { %18538 = vmatmul.mubr.f32.gmra.mrb[22].mxu1 %v25923_v59 }
 0x8ce   :  { %18540 = vmatprep.mubr.f32.mxu1 %v25926_v22 }
 0x8d1   :  { %18541 = vmatmul.mubr.f32.gmra.mrb[24].mxu1 %v25929_v5 }
 0x8d2   :  { %18543 = vmatprep.mubr.f32.mxu1 %v25932_v49 }
 0x8d5   :  { %18544 = vmatmul.mubr.f32.gmra.mrb[26].mxu1 %v25935_v7 }
 0x8d6   :  { %18546 = vmatprep.mubr.f32.mxu1 %v25938_v14 }
 0x8d9   :  { %18547 = vmatmul.mubr.f32.gmra.mrb[28].mxu1 %v25941_v23 }
 0x8da   :  { %18549 = vmatprep.mubr.f32.mxu1 %v25944_v60 }
 0x8dd   :  { %18550 = vmatmul.mubr.f32.gmra.mrb[30].mxu1 %v25947_v6 }
 0x8de   :  { %18552 = vmatprep.mubr.f32.mxu1 %v25950_v34 }
 0x8e1   :  { %18553 = vmatmul.mubr.f32.gmra.mrb[32].mxu1 %v25953_v48 }
 0x8e2   :  { %18555 = vmatprep.mubr.f32.mxu1 %v25956_v16 }
 0x8e5   :  { %18556 = vmatmul.mubr.f32.gmra.mrb[34].mxu1 %v25959_v24 }
 0x8e6   :  { %18558 = vmatprep.mubr.f32.mxu1 %v25962_v30 }
 0x8e9   :  { %18559 = vmatmul.mubr.f32.gmra.mrb[36].mxu1 %v25965_v37 }
 0x8ea   :  { %18561 = vmatprep.mubr.f32.mxu1 %v26058_v39 }
 0x8ed   :  { %18562 = vmatmul.mubr.f32.gmra.mrb[38].mxu1 %v26061_v55 }
 0x8ee   :  { %18596 = vmatprep.mubr.f32.mxu1 %v25836_v57  ;;  %v13701_v57 = vld [vmem:[%s28312_s5 + $0xbb0] sm:$0xff] }
 0x8f1   :  { %18597 = vmatmul.mubr.f32.vlgmr.msra.gmra.mrb[0].mxu1 %v25839_v21  ;;  %v19725_v21 = vpack.c.bf16 %v13702_v51, %v13701_v57  ;;  %v13708_v51 = vld [vmem:[%s28312_s5 + $0xbe8] sm:$0xff] }
 0x8f2   :  { %18599 = vmatprep.mubr.f32.mxu1 %v25848_v29  ;;  %19716 = vmatpush3.bf16.msra.mxu1 %v19713_v15  ;;  %v13703_v15 = vld [vmem:[%s28312_s5 + $0xbc0] sm:$0xff] }
 0x8f3   :  { %19718 = vmatprep.subr.bf16.mxu1 %v19717_v53  ;;  %v19729_v35 = vpack.c.bf16 %v13704_v42, %v13703_v15  ;;  %v13710_v42 = vld [vmem:[%s28312_s5 + $0xbf8] sm:$0xff] }
 0x8f5   :  { %18600 = vmatmul.mubr.f32.gmra.mrb[2].mxu1 %v25851_v62 }
 0x8f6   :  { %18602 = vmatprep.mubr.f32.mxu1 %v25860_v19  ;;  %19720 = vmatpush3.bf16.msra.mxu1 %v19717_v53  ;;  %v13705_v53 = vld [vmem:[%s28312_s5 + $0xbd0] sm:$0xff] }
 0x8f7   :  { %19722 = vmatprep.subr.bf16.mxu1 %v19721_v31  ;;  %v19733_v57 = vpack.c.bf16 %v13706_v28, %v13705_v53  ;;  %v13712_v28 = vld [vmem:[%s28312_s5 + $0xc08] sm:$0xff] }
 0x8f9   :  { %18603 = vmatmul.mubr.f32.gmra.mrb[4].mxu1 %v25863_v36 }
 0x8fa   :  { %18605 = vmatprep.mubr.f32.mxu1 %v25872_v11  ;;  %19724 = vmatpush3.bf16.msra.mxu1 %v19721_v31  ;;  %v13707_v31 = vld [vmem:[%s28312_s5 + $0xbe0] sm:$0xff] }
 0x8fb   :  { %19726 = vmatprep.subr.bf16.mxu1 %v19725_v21  ;;  %v19737_v15 = vpack.c.bf16 %v13708_v51, %v13707_v31  ;;  %v26133_v51 = vld [vmem:[#allocation2 + $0x114] sm:$0xff] }
 0x8fd   :  { %18606 = vmatmul.mubr.f32.gmra.mrb[6].mxu1 %v25875_v27 }
 0x8fe   :  { %18608 = vmatprep.mubr.f32.mxu1 %v25884_v2  ;;  %19728 = vmatpush3.bf16.msra.mxu1 %v19725_v21  ;;  %v13709_v21 = vld [vmem:[%s28312_s5 + $0xbf0] sm:$0xff] }
 0x8ff   :  { %19730 = vmatprep.subr.bf16.mxu1 %v19729_v35  ;;  %v19741_v53 = vpack.c.bf16 %v13710_v42, %v13709_v21  ;;  %v13714_v21 = vld [vmem:[%s28312_s5 + $0xc18] sm:$0xff] }
 0x901   :  { %18609 = vmatmul.mubr.f32.gmra.mrb[8].mxu1 %v25887_v10 }
 0x902   :  { %18611 = vmatprep.mubr.f32.mxu1 %v25896_v26  ;;  %19732 = vmatpush3.bf16.msra.mxu1 %v19729_v35  ;;  %v13711_v35 = vld [vmem:[%s28312_s5 + $0xc00] sm:$0xff] }
 0x903   :  { %19734 = vmatprep.subr.bf16.mxu1 %v19733_v57  ;;  %v19745_v31 = vpack.c.bf16 %v13712_v28, %v13711_v35  ;;  %v13716_v35 = vld [vmem:[%s28312_s5 + $0xc28] sm:$0xff] }
 0x905   :  { %18612 = vmatmul.mubr.f32.gmra.mrb[10].mxu1 %v25899_v54 }
 0x906   :  { %18614 = vmatprep.mubr.f32.mxu1 %v25902_v1  ;;  %19736 = vmatpush3.bf16.msra.mxu1 %v19733_v57  ;;  %v26130_v57 = vld [vmem:[#allocation2 + $0x10c] sm:$0xff] }
 0x907   :  { %19738 = vmatprep.subr.bf16.mxu1 %v19737_v15 }
 0x909   :  { %18615 = vmatmul.mubr.f32.gmra.mrb[12].mxu1 %v25905_v41 }
 0x90a   :  { %18617 = vmatprep.mubr.f32.mxu1 %v25908_v61  ;;  %19740 = vmatpush3.bf16.msra.mxu1 %v19737_v15  ;;  %v13713_v15 = vld [vmem:[%s28312_s5 + $0xc10] sm:$0xff] }
 0x90b   :  { %19742 = vmatprep.subr.bf16.mxu1 %v19741_v53  ;;  %v19749_v42 = vpack.c.bf16 %v13714_v21, %v13713_v15  ;;  %v13718_v15 = vld [vmem:[%s28312_s5 + $0xc38] sm:$0xff]  ;;  %v13720_v21 = vld [vmem:[%s28312_s5 + $0xc48] sm:$0xff] }
 0x90d   :  { %18618 = vmatmul.mubr.f32.gmra.mrb[14].mxu1 %v25911_v38 }
 0x90e   :  { %18620 = vmatprep.mubr.f32.mxu1 %v26034_v3  ;;  %19744 = vmatpush3.bf16.msra.mxu1 %v19741_v53  ;;  %v13715_v53 = vld [vmem:[%s28312_s5 + $0xc20] sm:$0xff] }
 0x90f   :  { %19746 = vmatprep.subr.bf16.mxu1 %v19745_v31  ;;  %v19753_v28 = vpack.c.bf16 %v13716_v35, %v13715_v53  ;;  %v13722_v35 = vld [vmem:[%s28312_s5 + $0xc58] sm:$0xff] }
 0x911   :  { %18621 = vmatmul.mubr.f32.gmra.mrb[16].mxu1 %v26037_v63 }
 0x912   :  { %18623 = vmatprep.mubr.f32.mxu1 %v26130_v57 }
 0x915   :  { %18624 = vmatmul.mubr.f32.gmra.mrb[18].mxu1 %v26133_v51 }
 0x916   :  { %18626 = vmatprep.mubr.f32.mxu1 %v25920_v18  ;;  %v26154_v18 = vld [vmem:[#allocation2 + $0x25c] sm:$0xff] }
 0x919   :  { %18627 = vmatmul.mubr.f32.gmra.mrb[20].mxu1 %v25923_v59  ;;  %v26157_v59 = vld [vmem:[#allocation2 + $0x264] sm:$0xff] }
 0x91a   :  { %18629 = vmatprep.mubr.f32.mxu1 %v25926_v22 }
 0x91d   :  { %18630 = vmatmul.mubr.f32.gmra.mrb[22].mxu1 %v25929_v5 }
 0x91e   :  { %18632 = vmatprep.mubr.f32.mxu1 %v25932_v49 }
 0x921   :  { %18633 = vmatmul.mubr.f32.gmra.mrb[24].mxu1 %v25935_v7 }
 0x922   :  { %18635 = vmatprep.mubr.f32.mxu1 %v25938_v14 }
 0x925   :  { %18636 = vmatmul.mubr.f32.gmra.mrb[26].mxu1 %v25941_v23 }
 0x926   :  { %18638 = vmatprep.mubr.f32.mxu1 %v25944_v60 }
 0x929   :  { %18639 = vmatmul.mubr.f32.gmra.mrb[28].mxu1 %v25947_v6 }
 0x92a   :  { %18641 = vmatprep.mubr.f32.mxu1 %v25950_v34 }
 0x92d   :  { %18642 = vmatmul.mubr.f32.gmra.mrb[30].mxu1 %v25953_v48 }
 0x92e   :  { %18644 = vmatprep.mubr.f32.mxu1 %v25956_v16 }
 0x931   :  { %18645 = vmatmul.mubr.f32.gmra.mrb[32].mxu1 %v25959_v24 }
 0x932   :  { %18647 = vmatprep.mubr.f32.mxu1 %v25962_v30 }
 0x935   :  { %18648 = vmatmul.mubr.f32.gmra.mrb[34].mxu1 %v25965_v37 }
 0x936   :  { %18650 = vmatprep.mubr.f32.mxu1 %v26058_v39 }
 0x939   :  { %18651 = vmatmul.mubr.f32.gmra.mrb[36].mxu1 %v26061_v55 }
 0x93a   :  { %18653 = vmatprep.mubr.f32.mxu1 %v26154_v18 }
 0x93d   :  { %18654 = vmatmul.mubr.f32.gmra.mrb[38].mxu1 %v26157_v59 }
 0x93e   :  { %18688 = vmatprep.mubr.f32.mxu1 %v25848_v29  ;;  %v13717_v29 = vld [vmem:[%s28312_s5 + $0xc30] sm:$0xff] }
 0x941   :  { %18689 = vmatmul.mubr.f32.vlgmr.msra.gmra.mrb[0].mxu1 %v25851_v62  ;;  %v19757_v62 = vpack.c.bf16 %v13718_v15, %v13717_v29  ;;  %v13724_v15 = vld [vmem:[%s28312_s5 + $0xc68] sm:$0xff] }
 0x942   :  { %18691 = vmatprep.mubr.f32.mxu1 %v25860_v19  ;;  %19748 = vmatpush3.bf16.msra.mxu1 %v19745_v31  ;;  %v13719_v31 = vld [vmem:[%s28312_s5 + $0xc40] sm:$0xff] }
 0x943   :  { %19750 = vmatprep.subr.bf16.mxu1 %v19749_v42  ;;  %v19761_v53 = vpack.c.bf16 %v13720_v21, %v13719_v31  ;;  %v13726_v21 = vld [vmem:[%s28312_s5 + $0xc78] sm:$0xff] }
 0x945   :  { %18692 = vmatmul.mubr.f32.gmra.mrb[2].mxu1 %v25863_v36 }
 0x946   :  { %18694 = vmatprep.mubr.f32.mxu1 %v25872_v11  ;;  %19752 = vmatpush3.bf16.msra.mxu1 %v19749_v42  ;;  %v13721_v42 = vld [vmem:[%s28312_s5 + $0xc50] sm:$0xff] }
 0x947   :  { %19754 = vmatprep.subr.bf16.mxu1 %v19753_v28  ;;  %v19765_v29 = vpack.c.bf16 %v13722_v35, %v13721_v42  ;;  %v9428_v35 = vld [vmem:[#allocation2 + $0x12c] sm:$0xff] }
 0x949   :  { %18695 = vmatmul.mubr.f32.gmra.mrb[4].mxu1 %v25875_v27 }
 0x94a   :  { %18697 = vmatprep.mubr.f32.mxu1 %v25884_v2  ;;  %19756 = vmatpush3.bf16.msra.mxu1 %v19753_v28  ;;  %v13723_v28 = vld [vmem:[%s28312_s5 + $0xc60] sm:$0xff] }
 0x94b   :  { %19758 = vmatprep.subr.bf16.mxu1 %v19757_v62  ;;  %v19769_v31 = vpack.c.bf16 %v13724_v15, %v13723_v28 }
 0x94d   :  { %18698 = vmatmul.mubr.f32.gmra.mrb[6].mxu1 %v25887_v10 }
 0x94e   :  { %18700 = vmatprep.mubr.f32.mxu1 %v25896_v26  ;;  %19760 = vmatpush3.bf16.msra.mxu1 %v19757_v62  ;;  %v13725_v62 = vld [vmem:[%s28312_s5 + $0xc70] sm:$0xff] }
 0x94f   :  { %19762 = vmatprep.subr.bf16.mxu1 %v19761_v53  ;;  %v19773_v42 = vpack.c.bf16 %v13726_v21, %v13725_v62 }
 0x951   :  { %18701 = vmatmul.mubr.f32.gmra.mrb[8].mxu1 %v25899_v54 }
 0x952   :  { %18703 = vmatprep.mubr.f32.mxu1 %v25902_v1  ;;  %19764 = vmatpush3.bf16.msra.mxu1 %v19761_v53  ;;  %v9427_v53 = vld [vmem:[#allocation2 + $0x124] sm:$0xff] }
 0x953   :  { %19766 = vmatprep.subr.bf16.mxu1 %v19765_v29 }
 0x955   :  { %18704 = vmatmul.mubr.f32.gmra.mrb[10].mxu1 %v25905_v41 }
 0x956   :  { %18706 = vmatprep.mubr.f32.mxu1 %v25908_v61  ;;  %19768 = vmatpush3.bf16.msra.mxu1 %v19765_v29 }
 0x957   :  { %19770 = vmatprep.subr.bf16.mxu1 %v19769_v31 }
 0x959   :  { %18707 = vmatmul.mubr.f32.gmra.mrb[12].mxu1 %v25911_v38 }
 0x95a   :  { %18709 = vmatprep.mubr.f32.mxu1 %v26034_v3  ;;  %19772 = vmatpush3.bf16.msra.mxu1 %v19769_v31 }
 0x95b   :  { %19774 = vmatprep.subr.bf16.mxu1 %v19773_v42 }
 0x95d   :  { %18710 = vmatmul.mubr.f32.gmra.mrb[14].mxu1 %v26037_v63 }
 0x95e   :  { %18712 = vmatprep.mubr.f32.mxu1 %v26130_v57  ;;  %19776 = vmatpush3.bf16.msra.mxu1 %v19773_v42 }
 0x961   :  { %18713 = vmatmul.mubr.f32.gmra.mrb[16].mxu1 %v26133_v51 }
 0x962   :  { %18715 = vmatprep.mubr.f32.mxu1 %v9427_v53 }
 0x965   :  { %18716 = vmatmul.mubr.f32.gmra.mrb[18].mxu1 %v9428_v35 }
 0x966   :  { %18718 = vmatprep.mubr.f32.mxu1 %v25926_v22  ;;  %v9455_v22 = vld [vmem:[#allocation2 + $0x274] sm:$0xff] }
 0x969   :  { %18719 = vmatmul.mubr.f32.gmra.mrb[20].mxu1 %v25929_v5  ;;  %v9456_v5 = vld [vmem:[#allocation2 + $0x27c] sm:$0xff] }
 0x96a   :  { %18721 = vmatprep.mubr.f32.mxu1 %v25932_v49 }
 0x96d   :  { %18722 = vmatmul.mubr.f32.gmra.mrb[22].mxu1 %v25935_v7 }
 0x96e   :  { %18724 = vmatprep.mubr.f32.mxu1 %v25938_v14 }
 0x971   :  { %18725 = vmatmul.mubr.f32.gmra.mrb[24].mxu1 %v25941_v23 }
 0x972   :  { %18727 = vmatprep.mubr.f32.mxu1 %v25944_v60 }
 0x975   :  { %18728 = vmatmul.mubr.f32.gmra.mrb[26].mxu1 %v25947_v6 }
 0x976   :  { %18730 = vmatprep.mubr.f32.mxu1 %v25950_v34 }
 0x979   :  { %18731 = vmatmul.mubr.f32.gmra.mrb[28].mxu1 %v25953_v48 }
 0x97a   :  { %18733 = vmatprep.mubr.f32.mxu1 %v25956_v16 }
 0x97d   :  { %18734 = vmatmul.mubr.f32.gmra.mrb[30].mxu1 %v25959_v24 }
 0x97e   :  { %18736 = vmatprep.mubr.f32.mxu1 %v25962_v30 }
 0x981   :  { %18737 = vmatmul.mubr.f32.gmra.mrb[32].mxu1 %v25965_v37 }
 0x982   :  { %18739 = vmatprep.mubr.f32.mxu1 %v26058_v39 }
 0x985   :  { %18740 = vmatmul.mubr.f32.gmra.mrb[34].mxu1 %v26061_v55 }
 0x986   :  { %18742 = vmatprep.mubr.f32.mxu1 %v26154_v18 }
 0x989   :  { %18743 = vmatmul.mubr.f32.gmra.mrb[36].mxu1 %v26157_v59 }
 0x98a   :  { %18745 = vmatprep.mubr.f32.mxu1 %v9455_v22 }
 0x98d   :  { %18746 = vmatmul.mubr.f32.gmra.mrb[38].mxu1 %v9456_v5 }
 0x98e   :  { %18780 = vmatprep.mubr.f32.mxu1 %v25860_v19  ;;  %v9429_v19 = vld [vmem:[#allocation2 + $0x13c] sm:$0xff] }
 0x991   :  { %18781 = vmatmul.mubr.f32.vlgmr.msra.gmra.mrb[0].mxu1 %v25863_v36  ;;  %v9430_v36 = vld [vmem:[#allocation2 + $0x144] sm:$0xff] }
 0x992   :  { %18783 = vmatprep.mubr.f32.mxu1 %v25872_v11  ;;  %v9457_v11 = vld [vmem:[#allocation2 + $0x28c] sm:$0xff] }
 0x995   :  { %18784 = vmatmul.mubr.f32.gmra.mrb[2].mxu1 %v25875_v27  ;;  %v9458_v27 = vld [vmem:[#allocation2 + $0x294] sm:$0xff] }
 0x996   :  { %18786 = vmatprep.mubr.f32.mxu1 %v25884_v2  ;;  %v28340_v2 = vmov 0.0|0.0  }
 0x997   :  { %19777 = vmatprep.subr.bf16.mxu0 %v28340_v2 }
 0x999   :  { %18787 = vmatmul.mubr.f32.gmra.mrb[4].mxu1 %v25887_v10  ;;  %v11177_v10 = vld [vmem:[%s28313_s1 + $0x8] sm:$0xff] }
 0x99a   :  { %18789 = vmatprep.mubr.f32.mxu1 %v25896_v26  ;;  %13728 = vmatprep.mubr.msk.f32.mxu0 %vm11226_vm0, %v11177_v10 }
 0x99d   :  { %18790 = vmatmul.mubr.f32.gmra.mrb[6].mxu1 %v25899_v54 }
 0x99e   :  { %18792 = vmatprep.mubr.f32.mxu1 %v25902_v1 }
 0x9a1   :  { %18793 = vmatmul.mubr.f32.gmra.mrb[8].mxu1 %v25905_v41  ;;  %v26279_v41 = vld [vmem:[%s28314_s6] ss:$0 sm:$0xff] }
 0x9a2   :  { %18795 = vmatprep.mubr.f32.mxu1 %v25908_v61 }
 0x9a5   :  { %18796 = vmatmul.mubr.f32.gmra.mrb[10].mxu1 %v25911_v38 }
 0x9a6   :  { %18798 = vmatprep.mubr.f32.mxu1 %v26034_v3 }
 0x9a9   :  { %18799 = vmatmul.mubr.f32.gmra.mrb[12].mxu1 %v26037_v63 }
 0x9aa   :  { %18801 = vmatprep.mubr.f32.mxu1 %v26130_v57 }
 0x9ad   :  { %18802 = vmatmul.mubr.f32.gmra.mrb[14].mxu1 %v26133_v51 }
 0x9ae   :  { %18804 = vmatprep.mubr.f32.mxu1 %v9427_v53 }
 0x9b1   :  { %18805 = vmatmul.mubr.f32.gmra.mrb[16].mxu1 %v9428_v35 }
 0x9b2   :  { %18807 = vmatprep.mubr.f32.mxu1 %v9429_v19 }
 0x9b5   :  { %18808 = vmatmul.mubr.f32.gmra.mrb[18].mxu1 %v9430_v36 }
 0x9b6   :  { %18810 = vmatprep.mubr.f32.mxu1 %v25932_v49 }
 0x9b9   :  { %18811 = vmatmul.mubr.f32.gmra.mrb[20].mxu1 %v25935_v7 }
 0x9ba   :  { %18813 = vmatprep.mubr.f32.mxu1 %v25938_v14 }
 0x9bd   :  { %18814 = vmatmul.mubr.f32.gmra.mrb[22].mxu1 %v25941_v23 }
 0x9be   :  { %18816 = vmatprep.mubr.f32.mxu1 %v25944_v60 }
 0x9c1   :  { %18817 = vmatmul.mubr.f32.gmra.mrb[24].mxu1 %v25947_v6 }
 0x9c2   :  { %18819 = vmatprep.mubr.f32.mxu1 %v25950_v34 }
 0x9c5   :  { %18820 = vmatmul.mubr.f32.gmra.mrb[26].mxu1 %v25953_v48 }
 0x9c6   :  { %18822 = vmatprep.mubr.f32.mxu1 %v25956_v16 }
 0x9c9   :  { %18823 = vmatmul.mubr.f32.gmra.mrb[28].mxu1 %v25959_v24 }
 0x9ca   :  { %18825 = vmatprep.mubr.f32.mxu1 %v25962_v30 }
 0x9cd   :  { %18826 = vmatmul.mubr.f32.gmra.mrb[30].mxu1 %v25965_v37 }
 0x9ce   :  { %18828 = vmatprep.mubr.f32.mxu1 %v26058_v39 }
 0x9d1   :  { %18829 = vmatmul.mubr.f32.gmra.mrb[32].mxu1 %v26061_v55 }
 0x9d2   :  { %18831 = vmatprep.mubr.f32.mxu1 %v26154_v18 }
 0x9d5   :  { %18832 = vmatmul.mubr.f32.gmra.mrb[34].mxu1 %v26157_v59 }
 0x9d6   :  { %18834 = vmatprep.mubr.f32.mxu1 %v9455_v22 }
 0x9d9   :  { %18835 = vmatmul.mubr.f32.gmra.mrb[36].mxu1 %v9456_v5 }
 0x9da   :  { %18837 = vmatprep.mubr.f32.mxu1 %v9457_v11 }
 0x9dd   :  { %18838 = vmatmul.mubr.f32.gmra.mrb[38].mxu1 %v9458_v27 }
 0xa64   :  { %v18782_v26 = vpop.f32.mrb[0].mxu1 }
 0xa65   :  { %v20293_v54 = vadd.f32 %v18782_v26, %v24656_v43  ;;  %v10830_v1 = vpop.f32.mrb[1].mxu1 }
 0xa66   :  { %v20294_v61 = vadd.f32 %v10830_v1, %v24659_v4 }
 0xa67   :  { %v11077_v49 = vadd.f32 %v20293_v54, %v26279_v41 }
 0xa68   :  { %v18785_v38 = vpop.f32.mrb[2].mxu1  ;;  %v11076_v23 = vadd.f32 %v20294_v61, %v26279_v41 }
 0xa69   :  { %v20295_v7 = vadd.f32 %v18785_v38, %v24661_v0  ;;  %v10840_v14 = vpop.f32.mrb[3].mxu1  ;;  %v11117_v48 = vmax.f32 %v11077_v49, 0.0 }
 0xa6a   :  { %v20296_v60 = vadd.f32 %v10840_v14, %v24663_v44  ;;  %v11116_v30 = vmax.f32 %v11076_v23, 0.0 }
 0xa6b   :  { %v11079_v43 = vadd.f32 %v20295_v7, %v26279_v41 }
 0xa6c   :  { %v11078_v6 = vadd.f32 %v20296_v60, %v26279_v41  ;;  %v18788_v34 = vpop.f32.mrb[4].mxu1 }
 0xa6d   :  { %v11119_v16 = vmax.f32 %v11079_v43, 0.0  ;;  %v20297_v24 = vadd.f32 %v18788_v34, %v24666_v9  ;;  %v10850_v4 = vpop.f32.mrb[5].mxu1 }
 0xa6e   :  { %v11118_v37 = vmax.f32 %v11078_v6, 0.0  ;;  %v20298_v3 = vadd.f32 %v10850_v4, %v24669_v25 }
 0xa6f   :  { %v11157_v0 = vmax.f32 %v11117_v48, %v11119_v16  ;;  %v11081_v55 = vadd.f32 %v20297_v24, %v26279_v41 }
 0xa70   :  { %v11156_v63 = vmax.f32 %v11116_v30, %v11118_v37  ;;  %v18791_v39 = vpop.f32.mrb[6].mxu1  ;;  %v11080_v18 = vadd.f32 %v20298_v3, %v26279_v41 }
 0xa71   :  { %v20299_v44 = vadd.f32 %v18791_v39, %v24672_v47  ;;  %v10860_v57 = vpop.f32.mrb[7].mxu1  ;;  %v11121_v25 = vmax.f32 %v11081_v55, 0.0 }
 0xa72   :  { %v26292_v51 = vpack.c.bf16 %v11157_v0, %v11156_v63  ;;  %v20300_v59 = vadd.f32 %v10860_v57, %v24675_v33  ;;  %v11120_v47 = vmax.f32 %v11080_v18, 0.0 }
 0xa73   :  { %v11083_v9 = vadd.f32 %v20299_v44, %v26279_v41 }
 0xa74   :  { %v11082_v29 = vadd.f32 %v20300_v59, %v26279_v41  ;;  %v18794_v28 = vpop.f32.mrb[8].mxu1  ;;  %19779 = vmatpush1.bf16.msra.mxu0 %v26292_v51 }
 0xa75   :  { %v11123_v15 = vmax.f32 %v11083_v9, 0.0  ;;  %v20301_v31 = vadd.f32 %v18794_v28, %v24678_v8  ;;  %v10870_v62 = vpop.f32.mrb[9].mxu1  ;;  %19780 = vmatprep.subr.bf16.mxu0 %v28340_v2 }
 0xa76   :  { %v11122_v21 = vmax.f32 %v11082_v29, 0.0  ;;  %v20302_v42 = vadd.f32 %v10870_v62, %v24681_v12 }
 0xa77   :  { %v11159_v53 = vmax.f32 %v11121_v25, %v11123_v15  ;;  %v11085_v22 = vadd.f32 %v20301_v31, %v26279_v41 }
 0xa78   :  { %v11158_v33 = vmax.f32 %v11120_v47, %v11122_v21  ;;  %v18797_v35 = vpop.f32.mrb[10].mxu1  ;;  %v11084_v11 = vadd.f32 %v20302_v42, %v26279_v41  ;;  %v28699_v47 = vld [vmem:[#allocation72_spill] sm:$0xff] }
 0xa79   :  { %v20303_v5 = vadd.f32 %v18797_v35, %v24684_v20  ;;  %v10880_v19 = vpop.f32.mrb[11].mxu1  ;;  %v11125_v12 = vmax.f32 %v11085_v22, 0.0  ;;  %v28700_v35 = vld [vmem:[#allocation44_spill] sm:$0xff] }
 0xa7a   :  { %v26304_v36 = vpack.c.bf16 %v11159_v53, %v11158_v33  ;;  %v20304_v8 = vadd.f32 %v10880_v19, %v24687_v32  ;;  %v11124_v20 = vmax.f32 %v11084_v11, 0.0 }
 0xa7b   :  { %v11087_v27 = vadd.f32 %v20303_v5, %v26279_v41 }
 0xa7c   :  { %v11086_v10 = vadd.f32 %v20304_v8, %v26279_v41  ;;  %v18800_v26 = vpop.f32.mrb[12].mxu1  ;;  %19782 = vmatpush1.bf16.msra.mxu0 %v26304_v36 }
 0xa7d   :  { %v11127_v54 = vmax.f32 %v11087_v27, 0.0  ;;  %v20305_v1 = vadd.f32 %v18800_v26, %v24690_v58  ;;  %v10890_v61 = vpop.f32.mrb[13].mxu1  ;;  %19783 = vmatprep.subr.bf16.mxu0 %v28340_v2 }
 0xa7e   :  { %v11126_v38 = vmax.f32 %v11086_v10, 0.0  ;;  %v20306_v49 = vadd.f32 %v10890_v61, %v24693_v52 }
 0xa7f   :  { %v11161_v7 = vmax.f32 %v11125_v12, %v11127_v54  ;;  %v11089_v23 = vadd.f32 %v20305_v1, %v26279_v41  ;;  %v28702_v1 = vld [vmem:[#allocation45_spill] sm:$0xff] }
 0xa80   :  { %v11160_v32 = vmax.f32 %v11124_v20, %v11126_v38  ;;  %v18803_v14 = vpop.f32.mrb[14].mxu1  ;;  %v11088_v34 = vadd.f32 %v20306_v49, %v26279_v41 }
 0xa81   :  { %v20307_v60 = vadd.f32 %v18803_v14, %v24696_v13  ;;  %v10900_v43 = vpop.f32.mrb[15].mxu1  ;;  %v11129_v52 = vmax.f32 %v11089_v23, 0.0 }
 0xa82   :  { %v26316_v6 = vpack.c.bf16 %v11161_v7, %v11160_v32  ;;  %v20308_v58 = vadd.f32 %v10900_v43, %v24699_v17  ;;  %v11128_v13 = vmax.f32 %v11088_v34, 0.0  ;;  %v28703_v7 = vld [vmem:[#allocation74_spill] sm:$0xff] }
 0xa83   :  { %v11091_v48 = vadd.f32 %v20307_v60, %v26279_v41  ;;  %v28704_v34 = vld [vmem:[#allocation46_spill] sm:$0xff] }
 0xa84   :  { %v11090_v16 = vadd.f32 %v20308_v58, %v26279_v41  ;;  %v18806_v24 = vpop.f32.mrb[16].mxu1  ;;  %19785 = vmatpush1.bf16.msra.mxu0 %v26316_v6 }
 0xa85   :  { %v11131_v4 = vmax.f32 %v11091_v48, 0.0  ;;  %v20309_v30 = vadd.f32 %v18806_v24, %v24702_v46  ;;  %v10910_v37 = vpop.f32.mrb[17].mxu1  ;;  %19786 = vmatprep.subr.bf16.mxu0 %v28340_v2 }
 0xa86   :  { %v11130_v3 = vmax.f32 %v11090_v16, 0.0  ;;  %v20310_v0 = vadd.f32 %v10910_v37, %v24705_v40 }
 0xa87   :  { %v11163_v63 = vmax.f32 %v11129_v52, %v11131_v4  ;;  %v11093_v55 = vadd.f32 %v20309_v30, %v26279_v41  ;;  %v28705_v52 = vld [vmem:[#allocation75_spill] sm:$0xff] }
 0xa88   :  { %v11162_v17 = vmax.f32 %v11128_v13, %v11130_v3  ;;  %v18809_v39 = vpop.f32.mrb[18].mxu1  ;;  %v11092_v59 = vadd.f32 %v20310_v0, %v26279_v41 }
 0xa89   :  { %v20311_v44 = vadd.f32 %v18809_v39, %v24708_v56  ;;  %v10920_v57 = vpop.f32.mrb[19].mxu1  ;;  %v11133_v40 = vmax.f32 %v11093_v55, 0.0 }
 0xa8a   :  { %v26328_v18 = vpack.c.bf16 %v11163_v63, %v11162_v17  ;;  %v20312_v46 = vadd.f32 %v10920_v57, %v24711_v50  ;;  %v11132_v56 = vmax.f32 %v11092_v59, 0.0  ;;  %v28706_v63 = vld [vmem:[#allocation47_spill] sm:$0xff]  ;;  %v28707_v57 = vld [vmem:[#allocation76_spill] sm:$0xff] }
 0xa8b   :  { %v11095_v9 = vadd.f32 %v20311_v44, %v26279_v41 }
 0xa8c   :  { %v11094_v29 = vadd.f32 %v20312_v46, %v26279_v41  ;;  %v18812_v28 = vpop.f32.mrb[20].mxu1  ;;  %19788 = vmatpush1.bf16.msra.mxu0 %v26328_v18 }
 0xa8d   :  { %v11135_v25 = vmax.f32 %v11095_v9, 0.0  ;;  %v20313_v15 = vadd.f32 %v18812_v28, %v24714_v45  ;;  %v10930_v31 = vpop.f32.mrb[21].mxu1  ;;  %19789 = vmatprep.subr.bf16.mxu0 %v28340_v2  ;;  %v28701_v45 = vld [vmem:[#allocation73_spill] sm:$0xff] }
 0xa8e   :  { %v11134_v62 = vmax.f32 %v11094_v29, 0.0  ;;  %v20314_v21 = vadd.f32 %v10930_v31, %v28699_v47 }
 0xa8f   :  { %v11165_v42 = vmax.f32 %v11133_v40, %v11135_v25  ;;  %v11097_v33 = vadd.f32 %v20313_v15, %v26279_v41  ;;  %v28708_v40 = vld [vmem:[#allocation48_spill] sm:$0xff] }
 0xa90   :  { %v11164_v50 = vmax.f32 %v11132_v56, %v11134_v62  ;;  %v18815_v53 = vpop.f32.mrb[22].mxu1  ;;  %v11096_v11 = vadd.f32 %v20314_v21, %v26279_v41  ;;  %v28709_v62 = vld [vmem:[#allocation77_spill] sm:$0xff] }
 0xa91   :  { %v20315_v22 = vadd.f32 %v18815_v53, %v28700_v35  ;;  %v10940_v5 = vpop.f32.mrb[23].mxu1  ;;  %v11137_v12 = vmax.f32 %v11097_v33, 0.0  ;;  %v28710_v35 = vld [vmem:[#allocation49_spill] sm:$0xff] }
 0xa92   :  { %v26340_v19 = vpack.c.bf16 %v11165_v42, %v11164_v50  ;;  %v20316_v8 = vadd.f32 %v10940_v5, %v28701_v45  ;;  %v11136_v38 = vmax.f32 %v11096_v11, 0.0 }
 0xa93   :  { %v11099_v27 = vadd.f32 %v20315_v22, %v26279_v41 }
 0xa94   :  { %v11098_v10 = vadd.f32 %v20316_v8, %v26279_v41  ;;  %v18818_v26 = vpop.f32.mrb[24].mxu1  ;;  %19791 = vmatpush1.bf16.msra.mxu0 %v26340_v19  ;;  %v28711_v8 = vld [vmem:[#allocation78_spill] sm:$0xff] }
 0xa95   :  { %v11139_v54 = vmax.f32 %v11099_v27, 0.0  ;;  %v20317_v61 = vadd.f32 %v18818_v26, %v28702_v1  ;;  %v10950_v20 = vpop.f32.mrb[25].mxu1  ;;  %19792 = vmatprep.subr.bf16.mxu0 %v28340_v2  ;;  %v28712_v1 = vld [vmem:[#allocation50_spill] sm:$0xff] }
 0xa96   :  { %v11138_v49 = vmax.f32 %v11098_v10, 0.0  ;;  %v20318_v32 = vadd.f32 %v10950_v20, %v28703_v7  ;;  %v28713_v7 = vld [vmem:[#allocation79_spill] sm:$0xff] }
 0xa97   :  { %v11167_v14 = vmax.f32 %v11137_v12, %v11139_v54  ;;  %v11101_v43 = vadd.f32 %v20317_v61, %v26279_v41 }
 0xa98   :  { %v11166_v23 = vmax.f32 %v11136_v38, %v11138_v49  ;;  %v18821_v60 = vpop.f32.mrb[26].mxu1  ;;  %v11100_v24 = vadd.f32 %v20318_v32, %v26279_v41 }
 0xa99   :  { %v20319_v58 = vadd.f32 %v18821_v60, %v28704_v34  ;;  %v10960_v48 = vpop.f32.mrb[27].mxu1  ;;  %v11141_v3 = vmax.f32 %v11101_v43, 0.0 }
 0xa9a   :  { %v26352_v16 = vpack.c.bf16 %v11167_v14, %v11166_v23  ;;  %v20320_v4 = vadd.f32 %v10960_v48, %v28705_v52  ;;  %v11140_v55 = vmax.f32 %v11100_v24, 0.0 }
 0xa9b   :  { %v11103_v30 = vadd.f32 %v20319_v58, %v26279_v41  ;;  %v28714_v58 = vld [vmem:[#allocation51_spill] sm:$0xff] }
 0xa9c   :  { %v11102_v37 = vadd.f32 %v20320_v4, %v26279_v41  ;;  %v18824_v13 = vpop.f32.mrb[28].mxu1  ;;  %19794 = vmatpush1.bf16.msra.mxu0 %v26352_v16 }
 0xa9d   :  { %v11143_v0 = vmax.f32 %v11103_v30, 0.0  ;;  %v20321_v17 = vadd.f32 %v18824_v13, %v28706_v63  ;;  %v10970_v39 = vpop.f32.mrb[29].mxu1  ;;  %19795 = vmatprep.subr.bf16.mxu0 %v28340_v2  ;;  %v28715_v30 = vld [vmem:[#allocation80_spill] sm:$0xff] }
 0xa9e   :  { %v11142_v44 = vmax.f32 %v11102_v37, 0.0  ;;  %v20322_v59 = vadd.f32 %v10970_v39, %v28707_v57 }
 0xa9f   :  { %v11169_v46 = vmax.f32 %v11141_v3, %v11143_v0  ;;  %v11105_v28 = vadd.f32 %v20321_v17, %v26279_v41  ;;  %v28716_v17 = vld [vmem:[#allocation52_spill] sm:$0xff] }
 0xaa0   :  { %v11168_v9 = vmax.f32 %v11140_v55, %v11142_v44  ;;  %v18827_v29 = vpop.f32.mrb[30].mxu1  ;;  %v11104_v56 = vadd.f32 %v20322_v59, %v26279_v41  ;;  %v28717_v59 = vld [vmem:[#allocation81_spill] sm:$0xff] }
 0xaa1   :  { %v20323_v25 = vadd.f32 %v18827_v29, %v28708_v40  ;;  %v10980_v15 = vpop.f32.mrb[31].mxu1  ;;  %v11145_v53 = vmax.f32 %v11105_v28, 0.0 }
 0xaa2   :  { %v26364_v31 = vpack.c.bf16 %v11169_v46, %v11168_v9  ;;  %v20324_v47 = vadd.f32 %v10980_v15, %v28709_v62  ;;  %v11144_v11 = vmax.f32 %v11104_v56, 0.0 }
 0xaa3   :  { %v11107_v21 = vadd.f32 %v20323_v25, %v26279_v41 }
 0xaa4   :  { %v11106_v42 = vadd.f32 %v20324_v47, %v26279_v41  ;;  %v18830_v50 = vpop.f32.mrb[32].mxu1  ;;  %19797 = vmatpush1.bf16.msra.mxu0 %v26364_v31 }
 0xaa5   :  { %v11147_v33 = vmax.f32 %v11107_v21, 0.0  ;;  %v20325_v22 = vadd.f32 %v18830_v50, %v28710_v35  ;;  %v10990_v5 = vpop.f32.mrb[33].mxu1  ;;  %19798 = vmatprep.subr.bf16.mxu0 %v28340_v2  ;;  %v11176_v21 = vld [vmem:[%s28313_s1] sm:$0xff]  ;;  %v11181_v50 = vld [vmem:[%s28313_s1 + $0x28] sm:$0xff]  ;;  %v11187_v35 = vld [vmem:[%s28313_s1 + $0x58] sm:$0xff] }
 0xaa6   :  { %v11146_v45 = vmax.f32 %v11106_v42, 0.0  ;;  %v20326_v27 = vadd.f32 %v10990_v5, %v28711_v8  ;;  %v11178_v42 = vld [vmem:[%s28313_s1 + $0x10] sm:$0xff]  ;;  %v11191_v5 = vld [vmem:[%s28313_s1 + $0x78] sm:$0xff] }
 0xaa7   :  { %v11171_v10 = vmax.f32 %v11145_v53, %v11147_v33  ;;  %v11109_v54 = vadd.f32 %v20325_v22, %v26279_v41  ;;  %v11183_v53 = vld [vmem:[%s28313_s1 + $0x38] sm:$0xff]  ;;  %v11185_v33 = vld [vmem:[%s28313_s1 + $0x48] sm:$0xff]  ;;  %v11194_v8 = vld [vmem:[%s28313_s1 + $0x90] sm:$0xff] }
 0xaa8   :  { %v11170_v26 = vmax.f32 %v11144_v11, %v11146_v45  ;;  %v18833_v12 = vpop.f32.mrb[34].mxu1  ;;  %v11108_v49 = vadd.f32 %v20326_v27, %v26279_v41  ;;  %v11189_v22 = vld [vmem:[%s28313_s1 + $0x68] sm:$0xff]  ;;  %v11195_v45 = vld [vmem:[%s28313_s1 + $0x98] sm:$0xff] }
 0xaa9   :  { %v20327_v61 = vadd.f32 %v18833_v12, %v28712_v1  ;;  %v11000_v20 = vpop.f32.mrb[35].mxu1  ;;  %v11149_v43 = vmax.f32 %v11109_v54, 0.0  ;;  %v11193_v11 = vld [vmem:[%s28313_s1 + $0x88] sm:$0xff]  ;;  %v11198_v12 = vld [vmem:[%s28313_s1 + $0xb0] sm:$0xff]  ;;  %v11200_v1 = vld [vmem:[%s28313_s1 + $0xc0] sm:$0xff] }
 0xaaa   :  { %v26376_v38 = vpack.c.bf16 %v11171_v10, %v11170_v26  ;;  %v20328_v32 = vadd.f32 %v11000_v20, %v28713_v7  ;;  %v11148_v52 = vmax.f32 %v11108_v49, 0.0  ;;  %v11197_v27 = vld [vmem:[%s28313_s1 + $0xa8] sm:$0xff]  ;;  %v11196_v10 = vld [vmem:[%s28313_s1 + $0xa0] sm:$0xff]  ;;  %v11199_v26 = vld [vmem:[%s28313_s1 + $0xb8] sm:$0xff] }
 0xaab   :  { %v11111_v14 = vadd.f32 %v20327_v61, %v26279_v41  ;;  %v11201_v54 = vld [vmem:[%s28313_s1 + $0xc8] sm:$0xff]  ;;  %v11203_v61 = vld [vmem:[%s28313_s1 + $0xd8] sm:$0xff]  ;;  %v11202_v20 = vld [vmem:[%s28313_s1 + $0xd0] sm:$0xff] }
 0xaac   :  { %v11110_v23 = vadd.f32 %v20328_v32, %v26279_v41  ;;  %v18836_v60 = vpop.f32.mrb[36].mxu1  ;;  %19800 = vmatpush1.bf16.msra.mxu0 %v26376_v38  ;;  %v11204_v49 = vld [vmem:[%s28313_s1 + $0xe0] sm:$0xff]  ;;  %v11207_v7 = vld [vmem:[%s28313_s1 + $0xf8] sm:$0xff]  ;;  %v11206_v32 = vld [vmem:[%s28313_s1 + $0xf0] sm:$0xff] }
 0xaad   :  { %v11151_v34 = vmax.f32 %v11111_v14, 0.0  ;;  %v20329_v48 = vadd.f32 %v18836_v60, %v28714_v58  ;;  %v11010_v24 = vpop.f32.mrb[37].mxu1  ;;  %19801 = vmatprep.subr.bf16.mxu0 %v28340_v2  ;;  %v11209_v14 = vld [vmem:[%s28313_s1 + $0x108] sm:$0xff]  ;;  %v11211_v60 = vld [vmem:[%s28313_s1 + $0x118] sm:$0xff]  ;;  %v11212_v58 = vld [vmem:[%s28313_s1 + $0x120] sm:$0xff] }
 0xaae   :  { %v11150_v4 = vmax.f32 %v11110_v23, 0.0  ;;  %v20330_v37 = vadd.f32 %v11010_v24, %v28715_v30  ;;  %v11208_v23 = vld [vmem:[%s28313_s1 + $0x100] sm:$0xff]  ;;  %v11214_v24 = vld [vmem:[%s28313_s1 + $0x130] sm:$0xff]  ;;  %v11219_v30 = vld [vmem:[%s28313_s1 + $0x158] sm:$0xff] }
 0xaaf   :  { %v11173_v13 = vmax.f32 %v11149_v43, %v11151_v34  ;;  %v11113_v63 = vadd.f32 %v20329_v48, %v26279_v41  ;;  %v11210_v43 = vld [vmem:[%s28313_s1 + $0x110] sm:$0xff]  ;;  %v11213_v34 = vld [vmem:[%s28313_s1 + $0x128] sm:$0xff]  ;;  %v11215_v48 = vld [vmem:[%s28313_s1 + $0x138] sm:$0xff] }
 0xab0   :  { %v11172_v3 = vmax.f32 %v11148_v52, %v11150_v4  ;;  %v18839_v0 = vpop.f32.mrb[38].mxu1  ;;  %v11112_v57 = vadd.f32 %v20330_v37, %v26279_v41  ;;  %v11217_v52 = vld [vmem:[%s28313_s1 + $0x148] sm:$0xff]  ;;  %v11216_v4 = vld [vmem:[%s28313_s1 + $0x140] sm:$0xff]  ;;  %v11218_v37 = vld [vmem:[%s28313_s1 + $0x150] sm:$0xff] }
 0xab1   :  { %v20331_v39 = vadd.f32 %v18839_v0, %v28716_v17  ;;  %v11020_v55 = vpop.f32.mrb[39].mxu1  ;;  %v11153_v28 = vmax.f32 %v11113_v63, 0.0  ;;  %v11223_v0 = vld [vmem:[%s28313_s1 + $0x178] sm:$0xff]  ;;  %v11222_v63 = vld [vmem:[%s28313_s1 + $0x170] sm:$0xff]  ;;  %v11225_v17 = vld [vmem:[%s28313_s1 + $0x188] sm:$0xff] }
 0xab2   :  { %v26388_v44 = vpack.c.bf16 %v11173_v13, %v11172_v3  ;;  %v20332_v46 = vadd.f32 %v11020_v55, %v28717_v59  ;;  %v11152_v25 = vmax.f32 %v11112_v57, 0.0  ;;  %v11221_v13 = vld [vmem:[%s28313_s1 + $0x168] sm:$0xff]  ;;  %v11220_v3 = vld [vmem:[%s28313_s1 + $0x160] sm:$0xff] }
 0xab3   :  { %v11115_v9 = vadd.f32 %v20331_v39, %v26279_v41  ;;  %v11848_v39 = vld [vmem:[%s28316_s7 + $0x80] sm:$0xff]  ;;  %v11849_v55 = vld [vmem:[%s28316_s7 + $0x88] sm:$0xff] }
 0xab4   :  { %v11114_v29 = vadd.f32 %v20332_v46, %v26279_v41  ;;  %19803 = vmatpush1.bf16.msra.mxu0 %v26388_v44  ;;  %v11179_v41 = vld [vmem:[%s28313_s1 + $0x18] sm:$0xff]  ;;  %v19837_v57 = vpack.c.bf16 %v11849_v55, %v11848_v39  ;;  %v11493_v59 = vld [vmem:[%s28315_s2 + $0x8] sm:$0xff]  ;;  %v11832_v46 = vld [vmem:[%s28316_s7] sm:$0xff] }
 0xab5   :  { %v11155_v40 = vmax.f32 %v11115_v9, 0.0  ;;  %19804 = vmatprep.subr.bf16.mxu0 %v28340_v2  ;;  %v11833_v9 = vld [vmem:[%s28316_s7 + $0x8] sm:$0xff]  ;;  %v11523_v55 = vld [vmem:[%s28315_s2 + $0xf8] sm:$0xff] }
 0xab6   :  { %v11154_v15 = vmax.f32 %v11114_v29, 0.0  ;;  %v11492_v29 = vld [vmem:[%s28315_s2] sm:$0xff] }
 0xab7   :  { %v11175_v56 = vmax.f32 %v11153_v28, %v11155_v40  ;;  %v19839_v28 = vpack.c.bf16 %v11833_v9, %v11832_v46  ;;  %v11495_v40 = vld [vmem:[%s28315_s2 + $0x18] sm:$0xff]  ;;  %v11522_v46 = vld [vmem:[%s28315_s2 + $0xf0] sm:$0xff]  ;;  %v11525_v9 = vld [vmem:[%s28315_s2 + $0x108] sm:$0xff] }
 0xab8   :  { %v11174_v62 = vmax.f32 %v11152_v25, %v11154_v15  ;;  %v11494_v25 = vld [vmem:[%s28315_s2 + $0x10] sm:$0xff]  ;;  %v11497_v15 = vld [vmem:[%s28315_s2 + $0x28] sm:$0xff] }
 0xaba   :  { %v19805_v47 = vpack.c.bf16 %v11175_v56, %v11174_v62  ;;  %v11850_v56 = vld [vmem:[%s28316_s7 + $0x90] sm:$0xff]  ;;  %v11851_v62 = vld [vmem:[%s28316_s7 + $0x98] sm:$0xff] }
 0xabc   :  { %19806 = vmatpush1.bf16.msra.mxu0 %v19805_v47 }
 0xabd   :  { %19807 = vmatprep.subr.bf16.mxu0 %v28340_v2 }
 0xabf   :  { %11367 = vmatmul.mubr.f32.vlgmr.msra.gmra.mrb[120].mxu0 %v11176_v21  ;;  %v11496_v21 = vld [vmem:[%s28315_s2 + $0x20] sm:$0xff] }
 0xac0   :  { %19809 = vmatpush1.bf16.msra.mxu0 %v26292_v51  ;;  %13729 = vmatprep.mubr.msk.f32.mxu0 %vm11226_vm0, %v11179_v41  ;;  %v11180_v51 = vld [vmem:[%s28313_s1 + $0x20] sm:$0xff]  ;;  %v19841_v41 = vpack.c.bf16 %v11851_v62, %v11850_v56  ;;  %v11529_v62 = vld [vmem:[%s28315_s2 + $0x128] sm:$0xff] }
 0xac1   :  { %19810 = vmatprep.subr.bf16.mxu0 %v28340_v2 }
 0xac3   :  { %11372 = vmatmul.mubr.f32.gmra.mrb[122].mxu0 %v11178_v42  ;;  %v11835_v42 = vld [vmem:[%s28316_s7 + $0x18] sm:$0xff] }
 0xac4   :  { %19812 = vmatpush1.bf16.msra.mxu0 %v26304_v36  ;;  %13730 = vmatprep.mubr.msk.f32.mxu0 %vm11226_vm0, %v11181_v50  ;;  %v11182_v36 = vld [vmem:[%s28313_s1 + $0x30] sm:$0xff]  ;;  %v11499_v50 = vld [vmem:[%s28315_s2 + $0x38] sm:$0xff] }
 0xac5   :  { %19813 = vmatprep.subr.bf16.mxu0 %v28340_v2 }
 0xac7   :  { %11377 = vmatmul.mubr.f32.gmra.mrb[124].mxu0 %v11180_v51 }
 0xac8   :  { %19815 = vmatpush1.bf16.msra.mxu0 %v26316_v6  ;;  %13731 = vmatprep.mubr.msk.f32.mxu0 %vm11226_vm0, %v11183_v53  ;;  %v11184_v6 = vld [vmem:[%s28313_s1 + $0x40] sm:$0xff]  ;;  %v11498_v53 = vld [vmem:[%s28315_s2 + $0x30] sm:$0xff] }
 0xac9   :  { %19816 = vmatprep.subr.bf16.mxu0 %v28340_v2 }
 0xacb   :  { %11382 = vmatmul.mubr.f32.gmra.mrb[126].mxu0 %v11182_v36  ;;  %v11501_v36 = vld [vmem:[%s28315_s2 + $0x48] sm:$0xff] }
 0xacc   :  { %19818 = vmatpush1.bf16.msra.mxu0 %v26328_v18  ;;  %13732 = vmatprep.mubr.msk.f32.mxu0 %vm11226_vm0, %v11185_v33  ;;  %v11186_v18 = vld [vmem:[%s28313_s1 + $0x50] sm:$0xff]  ;;  %v11500_v33 = vld [vmem:[%s28315_s2 + $0x40] sm:$0xff] }
 0xacd   :  { %19819 = vmatprep.subr.bf16.mxu0 %v28340_v2 }
 0xacf   :  { %11387 = vmatmul.mubr.f32.gmra.mrb[128].mxu0 %v11184_v6  ;;  %v11503_v6 = vld [vmem:[%s28315_s2 + $0x58] sm:$0xff] }
 0xad0   :  { %19821 = vmatpush1.bf16.msra.mxu0 %v26340_v19  ;;  %13733 = vmatprep.mubr.msk.f32.mxu0 %vm11226_vm0, %v11187_v35  ;;  %v11188_v19 = vld [vmem:[%s28313_s1 + $0x60] sm:$0xff] }
 0xad1   :  { %19822 = vmatprep.subr.bf16.mxu0 %v28340_v2  ;;  %v11852_v35 = vld [vmem:[%s28316_s7 + $0xa0] sm:$0xff] }
 0xad3   :  { %11392 = vmatmul.mubr.f32.gmra.mrb[130].mxu0 %v11186_v18  ;;  %v11853_v18 = vld [vmem:[%s28316_s7 + $0xa8] sm:$0xff] }
 0xad4   :  { %19824 = vmatpush1.bf16.msra.mxu0 %v26352_v16  ;;  %13734 = vmatprep.mubr.msk.f32.mxu0 %vm11226_vm0, %v11189_v22  ;;  %v11190_v16 = vld [vmem:[%s28313_s1 + $0x70] sm:$0xff]  ;;  %v11836_v22 = vld [vmem:[%s28316_s7 + $0x20] sm:$0xff] }
 0xad5   :  { %19825 = vmatprep.subr.bf16.mxu0 %v28340_v2 }
 0xad7   :  { %11397 = vmatmul.mubr.f32.gmra.mrb[132].mxu0 %v11188_v19  ;;  %v11502_v19 = vld [vmem:[%s28315_s2 + $0x50] sm:$0xff] }
 0xad8   :  { %19827 = vmatpush1.bf16.msra.mxu0 %v26364_v31  ;;  %13735 = vmatprep.mubr.msk.f32.mxu0 %vm11226_vm0, %v11191_v5  ;;  %v11192_v31 = vld [vmem:[%s28313_s1 + $0x80] sm:$0xff]  ;;  %v19845_v5 = vpack.c.bf16 %v11853_v18, %v11852_v35  ;;  %v11537_v35 = vld [vmem:[%s28315_s2 + $0x168] sm:$0xff]  ;;  %v11862_v18 = vld [vmem:[%s28316_s7 + $0xf0] sm:$0xff] }
 0xad9   :  { %19828 = vmatprep.subr.bf16.mxu0 %v28340_v2 }
 0xadb   :  { %11402 = vmatmul.mubr.f32.gmra.mrb[134].mxu0 %v11190_v16  ;;  %v11837_v16 = vld [vmem:[%s28316_s7 + $0x28] sm:$0xff] }
 0xadc   :  { %19830 = vmatpush1.bf16.msra.mxu0 %v26376_v38  ;;  %13736 = vmatprep.mubr.msk.f32.mxu0 %vm11226_vm0, %v11193_v11  ;;  %v11205_v38 = vld [vmem:[%s28313_s1 + $0xe8] sm:$0xff] }
 0xadd   :  { %19831 = vmatprep.subr.bf16.mxu0 %v28340_v2  ;;  %v11505_v11 = vld [vmem:[%s28315_s2 + $0x68] sm:$0xff] }
 0xadf   :  { %11407 = vmatmul.mubr.f32.gmra.mrb[136].mxu0 %v11192_v31  ;;  %v19847_v31 = vpack.c.bf16 %v11837_v16, %v11836_v22  ;;  %v11863_v22 = vld [vmem:[%s28316_s7 + $0xf8] sm:$0xff] }
 0xae0   :  { %19833 = vmatpush1.bf16.msra.mxu0 %v26388_v44  ;;  %13737 = vmatprep.mubr.msk.f32.mxu0 %vm11226_vm0, %v11195_v45  ;;  %v11224_v44 = vld [vmem:[%s28313_s1 + $0x180] sm:$0xff]  ;;  %v19865_v16 = vpack.c.bf16 %v11863_v22, %v11862_v18 }
 0xae1   :  { %19834 = vmatprep.subr.bf16.mxu0 %v28340_v2  ;;  %v11504_v45 = vld [vmem:[%s28315_s2 + $0x60] sm:$0xff]  ;;  %v11961_v2 = vld [vmem:[%s28316_s7 + $0x408] sm:$0xff] }
 0xae3   :  { %11412 = vmatmul.mubr.f32.gmra.mrb[138].mxu0 %v11194_v8  ;;  %v11507_v8 = vld [vmem:[%s28315_s2 + $0x78] sm:$0xff] }
 0xae4   :  { %19836 = vmatpush1.bf16.msra.mxu0 %v19805_v47  ;;  %13738 = vmatprep.mubr.msk.f32.mxu0 %vm11226_vm0, %v11197_v27  ;;  %v11834_v47 = vld [vmem:[%s28316_s7 + $0x10] sm:$0xff] }
 0xae5   :  { %19838 = vmatprep.subr.bf16.mxu0 %v19837_v57  ;;  %v19843_v51 = vpack.c.bf16 %v11835_v42, %v11834_v47  ;;  %v11506_v27 = vld [vmem:[%s28315_s2 + $0x70] sm:$0xff]  ;;  %v11843_v57 = vld [vmem:[%s28316_s7 + $0x58] sm:$0xff]  ;;  %v11844_v47 = vld [vmem:[%s28316_s7 + $0x60] sm:$0xff] }
 0xae6   :  { %v11528_v42 = vld [vmem:[%s28315_s2 + $0x120] sm:$0xff] }
 0xae7   :  { %11417 = vmatmul.mubr.f32.gmra.mrb[140].mxu0 %v11196_v10  ;;  %v11509_v10 = vld [vmem:[%s28315_s2 + $0x88] sm:$0xff] }
 0xae8   :  { %13739 = vmatprep.mubr.msk.f32.mxu0 %vm11226_vm0, %v11199_v26  ;;  %v11854_v26 = vld [vmem:[%s28316_s7 + $0xb0] sm:$0xff] }
 0xaeb   :  { %11422 = vmatmul.mubr.f32.gmra.mrb[142].mxu0 %v11198_v12  ;;  %v11855_v12 = vld [vmem:[%s28316_s7 + $0xb8] sm:$0xff] }
 0xaec   :  { %13740 = vmatprep.mubr.msk.f32.mxu0 %vm11226_vm0, %v11201_v54  ;;  %v11838_v54 = vld [vmem:[%s28316_s7 + $0x30] sm:$0xff] }
 0xaef   :  { %11427 = vmatmul.mubr.f32.gmra.mrb[144].mxu0 %v11200_v1  ;;  %v11508_v1 = vld [vmem:[%s28315_s2 + $0x80] sm:$0xff] }
 0xaf0   :  { %13741 = vmatprep.mubr.msk.f32.mxu0 %vm11226_vm0, %v11203_v61  ;;  %v19849_v61 = vpack.c.bf16 %v11855_v12, %v11854_v26  ;;  %v11881_v26 = vld [vmem:[%s28316_s7 + $0x188] sm:$0xff] }
 0xaf3   :  { %11432 = vmatmul.mubr.f32.gmra.mrb[146].mxu0 %v11202_v20  ;;  %v11839_v20 = vld [vmem:[%s28316_s7 + $0x38] sm:$0xff] }
 0xaf4   :  { %13742 = vmatprep.mubr.msk.f32.mxu0 %vm11226_vm0, %v11205_v38  ;;  %v11511_v38 = vld [vmem:[%s28315_s2 + $0x98] sm:$0xff] }
 0xaf7   :  { %11437 = vmatmul.mubr.f32.gmra.mrb[148].mxu0 %v11204_v49  ;;  %v19851_v49 = vpack.c.bf16 %v11839_v20, %v11838_v54  ;;  %v11540_v54 = vld [vmem:[%s28315_s2 + $0x180] sm:$0xff] }
 0xaf8   :  { %13743 = vmatprep.mubr.msk.f32.mxu0 %vm11226_vm0, %v11207_v7  ;;  %v11510_v7 = vld [vmem:[%s28315_s2 + $0x90] sm:$0xff] }
 0xafb   :  { %11442 = vmatmul.mubr.f32.gmra.mrb[150].mxu0 %v11206_v32  ;;  %v11513_v32 = vld [vmem:[%s28315_s2 + $0xa8] sm:$0xff] }
 0xafc   :  { %13744 = vmatprep.mubr.msk.f32.mxu0 %vm11226_vm0, %v11209_v14  ;;  %v11512_v14 = vld [vmem:[%s28315_s2 + $0xa0] sm:$0xff] }
 0xaff   :  { %11447 = vmatmul.mubr.f32.gmra.mrb[152].mxu0 %v11208_v23  ;;  %v11515_v23 = vld [vmem:[%s28315_s2 + $0xb8] sm:$0xff] }
 0xb00   :  { %13745 = vmatprep.mubr.msk.f32.mxu0 %vm11226_vm0, %v11211_v60  ;;  %v11856_v60 = vld [vmem:[%s28316_s7 + $0xc0] sm:$0xff] }
 0xb03   :  { %11452 = vmatmul.mubr.f32.gmra.mrb[154].mxu0 %v11210_v43  ;;  %v11857_v43 = vld [vmem:[%s28316_s7 + $0xc8] sm:$0xff] }
 0xb04   :  { %13746 = vmatprep.mubr.msk.f32.mxu0 %vm11226_vm0, %v11213_v34  ;;  %v11840_v34 = vld [vmem:[%s28316_s7 + $0x40] sm:$0xff] }
 0xb07   :  { %11457 = vmatmul.mubr.f32.gmra.mrb[156].mxu0 %v11212_v58  ;;  %v11514_v58 = vld [vmem:[%s28315_s2 + $0xb0] sm:$0xff] }
 0xb08   :  { %13747 = vmatprep.mubr.msk.f32.mxu0 %vm11226_vm0, %v11215_v48  ;;  %v19853_v48 = vpack.c.bf16 %v11857_v43, %v11856_v60 }
 0xb0b   :  { %11462 = vmatmul.mubr.f32.gmra.mrb[158].mxu0 %v11214_v24  ;;  %v11841_v24 = vld [vmem:[%s28316_s7 + $0x48] sm:$0xff] }
 0xb0c   :  { %13748 = vmatprep.mubr.msk.f32.mxu0 %vm11226_vm0, %v11217_v52  ;;  %v11517_v52 = vld [vmem:[%s28315_s2 + $0xc8] sm:$0xff] }
 0xb0f   :  { %11467 = vmatmul.mubr.f32.gmra.mrb[160].mxu0 %v11216_v4  ;;  %v19855_v4 = vpack.c.bf16 %v11841_v24, %v11840_v34 }
 0xb10   :  { %13749 = vmatprep.mubr.msk.f32.mxu0 %vm11226_vm0, %v11219_v30  ;;  %v11516_v30 = vld [vmem:[%s28315_s2 + $0xc0] sm:$0xff] }
 0xb13   :  { %11472 = vmatmul.mubr.f32.gmra.mrb[162].mxu0 %v11218_v37  ;;  %v11519_v37 = vld [vmem:[%s28315_s2 + $0xd8] sm:$0xff] }
 0xb14   :  { %13750 = vmatprep.mubr.msk.f32.mxu0 %vm11226_vm0, %v11221_v13  ;;  %v11518_v13 = vld [vmem:[%s28315_s2 + $0xd0] sm:$0xff] }
 0xb17   :  { %11477 = vmatmul.mubr.f32.gmra.mrb[164].mxu0 %v11220_v3  ;;  %v11521_v3 = vld [vmem:[%s28315_s2 + $0xe8] sm:$0xff] }
 0xb18   :  { %13751 = vmatprep.mubr.msk.f32.mxu0 %vm11226_vm0, %v11223_v0  ;;  %v11858_v0 = vld [vmem:[%s28316_s7 + $0xd0] sm:$0xff] }
 0xb1b   :  { %11482 = vmatmul.mubr.f32.gmra.mrb[166].mxu0 %v11222_v63  ;;  %v11859_v63 = vld [vmem:[%s28316_s7 + $0xd8] sm:$0xff] }
 0xb1c   :  { %13752 = vmatprep.mubr.msk.f32.mxu0 %vm11226_vm0, %v11225_v17  ;;  %v11520_v17 = vld [vmem:[%s28315_s2 + $0xe0] sm:$0xff]  ;;  %v19857_v39 = vpack.c.bf16 %v11859_v63, %v11858_v0 }
 0xb1f   :  { %11487 = vmatmul.mubr.f32.gmra.mrb[168].mxu0 %v11224_v44  ;;  %v11842_v44 = vld [vmem:[%s28316_s7 + $0x50] sm:$0xff] }
 0xb20   :  { %13753 = vmatprep.mubr.msk.f32.mxu0 %vm11226_vm0, %v11493_v59  ;;  %v19859_v59 = vpack.c.bf16 %v11843_v57, %v11842_v44 }
 0xb23   :  { %11682 = vmatmul.mubr.f32.vlgmr.msra.gmra.mrb[170].mxu0 %v11492_v29  ;;  %v11524_v29 = vld [vmem:[%s28315_s2 + $0x100] sm:$0xff] }
 0xb24   :  { %13754 = vmatprep.mubr.msk.f32.mxu0 %vm11226_vm0, %v11495_v40  ;;  %19840 = vmatpush3.bf16.msra.mxu0 %v19839_v28  ;;  %v11527_v28 = vld [vmem:[%s28315_s2 + $0x118] sm:$0xff]  ;;  %v11860_v40 = vld [vmem:[%s28316_s7 + $0xe0] sm:$0xff] }
 0xb25   :  { %19842 = vmatprep.subr.bf16.mxu0 %v19841_v41 }
 0xb27   :  { %11687 = vmatmul.mubr.f32.gmra.mrb[172].mxu0 %v11494_v25  ;;  %v11861_v25 = vld [vmem:[%s28316_s7 + $0xe8] sm:$0xff] }
 0xb28   :  { %13755 = vmatprep.mubr.msk.f32.mxu0 %vm11226_vm0, %v11497_v15  ;;  %19844 = vmatpush3.bf16.msra.mxu0 %v19843_v51  ;;  %v11526_v15 = vld [vmem:[%s28315_s2 + $0x110] sm:$0xff]  ;;  %v19861_v56 = vpack.c.bf16 %v11861_v25, %v11860_v40 }
 0xb29   :  { %19846 = vmatprep.subr.bf16.mxu0 %v19845_v5  ;;  %v11530_v51 = vld [vmem:[%s28315_s2 + $0x130] sm:$0xff]  ;;  %v11536_v5 = vld [vmem:[%s28315_s2 + $0x160] sm:$0xff] }
 0xb2b   :  { %11692 = vmatmul.mubr.f32.gmra.mrb[174].mxu0 %v11496_v21  ;;  %v11845_v21 = vld [vmem:[%s28316_s7 + $0x68] sm:$0xff] }
 0xb2c   :  { %13756 = vmatprep.mubr.msk.f32.mxu0 %vm11226_vm0, %v11499_v50  ;;  %19848 = vmatpush3.bf16.msra.mxu0 %v19847_v31  ;;  %v19863_v41 = vpack.c.bf16 %v11845_v21, %v11844_v47  ;;  %v11531_v50 = vld [vmem:[%s28315_s2 + $0x138] sm:$0xff] }
 0xb2d   :  { %19850 = vmatprep.subr.bf16.mxu0 %v19849_v61  ;;  %v11539_v31 = vld [vmem:[%s28315_s2 + $0x178] sm:$0xff] }
 0xb2f   :  { %11697 = vmatmul.mubr.f32.gmra.mrb[176].mxu0 %v11498_v53  ;;  %v11533_v53 = vld [vmem:[%s28315_s2 + $0x148] sm:$0xff] }
 0xb30   :  { %13757 = vmatprep.mubr.msk.f32.mxu0 %vm11226_vm0, %v11501_v36  ;;  %19852 = vmatpush3.bf16.msra.mxu0 %v19851_v49  ;;  %v11532_v36 = vld [vmem:[%s28315_s2 + $0x140] sm:$0xff] }
 0xb31   :  { %19854 = vmatprep.subr.bf16.mxu0 %v19853_v48 }
 0xb33   :  { %11702 = vmatmul.mubr.f32.gmra.mrb[178].mxu0 %v11500_v33  ;;  %v11535_v33 = vld [vmem:[%s28315_s2 + $0x158] sm:$0xff] }
 0xb34   :  { %13758 = vmatprep.mubr.msk.f32.mxu0 %vm11226_vm0, %v11503_v6  ;;  %19856 = vmatpush3.bf16.msra.mxu0 %v19855_v4  ;;  %v11534_v6 = vld [vmem:[%s28315_s2 + $0x150] sm:$0xff] }
 0xb35   :  { %19858 = vmatprep.subr.bf16.mxu0 %v19857_v39 }
 0xb37   :  { %11707 = vmatmul.mubr.f32.gmra.mrb[180].mxu0 %v11502_v19  ;;  %v11846_v19 = vld [vmem:[%s28316_s7 + $0x70] sm:$0xff] }
 0xb38   :  { %13759 = vmatprep.mubr.msk.f32.mxu0 %vm11226_vm0, %v11505_v11  ;;  %19860 = vmatpush3.bf16.msra.mxu0 %v19859_v59  ;;  %v11847_v11 = vld [vmem:[%s28316_s7 + $0x78] sm:$0xff] }
 0xb39   :  { %19862 = vmatprep.subr.bf16.mxu0 %v19861_v56 }
 0xb3b   :  { %11712 = vmatmul.mubr.f32.gmra.mrb[182].mxu0 %v11504_v45  ;;  %v19867_v45 = vpack.c.bf16 %v11847_v11, %v11846_v19  ;;  %v11865_v11 = vld [vmem:[%s28316_s7 + $0x108] sm:$0xff] }
 0xb3c   :  { %13760 = vmatprep.mubr.msk.f32.mxu0 %vm11226_vm0, %v11507_v8  ;;  %19864 = vmatpush3.bf16.msra.mxu0 %v19863_v41  ;;  %v11538_v8 = vld [vmem:[%s28315_s2 + $0x170] sm:$0xff] }
 0xb3d   :  { %19866 = vmatprep.subr.bf16.mxu0 %v19865_v16  ;;  %v11864_v16 = vld [vmem:[%s28316_s7 + $0x100] sm:$0xff] }
 0xb3f   :  { %11717 = vmatmul.mubr.f32.gmra.mrb[184].mxu0 %v11506_v27  ;;  %v11541_v27 = vld [vmem:[%s28315_s2 + $0x188] sm:$0xff] }
 0xb40   :  { %13761 = vmatprep.mubr.msk.f32.mxu0 %vm11226_vm0, %v11509_v10  ;;  %19868 = vmatpush3.bf16.msra.mxu0 %v19867_v45  ;;  %v11880_v10 = vld [vmem:[%s28316_s7 + $0x180] sm:$0xff]  ;;  %v11883_v45 = vld [vmem:[%s28316_s7 + $0x198] sm:$0xff] }
 0xb41   :  { %v19869_v12 = vpack.c.bf16 %v11881_v26, %v11880_v10  ;;  %v19871_v26 = vpack.c.bf16 %v11865_v11, %v11864_v16 }
 0xb43   :  { %11722 = vmatmul.mubr.f32.gmra.mrb[186].mxu0 %v11508_v1  ;;  %19870 = vmatprep.subr.bf16.mxu0 %v19869_v12 }
 0xb44   :  { %13762 = vmatprep.mubr.msk.f32.mxu0 %vm11226_vm0, %v11511_v38 }
 0xb47   :  { %11727 = vmatmul.mubr.f32.gmra.mrb[188].mxu0 %v11510_v7 }
 0xb48   :  { %13763 = vmatprep.mubr.msk.f32.mxu0 %vm11226_vm0, %v11513_v32 }
 0xb4b   :  { %11732 = vmatmul.mubr.f32.gmra.mrb[190].mxu0 %v11512_v14 }
 0xb4c   :  { %13764 = vmatprep.mubr.msk.f32.mxu0 %vm11226_vm0, %v11515_v23 }
 0xb4f   :  { %11737 = vmatmul.mubr.f32.gmra.mrb[192].mxu0 %v11514_v58 }
 0xb50   :  { %13765 = vmatprep.mubr.msk.f32.mxu0 %vm11226_vm0, %v11517_v52 }
 0xb53   :  { %11742 = vmatmul.mubr.f32.gmra.mrb[194].mxu0 %v11516_v30 }
 0xb54   :  { %13766 = vmatprep.mubr.msk.f32.mxu0 %vm11226_vm0, %v11519_v37 }
 0xb57   :  { %11747 = vmatmul.mubr.f32.gmra.mrb[196].mxu0 %v11518_v13 }
 0xb58   :  { %13767 = vmatprep.mubr.msk.f32.mxu0 %vm11226_vm0, %v11521_v3 }
 0xb5b   :  { %11752 = vmatmul.mubr.f32.gmra.mrb[198].mxu0 %v11520_v17 }
 0xb5c   :  { %13768 = vmatprep.mubr.msk.f32.mxu0 %vm11226_vm0, %v11523_v55 }
 0xb5f   :  { %11757 = vmatmul.mubr.f32.gmra.mrb[200].mxu0 %v11522_v46 }
 0xb60   :  { %13769 = vmatprep.mubr.msk.f32.mxu0 %vm11226_vm0, %v11525_v9 }
 0xb63   :  { %11762 = vmatmul.mubr.f32.gmra.mrb[202].mxu0 %v11524_v29 }
 0xb64   :  { %13770 = vmatprep.mubr.msk.f32.mxu0 %vm11226_vm0, %v11527_v28 }
 0xb67   :  { %11767 = vmatmul.mubr.f32.gmra.mrb[204].mxu0 %v11526_v15 }
 0xb68   :  { %13771 = vmatprep.mubr.msk.f32.mxu0 %vm11226_vm0, %v11529_v62 }
 0xb6b   :  { %11772 = vmatmul.mubr.f32.gmra.mrb[206].mxu0 %v11528_v42 }
 0xb6c   :  { %13772 = vmatprep.mubr.msk.f32.mxu0 %vm11226_vm0, %v11531_v50 }
 0xb6f   :  { %11777 = vmatmul.mubr.f32.gmra.mrb[208].mxu0 %v11530_v51 }
 0xb70   :  { %13773 = vmatprep.mubr.msk.f32.mxu0 %vm11226_vm0, %v11533_v53 }
 0xb73   :  { %11782 = vmatmul.mubr.f32.gmra.mrb[210].mxu0 %v11532_v36 }
 0xb74   :  { %13774 = vmatprep.mubr.msk.f32.mxu0 %vm11226_vm0, %v11535_v33 }
 0xb77   :  { %11787 = vmatmul.mubr.f32.gmra.mrb[212].mxu0 %v11534_v6 }
 0xb78   :  { %13775 = vmatprep.mubr.msk.f32.mxu0 %vm11226_vm0, %v11537_v35 }
 0xb7b   :  { %11792 = vmatmul.mubr.f32.gmra.mrb[214].mxu0 %v11536_v5 }
 0xb7c   :  { %13776 = vmatprep.mubr.msk.f32.mxu0 %vm11226_vm0, %v11539_v31  ;;  %v11882_v31 = vld [vmem:[%s28316_s7 + $0x190] sm:$0xff] }
 0xb7d   :  { %v19873_v12 = vpack.c.bf16 %v11883_v45, %v11882_v31 }
 0xb7f   :  { %11797 = vmatmul.mubr.f32.gmra.mrb[216].mxu0 %v11538_v8 }
 0xb80   :  { %13777 = vmatprep.mubr.msk.f32.mxu0 %vm11226_vm0, %v11541_v27 }
 0xb83   :  { %11802 = vmatmul.mubr.f32.gmra.mrb[218].mxu0 %v11540_v54  ;;  %v11866_v54 = vld [vmem:[%s28316_s7 + $0x110] sm:$0xff] }
 0xb92   :  { %v26863_v1 = vpop.f32.mrb[120].mxu0 }
 0xb93   :  { %v11370_v61 = vpop.f32.mrb[121].mxu0 }
 0xb94   :  { %v11884_v61 = vld [vmem:[%s28316_s7 + $0x1a0] sm:$0xff] }
 0xb96   :  { %v11373_v20 = vpop.f32.mrb[122].mxu0 }
 0xb97   :  { %v11375_v38 = vpop.f32.mrb[123].mxu0 }
 0xb9a   :  { %v26865_v49 = vpop.f32.mrb[124].mxu0 }
 0xb9b   :  { %v11380_v7 = vpop.f32.mrb[125].mxu0 }
 0xb9e   :  { %v26867_v32 = vpop.f32.mrb[126].mxu0 }
 0xb9f   :  { %v11385_v14 = vpop.f32.mrb[127].mxu0 }
 0xba2   :  { %v26869_v23 = vpop.f32.mrb[128].mxu0 }
 0xba3   :  { %v11390_v60 = vpop.f32.mrb[129].mxu0 }
 0xba6   :  { %v26871_v43 = vpop.f32.mrb[130].mxu0 }
 0xba7   :  { %v11395_v34 = vpop.f32.mrb[131].mxu0 }
 0xbaa   :  { %v26873_v58 = vpop.f32.mrb[132].mxu0 }
 0xbab   :  { %v11400_v48 = vpop.f32.mrb[133].mxu0 }
 0xbac   :  { %v11868_v48 = vld [vmem:[%s28316_s7 + $0x120] sm:$0xff] }
 0xbae   :  { %v26875_v24 = vpop.f32.mrb[134].mxu0 }
 0xbaf   :  { %v11405_v52 = vpop.f32.mrb[135].mxu0 }
 0xbb0   :  { %v11869_v52 = vld [vmem:[%s28316_s7 + $0x128] sm:$0xff] }
 0xbb2   :  { %v26877_v4 = vpop.f32.mrb[136].mxu0 }
 0xbb3   :  { %v11410_v30 = vpop.f32.mrb[137].mxu0 }
 0xbb4   :  { %v11886_v30 = vld [vmem:[%s28316_s7 + $0x1b0] sm:$0xff] }
 0xbb6   :  { %v26879_v37 = vpop.f32.mrb[138].mxu0 }
 0xbb7   :  { %v11415_v13 = vpop.f32.mrb[139].mxu0 }
 0xbb8   :  { %v11887_v13 = vld [vmem:[%s28316_s7 + $0x1b8] sm:$0xff] }
 0xbba   :  { %v26881_v3 = vpop.f32.mrb[140].mxu0 }
 0xbbb   :  { %v11420_v0 = vpop.f32.mrb[141].mxu0 }
 0xbbe   :  { %v26883_v63 = vpop.f32.mrb[142].mxu0 }
 0xbbf   :  { %v11425_v17 = vpop.f32.mrb[143].mxu0 }
 0xbc2   :  { %v26885_v39 = vpop.f32.mrb[144].mxu0 }
 0xbc3   :  { %v11430_v55 = vpop.f32.mrb[145].mxu0 }
 0xbc6   :  { %v26887_v44 = vpop.f32.mrb[146].mxu0 }
 0xbc7   :  { %v11435_v57 = vpop.f32.mrb[147].mxu0 }
 0xbc8   :  { %v19879_v57 = vpack.c.bf16 %v11869_v52, %v11868_v48 }
 0xbca   :  { %v26889_v59 = vpop.f32.mrb[148].mxu0 }
 0xbcb   :  { %v11440_v46 = vpop.f32.mrb[149].mxu0 }
 0xbcc   :  { %v19881_v46 = vpack.c.bf16 %v11887_v13, %v11886_v30 }
 0xbce   :  { %v26891_v9 = vpop.f32.mrb[150].mxu0 }
 0xbcf   :  { %v11445_v29 = vpop.f32.mrb[151].mxu0 }
 0xbd0   :  { %v11870_v29 = vld [vmem:[%s28316_s7 + $0x130] sm:$0xff] }
 0xbd2   :  { %v26893_v28 = vpop.f32.mrb[152].mxu0 }
 0xbd3   :  { %v11450_v40 = vpop.f32.mrb[153].mxu0 }
 0xbd4   :  { %v11871_v40 = vld [vmem:[%s28316_s7 + $0x138] sm:$0xff] }
 0xbd6   :  { %v26895_v25 = vpop.f32.mrb[154].mxu0 }
 0xbd7   :  { %v11455_v15 = vpop.f32.mrb[155].mxu0 }
 0xbd8   :  { %v11888_v15 = vld [vmem:[%s28316_s7 + $0x1c0] sm:$0xff] }
 0xbda   :  { %v26897_v56 = vpop.f32.mrb[156].mxu0 }
 0xbdb   :  { %v11460_v62 = vpop.f32.mrb[157].mxu0 }
 0xbde   :  { %v26899_v47 = vpop.f32.mrb[158].mxu0 }
 0xbdf   :  { %v11465_v21 = vpop.f32.mrb[159].mxu0 }
 0xbe2   :  { %v26901_v41 = vpop.f32.mrb[160].mxu0 }
 0xbe3   :  { %v11470_v42 = vpop.f32.mrb[161].mxu0 }
 0xbe6   :  { %v26903_v50 = vpop.f32.mrb[162].mxu0 }
 0xbe7   :  { %v11475_v51 = vpop.f32.mrb[163].mxu0 }
 0xbe8   :  { %v19883_v51 = vpack.c.bf16 %v11871_v40, %v11870_v29 }
 0xbea   :  { %v26905_v53 = vpop.f32.mrb[164].mxu0 }
 0xbeb   :  { %v11480_v36 = vpop.f32.mrb[165].mxu0 }
 0xbee   :  { %v26907_v33 = vpop.f32.mrb[166].mxu0 }
 0xbef   :  { %v11485_v6 = vpop.f32.mrb[167].mxu0 }
 0xbf0   :  { %v11872_v6 = vld [vmem:[%s28316_s7 + $0x140] sm:$0xff] }
 0xbf2   :  { %v26909_v35 = vpop.f32.mrb[168].mxu0 }
 0xbf3   :  { %v11490_v18 = vpop.f32.mrb[169].mxu0 }
 0xbf4   :  { %v11873_v18 = vld [vmem:[%s28316_s7 + $0x148] sm:$0xff] }
 0xbf5   :  { %v19887_v31 = vpack.c.bf16 %v11873_v18, %v11872_v6  ;;  %v11914_v6 = vld [vmem:[%s28316_s7 + $0x290] sm:$0xff]  ;;  %v11915_v18 = vld [vmem:[%s28316_s7 + $0x298] sm:$0xff] }
 0xbf6   :  { %v11683_v22 = vpop.f32.mrb[170].mxu0 }
 0xbf7   :  { %v11807_v19 = vmax.f32 %v26863_v1, %v11683_v22  ;;  %v11685_v5 = vpop.f32.mrb[171].mxu0  ;;  %v11867_v1 = vld [vmem:[%s28316_s7 + $0x118] sm:$0xff]  ;;  %v11890_v22 = vld [vmem:[%s28316_s7 + $0x1d0] sm:$0xff] }
 0xbf8   :  { %v19875_v60 = vpack.c.bf16 %v11867_v1, %v11866_v54 }
 0xbfa   :  { %v11688_v8 = vpop.f32.mrb[172].mxu0 }
 0xbfb   :  { %v11808_v27 = vmax.f32 %v11373_v20, %v11688_v8  ;;  %v11690_v10 = vpop.f32.mrb[173].mxu0  ;;  %v11885_v20 = vld [vmem:[%s28316_s7 + $0x1a8] sm:$0xff]  ;;  %v11874_v8 = vld [vmem:[%s28316_s7 + $0x150] sm:$0xff] }
 0xbfc   :  { %v19877_v34 = vpack.c.bf16 %v11885_v20, %v11884_v61  ;;  %v11892_v10 = vld [vmem:[%s28316_s7 + $0x1e0] sm:$0xff] }
 0xbfd   :  { %12303 = vmatprep.mubr.f32.mxu0 %v11808_v27  ;;  %v11875_v27 = vld [vmem:[%s28316_s7 + $0x158] sm:$0xff]  ;;  %v11876_v20 = vld [vmem:[%s28316_s7 + $0x160] sm:$0xff] }
 0xbfe   :  { %v26936_v38 = vpop.f32.mrb[174].mxu0  ;;  %12304 = vmatmul.mubr.f32.vlgmr.msra.gmra.mrb[220].mxu0 %v11807_v19  ;;  %v11891_v19 = vld [vmem:[%s28316_s7 + $0x1d8] sm:$0xff]  ;;  %v19891_v1 = vpack.c.bf16 %v11875_v27, %v11874_v8  ;;  %v11916_v27 = vld [vmem:[%s28316_s7 + $0x2a0] sm:$0xff] }
 0xbff   :  { %v11809_v7 = vmax.f32 %v26865_v49, %v26936_v38  ;;  %19872 = vmatpush3.bf16.msra.mxu0 %v19871_v26  ;;  %v11695_v14 = vpop.f32.mrb[175].mxu0  ;;  %v19889_v45 = vpack.c.bf16 %v11891_v19, %v11890_v22  ;;  %v11899_v8 = vld [vmem:[%s28316_s7 + $0x218] sm:$0xff]  ;;  %v11901_v49 = vld [vmem:[%s28316_s7 + $0x228] sm:$0xff]  ;;  %v11918_v38 = vld [vmem:[%s28316_s7 + $0x2b0] sm:$0xff] }
 0xc00   :  { %19874 = vmatprep.subr.bf16.mxu0 %v19873_v12  ;;  %v11877_v14 = vld [vmem:[%s28316_s7 + $0x168] sm:$0xff] }
 0xc01   :  { %v19895_v13 = vpack.c.bf16 %v11877_v14, %v11876_v20  ;;  %v11900_v14 = vld [vmem:[%s28316_s7 + $0x220] sm:$0xff] }
 0xc02   :  { %v11698_v0 = vpop.f32.mrb[176].mxu0 }
 0xc03   :  { %v11810_v17 = vmax.f32 %v26867_v32, %v11698_v0  ;;  %19876 = vmatpush3.bf16.msra.mxu0 %v19875_v60  ;;  %v11700_v55 = vpop.f32.mrb[177].mxu0  ;;  %v11889_v32 = vld [vmem:[%s28316_s7 + $0x1c8] sm:$0xff]  ;;  %v11894_v60 = vld [vmem:[%s28316_s7 + $0x1f0] sm:$0xff] }
 0xc04   :  { %19878 = vmatprep.subr.bf16.mxu0 %v19877_v34  ;;  %v19885_v36 = vpack.c.bf16 %v11889_v32, %v11888_v15  ;;  %v11895_v34 = vld [vmem:[%s28316_s7 + $0x1f8] sm:$0xff] }
 0xc05   :  { %12373 = vmatprep.mubr.f32.mxu0 %v11810_v17  ;;  %v19897_v0 = vpack.c.bf16 %v11895_v34, %v11894_v60  ;;  %v11878_v17 = vld [vmem:[%s28316_s7 + $0x170] sm:$0xff]  ;;  %v11879_v55 = vld [vmem:[%s28316_s7 + $0x178] sm:$0xff] }
 0xc06   :  { %v26965_v62 = vpop.f32.mrb[178].mxu0  ;;  %v19899_v32 = vpack.c.bf16 %v11879_v55, %v11878_v17  ;;  %v11903_v17 = vld [vmem:[%s28316_s7 + $0x238] sm:$0xff]  ;;  %v11920_v55 = vld [vmem:[%s28316_s7 + $0x2c0] sm:$0xff] }
 0xc07   :  { %v11811_v21 = vmax.f32 %v26869_v23, %v26965_v62  ;;  %19880 = vmatpush3.bf16.msra.mxu0 %v19879_v57  ;;  %v11705_v42 = vpop.f32.mrb[179].mxu0  ;;  %v11912_v57 = vld [vmem:[%s28316_s7 + $0x280] sm:$0xff]  ;;  %v11933_v23 = vld [vmem:[%s28316_s7 + $0x328] sm:$0xff]  ;;  %v11950_v62 = vld [vmem:[%s28316_s7 + $0x3b0] sm:$0xff] }
 0xc08   :  { %19882 = vmatprep.subr.bf16.mxu0 %v19881_v46  ;;  %v11913_v46 = vld [vmem:[%s28316_s7 + $0x288] sm:$0xff] }
 0xc09   :  { %v19901_v42 = vpack.c.bf16 %v11913_v46, %v11912_v57  ;;  %v11921_v57 = vld [vmem:[%s28316_s7 + $0x2c8] sm:$0xff] }
 0xc0a   :  { %v11708_v5 = vpop.f32.mrb[180].mxu0 }
 0xc0b   :  { %v11812_v16 = vmax.f32 %v26871_v43, %v11708_v5  ;;  %19884 = vmatpush3.bf16.msra.mxu0 %v19883_v51  ;;  %v11710_v11 = vpop.f32.mrb[181].mxu0  ;;  %v11893_v43 = vld [vmem:[%s28316_s7 + $0x1e8] sm:$0xff]  ;;  %v11896_v51 = vld [vmem:[%s28316_s7 + $0x200] sm:$0xff] }
 0xc0c   :  { %19886 = vmatprep.subr.bf16.mxu0 %v19885_v36  ;;  %v19893_v61 = vpack.c.bf16 %v11893_v43, %v11892_v10  ;;  %v11897_v36 = vld [vmem:[%s28316_s7 + $0x208] sm:$0xff] }
 0xc0d   :  { %v19903_v11 = vpack.c.bf16 %v11897_v36, %v11896_v51  ;;  %v11917_v10 = vld [vmem:[%s28316_s7 + $0x2a8] sm:$0xff]  ;;  %v19917_v51 = vpack.c.bf16 %v11921_v57, %v11920_v55  ;;  %v11904_v36 = vld [vmem:[%s28316_s7 + $0x240] sm:$0xff] }
 0xc0e   :  { %v26994_v26 = vpop.f32.mrb[182].mxu0  ;;  %v19909_v20 = vpack.c.bf16 %v11917_v10, %v11916_v27  ;;  %v11906_v10 = vld [vmem:[%s28316_s7 + $0x250] sm:$0xff] }
 0xc0f   :  { %v11813_v12 = vmax.f32 %v26873_v58, %v26994_v26  ;;  %19888 = vmatpush3.bf16.msra.mxu0 %v19887_v31  ;;  %v11715_v54 = vpop.f32.mrb[183].mxu0  ;;  %v19905_v31 = vpack.c.bf16 %v11915_v18, %v11914_v6  ;;  %v11905_v6 = vld [vmem:[%s28316_s7 + $0x248] sm:$0xff]  ;;  %v11922_v18 = vld [vmem:[%s28316_s7 + $0x2d0] sm:$0xff] }
 0xc10   :  { %19890 = vmatprep.subr.bf16.mxu0 %v19889_v45  ;;  %v11898_v45 = vld [vmem:[%s28316_s7 + $0x210] sm:$0xff] }
 0xc11   :  { %v11982_v58 = vld [vmem:[%s28316_s7 + $0x4b0] sm:$0xff] }
 0xc12   :  { %v27010_v48 = vpop.f32.mrb[184].mxu0 }
 0xc13   :  { %v11814_v52 = vmax.f32 %v26875_v24, %v27010_v48  ;;  %19892 = vmatpush3.bf16.msra.mxu0 %v19891_v1  ;;  %v11720_v30 = vpop.f32.mrb[185].mxu0  ;;  %v11951_v24 = vld [vmem:[%s28316_s7 + $0x3b8] sm:$0xff] }
 0xc14   :  { %19894 = vmatprep.subr.bf16.mxu0 %v19893_v61  ;;  %v19907_v61 = vpack.c.bf16 %v11899_v8, %v11898_v45  ;;  %v19911_v30 = vpack.c.bf16 %v11901_v49, %v11900_v14  ;;  %v19919_v8 = vpack.c.bf16 %v11905_v6, %v11904_v36  ;;  %v11910_v36 = vld [vmem:[%s28316_s7 + $0x270] sm:$0xff]  ;;  %v11911_v6 = vld [vmem:[%s28316_s7 + $0x278] sm:$0xff] }
 0xc16   :  { %v27026_v29 = vpop.f32.mrb[186].mxu0 }
 0xc17   :  { %v11815_v40 = vmax.f32 %v26877_v4, %v27026_v29  ;;  %19896 = vmatpush3.bf16.msra.mxu0 %v19895_v13  ;;  %v11725_v15 = vpop.f32.mrb[187].mxu0  ;;  %v12014_v4 = vld [vmem:[%s28316_s7 + $0x5b0] sm:$0xff] }
 0xc18   :  { %19898 = vmatprep.subr.bf16.mxu0 %v19897_v0  ;;  %v11902_v0 = vld [vmem:[%s28316_s7 + $0x230] sm:$0xff] }
 0xc1a   :  { %v27042_v22 = vpop.f32.mrb[188].mxu0 }
 0xc1b   :  { %v11816_v19 = vmax.f32 %v26879_v37, %v27042_v22  ;;  %19900 = vmatpush3.bf16.msra.mxu0 %v19899_v32  ;;  %v11730_v5 = vpop.f32.mrb[189].mxu0  ;;  %v11983_v37 = vld [vmem:[%s28316_s7 + $0x4b8] sm:$0xff]  ;;  %v11966_v22 = vld [vmem:[%s28316_s7 + $0x430] sm:$0xff] }
 0xc1c   :  { %19902 = vmatprep.subr.bf16.mxu0 %v19901_v42  ;;  %v19915_v42 = vpack.c.bf16 %v11903_v17, %v11902_v0  ;;  %v11923_v5 = vld [vmem:[%s28316_s7 + $0x2d8] sm:$0xff]  ;;  %v11926_v0 = vld [vmem:[%s28316_s7 + $0x2f0] sm:$0xff] }
 0xc1d   :  { %v19921_v27 = vpack.c.bf16 %v11923_v5, %v11922_v18  ;;  %v11927_v17 = vld [vmem:[%s28316_s7 + $0x2f8] sm:$0xff]  ;;  %v11944_v18 = vld [vmem:[%s28316_s7 + $0x380] sm:$0xff]  ;;  %v11945_v5 = vld [vmem:[%s28316_s7 + $0x388] sm:$0xff] }
 0xc1e   :  { %12374 = vmatmul.mubr.f32.vlgmr.msra.gmra.mrb[222].mxu0 %v11809_v7  ;;  %v27061_v43 = vpop.f32.mrb[190].mxu0  ;;  %v11919_v7 = vld [vmem:[%s28316_s7 + $0x2b8] sm:$0xff] }
 0xc1f   :  { %v11817_v54 = vmax.f32 %v26881_v3, %v27061_v43  ;;  %19904 = vmatpush3.bf16.msra.mxu0 %v19903_v11  ;;  %12443 = vmatprep.mubr.f32.mxu0 %v11812_v16  ;;  %v11735_v1 = vpop.f32.mrb[191].mxu0  ;;  %v19913_v13 = vpack.c.bf16 %v11919_v7, %v11918_v38  ;;  %v12046_v3 = vld [vmem:[%s28316_s7 + $0x6b0] sm:$0xff] }
 0xc20   :  { %19906 = vmatprep.subr.bf16.mxu0 %v19905_v31  ;;  %v11907_v1 = vld [vmem:[%s28316_s7 + $0x258] sm:$0xff] }
 0xc21   :  { %v19923_v7 = vpack.c.bf16 %v11907_v1, %v11906_v10  ;;  %v19931_v10 = vpack.c.bf16 %v11911_v6, %v11910_v36  ;;  %v19933_v1 = vpack.c.bf16 %v11945_v5, %v11944_v18  ;;  %v11949_v36 = vld [vmem:[%s28316_s7 + $0x3a8] sm:$0xff] }
 0xc22   :  { %v27077_v16 = vpop.f32.mrb[192].mxu0 }
 0xc23   :  { %v11818_v60 = vmax.f32 %v26883_v63, %v27077_v16  ;;  %19908 = vmatpush3.bf16.msra.mxu0 %v19907_v61  ;;  %v11740_v34 = vpop.f32.mrb[193].mxu0  ;;  %v11924_v61 = vld [vmem:[%s28316_s7 + $0x2e0] sm:$0xff]  ;;  %v12015_v63 = vld [vmem:[%s28316_s7 + $0x5b8] sm:$0xff]  ;;  %v11998_v16 = vld [vmem:[%s28316_s7 + $0x530] sm:$0xff] }
 0xc24   :  { %19910 = vmatprep.subr.bf16.mxu0 %v19909_v20  ;;  %v11925_v20 = vld [vmem:[%s28316_s7 + $0x2e8] sm:$0xff] }
 0xc25   :  { %v19925_v34 = vpack.c.bf16 %v11925_v20, %v11924_v61  ;;  %v11928_v61 = vld [vmem:[%s28316_s7 + $0x300] sm:$0xff]  ;;  %v11929_v20 = vld [vmem:[%s28316_s7 + $0x308] sm:$0xff] }
 0xc26   :  { %v27093_v46 = vpop.f32.mrb[194].mxu0 }
 0xc27   :  { %v11819_v15 = vmax.f32 %v26885_v39, %v27093_v46  ;;  %19912 = vmatpush3.bf16.msra.mxu0 %v19911_v30  ;;  %v11745_v32 = vpop.f32.mrb[195].mxu0  ;;  %v11908_v30 = vld [vmem:[%s28316_s7 + $0x260] sm:$0xff]  ;;  %v12078_v39 = vld [vmem:[%s28316_s7 + $0x7b0] sm:$0xff] }
 0xc28   :  { %19914 = vmatprep.subr.bf16.mxu0 %v19913_v13  ;;  %v11909_v13 = vld [vmem:[%s28316_s7 + $0x268] sm:$0xff] }
 0xc2a   :  { %v27109_v11 = vpop.f32.mrb[196].mxu0 }
 0xc2b   :  { %v11820_v31 = vmax.f32 %v26887_v44, %v27109_v11  ;;  %19916 = vmatpush3.bf16.msra.mxu0 %v19915_v42  ;;  %v11750_v45 = vpop.f32.mrb[197].mxu0  ;;  %v19927_v42 = vpack.c.bf16 %v11909_v13, %v11908_v30  ;;  %v12047_v44 = vld [vmem:[%s28316_s7 + $0x6b8] sm:$0xff]  ;;  %v12030_v11 = vld [vmem:[%s28316_s7 + $0x630] sm:$0xff] }
 0xc2c   :  { %19918 = vmatprep.subr.bf16.mxu0 %v19917_v51  ;;  %v19929_v51 = vpack.c.bf16 %v11927_v17, %v11926_v0  ;;  %v19935_v0 = vpack.c.bf16 %v11929_v20, %v11928_v61  ;;  %v19945_v20 = vpack.c.bf16 %v11951_v24, %v11950_v62 }
 0xc2e   :  { %v27125_v14 = vpop.f32.mrb[198].mxu0 }
 0xc2f   :  { %v11821_v49 = vmax.f32 %v26889_v59, %v27125_v14  ;;  %19920 = vmatpush3.bf16.msra.mxu0 %v19919_v8  ;;  %v11755_v38 = vpop.f32.mrb[199].mxu0  ;;  %v12110_v59 = vld [vmem:[%s28316_s7 + $0x8b0] sm:$0xff] }
 0xc30   :  { %19922 = vmatprep.subr.bf16.mxu0 %v19921_v27  ;;  %v11946_v38 = vld [vmem:[%s28316_s7 + $0x390] sm:$0xff] }
 0xc32   :  { %v27141_v55 = vpop.f32.mrb[200].mxu0 }
 0xc33   :  { %v11822_v57 = vmax.f32 %v26891_v9, %v27141_v55  ;;  %19924 = vmatpush3.bf16.msra.mxu0 %v19923_v7  ;;  %v11760_v32 = vpop.f32.mrb[201].mxu0  ;;  %v11947_v7 = vld [vmem:[%s28316_s7 + $0x398] sm:$0xff]  ;;  %v12062_v55 = vld [vmem:[%s28316_s7 + $0x730] sm:$0xff] }
 0xc34   :  { %19926 = vmatprep.subr.bf16.mxu0 %v19925_v34  ;;  %v19937_v17 = vpack.c.bf16 %v11947_v7, %v11946_v38  ;;  %v11930_v32 = vld [vmem:[%s28316_s7 + $0x310] sm:$0xff]  ;;  %v11935_v7 = vld [vmem:[%s28316_s7 + $0x338] sm:$0xff] }
 0xc35   :  { %v11934_v38 = vld [vmem:[%s28316_s7 + $0x330] sm:$0xff]  ;;  %v12079_v9 = vld [vmem:[%s28316_s7 + $0x7b8] sm:$0xff] }
 0xc36   :  { %v27157_v45 = vpop.f32.mrb[202].mxu0 }
 0xc37   :  { %v11823_v8 = vmax.f32 %v26893_v28, %v27157_v45  ;;  %19928 = vmatpush3.bf16.msra.mxu0 %v19927_v42  ;;  %v11765_v27 = vpop.f32.mrb[203].mxu0  ;;  %v11931_v42 = vld [vmem:[%s28316_s7 + $0x318] sm:$0xff]  ;;  %v12142_v28 = vld [vmem:[%s28316_s7 + $0x9b0] sm:$0xff] }
 0xc38   :  { %19930 = vmatprep.subr.bf16.mxu0 %v19929_v51  ;;  %v11948_v51 = vld [vmem:[%s28316_s7 + $0x3a0] sm:$0xff]  ;;  %v19939_v27 = vpack.c.bf16 %v11931_v42, %v11930_v32 }
 0xc3a   :  { %v27173_v34 = vpop.f32.mrb[204].mxu0 }
 0xc3b   :  { %v11824_v30 = vmax.f32 %v26895_v25, %v27173_v34  ;;  %19932 = vmatpush3.bf16.msra.mxu0 %v19931_v10  ;;  %v11770_v13 = vpop.f32.mrb[205].mxu0  ;;  %v19941_v10 = vpack.c.bf16 %v11949_v36, %v11948_v51  ;;  %v19947_v51 = vpack.c.bf16 %v11935_v7, %v11934_v38  ;;  %v11939_v38 = vld [vmem:[%s28316_s7 + $0x358] sm:$0xff]  ;;  %v11956_v7 = vld [vmem:[%s28316_s7 + $0x3e0] sm:$0xff]  ;;  %v12094_v34 = vld [vmem:[%s28316_s7 + $0x830] sm:$0xff] }
 0xc3c   :  { %19934 = vmatprep.subr.bf16.mxu0 %v19933_v1  ;;  %v11932_v1 = vld [vmem:[%s28316_s7 + $0x320] sm:$0xff]  ;;  %v12111_v25 = vld [vmem:[%s28316_s7 + $0x8b8] sm:$0xff] }
 0xc3d   :  { %v19943_v61 = vpack.c.bf16 %v11933_v23, %v11932_v1  ;;  %v11952_v13 = vld [vmem:[%s28316_s7 + $0x3c0] sm:$0xff]  ;;  %v11955_v1 = vld [vmem:[%s28316_s7 + $0x3d8] sm:$0xff] }
 0xc3e   :  { %12444 = vmatmul.mubr.f32.vlgmr.msra.gmra.mrb[224].mxu0 %v11811_v21  ;;  %v27192_v6 = vpop.f32.mrb[206].mxu0 }
 0xc3f   :  { %v11825_v18 = vmax.f32 %v26897_v56, %v27192_v6  ;;  %19936 = vmatpush3.bf16.msra.mxu0 %v19935_v0  ;;  %12513 = vmatprep.mubr.f32.mxu0 %v11814_v52  ;;  %v11775_v5 = vpop.f32.mrb[207].mxu0  ;;  %v11953_v0 = vld [vmem:[%s28316_s7 + $0x3c8] sm:$0xff]  ;;  %v12174_v56 = vld [vmem:[%s28316_s7 + $0xab0] sm:$0xff] }
 0xc40   :  { %19938 = vmatprep.subr.bf16.mxu0 %v19937_v17  ;;  %v19949_v36 = vpack.c.bf16 %v11953_v0, %v11952_v13  ;;  %v11936_v5 = vld [vmem:[%s28316_s7 + $0x340] sm:$0xff]  ;;  %v11957_v13 = vld [vmem:[%s28316_s7 + $0x3e8] sm:$0xff] }
 0xc42   :  { %v27211_v21 = vpop.f32.mrb[208].mxu0 }
 0xc43   :  { %v11826_v48 = vmax.f32 %v26899_v47, %v27211_v21  ;;  %19940 = vmatpush3.bf16.msra.mxu0 %v19939_v27  ;;  %v11780_v52 = vpop.f32.mrb[209].mxu0  ;;  %v11937_v27 = vld [vmem:[%s28316_s7 + $0x348] sm:$0xff]  ;;  %v12143_v47 = vld [vmem:[%s28316_s7 + $0x9b8] sm:$0xff]  ;;  %v12126_v21 = vld [vmem:[%s28316_s7 + $0x930] sm:$0xff] }
 0xc44   :  { %19942 = vmatprep.subr.bf16.mxu0 %v19941_v10  ;;  %v11954_v10 = vld [vmem:[%s28316_s7 + $0x3d0] sm:$0xff]  ;;  %v19951_v52 = vpack.c.bf16 %v11937_v27, %v11936_v5  ;;  %v19957_v5 = vpack.c.bf16 %v11957_v13, %v11956_v7  ;;  %v11940_v27 = vld [vmem:[%s28316_s7 + $0x360] sm:$0xff] }
 0xc45   :  { %v11942_v13 = vld [vmem:[%s28316_s7 + $0x370] sm:$0xff] }
 0xc46   :  { %v27227_v17 = vpop.f32.mrb[210].mxu0 }
 0xc47   :  { %v11827_v32 = vmax.f32 %v26901_v41, %v27227_v17  ;;  %19944 = vmatpush3.bf16.msra.mxu0 %v19943_v61  ;;  %v11785_v42 = vpop.f32.mrb[211].mxu0  ;;  %v19953_v61 = vpack.c.bf16 %v11955_v1, %v11954_v10  ;;  %v11941_v10 = vld [vmem:[%s28316_s7 + $0x368] sm:$0xff]  ;;  %v11958_v1 = vld [vmem:[%s28316_s7 + $0x3f0] sm:$0xff] }
 0xc48   :  { %19946 = vmatprep.subr.bf16.mxu0 %v19945_v20  ;;  %v11938_v20 = vld [vmem:[%s28316_s7 + $0x350] sm:$0xff]  ;;  %v11976_v42 = vld [vmem:[%s28316_s7 + $0x480] sm:$0xff] }
 0xc49   :  { %v12206_v41 = vld [vmem:[%s28316_s7 + $0xbb0] sm:$0xff] }
 0xc4a   :  { %v27243_v23 = vpop.f32.mrb[212].mxu0 }
 0xc4b   :  { %v11828_v62 = vmax.f32 %v26903_v50, %v27243_v23  ;;  %19948 = vmatpush3.bf16.msra.mxu0 %v19947_v51  ;;  %v11790_v24 = vpop.f32.mrb[213].mxu0  ;;  %v12175_v50 = vld [vmem:[%s28316_s7 + $0xab8] sm:$0xff]  ;;  %v12158_v23 = vld [vmem:[%s28316_s7 + $0xa30] sm:$0xff] }
 0xc4c   :  { %19950 = vmatprep.subr.bf16.mxu0 %v19949_v36  ;;  %v19955_v36 = vpack.c.bf16 %v11939_v38, %v11938_v20  ;;  %v11959_v24 = vld [vmem:[%s28316_s7 + $0x3f8] sm:$0xff]  ;;  %v19959_v38 = vpack.c.bf16 %v11941_v10, %v11940_v27 }
 0xc4d   :  { %v19961_v7 = vpack.c.bf16 %v11959_v24, %v11958_v1  ;;  %v11960_v24 = vld [vmem:[%s28316_s7 + $0x400] sm:$0xff] }
 0xc4e   :  { %v27259_v0 = vpop.f32.mrb[214].mxu0 }
 0xc4f   :  { %19952 = vmatpush3.bf16.msra.mxu0 %v19951_v52  ;;  %v11795_v51 = vpop.f32.mrb[215].mxu0 }
 0xc50   :  { %19954 = vmatprep.subr.bf16.mxu0 %v19953_v61  ;;  %v11943_v51 = vld [vmem:[%s28316_s7 + $0x378] sm:$0xff]  ;;  %v11978_v61 = vld [vmem:[%s28316_s7 + $0x490] sm:$0xff] }
 0xc51   :  { %v19963_v27 = vpack.c.bf16 %v11943_v51, %v11942_v13  ;;  %v19967_v13 = vpack.c.bf16 %v11961_v2, %v11960_v24  ;;  %v11963_v51 = vld [vmem:[%s28316_s7 + $0x418] sm:$0xff]  ;;  %v11984_v24 = vld [vmem:[%s28316_s7 + $0x4c0] sm:$0xff] }
 0xc52   :  { %v27275_v52 = vpop.f32.mrb[216].mxu0 }
 0xc53   :  { %19956 = vmatpush3.bf16.msra.mxu0 %v19955_v36  ;;  %v11800_v20 = vpop.f32.mrb[217].mxu0  ;;  %v11977_v36 = vld [vmem:[%s28316_s7 + $0x488] sm:$0xff] }
 0xc54   :  { %19958 = vmatprep.subr.bf16.mxu0 %v19957_v5  ;;  %v19965_v1 = vpack.c.bf16 %v11977_v36, %v11976_v42  ;;  %v11980_v36 = vld [vmem:[%s28316_s7 + $0x4a0] sm:$0xff] }
 0xc56   :  { %v27291_v20 = vpop.f32.mrb[218].mxu0 }
 0xc57   :  { %v11831_v5 = vmax.f32 %v26909_v35, %v27291_v20  ;;  %19960 = vmatpush3.bf16.msra.mxu0 %v19959_v38  ;;  %v11805_v10 = vpop.f32.mrb[219].mxu0  ;;  %v11979_v38 = vld [vmem:[%s28316_s7 + $0x498] sm:$0xff]  ;;  %v13152_v35 = vld [vmem:[%s28318_s9 + $0x10] sm:$0xff] }
 0xc58   :  { %19962 = vmatprep.subr.bf16.mxu0 %v19961_v7  ;;  %v19969_v42 = vpack.c.bf16 %v11979_v38, %v11978_v61  ;;  %v11962_v7 = vld [vmem:[%s28316_s7 + $0x410] sm:$0xff]  ;;  %v11981_v10 = vld [vmem:[%s28316_s7 + $0x4a8] sm:$0xff] }
 0xc59   :  { %v19971_v2 = vpack.c.bf16 %v11963_v51, %v11962_v7  ;;  %v19973_v61 = vpack.c.bf16 %v11981_v10, %v11980_v36  ;;  %v11985_v38 = vld [vmem:[%s28316_s7 + $0x4c8] sm:$0xff]  ;;  %v11968_v7 = vld [vmem:[%s28316_s7 + $0x440] sm:$0xff]  ;;  %v11986_v36 = vld [vmem:[%s28316_s7 + $0x4d0] sm:$0xff] }
 0xc5a   :  { %v11969_v51 = vld [vmem:[%s28316_s7 + $0x448] sm:$0xff]  ;;  %v11987_v10 = vld [vmem:[%s28316_s7 + $0x4d8] sm:$0xff] }
 0xc5b   :  { %19964 = vmatpush3.bf16.msra.mxu0 %v19963_v27  ;;  %v11964_v27 = vld [vmem:[%s28316_s7 + $0x420] sm:$0xff] }
 0xc5c   :  { %19966 = vmatprep.subr.bf16.mxu0 %v19965_v1  ;;  %v11965_v1 = vld [vmem:[%s28316_s7 + $0x428] sm:$0xff] }
 0xc5d   :  { %v19975_v26 = vpack.c.bf16 %v11965_v1, %v11964_v27  ;;  %v11970_v27 = vld [vmem:[%s28316_s7 + $0x450] sm:$0xff]  ;;  %v11971_v1 = vld [vmem:[%s28316_s7 + $0x458] sm:$0xff] }
 0xc5e   :  { %12514 = vmatmul.mubr.f32.vlgmr.msra.gmra.mrb[226].mxu0 %v11813_v12  ;;  %v19977_v12 = vpack.c.bf16 %v11983_v37, %v11982_v58  ;;  %v11988_v58 = vld [vmem:[%s28316_s7 + $0x4e0] sm:$0xff]  ;;  %v11989_v37 = vld [vmem:[%s28316_s7 + $0x4e8] sm:$0xff] }
 0xc5f   :  { %19968 = vmatpush3.bf16.msra.mxu0 %v19967_v13  ;;  %12583 = vmatprep.mubr.f32.mxu0 %v11816_v19  ;;  %v11967_v19 = vld [vmem:[%s28316_s7 + $0x438] sm:$0xff] }
 0xc60   :  { %19970 = vmatprep.subr.bf16.mxu0 %v19969_v42  ;;  %v19979_v13 = vpack.c.bf16 %v11967_v19, %v11966_v22  ;;  %v19981_v42 = vpack.c.bf16 %v11985_v38, %v11984_v24  ;;  %v11972_v22 = vld [vmem:[%s28316_s7 + $0x460] sm:$0xff]  ;;  %v11973_v19 = vld [vmem:[%s28316_s7 + $0x468] sm:$0xff]  ;;  %v11990_v24 = vld [vmem:[%s28316_s7 + $0x4f0] sm:$0xff] }
 0xc61   :  { %v11991_v38 = vld [vmem:[%s28316_s7 + $0x4f8] sm:$0xff] }
 0xc63   :  { %19972 = vmatpush3.bf16.msra.mxu0 %v19971_v2  ;;  %v19983_v2 = vpack.c.bf16 %v11969_v51, %v11968_v7  ;;  %v11974_v7 = vld [vmem:[%s28316_s7 + $0x470] sm:$0xff]  ;;  %v11975_v51 = vld [vmem:[%s28316_s7 + $0x478] sm:$0xff] }
 0xc64   :  { %19974 = vmatprep.subr.bf16.mxu0 %v19973_v61  ;;  %v19985_v61 = vpack.c.bf16 %v11987_v10, %v11986_v36  ;;  %v12008_v36 = vld [vmem:[%s28316_s7 + $0x580] sm:$0xff]  ;;  %v12009_v10 = vld [vmem:[%s28316_s7 + $0x588] sm:$0xff] }
 0xc67   :  { %19976 = vmatpush3.bf16.msra.mxu0 %v19975_v26  ;;  %v19987_v26 = vpack.c.bf16 %v11971_v1, %v11970_v27  ;;  %v11992_v27 = vld [vmem:[%s28316_s7 + $0x500] sm:$0xff]  ;;  %v11993_v1 = vld [vmem:[%s28316_s7 + $0x508] sm:$0xff] }
 0xc68   :  { %19978 = vmatprep.subr.bf16.mxu0 %v19977_v12  ;;  %v19989_v12 = vpack.c.bf16 %v11989_v37, %v11988_v58  ;;  %v12010_v58 = vld [vmem:[%s28316_s7 + $0x590] sm:$0xff]  ;;  %v12011_v37 = vld [vmem:[%s28316_s7 + $0x598] sm:$0xff] }
 0xc6b   :  { %19980 = vmatpush3.bf16.msra.mxu0 %v19979_v13  ;;  %v19991_v13 = vpack.c.bf16 %v11973_v19, %v11972_v22  ;;  %v11994_v22 = vld [vmem:[%s28316_s7 + $0x510] sm:$0xff]  ;;  %v11995_v19 = vld [vmem:[%s28316_s7 + $0x518] sm:$0xff] }
 0xc6c   :  { %19982 = vmatprep.subr.bf16.mxu0 %v19981_v42  ;;  %v19993_v42 = vpack.c.bf16 %v11991_v38, %v11990_v24  ;;  %v12012_v24 = vld [vmem:[%s28316_s7 + $0x5a0] sm:$0xff]  ;;  %v12013_v38 = vld [vmem:[%s28316_s7 + $0x5a8] sm:$0xff] }
 0xc6f   :  { %19984 = vmatpush3.bf16.msra.mxu0 %v19983_v2  ;;  %v19995_v2 = vpack.c.bf16 %v11975_v51, %v11974_v7  ;;  %v11996_v7 = vld [vmem:[%s28316_s7 + $0x520] sm:$0xff]  ;;  %v11997_v51 = vld [vmem:[%s28316_s7 + $0x528] sm:$0xff] }
 0xc70   :  { %19986 = vmatprep.subr.bf16.mxu0 %v19985_v61  ;;  %v19997_v61 = vpack.c.bf16 %v12009_v10, %v12008_v36  ;;  %v20007_v29 = vpack.c.bf16 %v11997_v51, %v11996_v7  ;;  %v12016_v36 = vld [vmem:[%s28316_s7 + $0x5c0] sm:$0xff]  ;;  %v12017_v10 = vld [vmem:[%s28316_s7 + $0x5c8] sm:$0xff] }
 0xc71   :  { %v12004_v7 = vld [vmem:[%s28316_s7 + $0x560] sm:$0xff]  ;;  %v12005_v51 = vld [vmem:[%s28316_s7 + $0x568] sm:$0xff] }
 0xc73   :  { %19988 = vmatpush3.bf16.msra.mxu0 %v19987_v26  ;;  %v19999_v26 = vpack.c.bf16 %v11993_v1, %v11992_v27  ;;  %v12000_v27 = vld [vmem:[%s28316_s7 + $0x540] sm:$0xff]  ;;  %v12001_v1 = vld [vmem:[%s28316_s7 + $0x548] sm:$0xff] }
 0xc74   :  { %19990 = vmatprep.subr.bf16.mxu0 %v19989_v12  ;;  %v20001_v12 = vpack.c.bf16 %v12011_v37, %v12010_v58  ;;  %v12018_v58 = vld [vmem:[%s28316_s7 + $0x5d0] sm:$0xff]  ;;  %v12019_v37 = vld [vmem:[%s28316_s7 + $0x5d8] sm:$0xff] }
 0xc77   :  { %19992 = vmatpush3.bf16.msra.mxu0 %v19991_v13  ;;  %v20003_v13 = vpack.c.bf16 %v11995_v19, %v11994_v22  ;;  %v12002_v22 = vld [vmem:[%s28316_s7 + $0x550] sm:$0xff]  ;;  %v12003_v19 = vld [vmem:[%s28316_s7 + $0x558] sm:$0xff] }
 0xc78   :  { %19994 = vmatprep.subr.bf16.mxu0 %v19993_v42  ;;  %v20005_v42 = vpack.c.bf16 %v12013_v38, %v12012_v24  ;;  %v12020_v24 = vld [vmem:[%s28316_s7 + $0x5e0] sm:$0xff]  ;;  %v12021_v38 = vld [vmem:[%s28316_s7 + $0x5e8] sm:$0xff] }
 0xc7b   :  { %19996 = vmatpush3.bf16.msra.mxu0 %v19995_v2 }
 0xc7c   :  { %19998 = vmatprep.subr.bf16.mxu0 %v19997_v61  ;;  %v20013_v61 = vpack.c.bf16 %v12017_v10, %v12016_v36  ;;  %v12040_v36 = vld [vmem:[%s28316_s7 + $0x680] sm:$0xff]  ;;  %v12041_v10 = vld [vmem:[%s28316_s7 + $0x688] sm:$0xff] }
 0xc7e   :  { %12584 = vmatmul.mubr.f32.vlgmr.msra.gmra.mrb[228].mxu0 %v11815_v40  ;;  %v20009_v40 = vpack.c.bf16 %v12015_v63, %v12014_v4  ;;  %v12022_v4 = vld [vmem:[%s28316_s7 + $0x5f0] sm:$0xff]  ;;  %v12023_v63 = vld [vmem:[%s28316_s7 + $0x5f8] sm:$0xff] }
 0xc7f   :  { %20000 = vmatpush3.bf16.msra.mxu0 %v19999_v26  ;;  %12653 = vmatprep.mubr.f32.mxu0 %v11818_v60  ;;  %v11999_v60 = vld [vmem:[%s28316_s7 + $0x538] sm:$0xff]  ;;  %v20015_v26 = vpack.c.bf16 %v12001_v1, %v12000_v27  ;;  %v12024_v27 = vld [vmem:[%s28316_s7 + $0x600] sm:$0xff]  ;;  %v12025_v1 = vld [vmem:[%s28316_s7 + $0x608] sm:$0xff] }
 0xc80   :  { %20002 = vmatprep.subr.bf16.mxu0 %v20001_v12  ;;  %v20011_v2 = vpack.c.bf16 %v11999_v60, %v11998_v16  ;;  %v20017_v12 = vpack.c.bf16 %v12019_v37, %v12018_v58  ;;  %v12006_v16 = vld [vmem:[%s28316_s7 + $0x570] sm:$0xff]  ;;  %v12007_v60 = vld [vmem:[%s28316_s7 + $0x578] sm:$0xff] }
 0xc81   :  { %v12042_v58 = vld [vmem:[%s28316_s7 + $0x690] sm:$0xff]  ;;  %v12043_v37 = vld [vmem:[%s28316_s7 + $0x698] sm:$0xff] }
 0xc83   :  { %20004 = vmatpush3.bf16.msra.mxu0 %v20003_v13  ;;  %v20019_v13 = vpack.c.bf16 %v12003_v19, %v12002_v22  ;;  %v12026_v22 = vld [vmem:[%s28316_s7 + $0x610] sm:$0xff]  ;;  %v12027_v19 = vld [vmem:[%s28316_s7 + $0x618] sm:$0xff] }
 0xc84   :  { %20006 = vmatprep.subr.bf16.mxu0 %v20005_v42  ;;  %v20021_v42 = vpack.c.bf16 %v12021_v38, %v12020_v24  ;;  %v12044_v24 = vld [vmem:[%s28316_s7 + $0x6a0] sm:$0xff]  ;;  %v12045_v38 = vld [vmem:[%s28316_s7 + $0x6a8] sm:$0xff] }
 0xc87   :  { %20008 = vmatpush3.bf16.msra.mxu0 %v20007_v29  ;;  %v20023_v29 = vpack.c.bf16 %v12005_v51, %v12004_v7  ;;  %v12028_v7 = vld [vmem:[%s28316_s7 + $0x620] sm:$0xff]  ;;  %v12029_v51 = vld [vmem:[%s28316_s7 + $0x628] sm:$0xff] }
 0xc88   :  { %20010 = vmatprep.subr.bf16.mxu0 %v20009_v40  ;;  %v20025_v40 = vpack.c.bf16 %v12023_v63, %v12022_v4  ;;  %v20039_v43 = vpack.c.bf16 %v12029_v51, %v12028_v7  ;;  %v12048_v4 = vld [vmem:[%s28316_s7 + $0x6c0] sm:$0xff]  ;;  %v12049_v63 = vld [vmem:[%s28316_s7 + $0x6c8] sm:$0xff]  ;;  %v12038_v7 = vld [vmem:[%s28316_s7 + $0x670] sm:$0xff] }
 0xc89   :  { %v12039_v51 = vld [vmem:[%s28316_s7 + $0x678] sm:$0xff] }
 0xc8b   :  { %20012 = vmatpush3.bf16.msra.mxu0 %v20011_v2  ;;  %v20027_v2 = vpack.c.bf16 %v12007_v60, %v12006_v16  ;;  %v12032_v16 = vld [vmem:[%s28316_s7 + $0x640] sm:$0xff]  ;;  %v12033_v60 = vld [vmem:[%s28316_s7 + $0x648] sm:$0xff] }
 0xc8c   :  { %20014 = vmatprep.subr.bf16.mxu0 %v20013_v61  ;;  %v20029_v61 = vpack.c.bf16 %v12041_v10, %v12040_v36  ;;  %v12050_v36 = vld [vmem:[%s28316_s7 + $0x6d0] sm:$0xff]  ;;  %v12051_v10 = vld [vmem:[%s28316_s7 + $0x6d8] sm:$0xff] }
 0xc8f   :  { %20016 = vmatpush3.bf16.msra.mxu0 %v20015_v26  ;;  %v20031_v26 = vpack.c.bf16 %v12025_v1, %v12024_v27  ;;  %v12034_v27 = vld [vmem:[%s28316_s7 + $0x650] sm:$0xff]  ;;  %v12035_v1 = vld [vmem:[%s28316_s7 + $0x658] sm:$0xff] }
 0xc90   :  { %20018 = vmatprep.subr.bf16.mxu0 %v20017_v12  ;;  %v20033_v12 = vpack.c.bf16 %v12043_v37, %v12042_v58  ;;  %v12052_v58 = vld [vmem:[%s28316_s7 + $0x6e0] sm:$0xff]  ;;  %v12053_v37 = vld [vmem:[%s28316_s7 + $0x6e8] sm:$0xff] }
 0xc93   :  { %20020 = vmatpush3.bf16.msra.mxu0 %v20019_v13  ;;  %v20035_v13 = vpack.c.bf16 %v12027_v19, %v12026_v22  ;;  %v12036_v22 = vld [vmem:[%s28316_s7 + $0x660] sm:$0xff]  ;;  %v12037_v19 = vld [vmem:[%s28316_s7 + $0x668] sm:$0xff] }
 0xc94   :  { %20022 = vmatprep.subr.bf16.mxu0 %v20021_v42  ;;  %v20037_v42 = vpack.c.bf16 %v12045_v38, %v12044_v24  ;;  %v12054_v24 = vld [vmem:[%s28316_s7 + $0x6f0] sm:$0xff]  ;;  %v12055_v38 = vld [vmem:[%s28316_s7 + $0x6f8] sm:$0xff] }
 0xc97   :  { %20024 = vmatpush3.bf16.msra.mxu0 %v20023_v29 }
 0xc98   :  { %20026 = vmatprep.subr.bf16.mxu0 %v20025_v40  ;;  %v20045_v40 = vpack.c.bf16 %v12049_v63, %v12048_v4  ;;  %v12074_v4 = vld [vmem:[%s28316_s7 + $0x790] sm:$0xff]  ;;  %v12075_v63 = vld [vmem:[%s28316_s7 + $0x798] sm:$0xff] }
 0xc9b   :  { %20028 = vmatpush3.bf16.msra.mxu0 %v20027_v2  ;;  %v20047_v2 = vpack.c.bf16 %v12033_v60, %v12032_v16  ;;  %v12058_v16 = vld [vmem:[%s28316_s7 + $0x710] sm:$0xff]  ;;  %v12059_v60 = vld [vmem:[%s28316_s7 + $0x718] sm:$0xff] }
 0xc9c   :  { %20030 = vmatprep.subr.bf16.mxu0 %v20029_v61  ;;  %v20049_v61 = vpack.c.bf16 %v12051_v10, %v12050_v36  ;;  %v12076_v36 = vld [vmem:[%s28316_s7 + $0x7a0] sm:$0xff]  ;;  %v12077_v10 = vld [vmem:[%s28316_s7 + $0x7a8] sm:$0xff] }
 0xc9e   :  { %12654 = vmatmul.mubr.f32.vlgmr.msra.gmra.mrb[230].mxu0 %v11817_v54  ;;  %v20041_v54 = vpack.c.bf16 %v12047_v44, %v12046_v3  ;;  %v12072_v3 = vld [vmem:[%s28316_s7 + $0x780] sm:$0xff]  ;;  %v12073_v44 = vld [vmem:[%s28316_s7 + $0x788] sm:$0xff] }
 0xc9f   :  { %20032 = vmatpush3.bf16.msra.mxu0 %v20031_v26  ;;  %12723 = vmatprep.mubr.f32.mxu0 %v11820_v31  ;;  %v12031_v31 = vld [vmem:[%s28316_s7 + $0x638] sm:$0xff]  ;;  %v20051_v26 = vpack.c.bf16 %v12035_v1, %v12034_v27  ;;  %v12060_v27 = vld [vmem:[%s28316_s7 + $0x720] sm:$0xff]  ;;  %v12061_v1 = vld [vmem:[%s28316_s7 + $0x728] sm:$0xff] }
 0xca0   :  { %20034 = vmatprep.subr.bf16.mxu0 %v20033_v12  ;;  %v20043_v29 = vpack.c.bf16 %v12031_v31, %v12030_v11  ;;  %v20053_v12 = vpack.c.bf16 %v12053_v37, %v12052_v58  ;;  %v12056_v11 = vld [vmem:[%s28316_s7 + $0x700] sm:$0xff]  ;;  %v12057_v31 = vld [vmem:[%s28316_s7 + $0x708] sm:$0xff]  ;;  %v20071_v46 = vpack.c.bf16 %v12061_v1, %v12060_v27 }
 0xca1   :  { %v12080_v58 = vld [vmem:[%s28316_s7 + $0x7c0] sm:$0xff]  ;;  %v12081_v37 = vld [vmem:[%s28316_s7 + $0x7c8] sm:$0xff] }
 0xca2   :  { %v12105_v27 = vld [vmem:[%s28316_s7 + $0x888] sm:$0xff] }
 0xca3   :  { %20036 = vmatpush3.bf16.msra.mxu0 %v20035_v13  ;;  %v20055_v13 = vpack.c.bf16 %v12037_v19, %v12036_v22  ;;  %v12064_v22 = vld [vmem:[%s28316_s7 + $0x740] sm:$0xff]  ;;  %v12065_v19 = vld [vmem:[%s28316_s7 + $0x748] sm:$0xff] }
 0xca4   :  { %20038 = vmatprep.subr.bf16.mxu0 %v20037_v42  ;;  %v20057_v42 = vpack.c.bf16 %v12055_v38, %v12054_v24  ;;  %v12082_v24 = vld [vmem:[%s28316_s7 + $0x7d0] sm:$0xff]  ;;  %v12083_v38 = vld [vmem:[%s28316_s7 + $0x7d8] sm:$0xff] }
 0xca7   :  { %20040 = vmatpush3.bf16.msra.mxu0 %v20039_v43  ;;  %v20059_v43 = vpack.c.bf16 %v12039_v51, %v12038_v7  ;;  %v12066_v7 = vld [vmem:[%s28316_s7 + $0x750] sm:$0xff]  ;;  %v12067_v51 = vld [vmem:[%s28316_s7 + $0x758] sm:$0xff] }
 0xca8   :  { %20042 = vmatprep.subr.bf16.mxu0 %v20041_v54  ;;  %v20061_v54 = vpack.c.bf16 %v12073_v44, %v12072_v3  ;;  %v12084_v3 = vld [vmem:[%s28316_s7 + $0x7e0] sm:$0xff]  ;;  %v12085_v44 = vld [vmem:[%s28316_s7 + $0x7e8] sm:$0xff] }
 0xcab   :  { %20044 = vmatpush3.bf16.msra.mxu0 %v20043_v29  ;;  %v20063_v29 = vpack.c.bf16 %v12057_v31, %v12056_v11  ;;  %v12068_v11 = vld [vmem:[%s28316_s7 + $0x760] sm:$0xff]  ;;  %v12069_v31 = vld [vmem:[%s28316_s7 + $0x768] sm:$0xff] }
 0xcac   :  { %20046 = vmatprep.subr.bf16.mxu0 %v20045_v40  ;;  %v20065_v40 = vpack.c.bf16 %v12075_v63, %v12074_v4  ;;  %v12086_v63 = vld [vmem:[%s28316_s7 + $0x7f0] sm:$0xff] }
 0xcaf   :  { %20048 = vmatpush3.bf16.msra.mxu0 %v20047_v2  ;;  %v20067_v2 = vpack.c.bf16 %v12059_v60, %v12058_v16  ;;  %v20087_v60 = vpack.c.bf16 %v12069_v31, %v12068_v11  ;;  %v12115_v11 = vld [vmem:[%s28316_s7 + $0x8d8] sm:$0xff] }
 0xcb0   :  { %20050 = vmatprep.subr.bf16.mxu0 %v20049_v61  ;;  %v20069_v61 = vpack.c.bf16 %v12077_v10, %v12076_v36  ;;  %v12070_v10 = vld [vmem:[%s28316_s7 + $0x770] sm:$0xff] }
 0xcb3   :  { %20052 = vmatpush3.bf16.msra.mxu0 %v20051_v26 }
 0xcb4   :  { %20054 = vmatprep.subr.bf16.mxu0 %v20053_v12  ;;  %v20077_v12 = vpack.c.bf16 %v12081_v37, %v12080_v58  ;;  %v12090_v37 = vld [vmem:[%s28316_s7 + $0x810] sm:$0xff] }
 0xcb7   :  { %20056 = vmatpush3.bf16.msra.mxu0 %v20055_v13  ;;  %v20079_v13 = vpack.c.bf16 %v12065_v19, %v12064_v22  ;;  %v12109_v22 = vld [vmem:[%s28316_s7 + $0x8a8] sm:$0xff] }
 0xcb8   :  { %20058 = vmatprep.subr.bf16.mxu0 %v20057_v42  ;;  %v20081_v42 = vpack.c.bf16 %v12083_v38, %v12082_v24  ;;  %v12092_v38 = vld [vmem:[%s28316_s7 + $0x820] sm:$0xff] }
 0xcbb   :  { %20060 = vmatpush3.bf16.msra.mxu0 %v20059_v43  ;;  %v20083_v43 = vpack.c.bf16 %v12067_v51, %v12066_v7  ;;  %v12113_v7 = vld [vmem:[%s28316_s7 + $0x8c8] sm:$0xff] }
 0xcbc   :  { %20062 = vmatprep.subr.bf16.mxu0 %v20061_v54  ;;  %v20085_v54 = vpack.c.bf16 %v12085_v44, %v12084_v3  ;;  %v12096_v44 = vld [vmem:[%s28316_s7 + $0x840] sm:$0xff] }
 0xcbe   :  { %12724 = vmatmul.mubr.f32.vlgmr.msra.gmra.mrb[232].mxu0 %v11819_v15  ;;  %v20073_v15 = vpack.c.bf16 %v12079_v9, %v12078_v39  ;;  %v12088_v9 = vld [vmem:[%s28316_s7 + $0x800] sm:$0xff] }
 0xcbf   :  { %20064 = vmatpush3.bf16.msra.mxu0 %v20063_v29  ;;  %12793 = vmatprep.mubr.f32.mxu0 %v11822_v57  ;;  %v12063_v57 = vld [vmem:[%s28316_s7 + $0x738] sm:$0xff] }
 0xcc0   :  { %20066 = vmatprep.subr.bf16.mxu0 %v20065_v40  ;;  %v20075_v26 = vpack.c.bf16 %v12063_v57, %v12062_v55  ;;  %v12087_v29 = vld [vmem:[%s28316_s7 + $0x7f8] sm:$0xff] }
 0xcc1   :  { %v20089_v36 = vpack.c.bf16 %v12087_v29, %v12086_v63  ;;  %v12107_v55 = vld [vmem:[%s28316_s7 + $0x898] sm:$0xff]  ;;  %v12098_v63 = vld [vmem:[%s28316_s7 + $0x850] sm:$0xff] }
 0xcc2   :  { %v12099_v29 = vld [vmem:[%s28316_s7 + $0x858] sm:$0xff] }
 0xcc3   :  { %20068 = vmatpush3.bf16.msra.mxu0 %v20067_v2  ;;  %v12071_v2 = vld [vmem:[%s28316_s7 + $0x778] sm:$0xff] }
 0xcc4   :  { %20070 = vmatprep.subr.bf16.mxu0 %v20069_v61  ;;  %v12104_v61 = vld [vmem:[%s28316_s7 + $0x880] sm:$0xff]  ;;  %v20091_v1 = vpack.c.bf16 %v12071_v2, %v12070_v10 }
 0xcc5   :  { %v20093_v39 = vpack.c.bf16 %v12105_v27, %v12104_v61  ;;  %v13778_v10 = vld [vmem:[%s28317_s8] ss:$0 sm:$0xff]  ;;  %v12101_v27 = vld [vmem:[%s28316_s7 + $0x868] sm:$0xff] }
 0xcc6   :  { %v12100_v61 = vld [vmem:[%s28316_s7 + $0x860] sm:$0xff] }
 0xcc7   :  { %20072 = vmatpush3.bf16.msra.mxu0 %v20071_v46  ;;  %v12089_v46 = vld [vmem:[%s28316_s7 + $0x808] sm:$0xff] }
 0xcc8   :  { %20074 = vmatprep.subr.bf16.mxu0 %v20073_v15  ;;  %v12106_v15 = vld [vmem:[%s28316_s7 + $0x890] sm:$0xff]  ;;  %v20095_v57 = vpack.c.bf16 %v12089_v46, %v12088_v9  ;;  %v12119_v9 = vld [vmem:[%s28316_s7 + $0x8f8] sm:$0xff] }
 0xcc9   :  { %v20097_v58 = vpack.c.bf16 %v12107_v55, %v12106_v15 }
 0xccb   :  { %20076 = vmatpush3.bf16.msra.mxu0 %v20075_v26  ;;  %v12091_v26 = vld [vmem:[%s28316_s7 + $0x818] sm:$0xff] }
 0xccc   :  { %20078 = vmatprep.subr.bf16.mxu0 %v20077_v12  ;;  %v12108_v12 = vld [vmem:[%s28316_s7 + $0x8a0] sm:$0xff]  ;;  %v20099_v19 = vpack.c.bf16 %v12091_v26, %v12090_v37  ;;  %v12102_v37 = vld [vmem:[%s28316_s7 + $0x870] sm:$0xff]  ;;  %v12103_v26 = vld [vmem:[%s28316_s7 + $0x878] sm:$0xff] }
 0xccd   :  { %v20101_v24 = vpack.c.bf16 %v12109_v22, %v12108_v12  ;;  %v12136_v22 = vld [vmem:[%s28316_s7 + $0x980] sm:$0xff] }
 0xccf   :  { %20080 = vmatpush3.bf16.msra.mxu0 %v20079_v13  ;;  %v12093_v13 = vld [vmem:[%s28316_s7 + $0x828] sm:$0xff] }
 0xcd0   :  { %20082 = vmatprep.subr.bf16.mxu0 %v20081_v42  ;;  %v20103_v14 = vpack.c.bf16 %v12093_v13, %v12092_v38  ;;  %v12112_v42 = vld [vmem:[%s28316_s7 + $0x8c0] sm:$0xff]  ;;  %v12121_v13 = vld [vmem:[%s28316_s7 + $0x908] sm:$0xff] }
 0xcd1   :  { %v15565_v4 = vpop.f32.mrb[220].mxu0  ;;  %v20109_v3 = vpack.c.bf16 %v12113_v7, %v12112_v42  ;;  %v12120_v38 = vld [vmem:[%s28316_s7 + $0x900] sm:$0xff]  ;;  %v12141_v7 = vld [vmem:[%s28316_s7 + $0x9a8] sm:$0xff] }
 0xcd2   :  { %v15566_v40 = vpop.f32.mrb[221].mxu0  ;;  %v12140_v42 = vld [vmem:[%s28316_s7 + $0x9a0] sm:$0xff] }
 0xcd3   :  { %v27691_v16 = vadd.f32 %v15566_v40, %v15565_v4  ;;  %20084 = vmatpush3.bf16.msra.mxu0 %v20083_v43  ;;  %v12097_v43 = vld [vmem:[%s28316_s7 + $0x848] sm:$0xff]  ;;  %v12116_v40 = vld [vmem:[%s28316_s7 + $0x8e0] sm:$0xff] }
 0xcd4   :  { %20086 = vmatprep.subr.bf16.mxu0 %v20085_v54  ;;  %v12114_v54 = vld [vmem:[%s28316_s7 + $0x8d0] sm:$0xff]  ;;  %v20111_v31 = vpack.c.bf16 %v12097_v43, %v12096_v44  ;;  %v12124_v44 = vld [vmem:[%s28316_s7 + $0x920] sm:$0xff]  ;;  %v12125_v43 = vld [vmem:[%s28316_s7 + $0x928] sm:$0xff] }
 0xcd5   :  { %v20113_v4 = vpack.c.bf16 %v12115_v11, %v12114_v54  ;;  %v12306_v15 = vadd.f32 %v27691_v16, %v13778_v10  ;;  %v12137_v16 = vld [vmem:[%s28316_s7 + $0x988] sm:$0xff]  ;;  %v20135_v45 = vpack.c.bf16 %v12125_v43, %v12124_v44  ;;  %v12144_v54 = vld [vmem:[%s28316_s7 + $0x9c0] sm:$0xff] }
 0xcd6   :  { %v12145_v11 = vld [vmem:[%s28316_s7 + $0x9c8] sm:$0xff]  ;;  %v12172_v44 = vld [vmem:[%s28316_s7 + $0xaa0] sm:$0xff] }
 0xcd7   :  { %20088 = vmatpush3.bf16.msra.mxu0 %v20087_v60  ;;  %v12117_v60 = vld [vmem:[%s28316_s7 + $0x8e8] sm:$0xff] }
 0xcd8   :  { %20090 = vmatprep.subr.bf16.mxu0 %v20089_v36  ;;  %v20115_v36 = vpack.c.bf16 %v12099_v29, %v12098_v63  ;;  %v20117_v2 = vpack.c.bf16 %v12117_v60, %v12116_v40  ;;  %v12128_v63 = vld [vmem:[%s28316_s7 + $0x940] sm:$0xff]  ;;  %v12129_v29 = vld [vmem:[%s28316_s7 + $0x948] sm:$0xff]  ;;  %v12146_v40 = vld [vmem:[%s28316_s7 + $0x9d0] sm:$0xff] }
 0xcd9   :  { %v12147_v60 = vld [vmem:[%s28316_s7 + $0x9d8] sm:$0xff]  ;;  %v12173_v43 = vld [vmem:[%s28316_s7 + $0xaa8] sm:$0xff] }
 0xcda   :  { %v20145_v10 = vpack.c.bf16 %v12147_v60, %v12146_v40 }
 0xcdb   :  { %20092 = vmatpush3.bf16.msra.mxu0 %v20091_v1 }
 0xcdc   :  { %20094 = vmatprep.subr.bf16.mxu0 %v20093_v39  ;;  %v12118_v39 = vld [vmem:[%s28316_s7 + $0x8f0] sm:$0xff] }
 0xcde   :  { %12794 = vmatmul.mubr.f32.vlgmr.msra.gmra.mrb[234].mxu0 %v11821_v49  ;;  %v20105_v49 = vpack.c.bf16 %v12111_v25, %v12110_v59  ;;  %v12138_v59 = vld [vmem:[%s28316_s7 + $0x990] sm:$0xff]  ;;  %v12139_v25 = vld [vmem:[%s28316_s7 + $0x998] sm:$0xff] }
 0xcdf   :  { %20096 = vmatpush3.bf16.msra.mxu0 %v20095_v57  ;;  %12863 = vmatprep.mubr.f32.mxu0 %v11824_v30  ;;  %v12095_v30 = vld [vmem:[%s28316_s7 + $0x838] sm:$0xff]  ;;  %v20119_v57 = vpack.c.bf16 %v12101_v27, %v12100_v61  ;;  %v12148_v27 = vld [vmem:[%s28316_s7 + $0x9e0] sm:$0xff] }
 0xce0   :  { %20098 = vmatprep.subr.bf16.mxu0 %v20097_v58  ;;  %v20107_v51 = vpack.c.bf16 %v12095_v30, %v12094_v34  ;;  %v20121_v58 = vpack.c.bf16 %v12119_v9, %v12118_v39  ;;  %v12122_v34 = vld [vmem:[%s28316_s7 + $0x910] sm:$0xff]  ;;  %v12123_v30 = vld [vmem:[%s28316_s7 + $0x918] sm:$0xff] }
 0xce1   :  { %v12131_v61 = vld [vmem:[%s28316_s7 + $0x958] sm:$0xff] }
 0xce3   :  { %20100 = vmatpush3.bf16.msra.mxu0 %v20099_v19  ;;  %v20123_v19 = vpack.c.bf16 %v12103_v26, %v12102_v37 }
 0xce4   :  { %20102 = vmatprep.subr.bf16.mxu0 %v20101_v24  ;;  %v20125_v24 = vpack.c.bf16 %v12137_v16, %v12136_v22 }
 0xce7   :  { %20104 = vmatpush3.bf16.msra.mxu0 %v20103_v14  ;;  %v20127_v14 = vpack.c.bf16 %v12121_v13, %v12120_v38  ;;  %v12168_v13 = vld [vmem:[%s28316_s7 + $0xa80] sm:$0xff] }
 0xce8   :  { %20106 = vmatprep.subr.bf16.mxu0 %v20105_v49  ;;  %v20129_v49 = vpack.c.bf16 %v12139_v25, %v12138_v59  ;;  %v12169_v59 = vld [vmem:[%s28316_s7 + $0xa88] sm:$0xff] }
 0xceb   :  { %20108 = vmatpush3.bf16.msra.mxu0 %v20107_v51  ;;  %v20131_v51 = vpack.c.bf16 %v12123_v30, %v12122_v34  ;;  %v12170_v34 = vld [vmem:[%s28316_s7 + $0xa90] sm:$0xff]  ;;  %v12171_v30 = vld [vmem:[%s28316_s7 + $0xa98] sm:$0xff] }
 0xcec   :  { %20110 = vmatprep.subr.bf16.mxu0 %v20109_v3  ;;  %v20133_v3 = vpack.c.bf16 %v12141_v7, %v12140_v42  ;;  %v20161_v7 = vpack.c.bf16 %v12171_v30, %v12170_v34 }
 0xcef   :  { %20112 = vmatpush3.bf16.msra.mxu0 %v20111_v31 }
 0xcf0   :  { %20114 = vmatprep.subr.bf16.mxu0 %v20113_v4  ;;  %v20141_v4 = vpack.c.bf16 %v12145_v11, %v12144_v54 }
 0xcf1   :  { %v15600_v1 = vpop.f32.mrb[222].mxu0 }
 0xcf2   :  { %v15601_v46 = vpop.f32.mrb[223].mxu0 }
 0xcf3   :  { %v15602_v55 = vadd.f32 %v15601_v46, %v15600_v1  ;;  %20116 = vmatpush3.bf16.msra.mxu0 %v20115_v36  ;;  %v20143_v36 = vpack.c.bf16 %v12129_v29, %v12128_v63  ;;  %v12149_v1 = vld [vmem:[%s28316_s7 + $0x9e8] sm:$0xff]  ;;  %v12132_v46 = vld [vmem:[%s28316_s7 + $0x960] sm:$0xff]  ;;  %v12178_v63 = vld [vmem:[%s28316_s7 + $0xad0] sm:$0xff] }
 0xcf4   :  { %20118 = vmatprep.subr.bf16.mxu0 %v20117_v2  ;;  %v12130_v2 = vld [vmem:[%s28316_s7 + $0x950] sm:$0xff]  ;;  %v20149_v9 = vpack.c.bf16 %v12149_v1, %v12148_v27  ;;  %v12179_v29 = vld [vmem:[%s28316_s7 + $0xad8] sm:$0xff] }
 0xcf5   :  { %v27805_v12 = vadd.f32 %v15602_v55, %v12306_v15  ;;  %v20147_v39 = vpack.c.bf16 %v12131_v61, %v12130_v2  ;;  %v12133_v15 = vld [vmem:[%s28316_s7 + $0x968] sm:$0xff]  ;;  %v20177_v60 = vpack.c.bf16 %v12179_v29, %v12178_v63  ;;  %v12180_v2 = vld [vmem:[%s28316_s7 + $0xae0] sm:$0xff] }
 0xcf6   :  { %v20151_v22 = vpack.c.bf16 %v12133_v15, %v12132_v46  ;;  %v12181_v61 = vld [vmem:[%s28316_s7 + $0xae8] sm:$0xff]  ;;  %v12182_v15 = vld [vmem:[%s28316_s7 + $0xaf0] sm:$0xff]  ;;  %v12212_v63 = vld [vmem:[%s28316_s7 + $0xbe0] sm:$0xff] }
 0xcf7   :  { %20120 = vmatpush3.bf16.msra.mxu0 %v20119_v57  ;;  %v12150_v57 = vld [vmem:[%s28316_s7 + $0x9f0] sm:$0xff]  ;;  %v20181_v1 = vpack.c.bf16 %v12181_v61, %v12180_v2  ;;  %v12213_v29 = vld [vmem:[%s28316_s7 + $0xbe8] sm:$0xff] }
 0xcf8   :  { %20122 = vmatprep.subr.bf16.mxu0 %v20121_v58  ;;  %v12151_v58 = vld [vmem:[%s28316_s7 + $0x9f8] sm:$0xff]  ;;  %v12214_v61 = vld [vmem:[%s28316_s7 + $0xbf0] sm:$0xff] }
 0xcf9   :  { %v20153_v16 = vpack.c.bf16 %v12151_v58, %v12150_v57 }
 0xcfb   :  { %20124 = vmatpush3.bf16.msra.mxu0 %v20123_v19  ;;  %v12134_v19 = vld [vmem:[%s28316_s7 + $0x970] sm:$0xff] }
 0xcfc   :  { %20126 = vmatprep.subr.bf16.mxu0 %v20125_v24  ;;  %v12135_v24 = vld [vmem:[%s28316_s7 + $0x978] sm:$0xff] }
 0xcfd   :  { %v20155_v25 = vpack.c.bf16 %v12135_v24, %v12134_v19  ;;  %v12200_v24 = vld [vmem:[%s28316_s7 + $0xb80] sm:$0xff] }
 0xcfe   :  { %12864 = vmatmul.mubr.f32.vlgmr.msra.gmra.mrb[236].mxu0 %v11823_v8  ;;  %v20137_v8 = vpack.c.bf16 %v12143_v47, %v12142_v28  ;;  %v20165_v47 = vpack.c.bf16 %v12173_v43, %v12172_v44  ;;  %v28718_v44 = vmax.f32 %v26907_v33, %v27275_v52  ;;  %v12207_v33 = vld [vmem:[%s28316_s7 + $0xbb8] sm:$0xff]  ;;  %v12190_v52 = vld [vmem:[%s28316_s7 + $0xb30] sm:$0xff] }
 0xcff   :  { %20128 = vmatpush3.bf16.msra.mxu0 %v20127_v14  ;;  %12933 = vmatprep.mubr.f32.mxu0 %v11826_v48  ;;  %v12127_v48 = vld [vmem:[%s28316_s7 + $0x938] sm:$0xff]  ;;  %v20157_v14 = vpack.c.bf16 %v12169_v59, %v12168_v13  ;;  %v12201_v13 = vld [vmem:[%s28316_s7 + $0xb88] sm:$0xff] }
 0xd00   :  { %20130 = vmatprep.subr.bf16.mxu0 %v20129_v49  ;;  %v20139_v31 = vpack.c.bf16 %v12127_v48, %v12126_v21  ;;  %v12152_v49 = vld [vmem:[%s28316_s7 + $0xa00] sm:$0xff]  ;;  %v12177_v48 = vld [vmem:[%s28316_s7 + $0xac8] sm:$0xff] }
 0xd01   :  { %v12176_v21 = vld [vmem:[%s28316_s7 + $0xac0] sm:$0xff] }
 0xd02   :  { %v20173_v11 = vpack.c.bf16 %v12177_v48, %v12176_v21  ;;  %v12210_v21 = vld [vmem:[%s28316_s7 + $0xbd0] sm:$0xff]  ;;  %v12211_v48 = vld [vmem:[%s28316_s7 + $0xbd8] sm:$0xff] }
 0xd03   :  { %20132 = vmatpush3.bf16.msra.mxu0 %v20131_v51  ;;  %v12154_v51 = vld [vmem:[%s28316_s7 + $0xa10] sm:$0xff] }
 0xd04   :  { %20134 = vmatprep.subr.bf16.mxu0 %v20133_v3  ;;  %v12155_v3 = vld [vmem:[%s28316_s7 + $0xa18] sm:$0xff] }
 0xd05   :  { %v20163_v28 = vpack.c.bf16 %v12155_v3, %v12154_v51  ;;  %v12204_v51 = vld [vmem:[%s28316_s7 + $0xba0] sm:$0xff]  ;;  %v12205_v3 = vld [vmem:[%s28316_s7 + $0xba8] sm:$0xff] }
 0xd07   :  { %20136 = vmatpush3.bf16.msra.mxu0 %v20135_v45  ;;  %v12156_v45 = vld [vmem:[%s28316_s7 + $0xa20] sm:$0xff] }
 0xd08   :  { %20138 = vmatprep.subr.bf16.mxu0 %v20137_v8  ;;  %v12157_v8 = vld [vmem:[%s28316_s7 + $0xa28] sm:$0xff] }
 0xd09   :  { %v20167_v6 = vpack.c.bf16 %v12157_v8, %v12156_v45  ;;  %v12189_v45 = vld [vmem:[%s28316_s7 + $0xb28] sm:$0xff]  ;;  %v12191_v8 = vld [vmem:[%s28316_s7 + $0xb38] sm:$0xff] }
 0xd0b   :  { %20140 = vmatpush3.bf16.msra.mxu0 %v20139_v31  ;;  %v12160_v31 = vld [vmem:[%s28316_s7 + $0xa40] sm:$0xff] }
 0xd0c   :  { %20142 = vmatprep.subr.bf16.mxu0 %v20141_v4  ;;  %v12161_v4 = vld [vmem:[%s28316_s7 + $0xa48] sm:$0xff] }
 0xd0d   :  { %v20175_v40 = vpack.c.bf16 %v12161_v4, %v12160_v31  ;;  %v12194_v31 = vld [vmem:[%s28316_s7 + $0xb50] sm:$0xff]  ;;  %v12195_v4 = vld [vmem:[%s28316_s7 + $0xb58] sm:$0xff] }
 0xd0f   :  { %20144 = vmatpush3.bf16.msra.mxu0 %v20143_v36  ;;  %v12162_v36 = vld [vmem:[%s28316_s7 + $0xa50] sm:$0xff] }
 0xd10   :  { %20146 = vmatprep.subr.bf16.mxu0 %v20145_v10  ;;  %v12163_v10 = vld [vmem:[%s28316_s7 + $0xa58] sm:$0xff] }
 0xd11   :  { %v15635_v55 = vpop.f32.mrb[224].mxu0  ;;  %v20179_v27 = vpack.c.bf16 %v12163_v10, %v12162_v36  ;;  %v12196_v36 = vld [vmem:[%s28316_s7 + $0xb60] sm:$0xff]  ;;  %v12197_v10 = vld [vmem:[%s28316_s7 + $0xb68] sm:$0xff] }
 0xd12   :  { %v15636_v37 = vpop.f32.mrb[225].mxu0 }
 0xd13   :  { %v15637_v26 = vadd.f32 %v15636_v37, %v15635_v55  ;;  %20148 = vmatpush3.bf16.msra.mxu0 %v20147_v39  ;;  %v12164_v39 = vld [vmem:[%s28316_s7 + $0xa60] sm:$0xff]  ;;  %v12183_v55 = vld [vmem:[%s28316_s7 + $0xaf8] sm:$0xff] }
 0xd14   :  { %20150 = vmatprep.subr.bf16.mxu0 %v20149_v9  ;;  %v12165_v9 = vld [vmem:[%s28316_s7 + $0xa68] sm:$0xff] }
 0xd15   :  { %v27910_v38 = vadd.f32 %v15637_v26, %v27805_v12  ;;  %v12153_v12 = vld [vmem:[%s28316_s7 + $0xa08] sm:$0xff]  ;;  %v20183_v37 = vpack.c.bf16 %v12165_v9, %v12164_v39  ;;  %v20185_v26 = vpack.c.bf16 %v12183_v55, %v12182_v15  ;;  %v20215_v9 = vpack.c.bf16 %v12197_v10, %v12196_v36  ;;  %v12198_v15 = vld [vmem:[%s28316_s7 + $0xb70] sm:$0xff]  ;;  %v12199_v55 = vld [vmem:[%s28316_s7 + $0xb78] sm:$0xff] }
 0xd16   :  { %v20159_v42 = vpack.c.bf16 %v12153_v12, %v12152_v49  ;;  %v12202_v49 = vld [vmem:[%s28316_s7 + $0xb90] sm:$0xff]  ;;  %v12203_v12 = vld [vmem:[%s28316_s7 + $0xb98] sm:$0xff]  ;;  %v13158_v36 = vld [vmem:[%s28318_s9 + $0x40] sm:$0xff] }
 0xd17   :  { %20152 = vmatpush3.bf16.msra.mxu0 %v20151_v22  ;;  %v12166_v22 = vld [vmem:[%s28316_s7 + $0xa70] sm:$0xff]  ;;  %v20193_v30 = vpack.c.bf16 %v12203_v12, %v12202_v49  ;;  %v12223_v49 = vld [vmem:[%s28316_s7 + $0xc38] sm:$0xff]  ;;  %v13159_v10 = vld [vmem:[%s28318_s9 + $0x48] sm:$0xff] }
 0xd18   :  { %20154 = vmatprep.subr.bf16.mxu0 %v20153_v16  ;;  %v12167_v16 = vld [vmem:[%s28316_s7 + $0xa78] sm:$0xff] }
 0xd19   :  { %v20187_v59 = vpack.c.bf16 %v12167_v16, %v12166_v22  ;;  %v28719_v16 = vmov 0.0|0.0  }
 0xd1b   :  { %20156 = vmatpush3.bf16.msra.mxu0 %v20155_v25  ;;  %v20189_v25 = vpack.c.bf16 %v12201_v13, %v12200_v24  ;;  %v12218_v24 = vld [vmem:[%s28316_s7 + $0xc10] sm:$0xff]  ;;  %v28720_v13 = vmax.f32 %v26905_v53, %v27259_v0 }
 0xd1c   :  { %20158 = vmatprep.subr.bf16.mxu0 %v20157_v14  ;;  %v12184_v14 = vld [vmem:[%s28316_s7 + $0xb00] sm:$0xff]  ;;  %v12222_v0 = vld [vmem:[%s28316_s7 + $0xc30] sm:$0xff] }
 0xd1d   :  { %v20231_v12 = vpack.c.bf16 %v12223_v49, %v12222_v0 }
 0xd1e   :  { %12934 = vmatmul.mubr.f32.vlgmr.msra.gmra.mrb[238].mxu0 %v11825_v18  ;;  %v20169_v18 = vpack.c.bf16 %v12175_v50, %v12174_v56  ;;  %v12208_v56 = vld [vmem:[%s28316_s7 + $0xbc0] sm:$0xff]  ;;  %v12209_v50 = vld [vmem:[%s28316_s7 + $0xbc8] sm:$0xff] }
 0xd1f   :  { %20160 = vmatpush3.bf16.msra.mxu0 %v20159_v42  ;;  %13003 = vmatprep.mubr.f32.mxu0 %v11828_v62  ;;  %v12159_v62 = vld [vmem:[%s28316_s7 + $0xa38] sm:$0xff]  ;;  %v12186_v42 = vld [vmem:[%s28316_s7 + $0xb10] sm:$0xff] }
 0xd20   :  { %20162 = vmatprep.subr.bf16.mxu0 %v20161_v7  ;;  %v20171_v54 = vpack.c.bf16 %v12159_v62, %v12158_v23  ;;  %v12187_v7 = vld [vmem:[%s28316_s7 + $0xb18] sm:$0xff]  ;;  %v12192_v23 = vld [vmem:[%s28316_s7 + $0xb40] sm:$0xff]  ;;  %v12193_v62 = vld [vmem:[%s28316_s7 + $0xb48] sm:$0xff] }
 0xd21   :  { %v20195_v43 = vpack.c.bf16 %v12187_v7, %v12186_v42  ;;  %v12226_v7 = vld [vmem:[%s28316_s7 + $0xc50] sm:$0xff] }
 0xd23   :  { %20164 = vmatpush3.bf16.msra.mxu0 %v20163_v28  ;;  %v20197_v28 = vpack.c.bf16 %v12205_v3, %v12204_v51  ;;  %v12227_v51 = vld [vmem:[%s28316_s7 + $0xc58] sm:$0xff] }
 0xd24   :  { %20166 = vmatprep.subr.bf16.mxu0 %v20165_v47  ;;  %v12188_v47 = vld [vmem:[%s28316_s7 + $0xb20] sm:$0xff]  ;;  %v20237_v3 = vpack.c.bf16 %v12227_v51, %v12226_v7  ;;  %v13245_v7 = vld [vmem:[%s28319_s11 + $0x8] sm:$0xff] }
 0xd25   :  { %v20199_v17 = vpack.c.bf16 %v12189_v45, %v12188_v47 }
 0xd27   :  { %20168 = vmatpush3.bf16.msra.mxu0 %v20167_v6  ;;  %v20203_v6 = vpack.c.bf16 %v12191_v8, %v12190_v52 }
 0xd28   :  { %20170 = vmatprep.subr.bf16.mxu0 %v20169_v18  ;;  %v20205_v18 = vpack.c.bf16 %v12209_v50, %v12208_v56 }
 0xd2b   :  { %20172 = vmatpush3.bf16.msra.mxu0 %v20171_v54  ;;  %v20207_v54 = vpack.c.bf16 %v12193_v62, %v12192_v23 }
 0xd2c   :  { %20174 = vmatprep.subr.bf16.mxu0 %v20173_v11  ;;  %v20209_v11 = vpack.c.bf16 %v12211_v48, %v12210_v21  ;;  %v13150_v21 = vld [vmem:[%s28318_s9] sm:$0xff]  ;;  %v13151_v48 = vld [vmem:[%s28318_s9 + $0x8] sm:$0xff] }
 0xd2f   :  { %20176 = vmatpush3.bf16.msra.mxu0 %v20175_v40  ;;  %v20211_v40 = vpack.c.bf16 %v12195_v4, %v12194_v31  ;;  %v13154_v31 = vld [vmem:[%s28318_s9 + $0x20] sm:$0xff]  ;;  %v13155_v4 = vld [vmem:[%s28318_s9 + $0x28] sm:$0xff] }
 0xd30   :  { %20178 = vmatprep.subr.bf16.mxu0 %v20177_v60  ;;  %v20213_v60 = vpack.c.bf16 %v12213_v29, %v12212_v63  ;;  %v20252_v63 = vpack.c.bf16 %v13155_v4, %v13154_v31  ;;  %v13156_v29 = vld [vmem:[%s28318_s9 + $0x30] sm:$0xff] }
 0xd31   :  { %v15670_v46 = vpop.f32.mrb[226].mxu0 }
 0xd32   :  { %v15671_v57 = vpop.f32.mrb[227].mxu0 }
 0xd33   :  { %v15672_v58 = vadd.f32 %v15671_v57, %v15670_v46  ;;  %20180 = vmatpush3.bf16.msra.mxu0 %v20179_v27  ;;  %v12215_v27 = vld [vmem:[%s28316_s7 + $0xbf8] sm:$0xff] }
 0xd34   :  { %20182 = vmatprep.subr.bf16.mxu0 %v20181_v1  ;;  %v20217_v46 = vpack.c.bf16 %v12215_v27, %v12214_v61  ;;  %v13160_v61 = vld [vmem:[%s28318_s9 + $0x50] sm:$0xff]  ;;  %v13161_v27 = vld [vmem:[%s28318_s9 + $0x58] sm:$0xff] }
 0xd35   :  { %v28015_v19 = vadd.f32 %v15672_v58, %v27910_v38  ;;  %v12185_v38 = vld [vmem:[%s28316_s7 + $0xb08] sm:$0xff]  ;;  %v20219_v58 = vpack.c.bf16 %v12199_v55, %v12198_v15 }
 0xd36   :  { %v20191_v34 = vpack.c.bf16 %v12185_v38, %v12184_v14  ;;  %v12220_v14 = vld [vmem:[%s28316_s7 + $0xc20] sm:$0xff]  ;;  %v12221_v38 = vld [vmem:[%s28316_s7 + $0xc28] sm:$0xff] }
 0xd37   :  { %20184 = vmatpush3.bf16.msra.mxu0 %v20183_v37  ;;  %v12216_v37 = vld [vmem:[%s28316_s7 + $0xc00] sm:$0xff]  ;;  %v20228_v53 = vpack.c.bf16 %v12221_v38, %v12220_v14 }
 0xd38   :  { %20186 = vmatprep.subr.bf16.mxu0 %v20185_v26  ;;  %v12217_v26 = vld [vmem:[%s28316_s7 + $0xc08] sm:$0xff] }
 0xd39   :  { %v20222_v22 = vpack.c.bf16 %v12217_v26, %v12216_v37 }
 0xd3b   :  { %20188 = vmatpush3.bf16.msra.mxu0 %v20187_v59 }
 0xd3c   :  { %20190 = vmatprep.subr.bf16.mxu0 %v20189_v25  ;;  %v21304_v25 = vmov 0.0  }
 0xd3e   :  { %13004 = vmatmul.mubr.f32.vlgmr.msra.gmra.mrb[240].mxu0 %v11827_v32  ;;  %v20201_v32 = vpack.c.bf16 %v12207_v33, %v12206_v41  ;;  %v12230_v33 = vld [vmem:[%s28316_s7 + $0xc70] sm:$0xff] }
 0xd3f   :  { %20192 = vmatpush3.bf16.msra.mxu0 %v20191_v34  ;;  %13073 = vmatprep.mubr.f32.mxu0 %v28718_v44  ;;  %v12224_v34 = vld [vmem:[%s28316_s7 + $0xc40] sm:$0xff] }
 0xd40   :  { %20194 = vmatprep.subr.bf16.mxu0 %v20193_v30  ;;  %v12225_v30 = vld [vmem:[%s28316_s7 + $0xc48] sm:$0xff]  ;;  %v12228_v44 = vld [vmem:[%s28316_s7 + $0xc60] sm:$0xff] }
 0xd41   :  { %v20234_v42 = vpack.c.bf16 %v12225_v30, %v12224_v34 }
 0xd43   :  { %20196 = vmatpush3.bf16.msra.mxu0 %v20195_v43  ;;  %v12229_v43 = vld [vmem:[%s28316_s7 + $0xc68] sm:$0xff] }
 0xd44   :  { %20198 = vmatprep.subr.bf16.mxu0 %v20197_v28  ;;  %v20240_v41 = vpack.c.bf16 %v12229_v43, %v12228_v44 }
 0xd47   :  { %20200 = vmatpush3.bf16.msra.mxu0 %v20199_v17  ;;  %v12231_v17 = vld [vmem:[%s28316_s7 + $0xc78] sm:$0xff] }
 0xd48   :  { %20202 = vmatprep.subr.bf16.mxu0 %v20201_v32  ;;  %v20243_v52 = vpack.c.bf16 %v12231_v17, %v12230_v33  ;;  %v13248_v33 = vld [vmem:[%s28319_s11 + $0x20] sm:$0xff]  ;;  %v13249_v17 = vld [vmem:[%s28319_s11 + $0x28] sm:$0xff] }
 0xd4b   :  { %20204 = vmatpush3.bf16.msra.mxu0 %v20203_v6 }
 0xd4c   :  { %20206 = vmatprep.subr.bf16.mxu0 %v20205_v18 }
 0xd4f   :  { %20208 = vmatpush3.bf16.msra.mxu0 %v20207_v54  ;;  %v13153_v54 = vld [vmem:[%s28318_s9 + $0x18] sm:$0xff] }
 0xd50   :  { %20210 = vmatprep.subr.bf16.mxu0 %v20209_v11  ;;  %v20249_v11 = vpack.c.bf16 %v13153_v54, %v13152_v35 }
 0xd51   :  { %v15705_v2 = vpop.f32.mrb[228].mxu0 }
 0xd52   :  { %v15706_v1 = vpop.f32.mrb[229].mxu0 }
 0xd53   :  { %v15707_v39 = vadd.f32 %v15706_v1, %v15705_v2  ;;  %20212 = vmatpush3.bf16.msra.mxu0 %v20211_v40  ;;  %v13157_v40 = vld [vmem:[%s28318_s9 + $0x38] sm:$0xff]  ;;  %v20258_v2 = vpack.c.bf16 %v13159_v10, %v13158_v36  ;;  %v20261_v1 = vpack.c.bf16 %v13161_v27, %v13160_v61 }
 0xd54   :  { %20214 = vmatprep.subr.bf16.mxu0 %v20213_v60  ;;  %v20255_v60 = vpack.c.bf16 %v13157_v40, %v13156_v29 }
 0xd55   :  { %v12586_v57 = vadd.f32 %v15707_v39, %v28015_v19  ;;  %v12219_v19 = vld [vmem:[%s28316_s7 + $0xc18] sm:$0xff]  ;;  %v13162_v39 = vld [vmem:[%s28318_s9 + $0x60] sm:$0xff] }
 0xd56   :  { %v20225_v59 = vpack.c.bf16 %v12219_v19, %v12218_v24 }
 0xd57   :  { %20216 = vmatpush3.bf16.msra.mxu0 %v20215_v9  ;;  %v13163_v9 = vld [vmem:[%s28318_s9 + $0x68] sm:$0xff] }
 0xd58   :  { %20218 = vmatprep.subr.bf16.mxu0 %v20217_v46  ;;  %v20264_v46 = vpack.c.bf16 %v13163_v9, %v13162_v39 }
 0xd5b   :  { %20220 = vmatpush3.bf16.msra.mxu0 %v20219_v58  ;;  %v13165_v58 = vld [vmem:[%s28318_s9 + $0x78] sm:$0xff] }
 0xd5c   :  { %20221 = vmatprep.subr.bf16.mxu0 %v28719_v16 }
 0xd5e   :  { %13074 = vmatmul.mubr.f32.vlgmr.msra.gmra.mrb[242].mxu0 %v28720_v13 }
 0xd5f   :  { %20223 = vmatpush3.bf16.msra.mxu0 %v20222_v22  ;;  %18872 = vmatprep.mubr.msk.f32.mxu0 %vm21303_vm1, %v21304_v25 }
 0xd60   :  { %20224 = vmatprep.subr.bf16.mxu0 %v28719_v16 }
 0xd63   :  { %20226 = vmatpush3.bf16.msra.mxu0 %v20225_v59 }
 0xd64   :  { %20227 = vmatprep.subr.bf16.mxu0 %v28719_v16 }
 0xd67   :  { %20229 = vmatpush3.bf16.msra.mxu0 %v20228_v53 }
 0xd68   :  { %20230 = vmatprep.subr.bf16.mxu0 %v28719_v16 }
 0xd6b   :  { %20232 = vmatpush3.bf16.msra.mxu0 %v20231_v12 }
 0xd6c   :  { %20233 = vmatprep.subr.bf16.mxu0 %v28719_v16 }
 0xd6f   :  { %20235 = vmatpush3.bf16.msra.mxu0 %v20234_v42  ;;  %v13244_v42 = vld [vmem:[%s28319_s11] sm:$0xff] }
 0xd70   :  { %20236 = vmatprep.subr.bf16.mxu0 %v28719_v16  ;;  %v20270_v43 = vpack.c.bf16 %v13245_v7, %v13244_v42 }
 0xd71   :  { %v15740_v28 = vpop.f32.mrb[230].mxu0 }
 0xd72   :  { %v15741_v47 = vpop.f32.mrb[231].mxu0 }
 0xd73   :  { %v15742_v45 = vadd.f32 %v15741_v47, %v15740_v28  ;;  %20238 = vmatpush3.bf16.msra.mxu0 %v20237_v3  ;;  %v13246_v47 = vld [vmem:[%s28319_s11 + $0x10] sm:$0xff] }
 0xd74   :  { %20239 = vmatprep.subr.bf16.mxu0 %v28719_v16 }
 0xd75   :  { %v12656_v32 = vadd.f32 %v15742_v45, %v12586_v57  ;;  %v13164_v57 = vld [vmem:[%s28318_s9 + $0x70] sm:$0xff]  ;;  %v13247_v45 = vld [vmem:[%s28319_s11 + $0x18] sm:$0xff] }
 0xd76   :  { %v20267_v26 = vpack.c.bf16 %v13165_v58, %v13164_v57 }
 0xd77   :  { %20241 = vmatpush3.bf16.msra.mxu0 %v20240_v41  ;;  %v20273_v41 = vpack.c.bf16 %v13247_v45, %v13246_v47 }
 0xd78   :  { %20242 = vmatprep.subr.bf16.mxu0 %v28719_v16 }
 0xd7b   :  { %20244 = vmatpush3.bf16.msra.mxu0 %v20243_v52  ;;  %v13250_v52 = vld [vmem:[%s28319_s11 + $0x30] sm:$0xff] }
 0xd7c   :  { %20245 = vmatprep.subr.bf16.mxu0 %v28719_v16 }
 0xd7e   :  { %18873 = vmatmul.mubr.f32.vlgmr.msra.gmra.mrb[244].mxu0 %v11831_v5  ;;  %v20246_v5 = vpack.c.bf16 %v13151_v48, %v13150_v21  ;;  %v13256_v21 = vld [vmem:[%s28319_s11 + $0x60] sm:$0xff]  ;;  %v13257_v48 = vld [vmem:[%s28319_s11 + $0x68] sm:$0xff] }
 0xd7f   :  { %18907 = vmatprep.mubr.msk.f32.mxu0 %vm21303_vm1, %v21304_v25  ;;  %v20288_v35 = vpack.c.bf16 %v13257_v48, %v13256_v21 }
 0xd80   :  { %20247 = vmatpush3.bf16.msra.mxu0 %v20246_v5  ;;  %v13259_v5 = vld [vmem:[%s28319_s11 + $0x78] sm:$0xff] }
 0xd81   :  { %20248 = vmatprep.subr.bf16.mxu0 %v28719_v16 }
 0xd84   :  { %20250 = vmatpush3.bf16.msra.mxu0 %v20249_v11  ;;  %v13779_v11 = vld [vmem:[%s28320_s10] ss:$0 sm:$0xff] }
 0xd85   :  { %20251 = vmatprep.subr.bf16.mxu0 %v28719_v16 }
 0xd88   :  { %20253 = vmatpush3.bf16.msra.mxu0 %v20252_v63 }
 0xd89   :  { %20254 = vmatprep.subr.bf16.mxu0 %v28719_v16 }
 0xd8c   :  { %20256 = vmatpush3.bf16.msra.mxu0 %v20255_v60 }
 0xd8d   :  { %20257 = vmatprep.subr.bf16.mxu0 %v28719_v16 }
 0xd90   :  { %20259 = vmatpush3.bf16.msra.mxu0 %v20258_v2 }
 0xd91   :  { %v15775_v8 = vpop.f32.mrb[232].mxu0  ;;  %20260 = vmatprep.subr.bf16.mxu0 %v28719_v16 }
 0xd92   :  { %v15776_v56 = vpop.f32.mrb[233].mxu0 }
 0xd93   :  { %v15777_v50 = vadd.f32 %v15776_v56, %v15775_v8  ;;  %v13252_v56 = vld [vmem:[%s28319_s11 + $0x40] sm:$0xff] }
 0xd94   :  { %20262 = vmatpush3.bf16.msra.mxu0 %v20261_v1 }
 0xd95   :  { %v12726_v6 = vadd.f32 %v15777_v50, %v12656_v32  ;;  %20263 = vmatprep.subr.bf16.mxu0 %v28719_v16  ;;  %v20276_v32 = vpack.c.bf16 %v13249_v17, %v13248_v33  ;;  %v13253_v50 = vld [vmem:[%s28319_s11 + $0x48] sm:$0xff] }
 0xd98   :  { %20265 = vmatpush3.bf16.msra.mxu0 %v20264_v46 }
 0xd99   :  { %20266 = vmatprep.subr.bf16.mxu0 %v28719_v16 }
 0xd9c   :  { %20268 = vmatpush3.bf16.msra.mxu0 %v20267_v26 }
 0xd9d   :  { %20269 = vmatprep.subr.bf16.mxu0 %v28719_v16 }
 0xdb1   :  { %v15810_v18 = vpop.f32.mrb[234].mxu0 }
 0xdb2   :  { %v15811_v23 = vpop.f32.mrb[235].mxu0 }
 0xdb3   :  { %v15812_v62 = vadd.f32 %v15811_v23, %v15810_v18  ;;  %v13254_v18 = vld [vmem:[%s28319_s11 + $0x50] sm:$0xff]  ;;  %v13255_v23 = vld [vmem:[%s28319_s11 + $0x58] sm:$0xff] }
 0xdb5   :  { %v12796_v20 = vadd.f32 %v15812_v62, %v12726_v6  ;;  %v20282_v6 = vpack.c.bf16 %v13253_v50, %v13252_v56  ;;  %v20285_v62 = vpack.c.bf16 %v13255_v23, %v13254_v18 }
 0xdd1   :  { %v15845_v15 = vpop.f32.mrb[236].mxu0 }
 0xdd2   :  { %v15846_v55 = vpop.f32.mrb[237].mxu0 }
 0xdd3   :  { %v15847_v37 = vadd.f32 %v15846_v55, %v15845_v15 }
 0xdd5   :  { %v12866_v22 = vadd.f32 %v15847_v37, %v12796_v20  ;;  %v13258_v20 = vld [vmem:[%s28319_s11 + $0x70] sm:$0xff] }
 0xdd6   :  { %v20291_v54 = vpack.c.bf16 %v13259_v5, %v13258_v20 }
 0xdf1   :  { %v15880_v24 = vpop.f32.mrb[238].mxu0 }
 0xdf2   :  { %v15881_v19 = vpop.f32.mrb[239].mxu0 }
 0xdf3   :  { %v15882_v13 = vadd.f32 %v15881_v19, %v15880_v24 }
 0xdf5   :  { %v12936_v59 = vadd.f32 %v15882_v13, %v12866_v22 }
 0xe11   :  { %v15915_v14 = vpop.f32.mrb[240].mxu0 }
 0xe12   :  { %v15916_v38 = vpop.f32.mrb[241].mxu0 }
 0xe13   :  { %v15917_v53 = vadd.f32 %v15916_v38, %v15915_v14 }
 0xe15   :  { %v13006_v0 = vadd.f32 %v15917_v53, %v12936_v59 }
 0xe31   :  { %v15950_v49 = vpop.f32.mrb[242].mxu0 }
 0xe32   :  { %v15951_v12 = vpop.f32.mrb[243].mxu0 }
 0xe33   :  { %v15952_v34 = vadd.f32 %v15951_v12, %v15950_v49 }
 0xe35   :  { %v13076_v30 = vadd.f32 %v15952_v34, %v13006_v0 }
 0xe51   :  { %v13145_v51 = vpop.f32.mrb[244].mxu0 }
 0xe52   :  { %v13146_v3 = vadd.f32 %v13145_v51, %v13076_v30  ;;  %v18874_v44 = vpop.f32.mrb[245].mxu0 }
 0xe54   :  { %v13149_v28 = vmax.f32 %v13146_v3, 0.0 }
 0xe56   :  { %18908 = vmatmul.mubr.f32.vlgmr.msra.gmra.mrb[246].mxu0 %v13149_v28 }
 0xe57   :  { %20271 = vmatpush3.bf16.msra.mxu0 %v20270_v43  ;;  %18942 = vmatprep.mubr.msk.f32.mxu0 %vm21303_vm1, %v21304_v25  ;;  %v13251_v25 = vld [vmem:[%s28319_s11 + $0x38] sm:$0xff] }
 0xe58   :  { %20272 = vmatprep.subr.bf16.mxu0 %v28719_v16  ;;  %v20279_v8 = vpack.c.bf16 %v13251_v25, %v13250_v52 }
 0xe5b   :  { %20274 = vmatpush3.bf16.msra.mxu0 %v20273_v41 }
 0xe5c   :  { %20275 = vmatprep.subr.bf16.mxu0 %v28719_v16 }
 0xe5f   :  { %20277 = vmatpush3.bf16.msra.mxu0 %v20276_v32 }
 0xe60   :  { %20278 = vmatprep.subr.bf16.mxu0 %v28719_v16 }
 0xe63   :  { %20280 = vmatpush3.bf16.msra.mxu0 %v20279_v8 }
 0xe64   :  { %20281 = vmatprep.subr.bf16.mxu0 %v28719_v16 }
 0xe67   :  { %20283 = vmatpush3.bf16.msra.mxu0 %v20282_v6 }
 0xe68   :  { %20284 = vmatprep.subr.bf16.mxu0 %v28719_v16 }
 0xe6b   :  { %20286 = vmatpush3.bf16.msra.mxu0 %v20285_v62 }
 0xe6c   :  { %20287 = vmatprep.subr.bf16.mxu0 %v28719_v16 }
 0xe6f   :  { %20289 = vmatpush3.bf16.msra.mxu0 %v20288_v35 }
 0xe70   :  { %20290 = vmatprep.subr.bf16.mxu0 %v28719_v16  ;;  %v13780_v16 = vld [vmem:[%s28321_s12] ss:$0 sm:$0xff] }
 0xe73   :  { %20292 = vmatpush3.bf16.msra.mxu0 %v20291_v54 }
 0xf29   :  { %v13239_v31 = vpop.f32.mrb[246].mxu0 }
 0xf2a   :  { %v13240_v4 = vadd.f32 %v13779_v11, %v13239_v31  ;;  %v18909_v63 = vpop.f32.mrb[247].mxu0 }
 0xf2c   :  { %v13243_v29 = vmax.f32 %v13240_v4, 0.0 }
 0xf2e   :  { %18943 = vmatmul.mubr.f32.vlgmr.msra.gmra.mrb[248].mxu0 %v13243_v29 }
0x1001   :  { %v13333_v40 = vpop.f32.mrb[248].mxu0 }
0x1002   :  { %v13334_v60 = vadd.f32 %v13780_v16, %v13333_v40  ;;  %v18944_v36 = vpop.f32.mrb[249].mxu0 }
0x1004   :  { %13337 = vst [vmem:[%s28322_s13] sm:$0xff] %v13334_v60 }

</bundles_post_ra>
